<compile_context>
chip_gen: v5e
topology: v5e:2x2
jax: 0.10.0
libtpu: 0.0.40
codegen_flags: <defaults>
</compile_context>

<pallas_src>
import jax
import jax.numpy as jnp
import numpy as np
from jax.experimental import pallas as pl
from jax.experimental.pallas import tpu as pltpu


# ---------------------------------------------------------------------------
# Kernel 1: conv1(3->32) + ReLU + 2x2 maxpool + conv2(32->64) + ReLU + 2x2
#           maxpool, fully fused.  One grid step = one batch tile (bt images).
#
#   x1_ref : (bt, 256, 128) bf16, phase-packed im2col of the input:
#              row = rp*128 + cp*64 + a*8 + a'
#              col = (p1*2+q1)*32 + (dy*3+dx)*3 + cin   (27 -> 32 zero padded)
#              val = x_pad[b, 4a+2rp+p1+dy, 4a'+2cp+q1+dx, cin]
#            (p1,q1) = conv1 pooling phase, (rp,cp) = parity of the pooled
#            output index, (a,a') = pooled index // 2.
#   w1_ref : (128, 128) bf16 block-diagonal (4 copies of the 32x32 conv1
#            matmul weight), b1_ref : (1, 128) f32 (bias tiled x4)
#   w2_ref : (288, 64) bf16 tap-major im2col weight, b2_ref : (1, 64) f32
#   out_ref: (bt*32, 128) bf16, row = b*32 + s, col = half*64 + c, holding
#            pool2 output at spatial p = half*32 + s (p = m*8 + n) — feeds fc1
#            through a free reshape to (B, 4096) with matching wf1 row order.
#   pad{rp}{cp}: (bt, 10, 24, 32) bf16 VMEM scratch; interior [:,1:9,8:16,:]
#            holds the pool1 parity plane, the (only) border cells conv2 can
#            read are zeroed each step.
#   x2buf  : (4*bt*64, 288) bf16 VMEM scratch — conv2 im2col slab
#            (row = phase*bt*64 + b*64 + m*8 + n, col = tap*32 + cin).
# ---------------------------------------------------------------------------
def _conv_stack_kernel(x1_ref, w1_ref, b1_ref, w2_ref, b2_ref, out_ref,
                       pad00, pad01, pad10, pad11, x2buf):
    bt = x1_ref.shape[0]
    nrow = bt * 64

    # ---- conv1: ONE (bt*256,128)x(128,128) MXU matmul (block-diag weight) ---
    x1 = x1_ref[...].reshape(bt * 256, 128)
    y1 = jnp.dot(x1, w1_ref[...], preferred_element_type=jnp.float32)
    y1 = jnp.maximum(y1 + b1_ref[...], 0.0)                   # (bt*256,128) f32

    # 2x2/stride-2 max-pool = max over the 4 phase column-groups (VPU maxes)
    m1 = jnp.maximum(y1[:, :64], y1[:, 64:])
    h1 = jnp.maximum(m1[:, :32], m1[:, 32:]).astype(jnp.bfloat16)
    h1 = h1.reshape(bt, 256, 32)
    # h1[b, rp*128+cp*64+a*8+a', c] == pool1(relu(conv1))[b, 2a+rp, 2a'+cp, c]

    # ---- scatter the 4 parity planes of pool1 into bordered bf16 scratch ----
    # Zero only the border cells conv2's shifted windows can read (row 9 /
    # col 16 for even parity, row 0 / col 7 for odd parity; the col strip is
    # 2 wide so all bf16 sublane stores stay pack-aligned).  Everything read
    # below is (re)written here every step -> no cross-step scratch reliance.
    pads = ((pad00, pad01), (pad10, pad11))
    zrow = jnp.zeros((bt, 1, 24, 32), jnp.bfloat16)
    zcol = jnp.zeros((bt, 10, 2, 32), jnp.bfloat16)
    for rp in range(2):
        for cp in range(2):
            ref = pads[rp][cp]
            r = 9 if rp == 0 else 0
            c = 16 if cp == 0 else 6
            ref[:, r:r + 1, :, :] = zrow
            ref[:, :, c:c + 2, :] = zcol
            base = rp * 128 + cp * 64
            ref[:, 1:9, 8:16, :] = h1[:, base:base + 64, :].reshape(bt, 8, 8, 32)

    # ---- conv2 im2col slab: 9 taps along K, 4 pooling phases along M --------
    for dy in range(3):
        for dx in range(3):
            k = dy * 3 + dx
            for p2 in range(2):                 # conv2 pooling phase (row)
                for q2 in range(2):             # conv2 pooling phase (col)
                    ph = p2 * 2 + q2
                    t, u = p2 + dy - 1, q2 + dx - 1
                    rp, cp = t & 1, u & 1
                    st, su = (t - rp) // 2, (u - cp) // 2
                    win = pads[rp][cp][:, 1 + st:9 + st, 8 + su:16 + su, :]
                    x2buf[ph * nrow:(ph + 1) * nrow, k * 32:(k + 1) * 32] = (
                        win.reshape(nrow, 32))

    # ---- conv2: ONE K=288 MXU matmul + bias + ReLU + 2x2 maxpool ------------
    y2 = jnp.dot(x2buf[...], w2_ref[...], preferred_element_type=jnp.float32)
    y2 = jnp.maximum(y2 + b2_ref[...], 0.0)                   # (4*bt*64, 64)
    h2 = jnp.max(y2.reshape(4, bt, 64, 64), axis=0)           # pool2: phase max

    # lane-dense store: pair spatial positions p and p+32 in one 128-wide row
    out = jnp.concatenate([h2[:, :32, :], h2[:, 32:, :]], axis=-1)
    out_ref[...] = out.reshape(bt * 32, 128).astype(out_ref.dtype)


# ---------------------------------------------------------------------------
# Kernel 2: fused MLP — out = relu(x @ w1 + b1) @ w2 + b2
#           (w2/b2 pre-padded to 128 output columns -> lane-dense store)
# ---------------------------------------------------------------------------
def _mlp_kernel(x_ref, w1_ref, b1_ref, w2_ref, b2_ref, out_ref):
    h = jnp.dot(x_ref[...], w1_ref[...],
                preferred_element_type=jnp.float32) + b1_ref[...]
    h = jnp.maximum(h, 0.0).astype(jnp.bfloat16)
    out_ref[...] = jnp.dot(h, w2_ref[...],
                           preferred_element_type=jnp.float32) + b2_ref[...]


# ---------------------------------------------------------------------------
# Per-generation sizing
# ---------------------------------------------------------------------------
def _tpu_defaults():
    """Batch-tile cap / scoped-VMEM limit per TPU generation (conservative).
    Per-image working set here is ~1 MiB (lane-dense x1 block double-buffered
    + 4 bf16 parity planes + the K=288 slab + f32 temporaries)."""
    kind = ""
    try:
        kind = jax.devices()[0].device_kind.lower()
    except Exception:
        pass
    if "v5 lite" in kind or "v5e" in kind:   # 1 TC, 128 MiB VMEM, 16 MiB scoped default
        return dict(bt_cap=16, even_steps=False, vmem=64 << 20)
    if "v6" in kind:                         # 1 TC, 128 MiB VMEM
        return dict(bt_cap=32, even_steps=False, vmem=96 << 20)
    if "v7" in kind or "7x" in kind:         # 2 TCs, 64 MiB VMEM per core
        return dict(bt_cap=16, even_steps=True, vmem=48 << 20)
    return dict(bt_cap=8, even_steps=True, vmem=32 << 20)


def _pick_batch_tile(batch, cfg):
    """Largest divisor of `batch` under the per-generation cap.  On 2-TC parts
    (v7x) keep >= 2 grid steps and an even step count so neither core idles;
    on 1-TC parts just take the biggest tile that fits (fewer grid steps)."""
    best = 1
    for bt in range(1, min(cfg["bt_cap"], batch) + 1):
        if batch % bt:
            continue
        steps = batch // bt
        if cfg["even_steps"] and batch >= 2 and (steps < 2 or steps % 2):
            continue
        best = bt
    return best


def _pick_row_tile(batch):
    for bm in (256, 128, 64, 32, 16, 8):
        if batch % bm == 0:
            return bm
    return batch


# ---------------------------------------------------------------------------
# Wrappers
# ---------------------------------------------------------------------------
def _conv1_im2col(x_nhwc):
    """(B,32,32,3) -> (B,256,128) bf16 phase-packed im2col (see kernel docs)."""
    B = x_nhwc.shape[0]
    xp = jnp.pad(x_nhwc, ((0, 0), (1, 1), (1, 1), (0, 0)))            # (B,34,34,3)
    taps = [xp[:, dy:dy + 32, dx:dx + 32, :]
            for dy in range(3) for dx in range(3)]
    pat = jnp.concatenate(taps, axis=-1)                              # (B,32,32,27)
    # split I = 4a + 2rp + p1, J = 4a' + 2cp + q1; rows (rp,cp,a,a'),
    # cols (p1,q1,tap,cin)
    pat = pat.reshape(B, 8, 2, 2, 8, 2, 2, 27)                        # (B,a,rp,p1,a',cp,q1,k)
    pat = pat.transpose(0, 2, 5, 1, 4, 3, 6, 7)                       # (B,rp,cp,a,a',p1,q1,k)
    pat = pat.reshape(B, 256, 4, 27)
    pat = jnp.pad(pat, ((0, 0), (0, 0), (0, 0), (0, 5)))              # k: 27 -> 32
    return pat.reshape(B, 256, 128).astype(jnp.bfloat16)


def conv_stack(x_nhwc, pp, cfg):
    """Fused conv1+ReLU+pool + conv2+ReLU+pool.  Returns (B*32, 128) bf16."""
    B = x_nhwc.shape[0]
    bt = _pick_batch_tile(B, cfg)
    x1 = _conv1_im2col(x_nhwc)
    return pl.pallas_call(
        _conv_stack_kernel,
        out_shape=jax.ShapeDtypeStruct((B * 32, 128), jnp.bfloat16),
        grid_spec=pltpu.PrefetchScalarGridSpec(
            num_scalar_prefetch=0,
            grid=(B // bt,),
            in_specs=[
                pl.BlockSpec((bt, 256, 128), lambda b: (b, 0, 0)),    # activations
                pl.BlockSpec((128, 128), lambda b: (0, 0)),           # weights stay
                pl.BlockSpec((1, 128), lambda b: (0, 0)),             # resident
                pl.BlockSpec((288, 64), lambda b: (0, 0)),            # across the
                pl.BlockSpec((1, 64), lambda b: (0, 0)),              # batch grid
            ],
            out_specs=pl.BlockSpec((bt * 32, 128), lambda b: (b, 0)),
            scratch_shapes=[pltpu.VMEM((bt, 10, 24, 32), jnp.bfloat16)] * 4
                         + [pltpu.VMEM((4 * bt * 64, 288), jnp.bfloat16)],
        ),
        compiler_params=pltpu.CompilerParams(
            dimension_semantics=("parallel",),
            vmem_limit_bytes=cfg["vmem"]),
    )(x1, pp["w1c"], pp["b1c"], pp["w2c"], pp["b2c"])


def mlp(x_flat, pp, cfg):
    B = x_flat.shape[0]
    bm = _pick_row_tile(B)
    out = pl.pallas_call(
        _mlp_kernel,
        out_shape=jax.ShapeDtypeStruct((B, 128), jnp.float32),
        grid_spec=pltpu.PrefetchScalarGridSpec(
            num_scalar_prefetch=0,
            grid=(B // bm,),
            in_specs=[
                pl.BlockSpec((bm, 4096), lambda i: (i, 0)),
                pl.BlockSpec((4096, 128), lambda i: (0, 0)),          # weights
                pl.BlockSpec((1, 128), lambda i: (0, 0)),             # resident
                pl.BlockSpec((128, 128), lambda i: (0, 0)),
                pl.BlockSpec((1, 128), lambda i: (0, 0)),
            ],
            out_specs=pl.BlockSpec((bm, 128), lambda i: (i, 0)),
        ),
        compiler_params=pltpu.CompilerParams(
            dimension_semantics=("parallel",),
            vmem_limit_bytes=cfg["vmem"]),
    )(x_flat, pp["wf1c"], pp["bf1c"], pp["wf2c"], pp["bf2c"])
    return out[:, :10]                      # drop the zero-padded logit columns


def simple_cnn_forward(x_nchw, pp):
    """SimpleCNN forward.  x_nchw: (B, 3, 32, 32) f32 -> (B, 10) f32."""
    B = x_nchw.shape[0]
    cfg = _tpu_defaults()                              # trace-time, python only
    x = jnp.transpose(x_nchw, (0, 2, 3, 1))            # NCHW -> NHWC (input prep)
    h2 = conv_stack(x, pp, cfg)                        # (B*32, 128) bf16
    x_fc = h2.reshape(B, 64 * 64)                      # free metadata reshape
    return mlp(x_fc, pp, cfg)


# ---------------------------------------------------------------------------
# One-time (parameter-load time) weight preparation
# ---------------------------------------------------------------------------
def prepare_params(params):
    """* conv1 -> 128x128 block-diagonal matmul form (4 pooling phases packed),
         bias tiled to 128 lanes
       * conv2 -> (288, 64) tap-major im2col matmul weight
       * fc1 rows permuted from the torch NCHW-flatten order to the kernel's
         (spatial s, half, channel) flatten order (f = s*128 + half*64 + c,
         spatial p = half*32 + s = m*8 + n)
       * fc2 weight/bias zero-padded 10 -> 128 output columns (dense store)"""
    w1p = jnp.pad(params["w1"].reshape(27, 32), ((0, 5), (0, 0)))      # K 27->32
    w1blk = jnp.kron(jnp.eye(4, dtype=w1p.dtype), w1p)                 # (128,128)
    b1t = jnp.tile(params["b1"].reshape(1, 32), (1, 4))                # (1,128)
    wf1 = (params["wf1"].reshape(64, 2, 4, 8, 128)                     # (c,mh,ml,n,o)
           .transpose(2, 3, 1, 0, 4)                                   # (ml,n,mh,c,o)
           .reshape(64 * 64, 128))                                     # row = s*128+half*64+c
    wf2 = jnp.pad(params["wf2"], ((0, 0), (0, 118)))                   # N 10 -> 128
    bf2 = jnp.pad(params["bf2"], ((0, 118),))
    return {
        "w1c": w1blk.astype(jnp.bfloat16),                             # (128,128)
        "b1c": b1t,                                                    # (1,128) f32
        "w2c": params["w2"].reshape(288, 64).astype(jnp.bfloat16),     # (288,64)
        "b2c": params["b2"].reshape(1, 64),
        "wf1c": wf1.astype(jnp.bfloat16),                              # (4096,128)
        "bf1c": params["bf1"].reshape(1, 128),
        "wf2c": wf2.astype(jnp.bfloat16),                              # (128,128)
        "bf2c": bf2.reshape(1, 128),
    }


# ---------------------------------------------------------------------------
# Pure-JAX reference (torch semantics) for verification
# ---------------------------------------------------------------------------
def reference_forward(x_nchw, params):
    x = jnp.transpose(x_nchw, (0, 2, 3, 1))

    def conv_relu(x, w, b):
        y = jax.lax.conv_general_dilated(
            x, w, window_strides=(1, 1), padding="SAME",
            dimension_numbers=("NHWC", "HWIO", "NHWC"))
        return jnp.maximum(y + b, 0.0)

    def pool(x):
        B, H, W, C = x.shape
        return jnp.max(x.reshape(B, H // 2, 2, W // 2, 2, C), axis=(2, 4))

    x = pool(conv_relu(x, params["w1"], params["b1"]))
    x = pool(conv_relu(x, params["w2"], params["b2"]))
    B = x.shape[0]
    x = jnp.transpose(x, (0, 3, 1, 2)).reshape(B, -1)    # torch NCHW flatten
    h = jnp.maximum(x @ params["wf1"] + params["bf1"], 0.0)
    return h @ params["wf2"] + params["bf2"]


# ---------------------------------------------------------------------------
# Deterministic parameter init (shapes from SimpleCNN.__init__)
# ---------------------------------------------------------------------------
def init_params(key):
    ks = jax.random.split(key, 8)

    def nrm(k, shape, fan_in):
        return jax.random.normal(k, shape, jnp.float32) / np.sqrt(fan_in)

    return {
        "w1":  nrm(ks[0], (3, 3, 3, 32), 3 * 9),             # conv1: 3 -> 32
        "b1":  0.1 * jax.random.normal(ks[1], (32,), jnp.float32),
        "w2":  nrm(ks[2], (3, 3, 32, 64), 32 * 9),            # conv2: 32 -> 64
        "b2":  0.1 * jax.random.normal(ks[3], (64,), jnp.float32),
        "wf1": nrm(ks[4], (64 * 8 * 8, 128), 64 * 8 * 8),     # fc1
        "bf1": 0.1 * jax.random.normal(ks[5], (128,), jnp.float32),
        "wf2": nrm(ks[6], (128, 10), 128),                    # fc2
        "bf2": 0.1 * jax.random.normal(ks[7], (10,), jnp.float32),
    }


# ---------------------------------------------------------------------------
if __name__ == "__main__":
    key = jax.random.PRNGKey(0)
    pkey, xkey = jax.random.split(key)
    params = init_params(pkey)
    pp = prepare_params(params)       # one-time weight prep (not per step)

    # fc1 expects 64*8*8 features => input spatial must be 32x32 (CIFAR).
    x = jax.random.normal(xkey, (2, 3, 32, 32), jnp.float32)

    out = jax.block_until_ready(jax.jit(simple_cnn_forward)(x, pp))
    assert out.shape == (2, 10) and out.dtype == jnp.float32

    ref = jax.block_until_ready(jax.jit(reference_forward)(x, params))
    # Tolerance sized for bf16 MXU operands (f32 accumulation) across the four
    # chained matmul layers; any indexing/pooling/flatten bug would show as O(1).
    np.testing.assert_allclose(np.asarray(out), np.asarray(ref),
                               rtol=3e-2, atol=3e-2)
    print("KERNEL_OK")
</pallas_src>

<mosaic_0001>
module attributes {stable_mosaic.version = 11 : i64} {
  func.func @_conv_stack_kernel(%arg0: i32, %arg1: memref<1x256x128xbf16, #tpu.memory_space<vmem>>, %arg2: memref<128x128xbf16, #tpu.memory_space<vmem>>, %arg3: memref<1x128xf32, #tpu.memory_space<vmem>>, %arg4: memref<288x64xbf16, #tpu.memory_space<vmem>>, %arg5: memref<1x64xf32, #tpu.memory_space<vmem>>, %arg6: memref<32x128xbf16, #tpu.memory_space<vmem>>, %arg7: memref<1x10x24x32xbf16, #tpu.memory_space<vmem>>, %arg8: memref<1x10x24x32xbf16, #tpu.memory_space<vmem>>, %arg9: memref<1x10x24x32xbf16, #tpu.memory_space<vmem>>, %arg10: memref<1x10x24x32xbf16, #tpu.memory_space<vmem>>, %arg11: memref<256x288xbf16, #tpu.memory_space<vmem>>) attributes {dimension_semantics = [#tpu.dimension_semantics<parallel>], iteration_bounds = array<i64: 2>, scalar_prefetch = 0 : i64, scratch_operands = 5 : i64, tpu.core_type = #tpu.core_type<tc>, window_params = [{transform_indices = @transform_0, window_bounds = array<i64: 1, 256, 128>}, {pipeline_mode = #tpu.pipeline_mode<synchronous>, transform_indices = @transform_1, window_bounds = array<i64: 128, 128>}, {pipeline_mode = #tpu.pipeline_mode<synchronous>, transform_indices = @transform_2, window_bounds = array<i64: 1, 128>}, {pipeline_mode = #tpu.pipeline_mode<synchronous>, transform_indices = @transform_3, window_bounds = array<i64: 288, 64>}, {pipeline_mode = #tpu.pipeline_mode<synchronous>, transform_indices = @transform_4, window_bounds = array<i64: 1, 64>}, {transform_indices = @transform_5, window_bounds = array<i64: 32, 128>}]} {
    %c0 = arith.constant 0 : index
    %c0_0 = arith.constant 0 : index
    %c0_1 = arith.constant 0 : index
    %0 = vector.load %arg1[%c0, %c0_0, %c0_1] : memref<1x256x128xbf16, #tpu.memory_space<vmem>>, vector<1x256x128xbf16>
    %1 = vector.shape_cast %0 : vector<1x256x128xbf16> to vector<256x128xbf16>
    %c0_2 = arith.constant 0 : index
    %c0_3 = arith.constant 0 : index
    %2 = vector.load %arg2[%c0_2, %c0_3] : memref<128x128xbf16, #tpu.memory_space<vmem>>, vector<128x128xbf16>
    %cst = arith.constant dense<0.000000e+00> : vector<256x128xf32>
    %3 = tpu.matmul %1, %2, %cst {dimension_numbers = #tpu.dot_dimension_numbers<[1], [0], [0], [1], [0, 0, 1, 1], [], []>} : vector<256x128xbf16>, vector<128x128xbf16>, vector<256x128xf32> -> vector<256x128xf32>
    %c0_4 = arith.constant 0 : index
    %c0_5 = arith.constant 0 : index
    %4 = vector.load %arg3[%c0_4, %c0_5] : memref<1x128xf32, #tpu.memory_space<vmem>>, vector<1x128xf32>
    %5 = vector.broadcast %4 : vector<1x128xf32> to vector<256x128xf32>
    %6 = arith.addf %3, %5 : vector<256x128xf32>
    %cst_6 = arith.constant 0.000000e+00 : f32
    %7 = vector.broadcast %cst_6 : f32 to vector<256x128xf32>
    %8 = arith.maximumf %6, %7 : vector<256x128xf32>
    %9 = vector.extract_strided_slice %8 {offsets = [0, 0], sizes = [256, 64], strides = [1, 1]} : vector<256x128xf32> to vector<256x64xf32>
    %10 = vector.extract_strided_slice %8 {offsets = [0, 64], sizes = [256, 64], strides = [1, 1]} : vector<256x128xf32> to vector<256x64xf32>
    %11 = arith.maximumf %9, %10 : vector<256x64xf32>
    %12 = vector.extract_strided_slice %11 {offsets = [0, 0], sizes = [256, 32], strides = [1, 1]} : vector<256x64xf32> to vector<256x32xf32>
    %13 = vector.extract_strided_slice %11 {offsets = [0, 32], sizes = [256, 32], strides = [1, 1]} : vector<256x64xf32> to vector<256x32xf32>
    %14 = arith.maximumf %12, %13 : vector<256x32xf32>
    %15 = arith.truncf %14 : vector<256x32xf32> to vector<256x32xbf16>
    %16 = vector.shape_cast %15 : vector<256x32xbf16> to vector<1x256x32xbf16>
    %cst_7 = arith.constant 0.000000e+00 : bf16
    %17 = vector.broadcast %cst_7 : bf16 to vector<1x1x24x32xbf16>
    %cst_8 = arith.constant 0.000000e+00 : bf16
    %18 = vector.broadcast %cst_8 : bf16 to vector<1x10x2x32xbf16>
    %c0_9 = arith.constant 0 : index
    %c9 = arith.constant 9 : index
    %c0_10 = arith.constant 0 : index
    %c0_11 = arith.constant 0 : index
    %19 = vector.load %arg7[%c0_9, %c9, %c0_10, %c0_11] : memref<1x10x24x32xbf16, #tpu.memory_space<vmem>>, vector<1x1x24x32xbf16>
    tpu.vector_store %arg7[%c0_9, %c9, %c0_10, %c0_11], %17 {strides = array<i32>} : memref<1x10x24x32xbf16, #tpu.memory_space<vmem>>, vector<1x1x24x32xbf16>,
    %c0_12 = arith.constant 0 : index
    %c0_13 = arith.constant 0 : index
    %c16 = arith.constant 16 : index
    %c0_14 = arith.constant 0 : index
    %20 = vector.load %arg7[%c0_12, %c0_13, %c16, %c0_14] : memref<1x10x24x32xbf16, #tpu.memory_space<vmem>>, vector<1x10x2x32xbf16>
    tpu.vector_store %arg7[%c0_12, %c0_13, %c16, %c0_14], %18 {strides = array<i32>} : memref<1x10x24x32xbf16, #tpu.memory_space<vmem>>, vector<1x10x2x32xbf16>,
    %21 = vector.extract_strided_slice %16 {offsets = [0, 0, 0], sizes = [1, 64, 32], strides = [1, 1, 1]} : vector<1x256x32xbf16> to vector<1x64x32xbf16>
    %22 = vector.shape_cast %21 : vector<1x64x32xbf16> to vector<1x8x8x32xbf16>
    %c0_15 = arith.constant 0 : index
    %c1 = arith.constant 1 : index
    %c8 = arith.constant 8 : index
    %c0_16 = arith.constant 0 : index
    %23 = vector.load %arg7[%c0_15, %c1, %c8, %c0_16] : memref<1x10x24x32xbf16, #tpu.memory_space<vmem>>, vector<1x8x8x32xbf16>
    tpu.vector_store %arg7[%c0_15, %c1, %c8, %c0_16], %22 {strides = array<i32>} : memref<1x10x24x32xbf16, #tpu.memory_space<vmem>>, vector<1x8x8x32xbf16>,
    %c0_17 = arith.constant 0 : index
    %c9_18 = arith.constant 9 : index
    %c0_19 = arith.constant 0 : index
    %c0_20 = arith.constant 0 : index
    %24 = vector.load %arg8[%c0_17, %c9_18, %c0_19, %c0_20] : memref<1x10x24x32xbf16, #tpu.memory_space<vmem>>, vector<1x1x24x32xbf16>
    tpu.vector_store %arg8[%c0_17, %c9_18, %c0_19, %c0_20], %17 {strides = array<i32>} : memref<1x10x24x32xbf16, #tpu.memory_space<vmem>>, vector<1x1x24x32xbf16>,
    %c0_21 = arith.constant 0 : index
    %c0_22 = arith.constant 0 : index
    %c6 = arith.constant 6 : index
    %c0_23 = arith.constant 0 : index
    %25 = vector.load %arg8[%c0_21, %c0_22, %c6, %c0_23] : memref<1x10x24x32xbf16, #tpu.memory_space<vmem>>, vector<1x10x2x32xbf16>
    tpu.vector_store %arg8[%c0_21, %c0_22, %c6, %c0_23], %18 {strides = array<i32>} : memref<1x10x24x32xbf16, #tpu.memory_space<vmem>>, vector<1x10x2x32xbf16>,
    %26 = vector.extract_strided_slice %16 {offsets = [0, 64, 0], sizes = [1, 64, 32], strides = [1, 1, 1]} : vector<1x256x32xbf16> to vector<1x64x32xbf16>
    %27 = vector.shape_cast %26 : vector<1x64x32xbf16> to vector<1x8x8x32xbf16>
    %c0_24 = arith.constant 0 : index
    %c1_25 = arith.constant 1 : index
    %c8_26 = arith.constant 8 : index
    %c0_27 = arith.constant 0 : index
    %28 = vector.load %arg8[%c0_24, %c1_25, %c8_26, %c0_27] : memref<1x10x24x32xbf16, #tpu.memory_space<vmem>>, vector<1x8x8x32xbf16>
    tpu.vector_store %arg8[%c0_24, %c1_25, %c8_26, %c0_27], %27 {strides = array<i32>} : memref<1x10x24x32xbf16, #tpu.memory_space<vmem>>, vector<1x8x8x32xbf16>,
    %c0_28 = arith.constant 0 : index
    %c0_29 = arith.constant 0 : index
    %c0_30 = arith.constant 0 : index
    %c0_31 = arith.constant 0 : index
    %29 = vector.load %arg9[%c0_28, %c0_29, %c0_30, %c0_31] : memref<1x10x24x32xbf16, #tpu.memory_space<vmem>>, vector<1x1x24x32xbf16>
    tpu.vector_store %arg9[%c0_28, %c0_29, %c0_30, %c0_31], %17 {strides = array<i32>} : memref<1x10x24x32xbf16, #tpu.memory_space<vmem>>, vector<1x1x24x32xbf16>,
    %c0_32 = arith.constant 0 : index
    %c0_33 = arith.constant 0 : index
    %c16_34 = arith.constant 16 : index
    %c0_35 = arith.constant 0 : index
    %30 = vector.load %arg9[%c0_32, %c0_33, %c16_34, %c0_35] : memref<1x10x24x32xbf16, #tpu.memory_space<vmem>>, vector<1x10x2x32xbf16>
    tpu.vector_store %arg9[%c0_32, %c0_33, %c16_34, %c0_35], %18 {strides = array<i32>} : memref<1x10x24x32xbf16, #tpu.memory_space<vmem>>, vector<1x10x2x32xbf16>,
    %31 = vector.extract_strided_slice %16 {offsets = [0, 128, 0], sizes = [1, 64, 32], strides = [1, 1, 1]} : vector<1x256x32xbf16> to vector<1x64x32xbf16>
    %32 = vector.shape_cast %31 : vector<1x64x32xbf16> to vector<1x8x8x32xbf16>
    %c0_36 = arith.constant 0 : index
    %c1_37 = arith.constant 1 : index
    %c8_38 = arith.constant 8 : index
    %c0_39 = arith.constant 0 : index
    %33 = vector.load %arg9[%c0_36, %c1_37, %c8_38, %c0_39] : memref<1x10x24x32xbf16, #tpu.memory_space<vmem>>, vector<1x8x8x32xbf16>
    tpu.vector_store %arg9[%c0_36, %c1_37, %c8_38, %c0_39], %32 {strides = array<i32>} : memref<1x10x24x32xbf16, #tpu.memory_space<vmem>>, vector<1x8x8x32xbf16>,
    %c0_40 = arith.constant 0 : index
    %c0_41 = arith.constant 0 : index
    %c0_42 = arith.constant 0 : index
    %c0_43 = arith.constant 0 : index
    %34 = vector.load %arg10[%c0_40, %c0_41, %c0_42, %c0_43] : memref<1x10x24x32xbf16, #tpu.memory_space<vmem>>, vector<1x1x24x32xbf16>
    tpu.vector_store %arg10[%c0_40, %c0_41, %c0_42, %c0_43], %17 {strides = array<i32>} : memref<1x10x24x32xbf16, #tpu.memory_space<vmem>>, vector<1x1x24x32xbf16>,
    %c0_44 = arith.constant 0 : index
    %c0_45 = arith.constant 0 : index
    %c6_46 = arith.constant 6 : index
    %c0_47 = arith.constant 0 : index
    %35 = vector.load %arg10[%c0_44, %c0_45, %c6_46, %c0_47] : memref<1x10x24x32xbf16, #tpu.memory_space<vmem>>, vector<1x10x2x32xbf16>
    tpu.vector_store %arg10[%c0_44, %c0_45, %c6_46, %c0_47], %18 {strides = array<i32>} : memref<1x10x24x32xbf16, #tpu.memory_space<vmem>>, vector<1x10x2x32xbf16>,
    %36 = vector.extract_strided_slice %16 {offsets = [0, 192, 0], sizes = [1, 64, 32], strides = [1, 1, 1]} : vector<1x256x32xbf16> to vector<1x64x32xbf16>
    %37 = vector.shape_cast %36 : vector<1x64x32xbf16> to vector<1x8x8x32xbf16>
    %c0_48 = arith.constant 0 : index
    %c1_49 = arith.constant 1 : index
    %c8_50 = arith.constant 8 : index
    %c0_51 = arith.constant 0 : index
    %38 = vector.load %arg10[%c0_48, %c1_49, %c8_50, %c0_51] : memref<1x10x24x32xbf16, #tpu.memory_space<vmem>>, vector<1x8x8x32xbf16>
    tpu.vector_store %arg10[%c0_48, %c1_49, %c8_50, %c0_51], %37 {strides = array<i32>} : memref<1x10x24x32xbf16, #tpu.memory_space<vmem>>, vector<1x8x8x32xbf16>,
    %c0_52 = arith.constant 0 : index
    %c0_53 = arith.constant 0 : index
    %c7 = arith.constant 7 : index
    %c0_54 = arith.constant 0 : index
    %39 = vector.load %arg10[%c0_52, %c0_53, %c7, %c0_54] : memref<1x10x24x32xbf16, #tpu.memory_space<vmem>>, vector<1x8x8x32xbf16>
    %40 = vector.shape_cast %39 : vector<1x8x8x32xbf16> to vector<64x32xbf16>
    %c0_55 = arith.constant 0 : index
    %c0_56 = arith.constant 0 : index
    %41 = vector.load %arg11[%c0_55, %c0_56] : memref<256x288xbf16, #tpu.memory_space<vmem>>, vector<64x32xbf16>
    tpu.vector_store %arg11[%c0_55, %c0_56], %40 {strides = array<i32>} : memref<256x288xbf16, #tpu.memory_space<vmem>>, vector<64x32xbf16>,
    %c0_57 = arith.constant 0 : index
    %c0_58 = arith.constant 0 : index
    %c8_59 = arith.constant 8 : index
    %c0_60 = arith.constant 0 : index
    %42 = vector.load %arg9[%c0_57, %c0_58, %c8_59, %c0_60] : memref<1x10x24x32xbf16, #tpu.memory_space<vmem>>, vector<1x8x8x32xbf16>
    %43 = vector.shape_cast %42 : vector<1x8x8x32xbf16> to vector<64x32xbf16>
    %c64 = arith.constant 64 : index
    %c0_61 = arith.constant 0 : index
    %44 = vector.load %arg11[%c64, %c0_61] : memref<256x288xbf16, #tpu.memory_space<vmem>>, vector<64x32xbf16>
    tpu.vector_store %arg11[%c64, %c0_61], %43 {strides = array<i32>} : memref<256x288xbf16, #tpu.memory_space<vmem>>, vector<64x32xbf16>,
    %c0_62 = arith.constant 0 : index
    %c1_63 = arith.constant 1 : index
    %c7_64 = arith.constant 7 : index
    %c0_65 = arith.constant 0 : index
    %45 = vector.load %arg8[%c0_62, %c1_63, %c7_64, %c0_65] : memref<1x10x24x32xbf16, #tpu.memory_space<vmem>>, vector<1x8x8x32xbf16>
    %46 = vector.shape_cast %45 : vector<1x8x8x32xbf16> to vector<64x32xbf16>
    %c128 = arith.constant 128 : index
    %c0_66 = arith.constant 0 : index
    %47 = vector.load %arg11[%c128, %c0_66] : memref<256x288xbf16, #tpu.memory_space<vmem>>, vector<64x32xbf16>
    tpu.vector_store %arg11[%c128, %c0_66], %46 {strides = array<i32>} : memref<256x288xbf16, #tpu.memory_space<vmem>>, vector<64x32xbf16>,
    %c0_67 = arith.constant 0 : index
    %c1_68 = arith.constant 1 : index
    %c8_69 = arith.constant 8 : index
    %c0_70 = arith.constant 0 : index
    %48 = vector.load %arg7[%c0_67, %c1_68, %c8_69, %c0_70] : memref<1x10x24x32xbf16, #tpu.memory_space<vmem>>, vector<1x8x8x32xbf16>
    %49 = vector.shape_cast %48 : vector<1x8x8x32xbf16> to vector<64x32xbf16>
    %c192 = arith.constant 192 : index
    %c0_71 = arith.constant 0 : index
    %50 = vector.load %arg11[%c192, %c0_71] : memref<256x288xbf16, #tpu.memory_space<vmem>>, vector<64x32xbf16>
    tpu.vector_store %arg11[%c192, %c0_71], %49 {strides = array<i32>} : memref<256x288xbf16, #tpu.memory_space<vmem>>, vector<64x32xbf16>,
    %c0_72 = arith.constant 0 : index
    %c0_73 = arith.constant 0 : index
    %c8_74 = arith.constant 8 : index
    %c0_75 = arith.constant 0 : index
    %51 = vector.load %arg9[%c0_72, %c0_73, %c8_74, %c0_75] : memref<1x10x24x32xbf16, #tpu.memory_space<vmem>>, vector<1x8x8x32xbf16>
    %52 = vector.shape_cast %51 : vector<1x8x8x32xbf16> to vector<64x32xbf16>
    %c0_76 = arith.constant 0 : index
    %c32 = arith.constant 32 : index
    %53 = vector.load %arg11[%c0_76, %c32] : memref<256x288xbf16, #tpu.memory_space<vmem>>, vector<64x32xbf16>
    tpu.vector_store %arg11[%c0_76, %c32], %52 {strides = array<i32>} : memref<256x288xbf16, #tpu.memory_space<vmem>>, vector<64x32xbf16>,
    %c0_77 = arith.constant 0 : index
    %c0_78 = arith.constant 0 : index
    %c8_79 = arith.constant 8 : index
    %c0_80 = arith.constant 0 : index
    %54 = vector.load %arg10[%c0_77, %c0_78, %c8_79, %c0_80] : memref<1x10x24x32xbf16, #tpu.memory_space<vmem>>, vector<1x8x8x32xbf16>
    %55 = vector.shape_cast %54 : vector<1x8x8x32xbf16> to vector<64x32xbf16>
    %c64_81 = arith.constant 64 : index
    %c32_82 = arith.constant 32 : index
    %56 = vector.load %arg11[%c64_81, %c32_82] : memref<256x288xbf16, #tpu.memory_space<vmem>>, vector<64x32xbf16>
    tpu.vector_store %arg11[%c64_81, %c32_82], %55 {strides = array<i32>} : memref<256x288xbf16, #tpu.memory_space<vmem>>, vector<64x32xbf16>,
    %c0_83 = arith.constant 0 : index
    %c1_84 = arith.constant 1 : index
    %c8_85 = arith.constant 8 : index
    %c0_86 = arith.constant 0 : index
    %57 = vector.load %arg7[%c0_83, %c1_84, %c8_85, %c0_86] : memref<1x10x24x32xbf16, #tpu.memory_space<vmem>>, vector<1x8x8x32xbf16>
    %58 = vector.shape_cast %57 : vector<1x8x8x32xbf16> to vector<64x32xbf16>
    %c128_87 = arith.constant 128 : index
    %c32_88 = arith.constant 32 : index
    %59 = vector.load %arg11[%c128_87, %c32_88] : memref<256x288xbf16, #tpu.memory_space<vmem>>, vector<64x32xbf16>
    tpu.vector_store %arg11[%c128_87, %c32_88], %58 {strides = array<i32>} : memref<256x288xbf16, #tpu.memory_space<vmem>>, vector<64x32xbf16>,
    %c0_89 = arith.constant 0 : index
    %c1_90 = arith.constant 1 : index
    %c8_91 = arith.constant 8 : index
    %c0_92 = arith.constant 0 : index
    %60 = vector.load %arg8[%c0_89, %c1_90, %c8_91, %c0_92] : memref<1x10x24x32xbf16, #tpu.memory_space<vmem>>, vector<1x8x8x32xbf16>
    %61 = vector.shape_cast %60 : vector<1x8x8x32xbf16> to vector<64x32xbf16>
    %c192_93 = arith.constant 192 : index
    %c32_94 = arith.constant 32 : index
    %62 = vector.load %arg11[%c192_93, %c32_94] : memref<256x288xbf16, #tpu.memory_space<vmem>>, vector<64x32xbf16>
    tpu.vector_store %arg11[%c192_93, %c32_94], %61 {strides = array<i32>} : memref<256x288xbf16, #tpu.memory_space<vmem>>, vector<64x32xbf16>,
    %c0_95 = arith.constant 0 : index
    %c0_96 = arith.constant 0 : index
    %c8_97 = arith.constant 8 : index
    %c0_98 = arith.constant 0 : index
    %63 = vector.load %arg10[%c0_95, %c0_96, %c8_97, %c0_98] : memref<1x10x24x32xbf16, #tpu.memory_space<vmem>>, vector<1x8x8x32xbf16>
    %64 = vector.shape_cast %63 : vector<1x8x8x32xbf16> to vector<64x32xbf16>
    %c0_99 = arith.constant 0 : index
    %c64_100 = arith.constant 64 : index
    %65 = vector.load %arg11[%c0_99, %c64_100] : memref<256x288xbf16, #tpu.memory_space<vmem>>, vector<64x32xbf16>
    tpu.vector_store %arg11[%c0_99, %c64_100], %64 {strides = array<i32>} : memref<256x288xbf16, #tpu.memory_space<vmem>>, vector<64x32xbf16>,
    %c0_101 = arith.constant 0 : index
    %c0_102 = arith.constant 0 : index
    %c9_103 = arith.constant 9 : index
    %c0_104 = arith.constant 0 : index
    %66 = vector.load %arg9[%c0_101, %c0_102, %c9_103, %c0_104] : memref<1x10x24x32xbf16, #tpu.memory_space<vmem>>, vector<1x8x8x32xbf16>
    %67 = vector.shape_cast %66 : vector<1x8x8x32xbf16> to vector<64x32xbf16>
    %c64_105 = arith.constant 64 : index
    %c64_106 = arith.constant 64 : index
    %68 = vector.load %arg11[%c64_105, %c64_106] : memref<256x288xbf16, #tpu.memory_space<vmem>>, vector<64x32xbf16>
    tpu.vector_store %arg11[%c64_105, %c64_106], %67 {strides = array<i32>} : memref<256x288xbf16, #tpu.memory_space<vmem>>, vector<64x32xbf16>,
    %c0_107 = arith.constant 0 : index
    %c1_108 = arith.constant 1 : index
    %c8_109 = arith.constant 8 : index
    %c0_110 = arith.constant 0 : index
    %69 = vector.load %arg8[%c0_107, %c1_108, %c8_109, %c0_110] : memref<1x10x24x32xbf16, #tpu.memory_space<vmem>>, vector<1x8x8x32xbf16>
    %70 = vector.shape_cast %69 : vector<1x8x8x32xbf16> to vector<64x32xbf16>
    %c128_111 = arith.constant 128 : index
    %c64_112 = arith.constant 64 : index
    %71 = vector.load %arg11[%c128_111, %c64_112] : memref<256x288xbf16, #tpu.memory_space<vmem>>, vector<64x32xbf16>
    tpu.vector_store %arg11[%c128_111, %c64_112], %70 {strides = array<i32>} : memref<256x288xbf16, #tpu.memory_space<vmem>>, vector<64x32xbf16>,
    %c0_113 = arith.constant 0 : index
    %c1_114 = arith.constant 1 : index
    %c9_115 = arith.constant 9 : index
    %c0_116 = arith.constant 0 : index
    %72 = vector.load %arg7[%c0_113, %c1_114, %c9_115, %c0_116] : memref<1x10x24x32xbf16, #tpu.memory_space<vmem>>, vector<1x8x8x32xbf16>
    %73 = vector.shape_cast %72 : vector<1x8x8x32xbf16> to vector<64x32xbf16>
    %c192_117 = arith.constant 192 : index
    %c64_118 = arith.constant 64 : index
    %74 = vector.load %arg11[%c192_117, %c64_118] : memref<256x288xbf16, #tpu.memory_space<vmem>>, vector<64x32xbf16>
    tpu.vector_store %arg11[%c192_117, %c64_118], %73 {strides = array<i32>} : memref<256x288xbf16, #tpu.memory_space<vmem>>, vector<64x32xbf16>,
    %c0_119 = arith.constant 0 : index
    %c1_120 = arith.constant 1 : index
    %c7_121 = arith.constant 7 : index
    %c0_122 = arith.constant 0 : index
    %75 = vector.load %arg8[%c0_119, %c1_120, %c7_121, %c0_122] : memref<1x10x24x32xbf16, #tpu.memory_space<vmem>>, vector<1x8x8x32xbf16>
    %76 = vector.shape_cast %75 : vector<1x8x8x32xbf16> to vector<64x32xbf16>
    %c0_123 = arith.constant 0 : index
    %c96 = arith.constant 96 : index
    %77 = vector.load %arg11[%c0_123, %c96] : memref<256x288xbf16, #tpu.memory_space<vmem>>, vector<64x32xbf16>
    tpu.vector_store %arg11[%c0_123, %c96], %76 {strides = array<i32>} : memref<256x288xbf16, #tpu.memory_space<vmem>>, vector<64x32xbf16>,
    %c0_124 = arith.constant 0 : index
    %c1_125 = arith.constant 1 : index
    %c8_126 = arith.constant 8 : index
    %c0_127 = arith.constant 0 : index
    %78 = vector.load %arg7[%c0_124, %c1_125, %c8_126, %c0_127] : memref<1x10x24x32xbf16, #tpu.memory_space<vmem>>, vector<1x8x8x32xbf16>
    %79 = vector.shape_cast %78 : vector<1x8x8x32xbf16> to vector<64x32xbf16>
    %c64_128 = arith.constant 64 : index
    %c96_129 = arith.constant 96 : index
    %80 = vector.load %arg11[%c64_128, %c96_129] : memref<256x288xbf16, #tpu.memory_space<vmem>>, vector<64x32xbf16>
    tpu.vector_store %arg11[%c64_128, %c96_129], %79 {strides = array<i32>} : memref<256x288xbf16, #tpu.memory_space<vmem>>, vector<64x32xbf16>,
    %c0_130 = arith.constant 0 : index
    %c1_131 = arith.constant 1 : index
    %c7_132 = arith.constant 7 : index
    %c0_133 = arith.constant 0 : index
    %81 = vector.load %arg10[%c0_130, %c1_131, %c7_132, %c0_133] : memref<1x10x24x32xbf16, #tpu.memory_space<vmem>>, vector<1x8x8x32xbf16>
    %82 = vector.shape_cast %81 : vector<1x8x8x32xbf16> to vector<64x32xbf16>
    %c128_134 = arith.constant 128 : index
    %c96_135 = arith.constant 96 : index
    %83 = vector.load %arg11[%c128_134, %c96_135] : memref<256x288xbf16, #tpu.memory_space<vmem>>, vector<64x32xbf16>
    tpu.vector_store %arg11[%c128_134, %c96_135], %82 {strides = array<i32>} : memref<256x288xbf16, #tpu.memory_space<vmem>>, vector<64x32xbf16>,
    %c0_136 = arith.constant 0 : index
    %c1_137 = arith.constant 1 : index
    %c8_138 = arith.constant 8 : index
    %c0_139 = arith.constant 0 : index
    %84 = vector.load %arg9[%c0_136, %c1_137, %c8_138, %c0_139] : memref<1x10x24x32xbf16, #tpu.memory_space<vmem>>, vector<1x8x8x32xbf16>
    %85 = vector.shape_cast %84 : vector<1x8x8x32xbf16> to vector<64x32xbf16>
    %c192_140 = arith.constant 192 : index
    %c96_141 = arith.constant 96 : index
    %86 = vector.load %arg11[%c192_140, %c96_141] : memref<256x288xbf16, #tpu.memory_space<vmem>>, vector<64x32xbf16>
    tpu.vector_store %arg11[%c192_140, %c96_141], %85 {strides = array<i32>} : memref<256x288xbf16, #tpu.memory_space<vmem>>, vector<64x32xbf16>,
    %c0_142 = arith.constant 0 : index
    %c1_143 = arith.constant 1 : index
    %c8_144 = arith.constant 8 : index
    %c0_145 = arith.constant 0 : index
    %87 = vector.load %arg7[%c0_142, %c1_143, %c8_144, %c0_145] : memref<1x10x24x32xbf16, #tpu.memory_space<vmem>>, vector<1x8x8x32xbf16>
    %88 = vector.shape_cast %87 : vector<1x8x8x32xbf16> to vector<64x32xbf16>
    %c0_146 = arith.constant 0 : index
    %c128_147 = arith.constant 128 : index
    %89 = vector.load %arg11[%c0_146, %c128_147] : memref<256x288xbf16, #tpu.memory_space<vmem>>, vector<64x32xbf16>
    tpu.vector_store %arg11[%c0_146, %c128_147], %88 {strides = array<i32>} : memref<256x288xbf16, #tpu.memory_space<vmem>>, vector<64x32xbf16>,
    %c0_148 = arith.constant 0 : index
    %c1_149 = arith.constant 1 : index
    %c8_150 = arith.constant 8 : index
    %c0_151 = arith.constant 0 : index
    %90 = vector.load %arg8[%c0_148, %c1_149, %c8_150, %c0_151] : memref<1x10x24x32xbf16, #tpu.memory_space<vmem>>, vector<1x8x8x32xbf16>
    %91 = vector.shape_cast %90 : vector<1x8x8x32xbf16> to vector<64x32xbf16>
    %c64_152 = arith.constant 64 : index
    %c128_153 = arith.constant 128 : index
    %92 = vector.load %arg11[%c64_152, %c128_153] : memref<256x288xbf16, #tpu.memory_space<vmem>>, vector<64x32xbf16>
    tpu.vector_store %arg11[%c64_152, %c128_153], %91 {strides = array<i32>} : memref<256x288xbf16, #tpu.memory_space<vmem>>, vector<64x32xbf16>,
    %c0_154 = arith.constant 0 : index
    %c1_155 = arith.constant 1 : index
    %c8_156 = arith.constant 8 : index
    %c0_157 = arith.constant 0 : index
    %93 = vector.load %arg9[%c0_154, %c1_155, %c8_156, %c0_157] : memref<1x10x24x32xbf16, #tpu.memory_space<vmem>>, vector<1x8x8x32xbf16>
    %94 = vector.shape_cast %93 : vector<1x8x8x32xbf16> to vector<64x32xbf16>
    %c128_158 = arith.constant 128 : index
    %c128_159 = arith.constant 128 : index
    %95 = vector.load %arg11[%c128_158, %c128_159] : memref<256x288xbf16, #tpu.memory_space<vmem>>, vector<64x32xbf16>
    tpu.vector_store %arg11[%c128_158, %c128_159], %94 {strides = array<i32>} : memref<256x288xbf16, #tpu.memory_space<vmem>>, vector<64x32xbf16>,
    %c0_160 = arith.constant 0 : index
    %c1_161 = arith.constant 1 : index
    %c8_162 = arith.constant 8 : index
    %c0_163 = arith.constant 0 : index
    %96 = vector.load %arg10[%c0_160, %c1_161, %c8_162, %c0_163] : memref<1x10x24x32xbf16, #tpu.memory_space<vmem>>, vector<1x8x8x32xbf16>
    %97 = vector.shape_cast %96 : vector<1x8x8x32xbf16> to vector<64x32xbf16>
    %c192_164 = arith.constant 192 : index
    %c128_165 = arith.constant 128 : index
    %98 = vector.load %arg11[%c192_164, %c128_165] : memref<256x288xbf16, #tpu.memory_space<vmem>>, vector<64x32xbf16>
    tpu.vector_store %arg11[%c192_164, %c128_165], %97 {strides = array<i32>} : memref<256x288xbf16, #tpu.memory_space<vmem>>, vector<64x32xbf16>,
    %c0_166 = arith.constant 0 : index
    %c1_167 = arith.constant 1 : index
    %c8_168 = arith.constant 8 : index
    %c0_169 = arith.constant 0 : index
    %99 = vector.load %arg8[%c0_166, %c1_167, %c8_168, %c0_169] : memref<1x10x24x32xbf16, #tpu.memory_space<vmem>>, vector<1x8x8x32xbf16>
    %100 = vector.shape_cast %99 : vector<1x8x8x32xbf16> to vector<64x32xbf16>
    %c0_170 = arith.constant 0 : index
    %c160 = arith.constant 160 : index
    %101 = vector.load %arg11[%c0_170, %c160] : memref<256x288xbf16, #tpu.memory_space<vmem>>, vector<64x32xbf16>
    tpu.vector_store %arg11[%c0_170, %c160], %100 {strides = array<i32>} : memref<256x288xbf16, #tpu.memory_space<vmem>>, vector<64x32xbf16>,
    %c0_171 = arith.constant 0 : index
    %c1_172 = arith.constant 1 : index
    %c9_173 = arith.constant 9 : index
    %c0_174 = arith.constant 0 : index
    %102 = vector.load %arg7[%c0_171, %c1_172, %c9_173, %c0_174] : memref<1x10x24x32xbf16, #tpu.memory_space<vmem>>, vector<1x8x8x32xbf16>
    %103 = vector.shape_cast %102 : vector<1x8x8x32xbf16> to vector<64x32xbf16>
    %c64_175 = arith.constant 64 : index
    %c160_176 = arith.constant 160 : index
    %104 = vector.load %arg11[%c64_175, %c160_176] : memref<256x288xbf16, #tpu.memory_space<vmem>>, vector<64x32xbf16>
    tpu.vector_store %arg11[%c64_175, %c160_176], %103 {strides = array<i32>} : memref<256x288xbf16, #tpu.memory_space<vmem>>, vector<64x32xbf16>,
    %c0_177 = arith.constant 0 : index
    %c1_178 = arith.constant 1 : index
    %c8_179 = arith.constant 8 : index
    %c0_180 = arith.constant 0 : index
    %105 = vector.load %arg10[%c0_177, %c1_178, %c8_179, %c0_180] : memref<1x10x24x32xbf16, #tpu.memory_space<vmem>>, vector<1x8x8x32xbf16>
    %106 = vector.shape_cast %105 : vector<1x8x8x32xbf16> to vector<64x32xbf16>
    %c128_181 = arith.constant 128 : index
    %c160_182 = arith.constant 160 : index
    %107 = vector.load %arg11[%c128_181, %c160_182] : memref<256x288xbf16, #tpu.memory_space<vmem>>, vector<64x32xbf16>
    tpu.vector_store %arg11[%c128_181, %c160_182], %106 {strides = array<i32>} : memref<256x288xbf16, #tpu.memory_space<vmem>>, vector<64x32xbf16>,
    %c0_183 = arith.constant 0 : index
    %c1_184 = arith.constant 1 : index
    %c9_185 = arith.constant 9 : index
    %c0_186 = arith.constant 0 : index
    %108 = vector.load %arg9[%c0_183, %c1_184, %c9_185, %c0_186] : memref<1x10x24x32xbf16, #tpu.memory_space<vmem>>, vector<1x8x8x32xbf16>
    %109 = vector.shape_cast %108 : vector<1x8x8x32xbf16> to vector<64x32xbf16>
    %c192_187 = arith.constant 192 : index
    %c160_188 = arith.constant 160 : index
    %110 = vector.load %arg11[%c192_187, %c160_188] : memref<256x288xbf16, #tpu.memory_space<vmem>>, vector<64x32xbf16>
    tpu.vector_store %arg11[%c192_187, %c160_188], %109 {strides = array<i32>} : memref<256x288xbf16, #tpu.memory_space<vmem>>, vector<64x32xbf16>,
    %c0_189 = arith.constant 0 : index
    %c1_190 = arith.constant 1 : index
    %c7_191 = arith.constant 7 : index
    %c0_192 = arith.constant 0 : index
    %111 = vector.load %arg10[%c0_189, %c1_190, %c7_191, %c0_192] : memref<1x10x24x32xbf16, #tpu.memory_space<vmem>>, vector<1x8x8x32xbf16>
    %112 = vector.shape_cast %111 : vector<1x8x8x32xbf16> to vector<64x32xbf16>
    %c0_193 = arith.constant 0 : index
    %c192_194 = arith.constant 192 : index
    %113 = vector.load %arg11[%c0_193, %c192_194] : memref<256x288xbf16, #tpu.memory_space<vmem>>, vector<64x32xbf16>
    tpu.vector_store %arg11[%c0_193, %c192_194], %112 {strides = array<i32>} : memref<256x288xbf16, #tpu.memory_space<vmem>>, vector<64x32xbf16>,
    %c0_195 = arith.constant 0 : index
    %c1_196 = arith.constant 1 : index
    %c8_197 = arith.constant 8 : index
    %c0_198 = arith.constant 0 : index
    %114 = vector.load %arg9[%c0_195, %c1_196, %c8_197, %c0_198] : memref<1x10x24x32xbf16, #tpu.memory_space<vmem>>, vector<1x8x8x32xbf16>
    %115 = vector.shape_cast %114 : vector<1x8x8x32xbf16> to vector<64x32xbf16>
    %c64_199 = arith.constant 64 : index
    %c192_200 = arith.constant 192 : index
    %116 = vector.load %arg11[%c64_199, %c192_200] : memref<256x288xbf16, #tpu.memory_space<vmem>>, vector<64x32xbf16>
    tpu.vector_store %arg11[%c64_199, %c192_200], %115 {strides = array<i32>} : memref<256x288xbf16, #tpu.memory_space<vmem>>, vector<64x32xbf16>,
    %c0_201 = arith.constant 0 : index
    %c2 = arith.constant 2 : index
    %c7_202 = arith.constant 7 : index
    %c0_203 = arith.constant 0 : index
    %117 = vector.load %arg8[%c0_201, %c2, %c7_202, %c0_203] : memref<1x10x24x32xbf16, #tpu.memory_space<vmem>>, vector<1x8x8x32xbf16>
    %118 = vector.shape_cast %117 : vector<1x8x8x32xbf16> to vector<64x32xbf16>
    %c128_204 = arith.constant 128 : index
    %c192_205 = arith.constant 192 : index
    %119 = vector.load %arg11[%c128_204, %c192_205] : memref<256x288xbf16, #tpu.memory_space<vmem>>, vector<64x32xbf16>
    tpu.vector_store %arg11[%c128_204, %c192_205], %118 {strides = array<i32>} : memref<256x288xbf16, #tpu.memory_space<vmem>>, vector<64x32xbf16>,
    %c0_206 = arith.constant 0 : index
    %c2_207 = arith.constant 2 : index
    %c8_208 = arith.constant 8 : index
    %c0_209 = arith.constant 0 : index
    %120 = vector.load %arg7[%c0_206, %c2_207, %c8_208, %c0_209] : memref<1x10x24x32xbf16, #tpu.memory_space<vmem>>, vector<1x8x8x32xbf16>
    %121 = vector.shape_cast %120 : vector<1x8x8x32xbf16> to vector<64x32xbf16>
    %c192_210 = arith.constant 192 : index
    %c192_211 = arith.constant 192 : index
    %122 = vector.load %arg11[%c192_210, %c192_211] : memref<256x288xbf16, #tpu.memory_space<vmem>>, vector<64x32xbf16>
    tpu.vector_store %arg11[%c192_210, %c192_211], %121 {strides = array<i32>} : memref<256x288xbf16, #tpu.memory_space<vmem>>, vector<64x32xbf16>,
    %c0_212 = arith.constant 0 : index
    %c1_213 = arith.constant 1 : index
    %c8_214 = arith.constant 8 : index
    %c0_215 = arith.constant 0 : index
    %123 = vector.load %arg9[%c0_212, %c1_213, %c8_214, %c0_215] : memref<1x10x24x32xbf16, #tpu.memory_space<vmem>>, vector<1x8x8x32xbf16>
    %124 = vector.shape_cast %123 : vector<1x8x8x32xbf16> to vector<64x32xbf16>
    %c0_216 = arith.constant 0 : index
    %c224 = arith.constant 224 : index
    %125 = vector.load %arg11[%c0_216, %c224] : memref<256x288xbf16, #tpu.memory_space<vmem>>, vector<64x32xbf16>
    tpu.vector_store %arg11[%c0_216, %c224], %124 {strides = array<i32>} : memref<256x288xbf16, #tpu.memory_space<vmem>>, vector<64x32xbf16>,
    %c0_217 = arith.constant 0 : index
    %c1_218 = arith.constant 1 : index
    %c8_219 = arith.constant 8 : index
    %c0_220 = arith.constant 0 : index
    %126 = vector.load %arg10[%c0_217, %c1_218, %c8_219, %c0_220] : memref<1x10x24x32xbf16, #tpu.memory_space<vmem>>, vector<1x8x8x32xbf16>
    %127 = vector.shape_cast %126 : vector<1x8x8x32xbf16> to vector<64x32xbf16>
    %c64_221 = arith.constant 64 : index
    %c224_222 = arith.constant 224 : index
    %128 = vector.load %arg11[%c64_221, %c224_222] : memref<256x288xbf16, #tpu.memory_space<vmem>>, vector<64x32xbf16>
    tpu.vector_store %arg11[%c64_221, %c224_222], %127 {strides = array<i32>} : memref<256x288xbf16, #tpu.memory_space<vmem>>, vector<64x32xbf16>,
    %c0_223 = arith.constant 0 : index
    %c2_224 = arith.constant 2 : index
    %c8_225 = arith.constant 8 : index
    %c0_226 = arith.constant 0 : index
    %129 = vector.load %arg7[%c0_223, %c2_224, %c8_225, %c0_226] : memref<1x10x24x32xbf16, #tpu.memory_space<vmem>>, vector<1x8x8x32xbf16>
    %130 = vector.shape_cast %129 : vector<1x8x8x32xbf16> to vector<64x32xbf16>
    %c128_227 = arith.constant 128 : index
    %c224_228 = arith.constant 224 : index
    %131 = vector.load %arg11[%c128_227, %c224_228] : memref<256x288xbf16, #tpu.memory_space<vmem>>, vector<64x32xbf16>
    tpu.vector_store %arg11[%c128_227, %c224_228], %130 {strides = array<i32>} : memref<256x288xbf16, #tpu.memory_space<vmem>>, vector<64x32xbf16>,
    %c0_229 = arith.constant 0 : index
    %c2_230 = arith.constant 2 : index
    %c8_231 = arith.constant 8 : index
    %c0_232 = arith.constant 0 : index
    %132 = vector.load %arg8[%c0_229, %c2_230, %c8_231, %c0_232] : memref<1x10x24x32xbf16, #tpu.memory_space<vmem>>, vector<1x8x8x32xbf16>
    %133 = vector.shape_cast %132 : vector<1x8x8x32xbf16> to vector<64x32xbf16>
    %c192_233 = arith.constant 192 : index
    %c224_234 = arith.constant 224 : index
    %134 = vector.load %arg11[%c192_233, %c224_234] : memref<256x288xbf16, #tpu.memory_space<vmem>>, vector<64x32xbf16>
    tpu.vector_store %arg11[%c192_233, %c224_234], %133 {strides = array<i32>} : memref<256x288xbf16, #tpu.memory_space<vmem>>, vector<64x32xbf16>,
    %c0_235 = arith.constant 0 : index
    %c1_236 = arith.constant 1 : index
    %c8_237 = arith.constant 8 : index
    %c0_238 = arith.constant 0 : index
    %135 = vector.load %arg10[%c0_235, %c1_236, %c8_237, %c0_238] : memref<1x10x24x32xbf16, #tpu.memory_space<vmem>>, vector<1x8x8x32xbf16>
    %136 = vector.shape_cast %135 : vector<1x8x8x32xbf16> to vector<64x32xbf16>
    %c0_239 = arith.constant 0 : index
    %c256 = arith.constant 256 : index
    %137 = vector.load %arg11[%c0_239, %c256] : memref<256x288xbf16, #tpu.memory_space<vmem>>, vector<64x32xbf16>
    tpu.vector_store %arg11[%c0_239, %c256], %136 {strides = array<i32>} : memref<256x288xbf16, #tpu.memory_space<vmem>>, vector<64x32xbf16>,
    %c0_240 = arith.constant 0 : index
    %c1_241 = arith.constant 1 : index
    %c9_242 = arith.constant 9 : index
    %c0_243 = arith.constant 0 : index
    %138 = vector.load %arg9[%c0_240, %c1_241, %c9_242, %c0_243] : memref<1x10x24x32xbf16, #tpu.memory_space<vmem>>, vector<1x8x8x32xbf16>
    %139 = vector.shape_cast %138 : vector<1x8x8x32xbf16> to vector<64x32xbf16>
    %c64_244 = arith.constant 64 : index
    %c256_245 = arith.constant 256 : index
    %140 = vector.load %arg11[%c64_244, %c256_245] : memref<256x288xbf16, #tpu.memory_space<vmem>>, vector<64x32xbf16>
    tpu.vector_store %arg11[%c64_244, %c256_245], %139 {strides = array<i32>} : memref<256x288xbf16, #tpu.memory_space<vmem>>, vector<64x32xbf16>,
    %c0_246 = arith.constant 0 : index
    %c2_247 = arith.constant 2 : index
    %c8_248 = arith.constant 8 : index
    %c0_249 = arith.constant 0 : index
    %141 = vector.load %arg8[%c0_246, %c2_247, %c8_248, %c0_249] : memref<1x10x24x32xbf16, #tpu.memory_space<vmem>>, vector<1x8x8x32xbf16>
    %142 = vector.shape_cast %141 : vector<1x8x8x32xbf16> to vector<64x32xbf16>
    %c128_250 = arith.constant 128 : index
    %c256_251 = arith.constant 256 : index
    %143 = vector.load %arg11[%c128_250, %c256_251] : memref<256x288xbf16, #tpu.memory_space<vmem>>, vector<64x32xbf16>
    tpu.vector_store %arg11[%c128_250, %c256_251], %142 {strides = array<i32>} : memref<256x288xbf16, #tpu.memory_space<vmem>>, vector<64x32xbf16>,
    %c0_252 = arith.constant 0 : index
    %c2_253 = arith.constant 2 : index
    %c9_254 = arith.constant 9 : index
    %c0_255 = arith.constant 0 : index
    %144 = vector.load %arg7[%c0_252, %c2_253, %c9_254, %c0_255] : memref<1x10x24x32xbf16, #tpu.memory_space<vmem>>, vector<1x8x8x32xbf16>
    %145 = vector.shape_cast %144 : vector<1x8x8x32xbf16> to vector<64x32xbf16>
    %c192_256 = arith.constant 192 : index
    %c256_257 = arith.constant 256 : index
    %146 = vector.load %arg11[%c192_256, %c256_257] : memref<256x288xbf16, #tpu.memory_space<vmem>>, vector<64x32xbf16>
    tpu.vector_store %arg11[%c192_256, %c256_257], %145 {strides = array<i32>} : memref<256x288xbf16, #tpu.memory_space<vmem>>, vector<64x32xbf16>,
    %c0_258 = arith.constant 0 : index
    %c0_259 = arith.constant 0 : index
    %147 = vector.load %arg11[%c0_258, %c0_259] : memref<256x288xbf16, #tpu.memory_space<vmem>>, vector<256x288xbf16>
    %c0_260 = arith.constant 0 : index
    %c0_261 = arith.constant 0 : index
    %148 = vector.load %arg4[%c0_260, %c0_261] : memref<288x64xbf16, #tpu.memory_space<vmem>>, vector<288x64xbf16>
    %cst_262 = arith.constant dense<0.000000e+00> : vector<256x64xf32>
    %149 = tpu.matmul %147, %148, %cst_262 {dimension_numbers = #tpu.dot_dimension_numbers<[1], [0], [0], [1], [0, 0, 1, 1], [], []>} : vector<256x288xbf16>, vector<288x64xbf16>, vector<256x64xf32> -> vector<256x64xf32>
    %c0_263 = arith.constant 0 : index
    %c0_264 = arith.constant 0 : index
    %150 = vector.load %arg5[%c0_263, %c0_264] : memref<1x64xf32, #tpu.memory_space<vmem>>, vector<1x64xf32>
    %151 = vector.broadcast %150 : vector<1x64xf32> to vector<256x64xf32>
    %152 = arith.addf %149, %151 : vector<256x64xf32>
    %cst_265 = arith.constant 0.000000e+00 : f32
    %153 = vector.broadcast %cst_265 : f32 to vector<256x64xf32>
    %154 = arith.maximumf %152, %153 : vector<256x64xf32>
    %155 = vector.shape_cast %154 : vector<256x64xf32> to vector<4x1x64x64xf32>
    %cst_266 = arith.constant dense<0xFF800000> : vector<1x64x64xf32>
    %156 = vector.multi_reduction <maximumf>, %155, %cst_266 [0] : vector<4x1x64x64xf32> to vector<1x64x64xf32>
    %157 = vector.extract_strided_slice %156 {offsets = [0, 0, 0], sizes = [1, 32, 64], strides = [1, 1, 1]} : vector<1x64x64xf32> to vector<1x32x64xf32>
    %158 = vector.extract_strided_slice %156 {offsets = [0, 32, 0], sizes = [1, 32, 64], strides = [1, 1, 1]} : vector<1x64x64xf32> to vector<1x32x64xf32>
    %159 = tpu.concatenate %157, %158 in 2 : vector<1x32x64xf32>, vector<1x32x64xf32> -> vector<1x32x128xf32>
    %160 = vector.shape_cast %159 : vector<1x32x128xf32> to vector<32x128xf32>
    %161 = arith.truncf %160 : vector<32x128xf32> to vector<32x128xbf16>
    %c0_267 = arith.constant 0 : index
    %c0_268 = arith.constant 0 : index
    %162 = vector.load %arg6[%c0_267, %c0_268] : memref<32x128xbf16, #tpu.memory_space<vmem>>, vector<32x128xbf16>
    tpu.vector_store %arg6[%c0_267, %c0_268], %161 {strides = array<i32>} : memref<32x128xbf16, #tpu.memory_space<vmem>>, vector<32x128xbf16>,
    return
  }
  func.func @transform_0(%arg0: i32) -> (i32, i32, i32) {
    %c0_i32 = arith.constant 0 : i32
    %c0_i32_0 = arith.constant 0 : i32
    %c0_i32_1 = arith.constant 0 : i32
    return %arg0, %c0_i32, %c0_i32_0 : i32, i32, i32
  }
  func.func @transform_1(%arg0: i32) -> (i32, i32) {
    %c0_i32 = arith.constant 0 : i32
    %c0_i32_0 = arith.constant 0 : i32
    %c0_i32_1 = arith.constant 0 : i32
    return %c0_i32, %c0_i32_0 : i32, i32
  }
  func.func @transform_2(%arg0: i32) -> (i32, i32) {
    %c0_i32 = arith.constant 0 : i32
    %c0_i32_0 = arith.constant 0 : i32
    %c0_i32_1 = arith.constant 0 : i32
    return %c0_i32, %c0_i32_0 : i32, i32
  }
  func.func @transform_3(%arg0: i32) -> (i32, i32) {
    %c0_i32 = arith.constant 0 : i32
    %c0_i32_0 = arith.constant 0 : i32
    %c0_i32_1 = arith.constant 0 : i32
    return %c0_i32, %c0_i32_0 : i32, i32
  }
  func.func @transform_4(%arg0: i32) -> (i32, i32) {
    %c0_i32 = arith.constant 0 : i32
    %c0_i32_0 = arith.constant 0 : i32
    %c0_i32_1 = arith.constant 0 : i32
    return %c0_i32, %c0_i32_0 : i32, i32
  }
  func.func @transform_5(%arg0: i32) -> (i32, i32) {
    %c0_i32 = arith.constant 0 : i32
    %c0_i32_0 = arith.constant 0 : i32
    return %arg0, %c0_i32 : i32, i32
  }
}

module attributes {stable_mosaic.version = 11 : i64} {
  func.func @_mlp_kernel(%arg0: i32, %arg1: memref<2x4096xbf16, #tpu.memory_space<vmem>>, %arg2: memref<4096x128xbf16, #tpu.memory_space<vmem>>, %arg3: memref<1x128xf32, #tpu.memory_space<vmem>>, %arg4: memref<128x128xbf16, #tpu.memory_space<vmem>>, %arg5: memref<1x128xf32, #tpu.memory_space<vmem>>, %arg6: memref<2x128xf32, #tpu.memory_space<vmem>>) attributes {dimension_semantics = [#tpu.dimension_semantics<parallel>], iteration_bounds = array<i64: 1>, scalar_prefetch = 0 : i64, scratch_operands = 0 : i64, tpu.core_type = #tpu.core_type<tc>, window_params = [{transform_indices = @transform_0, window_bounds = array<i64: 2, 4096>}, {pipeline_mode = #tpu.pipeline_mode<synchronous>, transform_indices = @transform_1, window_bounds = array<i64: 4096, 128>}, {pipeline_mode = #tpu.pipeline_mode<synchronous>, transform_indices = @transform_2, window_bounds = array<i64: 1, 128>}, {pipeline_mode = #tpu.pipeline_mode<synchronous>, transform_indices = @transform_3, window_bounds = array<i64: 128, 128>}, {pipeline_mode = #tpu.pipeline_mode<synchronous>, transform_indices = @transform_4, window_bounds = array<i64: 1, 128>}, {transform_indices = @transform_5, window_bounds = array<i64: 2, 128>}]} {
    %c0 = arith.constant 0 : index
    %c0_0 = arith.constant 0 : index
    %0 = vector.load %arg1[%c0, %c0_0] : memref<2x4096xbf16, #tpu.memory_space<vmem>>, vector<2x4096xbf16>
    %c0_1 = arith.constant 0 : index
    %c0_2 = arith.constant 0 : index
    %1 = vector.load %arg2[%c0_1, %c0_2] : memref<4096x128xbf16, #tpu.memory_space<vmem>>, vector<4096x128xbf16>
    %cst = arith.constant dense<0.000000e+00> : vector<2x128xf32>
    %2 = tpu.matmul %0, %1, %cst {dimension_numbers = #tpu.dot_dimension_numbers<[1], [0], [0], [1], [0, 0, 1, 1], [], []>} : vector<2x4096xbf16>, vector<4096x128xbf16>, vector<2x128xf32> -> vector<2x128xf32>
    %c0_3 = arith.constant 0 : index
    %c0_4 = arith.constant 0 : index
    %3 = vector.load %arg3[%c0_3, %c0_4] : memref<1x128xf32, #tpu.memory_space<vmem>>, vector<1x128xf32>
    %4 = vector.broadcast %3 : vector<1x128xf32> to vector<2x128xf32>
    %5 = arith.addf %2, %4 : vector<2x128xf32>
    %cst_5 = arith.constant 0.000000e+00 : f32
    %6 = vector.broadcast %cst_5 : f32 to vector<2x128xf32>
    %7 = arith.maximumf %5, %6 : vector<2x128xf32>
    %8 = arith.truncf %7 : vector<2x128xf32> to vector<2x128xbf16>
    %c0_6 = arith.constant 0 : index
    %c0_7 = arith.constant 0 : index
    %9 = vector.load %arg4[%c0_6, %c0_7] : memref<128x128xbf16, #tpu.memory_space<vmem>>, vector<128x128xbf16>
    %cst_8 = arith.constant dense<0.000000e+00> : vector<2x128xf32>
    %10 = tpu.matmul %8, %9, %cst_8 {dimension_numbers = #tpu.dot_dimension_numbers<[1], [0], [0], [1], [0, 0, 1, 1], [], []>} : vector<2x128xbf16>, vector<128x128xbf16>, vector<2x128xf32> -> vector<2x128xf32>
    %c0_9 = arith.constant 0 : index
    %c0_10 = arith.constant 0 : index
    %11 = vector.load %arg5[%c0_9, %c0_10] : memref<1x128xf32, #tpu.memory_space<vmem>>, vector<1x128xf32>
    %12 = vector.broadcast %11 : vector<1x128xf32> to vector<2x128xf32>
    %13 = arith.addf %10, %12 : vector<2x128xf32>
    %c0_11 = arith.constant 0 : index
    %c0_12 = arith.constant 0 : index
    %14 = vector.load %arg6[%c0_11, %c0_12] : memref<2x128xf32, #tpu.memory_space<vmem>>, vector<2x128xf32>
    tpu.vector_store %arg6[%c0_11, %c0_12], %13 {strides = array<i32>} : memref<2x128xf32, #tpu.memory_space<vmem>>, vector<2x128xf32>,
    return
  }
  func.func @transform_0(%arg0: i32) -> (i32, i32) {
    %c0_i32 = arith.constant 0 : i32
    %c0_i32_0 = arith.constant 0 : i32
    return %arg0, %c0_i32 : i32, i32
  }
  func.func @transform_1(%arg0: i32) -> (i32, i32) {
    %c0_i32 = arith.constant 0 : i32
    %c0_i32_0 = arith.constant 0 : i32
    %c0_i32_1 = arith.constant 0 : i32
    return %c0_i32, %c0_i32_0 : i32, i32
  }
  func.func @transform_2(%arg0: i32) -> (i32, i32) {
    %c0_i32 = arith.constant 0 : i32
    %c0_i32_0 = arith.constant 0 : i32
    %c0_i32_1 = arith.constant 0 : i32
    return %c0_i32, %c0_i32_0 : i32, i32
  }
  func.func @transform_3(%arg0: i32) -> (i32, i32) {
    %c0_i32 = arith.constant 0 : i32
    %c0_i32_0 = arith.constant 0 : i32
    %c0_i32_1 = arith.constant 0 : i32
    return %c0_i32, %c0_i32_0 : i32, i32
  }
  func.func @transform_4(%arg0: i32) -> (i32, i32) {
    %c0_i32 = arith.constant 0 : i32
    %c0_i32_0 = arith.constant 0 : i32
    %c0_i32_1 = arith.constant 0 : i32
    return %c0_i32, %c0_i32_0 : i32, i32
  }
  func.func @transform_5(%arg0: i32) -> (i32, i32) {
    %c0_i32 = arith.constant 0 : i32
    %c0_i32_0 = arith.constant 0 : i32
    return %arg0, %c0_i32 : i32, i32
  }
}

</mosaic_0001>

<bundles_post_ra>
// kernel: simple_cnn_forward.3
= control target key start
LH: loop header
LB: loop body
LE: loop exit
PB: predicated region body
PF: predicated region fallthrough
CT: control target
= control target key end

     0   :  { %s4861_s0 = inlined_call_operand.vmem [shape: bf16[2,4096], index: 0, kind: input, shape index: {}]   ;;  %s4862_s1 = inlined_call_operand.vmem [shape: bf16[4096,128], index: 1, kind: input, shape index: {}]   ;;  %s4863_s2 = inlined_call_operand.vmem [shape: f32[1,128], index: 2, kind: input, shape index: {}]   ;;  %s4864_s3 = inlined_call_operand.vmem [shape: bf16[128,128], index: 3, kind: input, shape index: {}]   ;;  %s4865_s4 = inlined_call_operand.vmem [shape: f32[1,128], index: 4, kind: input, shape index: {}]   ;;  %s4866_s5 = inlined_call_operand.hbm [shape: f32[2,128], index: 5, kind: output, shape index: {}]  }
   0x1   :  { %v3728_v0 = vld [vmem:[%s4862_s1 + $0x38] sm:$0xff]  ;;  %v3727_v4 = vld [vmem:[%s4862_s1 + $0x30] sm:$0xff]  ;;  %v3726_v8 = vld [vmem:[%s4862_s1 + $0x28] sm:$0xff] }
   0x2   :  { %v3736_v1 = vld [vmem:[%s4862_s1 + $0x78] sm:$0xff]  ;;  %2149 = vmatpush.bf16.msra.mxu0 %v3728_v0  ;;  %v3735_v5 = vld [vmem:[%s4862_s1 + $0x70] sm:$0xff]  ;;  %v3734_v9 = vld [vmem:[%s4862_s1 + $0x68] sm:$0xff] }
   0x3   :  { %v3744_v2 = vld [vmem:[%s4862_s1 + $0xb8] sm:$0xff]  ;;  %2162 = vmatpush.bf16.msra.mxu1 %v3736_v1  ;;  %v3743_v6 = vld [vmem:[%s4862_s1 + $0xb0] sm:$0xff]  ;;  %v3742_v10 = vld [vmem:[%s4862_s1 + $0xa8] sm:$0xff] }
   0x4   :  { %v3752_v3 = vld [vmem:[%s4862_s1 + $0xf8] sm:$0xff]  ;;  %2175 = vmatpush.bf16.msra.mxu2 %v3744_v2  ;;  %v3751_v7 = vld [vmem:[%s4862_s1 + $0xf0] sm:$0xff]  ;;  %v3750_v11 = vld [vmem:[%s4862_s1 + $0xe8] sm:$0xff] }
   0x5   :  { %2188 = vmatpush.bf16.msra.mxu3 %v3752_v3  ;;  %v3725_v12 = vld [vmem:[%s4862_s1 + $0x20] sm:$0xff]  ;;  %v3724_v16 = vld [vmem:[%s4862_s1 + $0x18] sm:$0xff]  ;;  %v3723_v20 = vld [vmem:[%s4862_s1 + $0x10] sm:$0xff] }
   0x6   :  { %2150 = vmatpush.bf16.msra.mxu0 %v3727_v4  ;;  %v3733_v13 = vld [vmem:[%s4862_s1 + $0x60] sm:$0xff]  ;;  %v3732_v17 = vld [vmem:[%s4862_s1 + $0x58] sm:$0xff]  ;;  %v3731_v21 = vld [vmem:[%s4862_s1 + $0x50] sm:$0xff] }
   0x7   :  { %2163 = vmatpush.bf16.msra.mxu1 %v3735_v5  ;;  %v3741_v14 = vld [vmem:[%s4862_s1 + $0xa0] sm:$0xff]  ;;  %v3740_v18 = vld [vmem:[%s4862_s1 + $0x98] sm:$0xff]  ;;  %v3739_v23 = vld [vmem:[%s4862_s1 + $0x90] sm:$0xff] }
   0x8   :  { %2176 = vmatpush.bf16.msra.mxu2 %v3743_v6  ;;  %v3749_v15 = vld [vmem:[%s4862_s1 + $0xe0] sm:$0xff]  ;;  %v3748_v19 = vld [vmem:[%s4862_s1 + $0xd8] sm:$0xff]  ;;  %v3747_v24 = vld [vmem:[%s4862_s1 + $0xd0] sm:$0xff] }
   0x9   :  { %2189 = vmatpush.bf16.msra.mxu3 %v3751_v7  ;;  %v21_v22 = vld [vmem:[%s4861_s0] sm:$0xff] }
   0xa   :  { %2151 = vmatpush.bf16.msra.mxu0 %v3726_v8  ;;  %542 = vst [vmem:[#allocation1] ss:$9 sm:$0xff] %v21_v22 }
   0xb   :  { %2164 = vmatpush.bf16.msra.mxu1 %v3734_v9 }
   0xc   :  { %2177 = vmatpush.bf16.msra.mxu2 %v3742_v10 }
   0xd   :  { %2190 = vmatpush.bf16.msra.mxu3 %v3750_v11 }
   0xe   :  { %2152 = vmatpush.bf16.msra.mxu0 %v3725_v12 }
   0xf   :  { %2165 = vmatpush.bf16.msra.mxu1 %v3733_v13 }
  0x10   :  { %2178 = vmatpush.bf16.msra.mxu2 %v3741_v14 }
  0x11   :  { %2191 = vmatpush.bf16.msra.mxu3 %v3749_v15 }
  0x12   :  { %2153 = vmatpush.bf16.msra.mxu0 %v3724_v16 }
  0x13   :  { %2166 = vmatpush.bf16.msra.mxu1 %v3732_v17 }
  0x14   :  { %2179 = vmatpush.bf16.msra.mxu2 %v3740_v18 }
  0x15   :  { %2192 = vmatpush.bf16.msra.mxu3 %v3748_v19 }
  0x16   :  { %10 = vsyncpa [#allocation3], 0  ;;  %2154 = vmatpush.bf16.msra.mxu0 %v3723_v20  ;;  %v3722_v25 = vld [vmem:[%s4862_s1 + $0x8] sm:$0xff]  ;;  %v3721_v29 = vld [vmem:[%s4862_s1] sm:$0xff]  ;;  %s4014_s18 = smov [#allocation2]   ;;  %s2656_s22 = sshll.u32 %s4866_s5, 4  ;;  %s2657_s22 = int_to_ptr.hbm [resolvable:$true] %s2656_s22 }
  0x17   :  { %2167 = vmatpush.bf16.msra.mxu1 %v3731_v21  ;;  %v3730_v26 = vld [vmem:[%s4862_s1 + $0x48] sm:$0xff]  ;;  %v3729_v30 = vld [vmem:[%s4862_s1 + $0x40] sm:$0xff]  ;;  %v3760_v33 = vld [vmem:[%s4862_s1 + $0x138] sm:$0xff]  ;;  %s2654_s19 = sshll.u32 %s4014_s18, 4  ;;  %s2655_s19 = int_to_ptr.vmem [resolvable:$true] %s2654_s19 }
  0x18   :  { %2180 = vmatpush.bf16.msra.mxu2 %v3739_v23  ;;  %v3738_v27 = vld [vmem:[%s4862_s1 + $0x88] sm:$0xff]  ;;  %v3737_v31 = vld [vmem:[%s4862_s1 + $0x80] sm:$0xff]  ;;  %v3768_v34 = vld [vmem:[%s4862_s1 + $0x178] sm:$0xff] }
  0x19   :  { %2193 = vmatpush.bf16.msra.mxu3 %v3747_v24  ;;  %v3746_v28 = vld [vmem:[%s4862_s1 + $0xc8] sm:$0xff]  ;;  %v3745_v32 = vld [vmem:[%s4862_s1 + $0xc0] sm:$0xff]  ;;  %v3776_v35 = vld [vmem:[%s4862_s1 + $0x1b8] sm:$0xff] }
  0x1a   :  { %2155 = vmatpush.bf16.msra.mxu0 %v3722_v25  ;;  %v3784_v36 = vld [vmem:[%s4862_s1 + $0x1f8] sm:$0xff]  ;;  %v3759_v37 = vld [vmem:[%s4862_s1 + $0x130] sm:$0xff]  ;;  %v543_v39 = vld [vmem:[#allocation1] sm:$0xff] }
  0x1b   :  { %2168 = vmatpush.bf16.msra.mxu1 %v3730_v26  ;;  %v545_v38 = vld [vmem:[#allocation1 + $0x12] sm:$0xff]  ;;  %v546_v41 = vld [vmem:[#allocation1 + $0x1b] sm:$0xff]  ;;  %v544_v42 = vld [vmem:[#allocation1 + $0x9] sm:$0xff] }
  0x1c   :  { %2181 = vmatpush.bf16.msra.mxu2 %v3738_v27  ;;  %v3767_v40 = vld [vmem:[%s4862_s1 + $0x170] sm:$0xff]  ;;  %v3758_v45 = vld [vmem:[%s4862_s1 + $0x128] sm:$0xff]  ;;  %v3757_v49 = vld [vmem:[%s4862_s1 + $0x120] sm:$0xff] }
  0x1d   :  { %2194 = vmatpush.bf16.msra.mxu3 %v3746_v28  ;;  %v3775_v43 = vld [vmem:[%s4862_s1 + $0x1b0] sm:$0xff]  ;;  %v3766_v46 = vld [vmem:[%s4862_s1 + $0x168] sm:$0xff]  ;;  %v3765_v50 = vld [vmem:[%s4862_s1 + $0x160] sm:$0xff] }
  0x1e   :  { %2156 = vmatpush.bf16.msra.mxu0 %v3721_v29  ;;  %v3783_v44 = vld [vmem:[%s4862_s1 + $0x1f0] sm:$0xff]  ;;  %v3774_v47 = vld [vmem:[%s4862_s1 + $0x1a8] sm:$0xff]  ;;  %v550_v54 = vld [vmem:[#allocation1 + $0x3f] sm:$0xff] }
  0x1f   :  { %2169 = vmatpush.bf16.msra.mxu1 %v3729_v30  ;;  %v3782_v48 = vld [vmem:[%s4862_s1 + $0x1e8] sm:$0xff]  ;;  %v549_v51 = vld [vmem:[#allocation1 + $0x36] sm:$0xff]  ;;  %v3773_v56 = vld [vmem:[%s4862_s1 + $0x1a0] sm:$0xff] }
  0x20   :  { %2182 = vmatpush.bf16.msra.mxu2 %v3737_v31  ;;  %v22_v52 = vld [vmem:[%s4861_s0 + $0x8] sm:$0xff]  ;;  %v3781_v57 = vld [vmem:[%s4862_s1 + $0x1e0] sm:$0xff]  ;;  %v3756_v58 = vld [vmem:[%s4862_s1 + $0x118] sm:$0xff] }
  0x21   :  { %2195 = vmatpush.bf16.msra.mxu3 %v3745_v32  ;;  %2157 = vmatmul.bf16.vlgmr.msra.gmra.mxu0 %v543_v39  ;;  %v547_v53 = vld [vmem:[#allocation1 + $0x24] sm:$0xff]  ;;  %v548_v55 = vld [vmem:[#allocation1 + $0x2d] sm:$0xff]  ;;  %v3764_v59 = vld [vmem:[%s4862_s1 + $0x158] sm:$0xff] }
  0x22   :  { %2201 = vmatpush.bf16.msrb.mxu0 %v3760_v33  ;;  %2170 = vmatmul.bf16.vlgmr.msra.gmra.mxu1 %v544_v42  ;;  %552 = vst [vmem:[#allocation1] ss:$9 sm:$0xff] %v22_v52  ;;  %v3772_v60 = vld [vmem:[%s4862_s1 + $0x198] sm:$0xff]  ;;  %v3755_v62 = vld [vmem:[%s4862_s1 + $0x110] sm:$0xff]  ;;  %v3754_v2 = vld [vmem:[%s4862_s1 + $0x108] sm:$0xff] }
  0x23   :  { %2214 = vmatpush.bf16.msrb.mxu1 %v3768_v34  ;;  %2183 = vmatmul.bf16.vlgmr.msra.gmra.mxu2 %v545_v38  ;;  %v3780_v61 = vld [vmem:[%s4862_s1 + $0x1d8] sm:$0xff]  ;;  %v3763_v63 = vld [vmem:[%s4862_s1 + $0x150] sm:$0xff]  ;;  %v3762_v3 = vld [vmem:[%s4862_s1 + $0x148] sm:$0xff] }
  0x24   :  { %2227 = vmatpush.bf16.msrb.mxu2 %v3776_v35  ;;  %2196 = vmatmul.bf16.vlgmr.msra.gmra.mxu3 %v546_v41  ;;  %v3771_v0 = vld [vmem:[%s4862_s1 + $0x190] sm:$0xff]  ;;  %v3770_v4 = vld [vmem:[%s4862_s1 + $0x188] sm:$0xff]  ;;  %v3753_v6 = vld [vmem:[%s4862_s1 + $0x100] sm:$0xff] }
  0x25   :  { %2240 = vmatpush.bf16.msrb.mxu3 %v3784_v36  ;;  %v3779_v1 = vld [vmem:[%s4862_s1 + $0x1d0] sm:$0xff]  ;;  %v3778_v5 = vld [vmem:[%s4862_s1 + $0x1c8] sm:$0xff]  ;;  %v3761_v7 = vld [vmem:[%s4862_s1 + $0x140] sm:$0xff] }
  0x26   :  { %2202 = vmatpush.bf16.msrb.mxu0 %v3759_v37  ;;  %v3769_v8 = vld [vmem:[%s4862_s1 + $0x180] sm:$0xff]  ;;  %v3792_v10 = vld [vmem:[%s4862_s1 + $0x238] sm:$0xff]  ;;  %v3791_v14 = vld [vmem:[%s4862_s1 + $0x230] sm:$0xff] }
  0x27   :  { %2215 = vmatpush.bf16.msrb.mxu1 %v3767_v40  ;;  %v3777_v9 = vld [vmem:[%s4862_s1 + $0x1c0] sm:$0xff]  ;;  %v3800_v11 = vld [vmem:[%s4862_s1 + $0x278] sm:$0xff]  ;;  %v3799_v15 = vld [vmem:[%s4862_s1 + $0x270] sm:$0xff] }
  0x28   :  { %2228 = vmatpush.bf16.msrb.mxu2 %v3775_v43  ;;  %v3808_v12 = vld [vmem:[%s4862_s1 + $0x2b8] sm:$0xff]  ;;  %v3807_v16 = vld [vmem:[%s4862_s1 + $0x2b0] sm:$0xff]  ;;  %v3790_v18 = vld [vmem:[%s4862_s1 + $0x228] sm:$0xff] }
  0x29   :  { %2241 = vmatpush.bf16.msrb.mxu3 %v3783_v44  ;;  %v3816_v13 = vld [vmem:[%s4862_s1 + $0x2f8] sm:$0xff]  ;;  %v3815_v17 = vld [vmem:[%s4862_s1 + $0x2f0] sm:$0xff]  ;;  %v3798_v19 = vld [vmem:[%s4862_s1 + $0x268] sm:$0xff] }
  0x2a   :  { %2203 = vmatpush.bf16.msrb.mxu0 %v3758_v45  ;;  %v3806_v20 = vld [vmem:[%s4862_s1 + $0x2a8] sm:$0xff]  ;;  %v3789_v22 = vld [vmem:[%s4862_s1 + $0x220] sm:$0xff]  ;;  %v3788_v26 = vld [vmem:[%s4862_s1 + $0x218] sm:$0xff] }
  0x2b   :  { %2216 = vmatpush.bf16.msrb.mxu1 %v3766_v46  ;;  %v3814_v21 = vld [vmem:[%s4862_s1 + $0x2e8] sm:$0xff]  ;;  %v3797_v23 = vld [vmem:[%s4862_s1 + $0x260] sm:$0xff]  ;;  %v3796_v27 = vld [vmem:[%s4862_s1 + $0x258] sm:$0xff] }
  0x2c   :  { %2229 = vmatpush.bf16.msrb.mxu2 %v3774_v47  ;;  %v3805_v24 = vld [vmem:[%s4862_s1 + $0x2a0] sm:$0xff]  ;;  %v3804_v28 = vld [vmem:[%s4862_s1 + $0x298] sm:$0xff]  ;;  %v3787_v30 = vld [vmem:[%s4862_s1 + $0x210] sm:$0xff] }
  0x2d   :  { %2242 = vmatpush.bf16.msrb.mxu3 %v3782_v48  ;;  %v3813_v25 = vld [vmem:[%s4862_s1 + $0x2e0] sm:$0xff]  ;;  %v3812_v29 = vld [vmem:[%s4862_s1 + $0x2d8] sm:$0xff]  ;;  %v3795_v31 = vld [vmem:[%s4862_s1 + $0x250] sm:$0xff] }
  0x2e   :  { %2204 = vmatpush.bf16.msrb.mxu0 %v3757_v49  ;;  %v3803_v32 = vld [vmem:[%s4862_s1 + $0x290] sm:$0xff]  ;;  %v3786_v34 = vld [vmem:[%s4862_s1 + $0x208] sm:$0xff]  ;;  %v3785_v38 = vld [vmem:[%s4862_s1 + $0x200] sm:$0xff] }
  0x2f   :  { %2217 = vmatpush.bf16.msrb.mxu1 %v3765_v50  ;;  %v3811_v33 = vld [vmem:[%s4862_s1 + $0x2d0] sm:$0xff]  ;;  %v3794_v35 = vld [vmem:[%s4862_s1 + $0x248] sm:$0xff]  ;;  %v3793_v39 = vld [vmem:[%s4862_s1 + $0x240] sm:$0xff] }
  0x30   :  { %2230 = vmatpush.bf16.msrb.mxu2 %v3773_v56  ;;  %v3802_v36 = vld [vmem:[%s4862_s1 + $0x288] sm:$0xff]  ;;  %v3801_v40 = vld [vmem:[%s4862_s1 + $0x280] sm:$0xff]  ;;  %v3824_v42 = vld [vmem:[%s4862_s1 + $0x338] sm:$0xff] }
  0x31   :  { %2243 = vmatpush.bf16.msrb.mxu3 %v3781_v57  ;;  %v3810_v37 = vld [vmem:[%s4862_s1 + $0x2c8] sm:$0xff]  ;;  %v3809_v41 = vld [vmem:[%s4862_s1 + $0x2c0] sm:$0xff]  ;;  %v3832_v43 = vld [vmem:[%s4862_s1 + $0x378] sm:$0xff] }
  0x32   :  { %2205 = vmatpush.bf16.msrb.mxu0 %v3756_v58  ;;  %v3840_v44 = vld [vmem:[%s4862_s1 + $0x3b8] sm:$0xff]  ;;  %v553_v46 = vld [vmem:[#allocation1] sm:$0xff]  ;;  %v554_v48 = vld [vmem:[#allocation1 + $0x9] sm:$0xff] }
  0x33   :  { %2218 = vmatpush.bf16.msrb.mxu1 %v3764_v59  ;;  %v3848_v45 = vld [vmem:[%s4862_s1 + $0x3f8] sm:$0xff]  ;;  %v3823_v50 = vld [vmem:[%s4862_s1 + $0x330] sm:$0xff]  ;;  %v3838_v56 = vld [vmem:[%s4862_s1 + $0x3a8] sm:$0xff] }
  0x34   :  { %2231 = vmatpush.bf16.msrb.mxu2 %v3772_v60  ;;  %v555_v47 = vld [vmem:[#allocation1 + $0x12] sm:$0xff]  ;;  %v556_v49 = vld [vmem:[#allocation1 + $0x1b] sm:$0xff]  ;;  %v3846_v57 = vld [vmem:[%s4862_s1 + $0x3e8] sm:$0xff] }
  0x35   :  { %2244 = vmatpush.bf16.msrb.mxu3 %v3780_v61  ;;  %v3839_v52 = vld [vmem:[%s4862_s1 + $0x3b0] sm:$0xff]  ;;  %v3821_v58 = vld [vmem:[%s4862_s1 + $0x320] sm:$0xff] }
  0x36   :  { %2206 = vmatpush.bf16.msrb.mxu0 %v3755_v62  ;;  %v3829_v59 = vld [vmem:[%s4862_s1 + $0x360] sm:$0xff]  ;;  %v3820_v62 = vld [vmem:[%s4862_s1 + $0x318] sm:$0xff] }
  0x37   :  { %2219 = vmatpush.bf16.msrb.mxu1 %v3763_v63  ;;  %v3837_v60 = vld [vmem:[%s4862_s1 + $0x3a0] sm:$0xff]  ;;  %v3828_v63 = vld [vmem:[%s4862_s1 + $0x358] sm:$0xff] }
  0x38   :  { %2232 = vmatpush.bf16.msrb.mxu2 %v3771_v0  ;;  %v3845_v61 = vld [vmem:[%s4862_s1 + $0x3e0] sm:$0xff]  ;;  %v3836_v0 = vld [vmem:[%s4862_s1 + $0x398] sm:$0xff] }
  0x39   :  { %2245 = vmatpush.bf16.msrb.mxu3 %v3779_v1  ;;  %v3844_v1 = vld [vmem:[%s4862_s1 + $0x3d8] sm:$0xff] }
  0x3a   :  { %2207 = vmatpush.bf16.msrb.mxu0 %v3754_v2  ;;  %v3819_v2 = vld [vmem:[%s4862_s1 + $0x310] sm:$0xff] }
  0x3b   :  { %2220 = vmatpush.bf16.msrb.mxu1 %v3762_v3  ;;  %v3827_v3 = vld [vmem:[%s4862_s1 + $0x350] sm:$0xff] }
  0x3c   :  { %2233 = vmatpush.bf16.msrb.mxu2 %v3770_v4  ;;  %v3835_v4 = vld [vmem:[%s4862_s1 + $0x390] sm:$0xff] }
  0x3d   :  { %2246 = vmatpush.bf16.msrb.mxu3 %v3778_v5  ;;  %v3843_v5 = vld [vmem:[%s4862_s1 + $0x3d0] sm:$0xff] }
  0x3e   :  { %2208 = vmatpush.bf16.msrb.mxu0 %v3753_v6  ;;  %v3818_v6 = vld [vmem:[%s4862_s1 + $0x308] sm:$0xff] }
  0x3f   :  { %2221 = vmatpush.bf16.msrb.mxu1 %v3761_v7  ;;  %v3826_v7 = vld [vmem:[%s4862_s1 + $0x348] sm:$0xff] }
  0x40   :  { %2234 = vmatpush.bf16.msrb.mxu2 %v3769_v8  ;;  %v3834_v8 = vld [vmem:[%s4862_s1 + $0x388] sm:$0xff] }
  0x41   :  { %2247 = vmatpush.bf16.msrb.mxu3 %v3777_v9  ;;  %2209 = vmatmul.bf16.vlgmr.msrb.gmra.mxu0 %v547_v53  ;;  %v3847_v53 = vld [vmem:[%s4862_s1 + $0x3f0] sm:$0xff]  ;;  %v3842_v9 = vld [vmem:[%s4862_s1 + $0x3c8] sm:$0xff] }
  0x42   :  { %2253 = vmatpush.bf16.msra.mxu0 %v3792_v10  ;;  %2222 = vmatmul.bf16.vlgmr.msrb.gmra.mxu1 %v548_v55  ;;  %v3830_v55 = vld [vmem:[%s4862_s1 + $0x368] sm:$0xff] }
  0x43   :  { %2266 = vmatpush.bf16.msra.mxu1 %v3800_v11  ;;  %2235 = vmatmul.bf16.vlgmr.msrb.gmra.mxu2 %v549_v51  ;;  %v3831_v51 = vld [vmem:[%s4862_s1 + $0x370] sm:$0xff]  ;;  %v557_v10 = vld [vmem:[#allocation1 + $0x24] sm:$0xff] }
  0x44   :  { %2279 = vmatpush.bf16.msra.mxu2 %v3808_v12  ;;  %2248 = vmatmul.bf16.vlgmr.msrb.gmra.mxu3 %v550_v54  ;;  %v3822_v54 = vld [vmem:[%s4862_s1 + $0x328] sm:$0xff]  ;;  %v559_v11 = vld [vmem:[#allocation1 + $0x36] sm:$0xff] }
  0x45   :  { %2292 = vmatpush.bf16.msra.mxu3 %v3816_v13  ;;  %v558_v12 = vld [vmem:[#allocation1 + $0x2d] sm:$0xff]  ;;  %v560_v13 = vld [vmem:[#allocation1 + $0x3f] sm:$0xff] }
  0x46   :  { %2254 = vmatpush.bf16.msra.mxu0 %v3791_v14  ;;  %v23_v14 = vld [vmem:[%s4861_s0 + $0x10] sm:$0xff] }
  0x47   :  { %2267 = vmatpush.bf16.msra.mxu1 %v3799_v15  ;;  %562 = vst [vmem:[#allocation1] ss:$9 sm:$0xff] %v23_v14  ;;  %v3817_v15 = vld [vmem:[%s4862_s1 + $0x300] sm:$0xff]  ;;  %v3900_v14 = vld [vmem:[%s4862_s1 + $0x598] sm:$0xff] }
  0x48   :  { %2280 = vmatpush.bf16.msra.mxu2 %v3807_v16  ;;  %v3825_v16 = vld [vmem:[%s4862_s1 + $0x340] sm:$0xff] }
  0x49   :  { %2293 = vmatpush.bf16.msra.mxu3 %v3815_v17  ;;  %v3833_v17 = vld [vmem:[%s4862_s1 + $0x380] sm:$0xff] }
  0x4a   :  { %2255 = vmatpush.bf16.msra.mxu0 %v3790_v18  ;;  %v3841_v18 = vld [vmem:[%s4862_s1 + $0x3c0] sm:$0xff] }
  0x4b   :  { %2268 = vmatpush.bf16.msra.mxu1 %v3798_v19  ;;  %v3856_v19 = vld [vmem:[%s4862_s1 + $0x438] sm:$0xff] }
  0x4c   :  { %2281 = vmatpush.bf16.msra.mxu2 %v3806_v20  ;;  %v3864_v20 = vld [vmem:[%s4862_s1 + $0x478] sm:$0xff] }
  0x4d   :  { %2294 = vmatpush.bf16.msra.mxu3 %v3814_v21  ;;  %v3872_v21 = vld [vmem:[%s4862_s1 + $0x4b8] sm:$0xff] }
  0x4e   :  { %2256 = vmatpush.bf16.msra.mxu0 %v3789_v22  ;;  %v3880_v22 = vld [vmem:[%s4862_s1 + $0x4f8] sm:$0xff] }
  0x4f   :  { %2269 = vmatpush.bf16.msra.mxu1 %v3797_v23  ;;  %v3855_v23 = vld [vmem:[%s4862_s1 + $0x430] sm:$0xff] }
  0x50   :  { %2282 = vmatpush.bf16.msra.mxu2 %v3805_v24  ;;  %v3863_v24 = vld [vmem:[%s4862_s1 + $0x470] sm:$0xff] }
  0x51   :  { %2295 = vmatpush.bf16.msra.mxu3 %v3813_v25  ;;  %v3871_v25 = vld [vmem:[%s4862_s1 + $0x4b0] sm:$0xff] }
  0x52   :  { %2257 = vmatpush.bf16.msra.mxu0 %v3788_v26  ;;  %v3879_v26 = vld [vmem:[%s4862_s1 + $0x4f0] sm:$0xff] }
  0x53   :  { %2270 = vmatpush.bf16.msra.mxu1 %v3796_v27  ;;  %v3854_v27 = vld [vmem:[%s4862_s1 + $0x428] sm:$0xff] }
  0x54   :  { %2283 = vmatpush.bf16.msra.mxu2 %v3804_v28  ;;  %v3862_v28 = vld [vmem:[%s4862_s1 + $0x468] sm:$0xff] }
  0x55   :  { %2296 = vmatpush.bf16.msra.mxu3 %v3812_v29  ;;  %v3870_v29 = vld [vmem:[%s4862_s1 + $0x4a8] sm:$0xff] }
  0x56   :  { %2258 = vmatpush.bf16.msra.mxu0 %v3787_v30  ;;  %v3878_v30 = vld [vmem:[%s4862_s1 + $0x4e8] sm:$0xff] }
  0x57   :  { %2271 = vmatpush.bf16.msra.mxu1 %v3795_v31  ;;  %v3853_v31 = vld [vmem:[%s4862_s1 + $0x420] sm:$0xff] }
  0x58   :  { %2284 = vmatpush.bf16.msra.mxu2 %v3803_v32  ;;  %v3861_v32 = vld [vmem:[%s4862_s1 + $0x460] sm:$0xff] }
  0x59   :  { %2297 = vmatpush.bf16.msra.mxu3 %v3811_v33  ;;  %v3869_v33 = vld [vmem:[%s4862_s1 + $0x4a0] sm:$0xff] }
  0x5a   :  { %2259 = vmatpush.bf16.msra.mxu0 %v3786_v34  ;;  %v3877_v34 = vld [vmem:[%s4862_s1 + $0x4e0] sm:$0xff] }
  0x5b   :  { %2272 = vmatpush.bf16.msra.mxu1 %v3794_v35  ;;  %v3852_v35 = vld [vmem:[%s4862_s1 + $0x418] sm:$0xff] }
  0x5c   :  { %2285 = vmatpush.bf16.msra.mxu2 %v3802_v36  ;;  %v3860_v36 = vld [vmem:[%s4862_s1 + $0x458] sm:$0xff] }
  0x5d   :  { %2298 = vmatpush.bf16.msra.mxu3 %v3810_v37  ;;  %v3868_v37 = vld [vmem:[%s4862_s1 + $0x498] sm:$0xff] }
  0x5e   :  { %2260 = vmatpush.bf16.msra.mxu0 %v3785_v38  ;;  %v3876_v38 = vld [vmem:[%s4862_s1 + $0x4d8] sm:$0xff] }
  0x5f   :  { %2273 = vmatpush.bf16.msra.mxu1 %v3793_v39  ;;  %v3851_v39 = vld [vmem:[%s4862_s1 + $0x410] sm:$0xff] }
  0x60   :  { %2286 = vmatpush.bf16.msra.mxu2 %v3801_v40  ;;  %v3859_v40 = vld [vmem:[%s4862_s1 + $0x450] sm:$0xff] }
  0x61   :  { %2299 = vmatpush.bf16.msra.mxu3 %v3809_v41  ;;  %2261 = vmatmul.bf16.vlgmr.msra.gmra.mxu0 %v553_v46  ;;  %v3867_v41 = vld [vmem:[%s4862_s1 + $0x490] sm:$0xff]  ;;  %v3874_v46 = vld [vmem:[%s4862_s1 + $0x4c8] sm:$0xff] }
  0x62   :  { %2305 = vmatpush.bf16.msrb.mxu0 %v3824_v42  ;;  %2274 = vmatmul.bf16.vlgmr.msra.gmra.mxu1 %v554_v48  ;;  %v3875_v42 = vld [vmem:[%s4862_s1 + $0x4d0] sm:$0xff]  ;;  %v3857_v48 = vld [vmem:[%s4862_s1 + $0x440] sm:$0xff] }
  0x63   :  { %2318 = vmatpush.bf16.msrb.mxu1 %v3832_v43  ;;  %2287 = vmatmul.bf16.vlgmr.msra.gmra.mxu2 %v555_v47  ;;  %v3850_v43 = vld [vmem:[%s4862_s1 + $0x408] sm:$0xff]  ;;  %v3849_v47 = vld [vmem:[%s4862_s1 + $0x400] sm:$0xff] }
  0x64   :  { %2331 = vmatpush.bf16.msrb.mxu2 %v3840_v44  ;;  %2300 = vmatmul.bf16.vlgmr.msra.gmra.mxu3 %v556_v49  ;;  %v3858_v44 = vld [vmem:[%s4862_s1 + $0x448] sm:$0xff]  ;;  %v3865_v49 = vld [vmem:[%s4862_s1 + $0x480] sm:$0xff] }
  0x65   :  { %2344 = vmatpush.bf16.msrb.mxu3 %v3848_v45  ;;  %v3866_v45 = vld [vmem:[%s4862_s1 + $0x488] sm:$0xff] }
  0x66   :  { %2306 = vmatpush.bf16.msrb.mxu0 %v3823_v50  ;;  %v3873_v50 = vld [vmem:[%s4862_s1 + $0x4c0] sm:$0xff] }
  0x67   :  { %2319 = vmatpush.bf16.msrb.mxu1 %v3831_v51  ;;  %v3888_v51 = vld [vmem:[%s4862_s1 + $0x538] sm:$0xff] }
  0x68   :  { %2332 = vmatpush.bf16.msrb.mxu2 %v3839_v52  ;;  %v3896_v52 = vld [vmem:[%s4862_s1 + $0x578] sm:$0xff] }
  0x69   :  { %2345 = vmatpush.bf16.msrb.mxu3 %v3847_v53  ;;  %v3904_v53 = vld [vmem:[%s4862_s1 + $0x5b8] sm:$0xff] }
  0x6a   :  { %2307 = vmatpush.bf16.msrb.mxu0 %v3822_v54  ;;  %v3912_v54 = vld [vmem:[%s4862_s1 + $0x5f8] sm:$0xff] }
  0x6b   :  { %2320 = vmatpush.bf16.msrb.mxu1 %v3830_v55  ;;  %v563_v55 = vld [vmem:[#allocation1] sm:$0xff] }
  0x6c   :  { %2333 = vmatpush.bf16.msrb.mxu2 %v3838_v56  ;;  %v565_v56 = vld [vmem:[#allocation1 + $0x12] sm:$0xff] }
  0x6d   :  { %2346 = vmatpush.bf16.msrb.mxu3 %v3846_v57  ;;  %v564_v57 = vld [vmem:[#allocation1 + $0x9] sm:$0xff] }
  0x6e   :  { %2308 = vmatpush.bf16.msrb.mxu0 %v3821_v58  ;;  %v566_v58 = vld [vmem:[#allocation1 + $0x1b] sm:$0xff] }
  0x6f   :  { %2321 = vmatpush.bf16.msrb.mxu1 %v3829_v59  ;;  %v3887_v59 = vld [vmem:[%s4862_s1 + $0x530] sm:$0xff] }
  0x70   :  { %2334 = vmatpush.bf16.msrb.mxu2 %v3837_v60  ;;  %v3895_v60 = vld [vmem:[%s4862_s1 + $0x570] sm:$0xff] }
  0x71   :  { %2347 = vmatpush.bf16.msrb.mxu3 %v3845_v61  ;;  %v3903_v61 = vld [vmem:[%s4862_s1 + $0x5b0] sm:$0xff] }
  0x72   :  { %2309 = vmatpush.bf16.msrb.mxu0 %v3820_v62  ;;  %v3911_v62 = vld [vmem:[%s4862_s1 + $0x5f0] sm:$0xff] }
  0x73   :  { %2322 = vmatpush.bf16.msrb.mxu1 %v3828_v63  ;;  %v3886_v63 = vld [vmem:[%s4862_s1 + $0x528] sm:$0xff] }
  0x74   :  { %2335 = vmatpush.bf16.msrb.mxu2 %v3836_v0  ;;  %v3894_v0 = vld [vmem:[%s4862_s1 + $0x568] sm:$0xff] }
  0x75   :  { %2348 = vmatpush.bf16.msrb.mxu3 %v3844_v1  ;;  %v3986_v1 = vld [vmem:[%s4863_s2] ss:$0 sm:$0xff] }
  0x76   :  { %2310 = vmatpush.bf16.msrb.mxu0 %v3819_v2  ;;  %v3902_v2 = vld [vmem:[%s4862_s1 + $0x5a8] sm:$0xff] }
  0x77   :  { %2323 = vmatpush.bf16.msrb.mxu1 %v3827_v3  ;;  %v3910_v3 = vld [vmem:[%s4862_s1 + $0x5e8] sm:$0xff] }
  0x78   :  { %2336 = vmatpush.bf16.msrb.mxu2 %v3835_v4 }
  0x79   :  { %2349 = vmatpush.bf16.msrb.mxu3 %v3843_v5  ;;  %v3885_v5 = vld [vmem:[%s4862_s1 + $0x520] sm:$0xff] }
  0x7a   :  { %2311 = vmatpush.bf16.msrb.mxu0 %v3818_v6  ;;  %v3893_v6 = vld [vmem:[%s4862_s1 + $0x560] sm:$0xff] }
  0x7b   :  { %2324 = vmatpush.bf16.msrb.mxu1 %v3826_v7 }
  0x7c   :  { %2337 = vmatpush.bf16.msrb.mxu2 %v3834_v8 }
  0x7d   :  { %2350 = vmatpush.bf16.msrb.mxu3 %v3842_v9  ;;  %v3901_v9 = vld [vmem:[%s4862_s1 + $0x5a0] sm:$0xff] }
  0x7e   :  { %2312 = vmatpush.bf16.msrb.mxu0 %v3817_v15  ;;  %v3908_v15 = vld [vmem:[%s4862_s1 + $0x5d8] sm:$0xff] }
  0x7f   :  { %2325 = vmatpush.bf16.msrb.mxu1 %v3825_v16 }
  0x80   :  { %2338 = vmatpush.bf16.msrb.mxu2 %v3833_v17 }
  0x81   :  { %2351 = vmatpush.bf16.msrb.mxu3 %v3841_v18  ;;  %2313 = vmatmul.bf16.vlgmr.msrb.gmra.mxu0 %v557_v10  ;;  %v3909_v10 = vld [vmem:[%s4862_s1 + $0x5e0] sm:$0xff] }
  0x82   :  { %2357 = vmatpush.bf16.msra.mxu0 %v3856_v19  ;;  %2326 = vmatmul.bf16.vlgmr.msrb.gmra.mxu1 %v558_v12  ;;  %v3884_v12 = vld [vmem:[%s4862_s1 + $0x518] sm:$0xff] }
  0x83   :  { %2370 = vmatpush.bf16.msra.mxu1 %v3864_v20  ;;  %2339 = vmatmul.bf16.vlgmr.msrb.gmra.mxu2 %v559_v11  ;;  %v3883_v20 = vld [vmem:[%s4862_s1 + $0x510] sm:$0xff] }
  0x84   :  { %2383 = vmatpush.bf16.msra.mxu2 %v3872_v21  ;;  %2352 = vmatmul.bf16.vlgmr.msrb.gmra.mxu3 %v560_v13  ;;  %v3892_v13 = vld [vmem:[%s4862_s1 + $0x558] sm:$0xff]  ;;  %v3891_v21 = vld [vmem:[%s4862_s1 + $0x550] sm:$0xff] }
  0x85   :  { %2396 = vmatpush.bf16.msra.mxu3 %v3880_v22 }
  0x86   :  { %2358 = vmatpush.bf16.msra.mxu0 %v3855_v23 }
  0x87   :  { %2371 = vmatpush.bf16.msra.mxu1 %v3863_v24  ;;  %v3899_v24 = vld [vmem:[%s4862_s1 + $0x590] sm:$0xff] }
  0x88   :  { %2384 = vmatpush.bf16.msra.mxu2 %v3871_v25  ;;  %v3907_v25 = vld [vmem:[%s4862_s1 + $0x5d0] sm:$0xff] }
  0x89   :  { %2397 = vmatpush.bf16.msra.mxu3 %v3879_v26  ;;  %v3882_v26 = vld [vmem:[%s4862_s1 + $0x508] sm:$0xff] }
  0x8a   :  { %2359 = vmatpush.bf16.msra.mxu0 %v3854_v27  ;;  %v3890_v27 = vld [vmem:[%s4862_s1 + $0x548] sm:$0xff] }
  0x8b   :  { %2372 = vmatpush.bf16.msra.mxu1 %v3862_v28  ;;  %v3898_v28 = vld [vmem:[%s4862_s1 + $0x588] sm:$0xff] }
  0x8c   :  { %2385 = vmatpush.bf16.msra.mxu2 %v3870_v29  ;;  %v3906_v29 = vld [vmem:[%s4862_s1 + $0x5c8] sm:$0xff] }
  0x8d   :  { %2398 = vmatpush.bf16.msra.mxu3 %v3878_v30  ;;  %v567_v30 = vld [vmem:[#allocation1 + $0x24] sm:$0xff] }
  0x8e   :  { %2360 = vmatpush.bf16.msra.mxu0 %v3853_v31  ;;  %v569_v31 = vld [vmem:[#allocation1 + $0x36] sm:$0xff] }
  0x8f   :  { %2373 = vmatpush.bf16.msra.mxu1 %v3861_v32 }
  0x90   :  { %2386 = vmatpush.bf16.msra.mxu2 %v3869_v33  ;;  %v568_v33 = vld [vmem:[#allocation1 + $0x2d] sm:$0xff] }
  0x91   :  { %2399 = vmatpush.bf16.msra.mxu3 %v3877_v34  ;;  %v570_v34 = vld [vmem:[#allocation1 + $0x3f] sm:$0xff] }
  0x92   :  { %2361 = vmatpush.bf16.msra.mxu0 %v3852_v35 }
  0x93   :  { %2374 = vmatpush.bf16.msra.mxu1 %v3860_v36  ;;  %v24_v36 = vld [vmem:[%s4861_s0 + $0x18] sm:$0xff] }
  0x94   :  { %2387 = vmatpush.bf16.msra.mxu2 %v3868_v37  ;;  %572 = vst [vmem:[#allocation1] ss:$9 sm:$0xff] %v24_v36  ;;  %v3881_v37 = vld [vmem:[%s4862_s1 + $0x500] sm:$0xff]  ;;  %v3974_v36 = vld [vmem:[%s4862_s1 + $0x7e8] sm:$0xff] }
  0x95   :  { %2400 = vmatpush.bf16.msra.mxu3 %v3876_v38  ;;  %v3889_v38 = vld [vmem:[%s4862_s1 + $0x540] sm:$0xff] }
  0x96   :  { %2362 = vmatpush.bf16.msra.mxu0 %v3851_v39  ;;  %v3897_v39 = vld [vmem:[%s4862_s1 + $0x580] sm:$0xff] }
  0x97   :  { %2375 = vmatpush.bf16.msra.mxu1 %v3859_v40  ;;  %v3905_v40 = vld [vmem:[%s4862_s1 + $0x5c0] sm:$0xff] }
  0x98   :  { %2388 = vmatpush.bf16.msra.mxu2 %v3867_v41  ;;  %v3920_v41 = vld [vmem:[%s4862_s1 + $0x638] sm:$0xff] }
  0x99   :  { %2401 = vmatpush.bf16.msra.mxu3 %v3875_v42  ;;  %v3928_v42 = vld [vmem:[%s4862_s1 + $0x678] sm:$0xff] }
  0x9a   :  { %2363 = vmatpush.bf16.msra.mxu0 %v3850_v43  ;;  %v3936_v43 = vld [vmem:[%s4862_s1 + $0x6b8] sm:$0xff] }
  0x9b   :  { %2376 = vmatpush.bf16.msra.mxu1 %v3858_v44  ;;  %v3944_v44 = vld [vmem:[%s4862_s1 + $0x6f8] sm:$0xff] }
  0x9c   :  { %2389 = vmatpush.bf16.msra.mxu2 %v3866_v45  ;;  %v3919_v45 = vld [vmem:[%s4862_s1 + $0x630] sm:$0xff] }
  0x9d   :  { %2402 = vmatpush.bf16.msra.mxu3 %v3874_v46  ;;  %v3927_v46 = vld [vmem:[%s4862_s1 + $0x670] sm:$0xff] }
  0x9e   :  { %2364 = vmatpush.bf16.msra.mxu0 %v3849_v47  ;;  %v2158_v4 = vpop.f32.mrf.mxu0  ;;  %v3935_v47 = vld [vmem:[%s4862_s1 + $0x6b0] sm:$0xff] }
  0x9f   :  { %2377 = vmatpush.bf16.msra.mxu1 %v3857_v48  ;;  %v2159_v7 = vadd.f32 %v3986_v1, %v2158_v4  ;;  %v2171_v8 = vpop.f32.mrf.mxu1  ;;  %v3943_v48 = vld [vmem:[%s4862_s1 + $0x6f0] sm:$0xff] }
  0xa0   :  { %2390 = vmatpush.bf16.msra.mxu2 %v3865_v49  ;;  %v3918_v49 = vld [vmem:[%s4862_s1 + $0x628] sm:$0xff] }
  0xa1   :  { %2403 = vmatpush.bf16.msra.mxu3 %v3873_v50  ;;  %2365 = vmatmul.bf16.vlgmr.msra.gmra.mxu0 %v563_v55  ;;  %v2172_v11 = vadd.f32 %v2171_v8, %v2159_v7  ;;  %v3926_v50 = vld [vmem:[%s4862_s1 + $0x668] sm:$0xff]  ;;  %v3925_v55 = vld [vmem:[%s4862_s1 + $0x660] sm:$0xff] }
  0xa2   :  { %2409 = vmatpush.bf16.msrb.mxu0 %v3888_v51  ;;  %2378 = vmatmul.bf16.vlgmr.msra.gmra.mxu1 %v564_v57  ;;  %v3934_v51 = vld [vmem:[%s4862_s1 + $0x6a8] sm:$0xff] }
  0xa3   :  { %2422 = vmatpush.bf16.msrb.mxu1 %v3896_v52  ;;  %2391 = vmatmul.bf16.vlgmr.msra.gmra.mxu2 %v565_v56  ;;  %v3942_v52 = vld [vmem:[%s4862_s1 + $0x6e8] sm:$0xff] }
  0xa4   :  { %2435 = vmatpush.bf16.msrb.mxu2 %v3904_v53  ;;  %2404 = vmatmul.bf16.vlgmr.msra.gmra.mxu3 %v566_v58  ;;  %v3933_v58 = vld [vmem:[%s4862_s1 + $0x6a0] sm:$0xff] }
  0xa5   :  { %2448 = vmatpush.bf16.msrb.mxu3 %v3912_v54  ;;  %v3917_v54 = vld [vmem:[%s4862_s1 + $0x620] sm:$0xff] }
  0xa6   :  { %2410 = vmatpush.bf16.msrb.mxu0 %v3887_v59  ;;  %v2184_v16 = vpop.f32.mrf.mxu2  ;;  %v2160_v19 = vpop.f32.mrf.mxu0  ;;  %v3941_v59 = vld [vmem:[%s4862_s1 + $0x6e0] sm:$0xff] }
  0xa7   :  { %2423 = vmatpush.bf16.msrb.mxu1 %v3895_v60  ;;  %v2185_v17 = vadd.f32 %v2184_v16, %v2172_v11  ;;  %v2197_v18 = vpop.f32.mrf.mxu3  ;;  %v2173_v23 = vpop.f32.mrf.mxu1  ;;  %v3914_v11 = vld [vmem:[%s4862_s1 + $0x608] sm:$0xff]  ;;  %v3929_v19 = vld [vmem:[%s4862_s1 + $0x680] sm:$0xff] }
  0xa8   :  { %2436 = vmatpush.bf16.msrb.mxu2 %v3903_v61  ;;  %v3916_v61 = vld [vmem:[%s4862_s1 + $0x618] sm:$0xff] }
  0xa9   :  { %2449 = vmatpush.bf16.msrb.mxu3 %v3911_v62  ;;  %v4603_v22 = vadd.f32 %v2197_v18, %v2185_v17  ;;  %v3924_v62 = vld [vmem:[%s4862_s1 + $0x658] sm:$0xff]  ;;  %v3913_v17 = vld [vmem:[%s4862_s1 + $0x600] sm:$0xff] }
  0xaa   :  { %2411 = vmatpush.bf16.msrb.mxu0 %v3886_v63  ;;  %v3932_v63 = vld [vmem:[%s4862_s1 + $0x698] sm:$0xff]  ;;  %v3921_v18 = vld [vmem:[%s4862_s1 + $0x640] sm:$0xff] }
  0xab   :  { %2424 = vmatpush.bf16.msrb.mxu1 %v3894_v0  ;;  %v3940_v0 = vld [vmem:[%s4862_s1 + $0x6d8] sm:$0xff] }
  0xac   :  { %2437 = vmatpush.bf16.msrb.mxu2 %v3902_v2  ;;  %v3968_v23 = vld [vmem:[%s4862_s1 + $0x7b8] sm:$0xff] }
  0xad   :  { %2450 = vmatpush.bf16.msrb.mxu3 %v3910_v3 }
  0xae   :  { %2412 = vmatpush.bf16.msrb.mxu0 %v3885_v5  ;;  %v2186_v32 = vpop.f32.mrf.mxu2  ;;  %v3915_v5 = vld [vmem:[%s4862_s1 + $0x610] sm:$0xff] }
  0xaf   :  { %2425 = vmatpush.bf16.msrb.mxu1 %v3893_v6  ;;  %v2199_v35 = vpop.f32.mrf.mxu3  ;;  %v3923_v6 = vld [vmem:[%s4862_s1 + $0x650] sm:$0xff] }
  0xb0   :  { %2438 = vmatpush.bf16.msrb.mxu2 %v3901_v9  ;;  %v3931_v9 = vld [vmem:[%s4862_s1 + $0x690] sm:$0xff]  ;;  %v3966_v35 = vld [vmem:[%s4862_s1 + $0x7a8] sm:$0xff] }
  0xb1   :  { %2451 = vmatpush.bf16.msrb.mxu3 %v3909_v10  ;;  %v3939_v10 = vld [vmem:[%s4862_s1 + $0x6d0] sm:$0xff] }
  0xb2   :  { %2413 = vmatpush.bf16.msrb.mxu0 %v3884_v12  ;;  %v3922_v12 = vld [vmem:[%s4862_s1 + $0x648] sm:$0xff]  ;;  %v3975_v32 = vld [vmem:[%s4862_s1 + $0x7f0] sm:$0xff] }
  0xb3   :  { %2426 = vmatpush.bf16.msrb.mxu1 %v3892_v13  ;;  %v3930_v13 = vld [vmem:[%s4862_s1 + $0x688] sm:$0xff] }
  0xb4   :  { %2439 = vmatpush.bf16.msrb.mxu2 %v3900_v14  ;;  %v3938_v14 = vld [vmem:[%s4862_s1 + $0x6c8] sm:$0xff] }
  0xb5   :  { %2452 = vmatpush.bf16.msrb.mxu3 %v3908_v15 }
  0xb6   :  { %2414 = vmatpush.bf16.msrb.mxu0 %v3883_v20  ;;  %v3937_v20 = vld [vmem:[%s4862_s1 + $0x6c0] sm:$0xff] }
  0xb7   :  { %2427 = vmatpush.bf16.msrb.mxu1 %v3891_v21  ;;  %v3952_v21 = vld [vmem:[%s4862_s1 + $0x738] sm:$0xff] }
  0xb8   :  { %2440 = vmatpush.bf16.msrb.mxu2 %v3899_v24  ;;  %v3976_v24 = vld [vmem:[%s4862_s1 + $0x7f8] sm:$0xff] }
  0xb9   :  { %2453 = vmatpush.bf16.msrb.mxu3 %v3907_v25  ;;  %v573_v25 = vld [vmem:[#allocation1] sm:$0xff] }
  0xba   :  { %2415 = vmatpush.bf16.msrb.mxu0 %v3882_v26  ;;  %v575_v26 = vld [vmem:[#allocation1 + $0x12] sm:$0xff] }
  0xbb   :  { %2428 = vmatpush.bf16.msrb.mxu1 %v3890_v27  ;;  %v574_v27 = vld [vmem:[#allocation1 + $0x9] sm:$0xff] }
  0xbc   :  { %2441 = vmatpush.bf16.msrb.mxu2 %v3898_v28  ;;  %v576_v28 = vld [vmem:[#allocation1 + $0x1b] sm:$0xff] }
  0xbd   :  { %2454 = vmatpush.bf16.msrb.mxu3 %v3906_v29  ;;  %v3951_v29 = vld [vmem:[%s4862_s1 + $0x730] sm:$0xff] }
  0xbe   :  { %2416 = vmatpush.bf16.msrb.mxu0 %v3881_v37  ;;  %v2210_v53 = vpop.f32.mrf.mxu0 }
  0xbf   :  { %2429 = vmatpush.bf16.msrb.mxu1 %v3889_v38  ;;  %v2211_v56 = vadd.f32 %v2210_v53, %v4603_v22  ;;  %v2223_v57 = vpop.f32.mrf.mxu1  ;;  %v3960_v22 = vld [vmem:[%s4862_s1 + $0x778] sm:$0xff] }
  0xc0   :  { %2442 = vmatpush.bf16.msrb.mxu2 %v3897_v39  ;;  %v3949_v39 = vld [vmem:[%s4862_s1 + $0x720] sm:$0xff] }
  0xc1   :  { %2455 = vmatpush.bf16.msrb.mxu3 %v3905_v40  ;;  %2417 = vmatmul.bf16.vlgmr.msrb.gmra.mxu0 %v567_v30  ;;  %v2224_v60 = vadd.f32 %v2223_v57, %v2211_v56  ;;  %v3959_v30 = vld [vmem:[%s4862_s1 + $0x770] sm:$0xff]  ;;  %v3957_v40 = vld [vmem:[%s4862_s1 + $0x760] sm:$0xff] }
  0xc2   :  { %2461 = vmatpush.bf16.msra.mxu0 %v3920_v41  ;;  %2430 = vmatmul.bf16.vlgmr.msrb.gmra.mxu1 %v568_v33  ;;  %v3950_v33 = vld [vmem:[%s4862_s1 + $0x728] sm:$0xff]  ;;  %v3963_v57 = vld [vmem:[%s4862_s1 + $0x790] sm:$0xff] }
  0xc3   :  { %2474 = vmatpush.bf16.msra.mxu1 %v3928_v42  ;;  %2443 = vmatmul.bf16.vlgmr.msrb.gmra.mxu2 %v569_v31  ;;  %v3967_v31 = vld [vmem:[%s4862_s1 + $0x7b0] sm:$0xff]  ;;  %v3965_v42 = vld [vmem:[%s4862_s1 + $0x7a0] sm:$0xff] }
  0xc4   :  { %2487 = vmatpush.bf16.msra.mxu2 %v3936_v43  ;;  %2456 = vmatmul.bf16.vlgmr.msrb.gmra.mxu3 %v570_v34  ;;  %v3958_v34 = vld [vmem:[%s4862_s1 + $0x768] sm:$0xff]  ;;  %v3973_v43 = vld [vmem:[%s4862_s1 + $0x7e0] sm:$0xff] }
  0xc5   :  { %2500 = vmatpush.bf16.msra.mxu3 %v3944_v44 }
  0xc6   :  { %2462 = vmatpush.bf16.msra.mxu0 %v3919_v45  ;;  %v2236_v1 = vpop.f32.mrf.mxu2  ;;  %v2212_v4 = vpop.f32.mrf.mxu0  ;;  %v3948_v45 = vld [vmem:[%s4862_s1 + $0x718] sm:$0xff] }
  0xc7   :  { %2475 = vmatpush.bf16.msra.mxu1 %v3927_v46  ;;  %v2237_v2 = vadd.f32 %v2236_v1, %v2224_v60  ;;  %v2249_v3 = vpop.f32.mrf.mxu3  ;;  %v2225_v8 = vpop.f32.mrf.mxu1  ;;  %v3956_v46 = vld [vmem:[%s4862_s1 + $0x758] sm:$0xff]  ;;  %v3954_v60 = vld [vmem:[%s4862_s1 + $0x748] sm:$0xff]  ;;  %v3945_v1 = vld [vmem:[%s4862_s1 + $0x700] sm:$0xff] }
  0xc8   :  { %2488 = vmatpush.bf16.msra.mxu2 %v3935_v47  ;;  %v3964_v47 = vld [vmem:[%s4862_s1 + $0x798] sm:$0xff]  ;;  %v3969_v4 = vld [vmem:[%s4862_s1 + $0x7c0] sm:$0xff] }
  0xc9   :  { %2501 = vmatpush.bf16.msra.mxu3 %v3943_v48  ;;  %v2250_v7 = vadd.f32 %v2249_v3, %v2237_v2  ;;  %v3972_v48 = vld [vmem:[%s4862_s1 + $0x7d8] sm:$0xff]  ;;  %v3953_v2 = vld [vmem:[%s4862_s1 + $0x740] sm:$0xff] }
  0xca   :  { %2463 = vmatpush.bf16.msra.mxu0 %v3918_v49  ;;  %v3961_v3 = vld [vmem:[%s4862_s1 + $0x780] sm:$0xff] }
  0xcb   :  { %2476 = vmatpush.bf16.msra.mxu1 %v3926_v50  ;;  %v580_v8 = vld [vmem:[#allocation1 + $0x3f] sm:$0xff] }
  0xcc   :  { %2489 = vmatpush.bf16.msra.mxu2 %v3934_v51 }
  0xcd   :  { %2502 = vmatpush.bf16.msra.mxu3 %v3942_v52 }
  0xce   :  { %2464 = vmatpush.bf16.msra.mxu0 %v3917_v54  ;;  %v2238_v15 = vpop.f32.mrf.mxu2  ;;  %v3947_v54 = vld [vmem:[%s4862_s1 + $0x710] sm:$0xff] }
  0xcf   :  { %2477 = vmatpush.bf16.msra.mxu1 %v3925_v55  ;;  %v2251_v16 = vpop.f32.mrf.mxu3  ;;  %v3955_v55 = vld [vmem:[%s4862_s1 + $0x750] sm:$0xff] }
  0xd0   :  { %2490 = vmatpush.bf16.msra.mxu2 %v3933_v58  ;;  %v3971_v58 = vld [vmem:[%s4862_s1 + $0x7d0] sm:$0xff] }
  0xd1   :  { %2503 = vmatpush.bf16.msra.mxu3 %v3941_v59  ;;  %v3946_v59 = vld [vmem:[%s4862_s1 + $0x708] sm:$0xff] }
  0xd2   :  { %2465 = vmatpush.bf16.msra.mxu0 %v3916_v61  ;;  %v3962_v61 = vld [vmem:[%s4862_s1 + $0x788] sm:$0xff] }
  0xd3   :  { %2478 = vmatpush.bf16.msra.mxu1 %v3924_v62  ;;  %v3970_v62 = vld [vmem:[%s4862_s1 + $0x7c8] sm:$0xff] }
  0xd4   :  { %2491 = vmatpush.bf16.msra.mxu2 %v3932_v63 }
  0xd5   :  { %2504 = vmatpush.bf16.msra.mxu3 %v3940_v0 }
  0xd6   :  { %2466 = vmatpush.bf16.msra.mxu0 %v3915_v5  ;;  %v577_v5 = vld [vmem:[#allocation1 + $0x24] sm:$0xff] }
  0xd7   :  { %2479 = vmatpush.bf16.msra.mxu1 %v3923_v6  ;;  %v578_v6 = vld [vmem:[#allocation1 + $0x2d] sm:$0xff] }
  0xd8   :  { %2492 = vmatpush.bf16.msra.mxu2 %v3931_v9 }
  0xd9   :  { %2505 = vmatpush.bf16.msra.mxu3 %v3939_v10 }
  0xda   :  { %2467 = vmatpush.bf16.msra.mxu0 %v3914_v11 }
  0xdb   :  { %2480 = vmatpush.bf16.msra.mxu1 %v3922_v12 }
  0xdc   :  { %2493 = vmatpush.bf16.msra.mxu2 %v3930_v13 }
  0xdd   :  { %2506 = vmatpush.bf16.msra.mxu3 %v3938_v14 }
  0xde   :  { %2468 = vmatpush.bf16.msra.mxu0 %v3913_v17  ;;  %v2262_v37 = vpop.f32.mrf.mxu0 }
  0xdf   :  { %2481 = vmatpush.bf16.msra.mxu1 %v3921_v18  ;;  %v2263_v38 = vadd.f32 %v2262_v37, %v2250_v7  ;;  %v2275_v41 = vpop.f32.mrf.mxu1  ;;  %v579_v7 = vld [vmem:[#allocation1 + $0x36] sm:$0xff] }
  0xe0   :  { %2494 = vmatpush.bf16.msra.mxu2 %v3929_v19  ;;  %v3984_v37 = vld [vmem:[%s4864_s3 + $0x38] sm:$0xff] }
  0xe1   :  { %2507 = vmatpush.bf16.msra.mxu3 %v3937_v20  ;;  %2469 = vmatmul.bf16.vlgmr.msra.gmra.mxu0 %v573_v25  ;;  %v2276_v44 = vadd.f32 %v2275_v41, %v2263_v38  ;;  %v3982_v41 = vld [vmem:[%s4864_s3 + $0x28] sm:$0xff] }
  0xe2   :  { %2513 = vmatpush.bf16.msrb.mxu0 %v3952_v21  ;;  %2482 = vmatmul.bf16.vlgmr.msra.gmra.mxu1 %v574_v27 }
  0xe3   :  { %2526 = vmatpush.bf16.msrb.mxu1 %v3960_v22  ;;  %2495 = vmatmul.bf16.vlgmr.msra.gmra.mxu2 %v575_v26 }
  0xe4   :  { %2539 = vmatpush.bf16.msrb.mxu2 %v3968_v23  ;;  %2508 = vmatmul.bf16.vlgmr.msra.gmra.mxu3 %v576_v28 }
  0xe5   :  { %2552 = vmatpush.bf16.msrb.mxu3 %v3976_v24 }
  0xe6   :  { %2514 = vmatpush.bf16.msrb.mxu0 %v3951_v29  ;;  %v2288_v49 = vpop.f32.mrf.mxu2  ;;  %v2264_v52 = vpop.f32.mrf.mxu0 }
  0xe7   :  { %2527 = vmatpush.bf16.msrb.mxu1 %v3959_v30  ;;  %v2289_v50 = vadd.f32 %v2288_v49, %v2276_v44  ;;  %v2301_v51 = vpop.f32.mrf.mxu3  ;;  %v2277_v56 = vpop.f32.mrf.mxu1  ;;  %v3981_v44 = vld [vmem:[%s4864_s3 + $0x20] sm:$0xff]  ;;  %v3978_v49 = vld [vmem:[%s4864_s3 + $0x8] sm:$0xff] }
  0xe8   :  { %2540 = vmatpush.bf16.msrb.mxu2 %v3967_v31 }
  0xe9   :  { %2553 = vmatpush.bf16.msrb.mxu3 %v3975_v32  ;;  %v2302_v53 = vadd.f32 %v2301_v51, %v2289_v50 }
  0xea   :  { %2515 = vmatpush.bf16.msrb.mxu0 %v3950_v33 }
  0xeb   :  { %2528 = vmatpush.bf16.msrb.mxu1 %v3958_v34 }
  0xec   :  { %2541 = vmatpush.bf16.msrb.mxu2 %v3966_v35 }
  0xed   :  { %2554 = vmatpush.bf16.msrb.mxu3 %v3974_v36 }
  0xee   :  { %2516 = vmatpush.bf16.msrb.mxu0 %v3949_v39  ;;  %v2290_v63 = vpop.f32.mrf.mxu2 }
  0xef   :  { %2529 = vmatpush.bf16.msrb.mxu1 %v3957_v40  ;;  %v2303_v0 = vpop.f32.mrf.mxu3  ;;  %v3983_v40 = vld [vmem:[%s4864_s3 + $0x30] sm:$0xff] }
  0xf0   :  { %2542 = vmatpush.bf16.msrb.mxu2 %v3965_v42 }
  0xf1   :  { %2555 = vmatpush.bf16.msrb.mxu3 %v3973_v43 }
  0xf2   :  { %2517 = vmatpush.bf16.msrb.mxu0 %v3948_v45  ;;  %v3980_v45 = vld [vmem:[%s4864_s3 + $0x18] sm:$0xff] }
  0xf3   :  { %2530 = vmatpush.bf16.msrb.mxu1 %v3956_v46 }
  0xf4   :  { %2543 = vmatpush.bf16.msrb.mxu2 %v3964_v47  ;;  %v3979_v47 = vld [vmem:[%s4864_s3 + $0x10] sm:$0xff] }
  0xf5   :  { %2556 = vmatpush.bf16.msrb.mxu3 %v3972_v48 }
  0xf6   :  { %2518 = vmatpush.bf16.msrb.mxu0 %v3947_v54  ;;  %v3977_v54 = vld [vmem:[%s4864_s3] sm:$0xff] }
  0xf7   :  { %2531 = vmatpush.bf16.msrb.mxu1 %v3955_v55 }
  0xf8   :  { %2544 = vmatpush.bf16.msrb.mxu2 %v3963_v57 }
  0xf9   :  { %2557 = vmatpush.bf16.msrb.mxu3 %v3971_v58 }
  0xfa   :  { %2519 = vmatpush.bf16.msrb.mxu0 %v3946_v59 }
  0xfb   :  { %2532 = vmatpush.bf16.msrb.mxu1 %v3954_v60 }
  0xfc   :  { %2545 = vmatpush.bf16.msrb.mxu2 %v3962_v61 }
  0xfd   :  { %2558 = vmatpush.bf16.msrb.mxu3 %v3970_v62 }
  0xfe   :  { %2520 = vmatpush.bf16.msrb.mxu0 %v3945_v1  ;;  %v2314_v9 = vpop.f32.mrf.mxu0 }
  0xff   :  { %2533 = vmatpush.bf16.msrb.mxu1 %v3953_v2  ;;  %v2315_v10 = vadd.f32 %v2314_v9, %v2302_v53  ;;  %v2327_v11 = vpop.f32.mrf.mxu1 }
 0x100   :  { %2546 = vmatpush.bf16.msrb.mxu2 %v3961_v3 }
 0x101   :  { %2559 = vmatpush.bf16.msrb.mxu3 %v3969_v4  ;;  %2521 = vmatmul.bf16.vlgmr.msrb.gmra.mxu0 %v577_v5  ;;  %v2328_v12 = vadd.f32 %v2327_v11, %v2315_v10 }
 0x102   :  { %2534 = vmatmul.bf16.vlgmr.msrb.gmra.mxu1 %v578_v6  ;;  %2635 = vmatpush.bf16.msra.mxu0 %v3984_v37 }
 0x103   :  { %2547 = vmatmul.bf16.vlgmr.msrb.gmra.mxu2 %v579_v7 }
 0x104   :  { %2560 = vmatmul.bf16.vlgmr.msrb.gmra.mxu3 %v580_v8 }
 0x106   :  { %v2340_v13 = vpop.f32.mrf.mxu2  ;;  %v2316_v16 = vpop.f32.mrf.mxu0  ;;  %2636 = vmatpush.bf16.msra.mxu0 %v3983_v40 }
 0x107   :  { %v2341_v14 = vadd.f32 %v2340_v13, %v2328_v12  ;;  %v2353_v15 = vpop.f32.mrf.mxu3  ;;  %v2329_v18 = vpop.f32.mrf.mxu1 }
 0x109   :  { %v2354_v17 = vadd.f32 %v2353_v15, %v2341_v14  ;;  %v3987_v15 = vld [vmem:[%s4865_s4] ss:$0 sm:$0xff] }
 0x10a   :  { %2637 = vmatpush.bf16.msra.mxu0 %v3982_v41 }
 0x10e   :  { %v2342_v19 = vpop.f32.mrf.mxu2  ;;  %2638 = vmatpush.bf16.msra.mxu0 %v3981_v44 }
 0x10f   :  { %v2355_v20 = vpop.f32.mrf.mxu3 }
 0x112   :  { %2639 = vmatpush.bf16.msra.mxu0 %v3980_v45 }
 0x116   :  { %2640 = vmatpush.bf16.msra.mxu0 %v3979_v47 }
 0x11a   :  { %2641 = vmatpush.bf16.msra.mxu0 %v3978_v49 }
 0x11e   :  { %v2366_v21 = vpop.f32.mrf.mxu0  ;;  %2642 = vmatpush.bf16.msra.mxu0 %v3977_v54 }
 0x11f   :  { %v2367_v22 = vadd.f32 %v2366_v21, %v2354_v17  ;;  %v2379_v23 = vpop.f32.mrf.mxu1 }
 0x121   :  { %v2380_v24 = vadd.f32 %v2379_v23, %v2367_v22 }
 0x126   :  { %v2392_v25 = vpop.f32.mrf.mxu2  ;;  %v2368_v28 = vpop.f32.mrf.mxu0 }
 0x127   :  { %v2393_v26 = vadd.f32 %v2392_v25, %v2380_v24  ;;  %v2405_v27 = vpop.f32.mrf.mxu3  ;;  %v2381_v30 = vpop.f32.mrf.mxu1 }
 0x129   :  { %v2406_v29 = vadd.f32 %v2405_v27, %v2393_v26 }
 0x12e   :  { %v2394_v31 = vpop.f32.mrf.mxu2 }
 0x12f   :  { %v2407_v32 = vpop.f32.mrf.mxu3 }
 0x13e   :  { %v2418_v33 = vpop.f32.mrf.mxu0 }
 0x13f   :  { %v2431_v34 = vpop.f32.mrf.mxu1  ;;  %v2419_v51 = vadd.f32 %v2418_v33, %v2406_v29 }
 0x141   :  { %v2432_v56 = vadd.f32 %v2431_v34, %v2419_v51 }
 0x146   :  { %v2444_v35 = vpop.f32.mrf.mxu2  ;;  %v2420_v38 = vpop.f32.mrf.mxu0 }
 0x147   :  { %v2457_v36 = vpop.f32.mrf.mxu3  ;;  %v2433_v39 = vpop.f32.mrf.mxu1  ;;  %v2445_v57 = vadd.f32 %v2444_v35, %v2432_v56 }
 0x149   :  { %v2458_v60 = vadd.f32 %v2457_v36, %v2445_v57 }
 0x14e   :  { %v2446_v42 = vpop.f32.mrf.mxu2 }
 0x14f   :  { %v2459_v43 = vpop.f32.mrf.mxu3 }
 0x15e   :  { %v2470_v46 = vpop.f32.mrf.mxu0 }
 0x15f   :  { %v2483_v48 = vpop.f32.mrf.mxu1  ;;  %v2471_v61 = vadd.f32 %v2470_v46, %v2458_v60 }
 0x161   :  { %v2484_v62 = vadd.f32 %v2483_v48, %v2471_v61 }
 0x166   :  { %v2496_v50 = vpop.f32.mrf.mxu2  ;;  %v2472_v53 = vpop.f32.mrf.mxu0 }
 0x167   :  { %v2509_v52 = vpop.f32.mrf.mxu3  ;;  %v2485_v55 = vpop.f32.mrf.mxu1  ;;  %v2497_v63 = vadd.f32 %v2496_v50, %v2484_v62 }
 0x169   :  { %v2510_v0 = vadd.f32 %v2509_v52, %v2497_v63 }
 0x16e   :  { %v2498_v58 = vpop.f32.mrf.mxu2 }
 0x16f   :  { %v2511_v59 = vpop.f32.mrf.mxu3 }
 0x17e   :  { %v2522_v1 = vpop.f32.mrf.mxu0 }
 0x17f   :  { %v2535_v2 = vpop.f32.mrf.mxu1  ;;  %v2523_v3 = vadd.f32 %v2522_v1, %v2510_v0 }
 0x181   :  { %v2536_v4 = vadd.f32 %v2535_v2, %v2523_v3 }
 0x186   :  { %v2548_v5 = vpop.f32.mrf.mxu2  ;;  %v2524_v8 = vpop.f32.mrf.mxu0 }
 0x187   :  { %v2561_v6 = vpop.f32.mrf.mxu3  ;;  %v2549_v7 = vadd.f32 %v2548_v5, %v2536_v4  ;;  %v2537_v9 = vpop.f32.mrf.mxu1 }
 0x189   :  { %v2562_v10 = vadd.f32 %v2561_v6, %v2549_v7 }
 0x18b   :  { %v2565_v11 = vmax.f32 %v2562_v10, 0.0 }
 0x18d   :  { %v2566_v12 = vpack.c.bf16 %v2565_v11, %v2565_v11 }
 0x18e   :  { %v2550_v13 = vpop.f32.mrf.mxu2 }
 0x18f   :  { %v2563_v14 = vpop.f32.mrf.mxu3  ;;  %2643 = vmatmul.bf16.vlgmr.msra.gmra.mxu0 %v2566_v12 }
 0x20c   :  { %v2644_v16 = vpop.f32.mrf.mxu0 }
 0x20d   :  { %v2645_v17 = vadd.f32 %v3987_v15, %v2644_v16 }
 0x20f   :  { %2648 = vst [vmem:[#allocation2] sm:$0x3] %v2645_v17 }
 0x210   :  { %2659 = dma.vmem_to_hbm [thread:$0]  %s2655_s19, 32, %s2657_s22, [#allocation3]  }
 0x214   :  { %v2646_v18 = vpop.f32.mrf.mxu0 }
 0x215   :  { %4012 = dma.done.wait [#allocation3], 32  }
 0x216   :  { %4013 = vsyncadd [#allocation3], 4294967264 }
 0x217   :  { %2664 = vsyncpa [#allocation3], 1 }

// kernel: simple_cnn_forward.2
= control target key start
LH: loop header
LB: loop body
LE: loop exit
PB: predicated region body
PF: predicated region fallthrough
CT: control target
= control target key end

     0   :  { %s5408_s18 = smov 0   ;;  %s7224_s0 = inlined_call_operand.vmem [shape: bf16[2,256,128], index: 0, kind: input, shape index: {}]   ;;  %s7225_s1 = inlined_call_operand.vmem [shape: bf16[128,128], index: 1, kind: input, shape index: {}]   ;;  %s7226_s2 = inlined_call_operand.vmem [shape: f32[1,128], index: 2, kind: input, shape index: {}]   ;;  %s7227_s3 = inlined_call_operand.vmem [shape: bf16[288,64], index: 3, kind: input, shape index: {}]   ;;  %s7228_s4 = inlined_call_operand.vmem [shape: f32[1,64], index: 4, kind: input, shape index: {}]   ;;  %s7229_s5 = inlined_call_operand.vmem [shape: bf16[64,128], index: 5, kind: output, shape index: {}]  }
   0x1 LB: > { %s5414_s19 = sadd.s32 4294967295, %s5372_s18   ;;  %p4649_p0 = scmp.ge.s32.totalorder %s5372_s18, 1  ;;  %s5372_s18 = sphi %s5408_s18, %s15_s18  }
   0x2   : > { %p187_p1 = scmp.lt.s32.totalorder %s5372_s18, 3 }
   0x4   : > { %p188_p2 = pnand %p4649_p0, %p187_p1 }
   0x5   : > { %p215_p3 = scmp.lt.s32.totalorder (!%p188_p2), %s5414_s19, 1  ;;  %s5375_s16 = smov (!%p188_p2), 32  }
   0x6   : > { %191 = sbr.rel (%p188_p2) target bundleno = 1364 (0x554), region = 40  ;;  %s5376_s21 = smov (!%p188_p2), 64  }
   0x7   : > { %s5377_s22 = smov (!%p188_p2), 96  }
   0xb   : > { %v5104_v0 = vld [vmem:[%s7225_s1 + $0x38] sm:$0xff]  ;;  %v5103_v1 = vld [vmem:[%s7225_s1 + $0x30] sm:$0xff]  ;;  %v5102_v2 = vld [vmem:[%s7225_s1 + $0x28] sm:$0xff]  ;;  %s216_s7 = scalar_select %p215_p3, %s5414_s19, 1  ;;  %vm897_vm0 = vcmask 257024   ;;  %v5374_v16 = vmov 0  }
   0xc   : > { %423 = vmatpush.bf16.msra.mxu0 %v5104_v0  ;;  %v5101_v3 = vld [vmem:[%s7225_s1 + $0x20] sm:$0xff]  ;;  %v5100_v4 = vld [vmem:[%s7225_s1 + $0x18] sm:$0xff]  ;;  %v5099_v5 = vld [vmem:[%s7225_s1 + $0x10] sm:$0xff]  ;;  %968 = vst.msk [vmem:[#allocation5 + $0x4] sm:$0xf] %vm897_vm0, %v5374_v16  ;;  %vm901_vm1 = vcmask 253952  }
   0xd   : > { %v5098_v6 = vld [vmem:[%s7225_s1 + $0x8] sm:$0xff]  ;;  %s5080_s10 = sshll.u32 %s216_s7, 7  ;;  %v5097_v7 = vld [vmem:[%s7225_s1] sm:$0xff]  ;;  %899 = vst.msk [vmem:[#allocation2 + $0x70] sm:$0xf] %vm897_vm0, %v5374_v16  ;;  %vm1336_vm5 = vcmask 519424  }
   0xe   : > { %s5447_s15 = scalar_lea.vmem %s7224_s0, %s5080_s10  ;;  %900 = vst.msk [vmem:[#allocation2 + $0x74] sm:$0xf] %vm897_vm0, %v5374_v16  ;;  %v5478_v20 = vld [vmem:[%s7226_s2] ss:$0 sm:$0xff]  ;;  %vm1554_vm2 = vsmask.f32 3328 }
   0xf   : > { %v5081_v8 = vld [vmem:[%s5447_s15] sm:$0xff]  ;;  %v5082_v9 = vld [vmem:[%s5447_s15 + $0x8] sm:$0xff]  ;;  %v5083_v10 = vld [vmem:[%s5447_s15 + $0x10] sm:$0xff]  ;;  %922 = vst.msk [vmem:[#allocation3 + $0x6c] sm:$0xf] %vm897_vm0, %v5374_v16  ;;  %vm925_vm6 = vcmask 257027  }
  0x10   : > { %424 = vmatpush.bf16.msra.mxu0 %v5103_v1  ;;  %v5084_v11 = vld [vmem:[%s5447_s15 + $0x18] sm:$0xff]  ;;  %v5085_v12 = vld [vmem:[%s5447_s15 + $0x20] sm:$0xff]  ;;  %v5086_v13 = vld [vmem:[%s5447_s15 + $0x28] sm:$0xff]  ;;  %923 = vst.msk [vmem:[#allocation3 + $0x70] sm:$0xf] %vm897_vm0, %v5374_v16  ;;  %vm1529_vm10 = vcmask 781824  }
  0x11   : > { %v5087_v14 = vld [vmem:[%s5447_s15 + $0x30] sm:$0xff]  ;;  %v5088_v15 = vld [vmem:[%s5447_s15 + $0x38] sm:$0xff]  ;;  %v5089_v18 = vld [vmem:[%s5447_s15 + $0x40] sm:$0xff]  ;;  %946 = vst.msk [vmem:[#allocation4 + $0x4] sm:$0xf] %vm897_vm0, %v5374_v16  ;;  %vm2053_vm11 = vcmask 1044224  }
  0x12   : > { %947 = vst.msk [vmem:[#allocation4 + $0x8] sm:$0xf] %vm897_vm0, %v5374_v16  ;;  %v5090_v28 = vld [vmem:[%s5447_s15 + $0x48] sm:$0xff]  ;;  %v5091_v40 = vld [vmem:[%s5447_s15 + $0x50] sm:$0xff]  ;;  %vm1555_vm3 = vsmask.f32 7440 }
  0x13   : > { %v1345_v17 = vld [vmem:[#allocation5 + $0x4] sm:$0xf]  ;;  %967 = vst.msk [vmem:[#allocation5] sm:$0xf] %vm897_vm0, %v5374_v16  ;;  %vm5524_vm4 = vmor %vm1554_vm2, %vm1555_vm3  ;;  %v5092_v57 = vld [vmem:[%s5447_s15 + $0x58] sm:$0xff]  ;;  %vm4156_vm12 = vcmask 261120  }
  0x14   : > { %425 = vmatpush.bf16.msra.mxu0 %v5102_v2  ;;  %1361 = vrot.lane.b32.xlu1 %v1345_v17, %s5375_s16  ;;  %v1489_v21 = vld [vmem:[#allocation5 + $0x4] sm:$0xf]  ;;  %948 = vst.msk [vmem:[#allocation4 + $0x8] sm:$0x1] %vm901_vm1, %v5374_v16  ;;  %v5093_v1 = vld [vmem:[%s5447_s15 + $0x60] sm:$0xff]  ;;  %vm4504_vm13 = vcmask 523264  }
  0x15   : > { %903 = vst.msk [vmem:[#allocation2 + $0x14] sm:$0x1] %vm901_vm1, %v5374_v16  ;;  %vm1005_vm7 = vsmask.f32 256  ;;  %vm1006_vm8 = vsmask.f32 4368 }
  0x16   : > { %904 = vst.msk [vmem:[#allocation2 + $0x20] sm:$0x1] %vm901_vm1, %v5374_v16  ;;  %vm5668_vm9 = vmor %vm1005_vm7, %vm1006_vm8 }
  0x17   : > { %905 = vst.msk [vmem:[#allocation2 + $0x2c] sm:$0x1] %vm901_vm1, %v5374_v16 }
  0x18   : > { %426 = vmatpush.bf16.msra.mxu0 %v5101_v3  ;;  %v1296_v35 = vld [vmem:[#allocation4 + $0x4] sm:$0xf]  ;;  %906 = vst.msk [vmem:[#allocation2 + $0x38] sm:$0x1] %vm901_vm1, %v5374_v16 }
  0x19   : > { %1312 = vrot.lane.b32.xlu2 %v1296_v35, %s5375_s16  ;;  %v1538_v37 = vld [vmem:[#allocation4 + $0x4] sm:$0xf]  ;;  %907 = vst.msk [vmem:[#allocation2 + $0x44] sm:$0x1] %vm901_vm1, %v5374_v16  ;;  %v5096_v35 = vld [vmem:[%s5447_s15 + $0x78] sm:$0xff] }
  0x1a   : > { %v1558_v38 = vshrl.u32 %v1538_v37, 16  ;;  %v1561_v39 = vshll.u32 %v1538_v37, 16  ;;  %908 = vst.msk [vmem:[#allocation2 + $0x50] sm:$0x1] %vm901_vm1, %v5374_v16  ;;  %v1128_v37 = vld [vmem:[#allocation4 + $0x4] sm:$0xf] }
  0x1b   : > { %v1539_v44 = vld [vmem:[#allocation4 + $0x8] sm:$0x1]  ;;  %909 = vst.msk [vmem:[#allocation2 + $0x5c] sm:$0x1] %vm901_vm1, %v5374_v16 }
  0x1c   : > { %427 = vmatpush.bf16.msra.mxu0 %v5100_v4  ;;  %1505 = vrot.lane.b32.xlu1 %v1489_v21, %s5376_s21  ;;  %v1560_v42 = vrot.slane %v1558_v38, 4  ;;  %v1563_v43 = vrot.slane %v1561_v39, 5  ;;  %v1567_v46 = vshll.u32 %v1539_v44, 16  ;;  %910 = vst.msk [vmem:[#allocation2 + $0x68] sm:$0x1] %vm901_vm1, %v5374_v16 }
  0x1d   : > { %911 = vst.msk [vmem:[#allocation2 + $0x74] sm:$0x1] %vm901_vm1, %v5374_v16 }
  0x1e   : > { %v1564_v45 = vor.u32 %v1563_v43, %v1560_v42  ;;  %v1569_v49 = vrot.slane %v1567_v46, 5  ;;  %949 = vst.msk [vmem:[#allocation4 + $0x14] sm:$0x1] %vm901_vm1, %v5374_v16 }
  0x1f   : > { %950 = vst.msk [vmem:[#allocation4 + $0x20] sm:$0x1] %vm901_vm1, %v5374_v16 }
  0x20   : > { %428 = vmatpush.bf16.msra.mxu0 %v5099_v5  ;;  %v1565_v48 = vrot.slane %v1564_v45, 4  ;;  %951 = vst.msk [vmem:[#allocation4 + $0x2c] sm:$0x1] %vm901_vm1, %v5374_v16  ;;  %v990_v45 = vld [vmem:[#allocation5 + $0x4] sm:$0xf] }
  0x21   : > { %952 = vst.msk [vmem:[#allocation4 + $0x38] sm:$0x1] %vm901_vm1, %v5374_v16  ;;  %v1014_v46 = vshrl.u32 %v990_v45, 16 }
  0x22   : > { %v1570_v51 = vsel %vm5524_vm4, %v1565_v48, %v1569_v49  ;;  %953 = vst.msk [vmem:[#allocation4 + $0x44] sm:$0x1] %vm901_vm1, %v5374_v16 }
  0x23   : > { %1669 = vrot.lane.b32.xlu2 %v1570_v51, %s5376_s21  ;;  %954 = vst.msk [vmem:[#allocation4 + $0x50] sm:$0x1] %vm901_vm1, %v5374_v16 }
  0x24   : > { %429 = vmatpush.bf16.msra.mxu0 %v5098_v6  ;;  %955 = vst.msk [vmem:[#allocation4 + $0x5c] sm:$0x1] %vm901_vm1, %v5374_v16 }
  0x25   : > { %956 = vst.msk [vmem:[#allocation4 + $0x68] sm:$0x1] %vm901_vm1, %v5374_v16 }
  0x26   : > { %1136 = vst.msk [vmem:[#allocation6 + $0x60] sm:$0xf] %vm897_vm0, %v1128_v37 }
  0x27   : > { %970 = vst.msk [vmem:[#allocation5] sm:$0x8] %vm925_vm6, %v5374_v16 }
  0x28   : > { %430 = vmatpush.bf16.msra.mxu0 %v5097_v7  ;;  %927 = vst.msk [vmem:[#allocation3 + $0xc] sm:$0x8] %vm925_vm6, %v5374_v16 }
  0x29   : > { %928 = vst.msk [vmem:[#allocation3 + $0x18] sm:$0x8] %vm925_vm6, %v5374_v16 }
  0x2a   : > { %929 = vst.msk [vmem:[#allocation3 + $0x24] sm:$0x8] %vm925_vm6, %v5374_v16 }
  0x2b   : > { %431 = vmatmul.bf16.vlgmr.msra.gmra.mxu0 %v5081_v8  ;;  %930 = vst.msk [vmem:[#allocation3 + $0x30] sm:$0x8] %vm925_vm6, %v5374_v16 }
  0x2c   : > { %931 = vst.msk [vmem:[#allocation3 + $0x3c] sm:$0x8] %vm925_vm6, %v5374_v16 }
  0x2d   : > { %932 = vst.msk [vmem:[#allocation3 + $0x48] sm:$0x8] %vm925_vm6, %v5374_v16 }
  0x2e   : > { %933 = vst.msk [vmem:[#allocation3 + $0x54] sm:$0x8] %vm925_vm6, %v5374_v16 }
  0x2f   : > { %934 = vst.msk [vmem:[#allocation3 + $0x60] sm:$0x8] %vm925_vm6, %v5374_v16 }
  0x30   : > { %935 = vst.msk [vmem:[#allocation3 + $0x6c] sm:$0x8] %vm925_vm6, %v5374_v16 }
  0x31   : > { %971 = vst.msk [vmem:[#allocation5 + $0xc] sm:$0x8] %vm925_vm6, %v5374_v16 }
  0x32   : > { %972 = vst.msk [vmem:[#allocation5 + $0x18] sm:$0x8] %vm925_vm6, %v5374_v16 }
  0x33   : > { %973 = vst.msk [vmem:[#allocation5 + $0x24] sm:$0x8] %vm925_vm6, %v5374_v16 }
  0x34   : > { %974 = vst.msk [vmem:[#allocation5 + $0x30] sm:$0x8] %vm925_vm6, %v5374_v16 }
  0x35   : > { %975 = vst.msk [vmem:[#allocation5 + $0x3c] sm:$0x8] %vm925_vm6, %v5374_v16 }
  0x36   : > { %976 = vst.msk [vmem:[#allocation5 + $0x48] sm:$0x8] %vm925_vm6, %v5374_v16 }
  0x37   : > { %977 = vst.msk [vmem:[#allocation5 + $0x54] sm:$0x8] %vm925_vm6, %v5374_v16 }
  0x38   : > { %978 = vst.msk [vmem:[#allocation5 + $0x60] sm:$0x8] %vm925_vm6, %v5374_v16 }
  0x3b   : > { %436 = vmatmul.bf16.gmra.mxu0 %v5082_v9  ;;  %v5094_v9 = vld [vmem:[%s5447_s15 + $0x68] sm:$0xff] }
  0x4b   : > { %441 = vmatmul.bf16.gmra.mxu0 %v5083_v10 }
  0x5b   : > { %446 = vmatmul.bf16.gmra.mxu0 %v5084_v11 }
  0x6b   : > { %451 = vmatmul.bf16.gmra.mxu0 %v5085_v12 }
  0x7b   : > { %456 = vmatmul.bf16.gmra.mxu0 %v5086_v13 }
  0x86   : > { %v1362_v38 = vpop.permute.xlu1 %1361 }
  0x87   : > { %1385 = vst.msk [vmem:[#allocation6 + $0x60] sm:$0xf] %vm1336_vm5, %v1362_v38 }
  0x8b   : > { %461 = vmatmul.bf16.gmra.mxu0 %v5087_v14 }
  0x9b   : > { %466 = vmatmul.bf16.gmra.mxu0 %v5088_v15 }
  0xa8   : > { %v432_v19 = vpop.f32.mrf.mxu0 }
  0xa9   : > { %v5481_v22 = vadd.f32 %v5478_v20, %v432_v19 }
  0xab   : > { %471 = vmatmul.bf16.gmra.mxu0 %v5089_v18  ;;  %v512_v25 = vmax.f32 %v5481_v22, 0.0  ;;  %v5095_v18 = vld [vmem:[%s5447_s15 + $0x70] sm:$0xff] }
  0xb0   : > { %v434_v23 = vpop.f32.mrf.mxu0 }
  0xb1   : > { %v5485_v24 = vadd.f32 %v5478_v20, %v434_v23 }
  0xb3   : > { %v513_v26 = vmax.f32 %v5485_v24, 0.0 }
  0xb5   : > { %v5194_v27 = vpack.i.bf16 %v513_v26, %v512_v25 }
  0xb7   : > { %5195 = vrot.lane.b32.xlu0 %v5194_v27, %s5376_s21 }
  0xb8   : > { %v437_v29 = vpop.f32.mrf.mxu0 }
  0xb9   : > { %v5496_v30 = vadd.f32 %v5478_v20, %v437_v29 }
  0xbb   : > { %476 = vmatmul.bf16.gmra.mxu0 %v5090_v28  ;;  %v514_v33 = vmax.f32 %v5496_v30, 0.0 }
  0xc0   : > { %v439_v31 = vpop.f32.mrf.mxu0 }
  0xc1   : > { %v5499_v32 = vadd.f32 %v5478_v20, %v439_v31 }
  0xc3   : > { %v515_v34 = vmax.f32 %v5499_v32, 0.0 }
  0xc5   : > { %v5199_v36 = vpack.i.bf16 %v515_v34, %v514_v33 }
  0xc7   : > { %5200 = vrot.lane.b32.xlu0 %v5199_v36, %s5376_s21 }
  0xc8   : > { %v442_v41 = vpop.f32.mrf.mxu0 }
  0xc9   : > { %v5535_v50 = vadd.f32 %v5478_v20, %v442_v41 }
  0xcb   : > { %481 = vmatmul.bf16.gmra.mxu0 %v5091_v40  ;;  %v516_v54 = vmax.f32 %v5535_v50, 0.0 }
  0xd0   : > { %v444_v52 = vpop.f32.mrf.mxu0 }
  0xd1   : > { %v5545_v53 = vadd.f32 %v5478_v20, %v444_v52 }
  0xd3   : > { %v517_v55 = vmax.f32 %v5545_v53, 0.0 }
  0xd5   : > { %v5204_v56 = vpack.i.bf16 %v517_v55, %v516_v54 }
  0xd7   : > { %5205 = vrot.lane.b32.xlu1 %v5204_v56, %s5376_s21  ;;  %v1016_v56 = vrot.slane %v1014_v46, 7 }
  0xd8   : > { %v447_v58 = vpop.f32.mrf.mxu0 }
  0xd9   : > { %v5568_v59 = vadd.f32 %v5478_v20, %v447_v58 }
  0xdb   : > { %486 = vmatmul.bf16.gmra.mxu0 %v5092_v57  ;;  %v518_v62 = vmax.f32 %v5568_v59, 0.0  ;;  %v1017_v57 = vshll.u32 %v990_v45, 16 }
  0xe0   : > { %v449_v60 = vpop.f32.mrf.mxu0 }
  0xe1   : > { %v5571_v61 = vadd.f32 %v5478_v20, %v449_v60 }
  0xe3   : > { %v519_v63 = vmax.f32 %v5571_v61, 0.0 }
  0xe5   : > { %v5209_v0 = vpack.i.bf16 %v519_v63, %v518_v62 }
  0xe7   : > { %5210 = vrot.lane.b32.xlu1 %v5209_v0, %s5376_s21 }
  0xe8   : > { %v452_v2 = vpop.f32.mrf.mxu0 }
  0xe9   : > { %v5582_v3 = vadd.f32 %v5478_v20, %v452_v2 }
  0xeb   : > { %491 = vmatmul.bf16.gmra.mxu0 %v5093_v1  ;;  %v520_v6 = vmax.f32 %v5582_v3, 0.0 }
  0xf0   : > { %v454_v4 = vpop.f32.mrf.mxu0 }
  0xf1   : > { %v5585_v5 = vadd.f32 %v5478_v20, %v454_v4 }
  0xf3   : > { %v521_v7 = vmax.f32 %v5585_v5, 0.0 }
  0xf5   : > { %v5214_v8 = vpack.i.bf16 %v521_v7, %v520_v6 }
  0xf7   : > { %5215 = vrot.lane.b32.xlu2 %v5214_v8, %s5376_s21 }
  0xf8   : > { %v457_v10 = vpop.f32.mrf.mxu0 }
  0xf9   : > { %v5596_v11 = vadd.f32 %v5478_v20, %v457_v10  ;;  %v1313_v10 = vpop.permute.xlu2 %1312 }
  0xfb   : > { %496 = vmatmul.bf16.gmra.mxu0 %v5094_v9  ;;  %v522_v14 = vmax.f32 %v5596_v11, 0.0 }
 0x100   : > { %v459_v12 = vpop.f32.mrf.mxu0 }
 0x101   : > { %v5599_v13 = vadd.f32 %v5478_v20, %v459_v12 }
 0x103   : > { %v523_v15 = vmax.f32 %v5599_v13, 0.0 }
 0x105   : > { %v5219_v17 = vpack.i.bf16 %v523_v15, %v522_v14 }
 0x107   : > { %5220 = vrot.lane.b32.xlu2 %v5219_v17, %s5376_s21 }
 0x108   : > { %v462_v19 = vpop.f32.mrf.mxu0 }
 0x109   : > { %v5610_v21 = vadd.f32 %v5478_v20, %v462_v19 }
 0x10b   : > { %501 = vmatmul.bf16.gmra.mxu0 %v5095_v18  ;;  %v524_v28 = vmax.f32 %v5610_v21, 0.0 }
 0x110   : > { %v464_v23 = vpop.f32.mrf.mxu0 }
 0x111   : > { %v5613_v27 = vadd.f32 %v5478_v20, %v464_v23 }
 0x113   : > { %v525_v29 = vmax.f32 %v5613_v27, 0.0 }
 0x115   : > { %v5224_v31 = vpack.i.bf16 %v525_v29, %v524_v28 }
 0x117   : > { %5225 = vrot.lane.b32.xlu0 %v5224_v31, %s5376_s21 }
 0x118   : > { %v467_v36 = vpop.f32.mrf.mxu0 }
 0x119   : > { %v5626_v39 = vadd.f32 %v5478_v20, %v467_v36  ;;  %v1506_v36 = vpop.permute.xlu1 %1505 }
 0x11b   : > { %506 = vmatmul.bf16.gmra.mxu0 %v5096_v35  ;;  %v526_v42 = vmax.f32 %v5626_v39, 0.0 }
 0x120   : > { %v469_v40 = vpop.f32.mrf.mxu0 }
 0x121   : > { %v5629_v41 = vadd.f32 %v5478_v20, %v469_v40  ;;  %v1670_v40 = vpop.permute.xlu2 %1669 }
 0x122   : > { %1693 = vst.msk [vmem:[#allocation6 + $0x60] sm:$0xf] %vm1529_vm10, %v1670_v40 }
 0x123   : > { %v527_v43 = vmax.f32 %v5629_v41, 0.0 }
 0x125   : > { %v5229_v44 = vpack.i.bf16 %v527_v43, %v526_v42 }
 0x127   : > { %5230 = vrot.lane.b32.xlu1 %v5229_v44, %s5376_s21 }
 0x128   : > { %v472_v48 = vpop.f32.mrf.mxu0 }
 0x129   : > { %v5196_v49 = vpop.permute.xlu0 %5195  ;;  %v5657_v0 = vadd.f32 %v5478_v20, %v472_v48 }
 0x12a   : > { %v5198_v51 = vunpack.i.h.bf16 %v5196_v49  ;;  %v5197_v52 = vunpack.i.l.bf16 %v5196_v49 }
 0x12b   : > { %v528_v4 = vmax.f32 %v5657_v0, 0.0 }
 0x12c   : > { %v5648_v58 = vmax.f32 %v513_v26, %v5198_v51  ;;  %v5652_v60 = vmax.f32 %v512_v25, %v5197_v52  ;;  %v989_v26 = vld [vmem:[#allocation5] sm:$0x8]  ;;  %v1019_v25 = vor.u32 %v1017_v57, %v1016_v56 }
 0x12d   : > { %v1009_v22 = vshrl.u32 %v989_v26, 16 }
 0x12e   : > { %v5234_v24 = vpack.i.bf16 %v5648_v58, %v5652_v60 }
 0x12f   : > { %v4750_v9 = vrot.slane %v1009_v22, 11 }
 0x130   : > { %v474_v1 = vpop.f32.mrf.mxu0  ;;  %5235 = vrot.lane.b32.xlu1 %v5234_v24, %s5377_s22 }
 0x131   : > { %v5676_v8 = vadd.f32 %v5478_v20, %v474_v1  ;;  %v1020_v17 = vsel %vm5668_vm9, %v4750_v9, %v1019_v25 }
 0x132   : > { %1120 = vst.msk [vmem:[#allocation6] sm:$0xf] %vm897_vm0, %v1020_v17 }
 0x133   : > { %v529_v12 = vmax.f32 %v5676_v8, 0.0  ;;  %1337 = vst.msk [vmem:[#allocation6] sm:$0xf] %vm1336_vm5, %v1313_v10 }
 0x134   : > { %1530 = vst.msk [vmem:[#allocation6] sm:$0xf] %vm1529_vm10, %v1506_v36 }
 0x135   : > { %v5239_v18 = vpack.i.bf16 %v529_v12, %v528_v4 }
 0x137   : > { %5240 = vrot.lane.b32.xlu2 %v5239_v18, %s5376_s21 }
 0x138   : > { %v477_v19 = vpop.f32.mrf.mxu0 }
 0x139   : > { %v5201_v23 = vpop.permute.xlu0 %5200  ;;  %v5716_v44 = vadd.f32 %v5478_v20, %v477_v19 }
 0x13a   : > { %v5203_v31 = vunpack.i.h.bf16 %v5201_v23  ;;  %v5202_v35 = vunpack.i.l.bf16 %v5201_v23 }
 0x13b   : > { %v530_v32 = vmax.f32 %v5716_v44, 0.0 }
 0x13c   : > { %v5708_v37 = vmax.f32 %v515_v34, %v5203_v31  ;;  %v5712_v38 = vmax.f32 %v514_v33, %v5202_v35 }
 0x13e   : > { %v5244_v16 = vpack.i.bf16 %v5708_v37, %v5712_v38 }
 0x140   : > { %v479_v45 = vpop.f32.mrf.mxu0  ;;  %5245 = vrot.lane.b32.xlu2 %v5244_v16, %s5377_s22 }
 0x141   : > { %v5724_v30 = vadd.f32 %v5478_v20, %v479_v45 }
 0x143   : > { %v531_v33 = vmax.f32 %v5724_v30, 0.0 }
 0x145   : > { %v5249_v34 = vpack.i.bf16 %v531_v33, %v530_v32 }
 0x147   : > { %5250 = vrot.lane.b32.xlu0 %v5249_v34, %s5376_s21 }
 0x148   : > { %v482_v46 = vpop.f32.mrf.mxu0 }
 0x149   : > { %v5206_v48 = vpop.permute.xlu1 %5205  ;;  %v5741_v57 = vadd.f32 %v5478_v20, %v482_v46 }
 0x14a   : > { %v5208_v49 = vunpack.i.h.bf16 %v5206_v48  ;;  %v5207_v51 = vunpack.i.l.bf16 %v5206_v48 }
 0x14b   : > { %v532_v22 = vmax.f32 %v5741_v57, 0.0 }
 0x14c   : > { %v5734_v52 = vmax.f32 %v517_v55, %v5208_v49  ;;  %v5738_v56 = vmax.f32 %v516_v54, %v5207_v51 }
 0x14e   : > { %v5254_v24 = vpack.i.bf16 %v5734_v52, %v5738_v56 }
 0x150   : > { %v484_v26 = vpop.f32.mrf.mxu0  ;;  %5255 = vrot.lane.b32.xlu0 %v5254_v24, %s5377_s22 }
 0x151   : > { %v5748_v25 = vadd.f32 %v5478_v20, %v484_v26  ;;  %v5216_v61 = vpop.permute.xlu2 %5215 }
 0x152   : > { %v5218_v59 = vunpack.i.h.bf16 %v5216_v61 }
 0x153   : > { %v533_v53 = vmax.f32 %v5748_v25, 0.0 }
 0x154   : > { %v5782_v16 = vmax.f32 %v521_v7, %v5218_v59 }
 0x155   : > { %v5259_v50 = vpack.i.bf16 %v533_v53, %v532_v22 }
 0x157   : > { %5260 = vrot.lane.b32.xlu1 %v5259_v50, %s5376_s21 }
 0x158   : > { %v487_v54 = vpop.f32.mrf.mxu0 }
 0x159   : > { %v5211_v55 = vpop.permute.xlu1 %5210  ;;  %v5765_v18 = vadd.f32 %v5478_v20, %v487_v54 }
 0x15a   : > { %v5213_v1 = vunpack.i.h.bf16 %v5211_v55  ;;  %v5212_v9 = vunpack.i.l.bf16 %v5211_v55 }
 0x15b   : > { %v534_v31 = vmax.f32 %v5765_v18, 0.0 }
 0x15c   : > { %v5758_v10 = vmax.f32 %v519_v63, %v5213_v1  ;;  %v5762_v17 = vmax.f32 %v518_v62, %v5212_v9  ;;  %v5217_v62 = vunpack.i.l.bf16 %v5216_v61 }
 0x15e   : > { %v5264_v19 = vpack.i.bf16 %v5758_v10, %v5762_v17  ;;  %v5786_v45 = vmax.f32 %v520_v6, %v5217_v62 }
 0x160   : > { %v489_v23 = vpop.f32.mrf.mxu0  ;;  %5265 = vrot.lane.b32.xlu1 %v5264_v19, %s5377_s22  ;;  %v5274_v46 = vpack.i.bf16 %v5782_v16, %v5786_v45 }
 0x161   : > { %v5772_v35 = vadd.f32 %v5478_v20, %v489_v23  ;;  %v5221_v5 = vpop.permute.xlu2 %5220 }
 0x162   : > { %v5223_v3 = vunpack.i.h.bf16 %v5221_v5  ;;  %v5222_v6 = vunpack.i.l.bf16 %v5221_v5 }
 0x163   : > { %v535_v63 = vmax.f32 %v5772_v35, 0.0 }
 0x164   : > { %v5806_v50 = vmax.f32 %v523_v15, %v5223_v3  ;;  %v5810_v54 = vmax.f32 %v522_v14, %v5222_v6 }
 0x165   : > { %v5269_v36 = vpack.i.bf16 %v535_v63, %v534_v31 }
 0x166   : > { %v5284_v1 = vpack.i.bf16 %v5806_v50, %v5810_v54 }
 0x167   : > { %5270 = vrot.lane.b32.xlu2 %v5269_v36, %s5376_s21 }
 0x168   : > { %v492_v40 = vpop.f32.mrf.mxu0 }
 0x169   : > { %v5789_v34 = vadd.f32 %v5478_v20, %v492_v40 }
 0x16b   : > { %v536_v49 = vmax.f32 %v5789_v34, 0.0 }
 0x16f   : > { %5275 = vrot.lane.b32.xlu2 %v5274_v46, %s5377_s22 }
 0x170   : > { %v494_v48 = vpop.f32.mrf.mxu0 }
 0x171   : > { %v5796_v51 = vadd.f32 %v5478_v20, %v494_v48 }
 0x173   : > { %v537_v7 = vmax.f32 %v5796_v51, 0.0 }
 0x175   : > { %v5279_v24 = vpack.i.bf16 %v537_v7, %v536_v49 }
 0x177   : > { %5280 = vrot.lane.b32.xlu0 %v5279_v24, %s5376_s21 }
 0x178   : > { %v497_v26 = vpop.f32.mrf.mxu0 }
 0x179   : > { %v5813_v55 = vadd.f32 %v5478_v20, %v497_v26 }
 0x17b   : > { %v538_v19 = vmax.f32 %v5813_v55, 0.0 }
 0x17f   : > { %5285 = vrot.lane.b32.xlu0 %v5284_v1, %s5377_s22 }
 0x180   : > { %v499_v9 = vpop.f32.mrf.mxu0 }
 0x181   : > { %v5820_v23 = vadd.f32 %v5478_v20, %v499_v9 }
 0x183   : > { %v539_v13 = vmax.f32 %v5820_v23, 0.0  ;;  %v3551_v23 = vld [vmem:[#allocation3 + $0x70] sm:$0xf] }
 0x184   : > { %3559 = vst.msk [vmem:[#allocation6 + $0x11c] sm:$0xf] %vm897_vm0, %v3551_v23 }
 0x185   : > { %v5289_v11 = vpack.i.bf16 %v539_v13, %v538_v19 }
 0x187   : > { %5290 = vrot.lane.b32.xlu1 %v5289_v11, %s5376_s21 }
 0x188   : > { %v502_v14 = vpop.f32.mrf.mxu0 }
 0x189   : > { %v5226_v15 = vpop.permute.xlu0 %5225  ;;  %v5837_v40 = vadd.f32 %v5478_v20, %v502_v14 }
 0x18a   : > { %v5228_v61 = vunpack.i.h.bf16 %v5226_v15  ;;  %v5227_v59 = vunpack.i.l.bf16 %v5226_v15 }
 0x18b   : > { %v7230_v5 = vmax.f32 %v5837_v40, 0.0 }
 0x18c   : > { %v5830_v62 = vmax.f32 %v525_v29, %v5228_v61  ;;  %v5834_v36 = vmax.f32 %v524_v28, %v5227_v59 }
 0x18e   : > { %v5294_v46 = vpack.i.bf16 %v5830_v62, %v5834_v36 }
 0x190   : > { %v504_v48 = vpop.f32.mrf.mxu0  ;;  %5295 = vrot.lane.b32.xlu1 %v5294_v46, %s5377_s22 }
 0x191   : > { %v5844_v3 = vadd.f32 %v5478_v20, %v504_v48  ;;  %v5846_v27 = vpop.permute.xlu2 %5240 }
 0x193   : > { %v7231_v21 = vmax.f32 %v5844_v3, 0.0 }
 0x195   : > { %v5299_v28 = vpack.i.bf16 %v7231_v21, %v7230_v5 }
 0x197   : > { %5300 = vrot.lane.b32.xlu2 %v5299_v28, %s5376_s21 }
 0x199   : > { %v5231_v29 = vpop.permute.xlu1 %5230 }
 0x19a   : > { %v5233_v6 = vunpack.i.h.bf16 %v5231_v29  ;;  %v5232_v24 = vunpack.i.l.bf16 %v5231_v29  ;;  %v5246_v26 = vpop.permute.xlu2 %5245 }
 0x19b   : > { %v5248_v1 = vunpack.i.h.bf16 %v5246_v26  ;;  %v5247_v9 = vunpack.i.l.bf16 %v5246_v26 }
 0x19c   : > { %v5856_v11 = vmax.f32 %v527_v43, %v5233_v6  ;;  %v5860_v14 = vmax.f32 %v526_v42, %v5232_v24  ;;  %v507_v43 = vpop.f32.mrf.mxu0  ;;  %v2423_v6 = vld [vmem:[#allocation2 + $0x14] sm:$0x1] }
 0x19d   : > { %v835_v15 = vmax.f32 %v5708_v37, %v5248_v1  ;;  %v834_v61 = vmax.f32 %v5712_v38, %v5247_v9  ;;  %v2448_v9 = vshll.u32 %v2423_v6, 16  ;;  %v5243_v6 = vunpack.i.h.bf16 %v5846_v27 }
 0x19e   : > { %v5304_v59 = vpack.i.bf16 %v5856_v11, %v5860_v14 }
 0x19f   : > { %v867_v46 = vpack.c.bf16 %v835_v15, %v835_v15  ;;  %v866_v48 = vpack.c.bf16 %v834_v61, %v834_v61  ;;  %v5876_v15 = vadd.f32 %v5478_v20, %v507_v43 }
 0x1a0   : > { %5305 = vrot.lane.b32.xlu2 %v5304_v59, %s5377_s22 }
 0x1a1   : > { %916 = vst.msk [vmem:[#allocation2 + $0x34] sm:$0xf] %vm897_vm0, %v867_v46 }
 0x1a2   : > { %915 = vst.msk [vmem:[#allocation2 + $0x28] sm:$0xf] %vm897_vm0, %v866_v48  ;;  %v5236_v41 = vpop.permute.xlu1 %5235 }
 0x1a3   : > { %v5238_v39 = vunpack.i.h.bf16 %v5236_v41  ;;  %v5237_v42 = vunpack.i.l.bf16 %v5236_v41 }
 0x1a4   : > { %v509_v24 = vpop.f32.mrf.mxu0 }
 0x1a5   : > { %v833_v28 = vmax.f32 %v5648_v58, %v5238_v39  ;;  %v832_v37 = vmax.f32 %v5652_v60, %v5237_v42  ;;  %v5879_v58 = vadd.f32 %v5478_v20, %v509_v24  ;;  %v2450_v39 = vrot.slane %v2448_v9, 5 }
 0x1a6   : > { %v7232_v42 = vmax.f32 %v5876_v15, 0.0 }
 0x1a7   : > { %v865_v38 = vpack.c.bf16 %v833_v28, %v833_v28  ;;  %v864_v29 = vpack.c.bf16 %v832_v37, %v832_v37  ;;  %v7233_v43 = vmax.f32 %v5879_v58, 0.0 }
 0x1a8   : > { %v1283_v26 = vld [vmem:[#allocation2 + $0x34] sm:$0xf] }
 0x1a9   : > { %914 = vst.msk [vmem:[#allocation2 + $0x1c] sm:$0xf] %vm897_vm0, %v865_v38  ;;  %v1282_v1 = vld [vmem:[#allocation2 + $0x28] sm:$0xf]  ;;  %v2313_v20 = vld [vmem:[#allocation2 + $0x34] sm:$0xf] }
 0x1aa   : > { %913 = vst.msk [vmem:[#allocation2 + $0x10] sm:$0xf] %vm897_vm0, %v864_v29  ;;  %v3562_v9 = vld [vmem:[#allocation2 + $0x28] sm:$0xf]  ;;  %v2428_v30 = vld [vmem:[#allocation2 + $0x34] sm:$0xf] }
 0x1ab   : > { %1291 = vst.msk [vmem:[#allocation6 + $0x144] sm:$0xf] %vm897_vm0, %v1283_v26  ;;  %v3591_v8 = vshrl.u32 %v3562_v9, 16  ;;  %v2065_v25 = vld [vmem:[#allocation2 + $0x34] sm:$0xf] }
 0x1ac   : > { %1290 = vst.msk [vmem:[#allocation6 + $0x138] sm:$0xf] %vm897_vm0, %v1282_v1  ;;  %v5242_v1 = vunpack.i.l.bf16 %v5846_v27  ;;  %v5898_v27 = vmax.f32 %v529_v12, %v5243_v6  ;;  %v3594_v12 = vshll.u32 %v3562_v9, 16  ;;  %v2425_v6 = vld [vmem:[#allocation2 + $0x20] sm:$0x1] }
 0x1ad   : > { %2321 = vst.msk [vmem:[#allocation6 + $0x28] sm:$0xf] %vm897_vm0, %v2313_v20 }
 0x1b0   : > { %v2063_v60 = vld [vmem:[#allocation2 + $0x1c] sm:$0xf] }
 0x1b1   : > { %2080 = vrot.lane.b32.xlu2 %v2063_v60, %s5377_s22  ;;  %v2062_v61 = vld [vmem:[#allocation2 + $0x10] sm:$0xf]  ;;  %v2424_v24 = vld [vmem:[#allocation2 + $0x1c] sm:$0xf] }
 0x1b2   : > { %v1393_v59 = vld [vmem:[#allocation2 + $0x10] sm:$0xf]  ;;  %2078 = vrot.lane.b32.xlu1 %v2062_v61, %s5377_s22  ;;  %v1281_v26 = vld [vmem:[#allocation2 + $0x1c] sm:$0xf]  ;;  %v2312_v61 = vld [vmem:[#allocation2 + $0x28] sm:$0xf] }
 0x1b3   : > { %1409 = vrot.lane.b32.xlu0 %v1393_v59, %s5375_s16  ;;  %v2422_v46 = vld [vmem:[#allocation2 + $0x10] sm:$0xf]  ;;  %1289 = vst.msk [vmem:[#allocation6 + $0x12c] sm:$0xf] %vm897_vm0, %v1281_v26  ;;  %v3560_v59 = vld [vmem:[#allocation2 + $0x1c] sm:$0xf] }
 0x1b4   : > { %v2439_v48 = vshrl.u32 %v2422_v46, 16  ;;  %v2442_v41 = vshll.u32 %v2422_v46, 16  ;;  %v1280_v28 = vld [vmem:[#allocation2 + $0x10] sm:$0xf]  ;;  %v5309_v46 = vpack.i.bf16 %v7233_v43, %v7232_v42  ;;  %v2453_v5 = vshrl.u32 %v2424_v24, 16 }
 0x1b5   : > { %1288 = vst.msk [vmem:[#allocation6 + $0x120] sm:$0xf] %vm897_vm0, %v1280_v28  ;;  %v2310_v29 = vld [vmem:[#allocation2 + $0x10] sm:$0xf]  ;;  %v1394_v28 = vld [vmem:[#allocation2 + $0x1c] sm:$0xf] }
 0x1b6   : > { %v2441_v37 = vrot.slane %v2439_v48, 4  ;;  %v2444_v38 = vrot.slane %v2442_v41, 5  ;;  %2318 = vst.msk [vmem:[#allocation6 + $0x4] sm:$0xf] %vm897_vm0, %v2310_v29  ;;  %v2311_v48 = vld [vmem:[#allocation2 + $0x1c] sm:$0xf] }
 0x1b7   : > { %v2456_v21 = vshll.u32 %v2424_v24, 16  ;;  %2320 = vst.msk [vmem:[#allocation6 + $0x1c] sm:$0xf] %vm897_vm0, %v2312_v61  ;;  %v3577_v20 = vshrl.u32 %v3560_v59, 16  ;;  %v2455_v24 = vrot.slane %v2453_v5, 4 }
 0x1b8   : > { %v2445_v60 = vor.u32 %v2444_v38, %v2441_v37  ;;  %v5905_v37 = vmax.f32 %v528_v4, %v5242_v1  ;;  %v3580_v38 = vshll.u32 %v3560_v59, 16  ;;  %2319 = vst.msk [vmem:[#allocation6 + $0x10] sm:$0xf] %vm897_vm0, %v2311_v48  ;;  %v2462_v4 = vshll.u32 %v2425_v6, 16  ;;  %v3288_v48 = vld [vmem:[#allocation2 + $0x1c] sm:$0xf] }
 0x1b9   : > { %v5251_v41 = vpop.permute.xlu0 %5250  ;;  %v3593_v1 = vrot.slane %v3591_v8, 4  ;;  %v3596_v59 = vrot.slane %v3594_v12, 5  ;;  %v3563_v43 = vld [vmem:[#allocation2 + $0x2c] sm:$0x1] }
 0x1ba   : > { %v2446_v29 = vrot.slane %v2445_v60, 4  ;;  %1411 = vrot.lane.b32.xlu1 %v1394_v28, %s5375_s16  ;;  %v2458_v60 = vrot.slane %v2456_v21, 5  ;;  %v3582_v61 = vrot.slane %v3580_v38, 5  ;;  %v5314_v0 = vpack.i.bf16 %v5898_v27, %v5905_v37  ;;  %v3561_v21 = vld [vmem:[#allocation2 + $0x20] sm:$0x1] }
 0x1bb   : > { %5310 = vrot.lane.b32.xlu0 %v5309_v46, %s5376_s21  ;;  %v3579_v46 = vrot.slane %v3577_v20, 4  ;;  %v5253_v28 = vunpack.i.h.bf16 %v5251_v41  ;;  %v5252_v42 = vunpack.i.l.bf16 %v5251_v41  ;;  %v3597_v6 = vor.u32 %v3596_v59, %v3593_v1 }
 0x1bc   : > { %v2451_v26 = vsel %vm5524_vm4, %v2446_v29, %v2450_v39  ;;  %v2459_v29 = vor.u32 %v2458_v60, %v2455_v24  ;;  %v2464_v12 = vrot.slane %v2462_v4, 5 }
 0x1bd   : > { %2550 = vrot.lane.b32.xlu2 %v2451_v26, %s5375_s16  ;;  %v3583_v9 = vor.u32 %v3582_v61, %v3579_v46  ;;  %v1395_v26 = vld [vmem:[#allocation2 + $0x28] sm:$0xf]  ;;  %v5919_v8 = vmax.f32 %v531_v33, %v5253_v28  ;;  %v5923_v41 = vmax.f32 %v530_v32, %v5252_v42  ;;  %v3586_v61 = vshll.u32 %v3561_v21, 16 }
 0x1be   : > { %v2460_v46 = vrot.slane %v2459_v29, 4  ;;  %v3598_v32 = vrot.slane %v3597_v6, 4  ;;  %v2481_v29 = vshrl.u32 %v2428_v30, 16  ;;  %v2064_v21 = vld [vmem:[#allocation2 + $0x28] sm:$0xf] }
 0x1bf   : > { %v5319_v33 = vpack.i.bf16 %v5919_v8, %v5923_v41  ;;  %v3588_v44 = vrot.slane %v3586_v61, 5  ;;  %v2429_v61 = vld [vmem:[#allocation2 + $0x38] sm:$0x1] }
 0x1c1   : > { %v5913_v39 = vpop.permute.xlu2 %5270 }
 0x1c2   : > { %3304 = vrot.lane.b32.xlu1 %v3288_v48, %s5377_s22  ;;  %v5256_v5 = vpop.permute.xlu0 %5255  ;;  %v3584_v48 = vrot.slane %v3583_v9, 4 }
 0x1c3   : > { %5315 = vrot.lane.b32.xlu0 %v5314_v0, %s5377_s22  ;;  %v5258_v20 = vunpack.i.h.bf16 %v5256_v5  ;;  %v5257_v38 = vunpack.i.l.bf16 %v5256_v5  ;;  %v3600_v0 = vshll.u32 %v3563_v43, 16  ;;  %v2484_v5 = vshll.u32 %v2428_v30, 16 }
 0x1c4   : > { %v3589_v9 = vsel %vm5524_vm4, %v3584_v48, %v3588_v44 }
 0x1c5   : > { %1413 = vrot.lane.b32.xlu2 %v1395_v26, %s5375_s16  ;;  %v837_v24 = vmax.f32 %v5734_v52, %v5258_v20  ;;  %v836_v60 = vmax.f32 %v5738_v56, %v5257_v38  ;;  %v2465_v52 = vsel %vm5524_vm4, %v2460_v46, %v2464_v12  ;;  %v3602_v56 = vrot.slane %v3600_v0, 5  ;;  %3696 = vst.msk [vmem:[#allocation6 + $0x128] sm:$0xf] %vm897_vm0, %v3589_v9  ;;  %v2426_v46 = vld [vmem:[#allocation2 + $0x28] sm:$0xf] }
 0x1c6   : > { %v2467_v0 = vshrl.u32 %v2426_v46, 16  ;;  %v2470_v48 = vshll.u32 %v2426_v46, 16 }
 0x1c7   : > { %v869_v1 = vpack.c.bf16 %v837_v24, %v837_v24  ;;  %v868_v59 = vpack.c.bf16 %v836_v60, %v836_v60  ;;  %v3603_v26 = vsel %vm5524_vm4, %v3598_v32, %v3602_v56  ;;  %v2483_v24 = vrot.slane %v2481_v29, 4 }
 0x1c8   : > { %v2486_v60 = vrot.slane %v2484_v5, 5  ;;  %3697 = vst.msk [vmem:[#allocation6 + $0x134] sm:$0xf] %vm897_vm0, %v3603_v26  ;;  %v2490_v32 = vshll.u32 %v2429_v61, 16  ;;  %v2472_v9 = vrot.slane %v2470_v48, 5 }
 0x1c9   : > { %918 = vst.msk [vmem:[#allocation2 + $0x4c] sm:$0xf] %vm897_vm0, %v869_v1  ;;  %v5276_v42 = vpop.permute.xlu2 %5275  ;;  %v5261_v4 = vpop.permute.xlu1 %5260 }
 0x1ca   : > { %917 = vst.msk [vmem:[#allocation2 + $0x40] sm:$0xf] %vm897_vm0, %v868_v59  ;;  %v5278_v43 = vunpack.i.h.bf16 %v5276_v42  ;;  %v5277_v28 = vunpack.i.l.bf16 %v5276_v42  ;;  %5320 = vrot.lane.b32.xlu1 %v5319_v33, %s5377_s22  ;;  %v5263_v1 = vunpack.i.h.bf16 %v5261_v4  ;;  %v5262_v59 = vunpack.i.l.bf16 %v5261_v4  ;;  %v2427_v4 = vld [vmem:[#allocation2 + $0x2c] sm:$0x1] }
 0x1cb   : > { %2552 = vrot.lane.b32.xlu0 %v2465_v52, %s5375_s16  ;;  %v2487_v44 = vor.u32 %v2486_v60, %v2483_v24  ;;  %v2476_v61 = vshll.u32 %v2427_v4, 16 }
 0x1cc   : > { %v841_v20 = vmax.f32 %v5782_v16, %v5278_v43  ;;  %v840_v38 = vmax.f32 %v5786_v45, %v5277_v28  ;;  %v1396_v16 = vld [vmem:[#allocation2 + $0x34] sm:$0xf]  ;;  %v5958_v26 = vmax.f32 %v532_v22, %v5262_v59 }
 0x1cd   : > { %2082 = vrot.lane.b32.xlu2 %v2064_v21, %s5377_s22  ;;  %v2469_v21 = vrot.slane %v2467_v0, 4 }
 0x1ce   : > { %v873_v6 = vpack.c.bf16 %v841_v20, %v841_v20  ;;  %v872_v12 = vpack.c.bf16 %v840_v38, %v840_v38  ;;  %v5954_v38 = vmax.f32 %v533_v53, %v5263_v1 }
 0x1cf   : > { %v2473_v53 = vor.u32 %v2472_v9, %v2469_v21 }
 0x1d0   : > { %938 = vst.msk [vmem:[#allocation3 + $0x1c] sm:$0xf] %vm897_vm0, %v873_v6  ;;  %v1398_v45 = vld [vmem:[#allocation2 + $0x4c] sm:$0xf]  ;;  %v2488_v6 = vrot.slane %v2487_v44, 4  ;;  %v5324_v22 = vpack.i.bf16 %v5954_v38, %v5958_v26  ;;  %v2478_v44 = vrot.slane %v2476_v61, 5 }
 0x1d1   : > { %937 = vst.msk [vmem:[#allocation3 + $0x10] sm:$0xf] %vm897_vm0, %v872_v12  ;;  %v1397_v30 = vld [vmem:[#allocation2 + $0x40] sm:$0xf]  ;;  %v2432_v56 = vld [vmem:[#allocation2 + $0x4c] sm:$0xf] }
 0x1d2   : > { %v5266_v33 = vpop.permute.xlu1 %5265  ;;  %1417 = vrot.lane.b32.xlu1 %v1397_v30, %s5375_s16  ;;  %v2509_v43 = vshrl.u32 %v2432_v56, 16  ;;  %v2512_v28 = vshll.u32 %v2432_v56, 16  ;;  %v1285_v20 = vld [vmem:[#allocation2 + $0x4c] sm:$0xf]  ;;  %v2492_v12 = vrot.slane %v2490_v32, 5 }
 0x1d3   : > { %1415 = vrot.lane.b32.xlu0 %v1396_v16, %s5375_s16  ;;  %v5268_v42 = vunpack.i.h.bf16 %v5266_v33  ;;  %v5267_v52 = vunpack.i.l.bf16 %v5266_v33  ;;  %v2430_v24 = vld [vmem:[#allocation2 + $0x40] sm:$0xf]  ;;  %1293 = vst.msk [vmem:[#allocation6 + $0x15c] sm:$0xf] %vm897_vm0, %v1285_v20  ;;  %v2433_v16 = vld [vmem:[#allocation2 + $0x50] sm:$0x1] }
 0x1d4   : > { %v2514_v46 = vrot.slane %v2512_v28, 5  ;;  %v2498_v0 = vshll.u32 %v2430_v24, 16  ;;  %v2493_v57 = vsel %vm5524_vm4, %v2488_v6, %v2492_v12  ;;  %v2518_v1 = vshll.u32 %v2433_v16, 16  ;;  %v2315_v30 = vld [vmem:[#allocation2 + $0x4c] sm:$0xf] }
 0x1d5   : > { %1419 = vrot.lane.b32.xlu2 %v1398_v45, %s5375_s16  ;;  %v839_v29 = vmax.f32 %v5758_v10, %v5268_v42  ;;  %v838_v5 = vmax.f32 %v5762_v17, %v5267_v52  ;;  %v2511_v17 = vrot.slane %v2509_v43, 4  ;;  %v2495_v45 = vshrl.u32 %v2430_v24, 16  ;;  %v2431_v32 = vld [vmem:[#allocation2 + $0x44] sm:$0x1]  ;;  %2323 = vst.msk [vmem:[#allocation6 + $0x40] sm:$0xf] %vm897_vm0, %v2315_v30 }
 0x1d6   : > { %v2474_v33 = vrot.slane %v2473_v53, 4  ;;  %v2500_v52 = vrot.slane %v2498_v0, 5  ;;  %v2504_v21 = vshll.u32 %v2431_v32, 16  ;;  %v1146_v20 = vld [vmem:[#allocation3 + $0x18] sm:$0x8] }
 0x1d7   : > { %v871_v10 = vpack.c.bf16 %v839_v29, %v839_v29  ;;  %v870_v60 = vpack.c.bf16 %v838_v5, %v838_v5  ;;  %v2515_v48 = vor.u32 %v2514_v46, %v2511_v17  ;;  %v2497_v42 = vrot.slane %v2495_v45, 4  ;;  %v2327_v43 = vld [vmem:[#allocation3 + $0x1c] sm:$0xf]  ;;  %v1144_v5 = vld [vmem:[#allocation3 + $0xc] sm:$0x8] }
 0x1d8   : > { %v2326_v59 = vld [vmem:[#allocation3 + $0x10] sm:$0xf]  ;;  %v2520_v29 = vrot.slane %v2518_v1, 5  ;;  %2335 = vst.msk [vmem:[#allocation6 + $0x70] sm:$0xf] %vm897_vm0, %v2327_v43  ;;  %v2479_v4 = vsel %vm5524_vm4, %v2474_v33, %v2478_v44  ;;  %v1161_v61 = vshrl.u32 %v1144_v5, 16 }
 0x1d9   : > { %920 = vst.msk [vmem:[#allocation2 + $0x64] sm:$0xf] %vm897_vm0, %v871_v10  ;;  %v1145_v56 = vld [vmem:[#allocation3 + $0x10] sm:$0xf]  ;;  %v2516_v28 = vrot.slane %v2515_v48, 4  ;;  %v2501_v12 = vor.u32 %v2500_v52, %v2497_v42 }
 0x1da   : > { %919 = vst.msk [vmem:[#allocation2 + $0x58] sm:$0xf] %vm897_vm0, %v870_v60  ;;  %2556 = vrot.lane.b32.xlu1 %v2493_v57, %s5375_s16  ;;  %v1166_v9 = vshrl.u32 %v1145_v56, 16  ;;  %v2067_v6 = vld [vmem:[#allocation2 + $0x4c] sm:$0xf]  ;;  %v1169_v48 = vshll.u32 %v1145_v56, 16 }
 0x1db   : > { %2084 = vrot.lane.b32.xlu0 %v2065_v25, %s5377_s22  ;;  %2334 = vst.msk [vmem:[#allocation6 + $0x64] sm:$0xf] %vm897_vm0, %v2326_v59  ;;  %v1147_v10 = vld [vmem:[#allocation3 + $0x1c] sm:$0xf]  ;;  %v2521_v60 = vsel %vm5524_vm4, %v2516_v28, %v2520_v29  ;;  %v1174_v25 = vshrl.u32 %v1146_v20, 16  ;;  %v2502_v57 = vrot.slane %v2501_v12, 4 }
 0x1dc   : > { %v3564_v16 = vld [vmem:[#allocation2 + $0x34] sm:$0xf]  ;;  %v1284_v53 = vld [vmem:[#allocation2 + $0x40] sm:$0xf]  ;;  %v1168_v45 = vrot.slane %v1166_v9, 7  ;;  %v1179_v0 = vshrl.u32 %v1147_v10, 16 }
 0x1dd   : > { %5325 = vrot.lane.b32.xlu2 %v5324_v22, %s5377_s22  ;;  %1292 = vst.msk [vmem:[#allocation6 + $0x150] sm:$0xf] %vm897_vm0, %v1284_v53  ;;  %v2506_v22 = vrot.slane %v2504_v21, 5  ;;  %v3605_v1 = vshrl.u32 %v3564_v16, 16  ;;  %v2435_v59 = vld [vmem:[#allocation2 + $0x5c] sm:$0x1] }
 0x1de   : > { %v4758_v44 = vrot.slane %v1161_v61, 11  ;;  %v3608_v32 = vshll.u32 %v3564_v16, 16  ;;  %v1171_v42 = vor.u32 %v1169_v48, %v1168_v45  ;;  %v4759_v52 = vrot.slane %v1174_v25, 11  ;;  %v2066_v5 = vld [vmem:[#allocation2 + $0x40] sm:$0xf] }
 0x1df   : > { %v1182_v9 = vshll.u32 %v1147_v10, 16  ;;  %v2507_v56 = vsel %vm5524_vm4, %v2502_v57, %v2506_v22  ;;  %v2532_v21 = vshll.u32 %v2435_v59, 16  ;;  %v2314_v20 = vld [vmem:[#allocation2 + $0x40] sm:$0xf]  ;;  %v3544_v53 = vld [vmem:[#allocation3 + $0x1c] sm:$0xf]  ;;  %v5273_v45 = vunpack.i.h.bf16 %v5913_v39 }
 0x1e0   : > { %2322 = vst.msk [vmem:[#allocation6 + $0x34] sm:$0xf] %vm897_vm0, %v2314_v20  ;;  %v2317_v10 = vld [vmem:[#allocation2 + $0x64] sm:$0xf]  ;;  %v3610_v61 = vrot.slane %v3608_v32, 5 }
 0x1e1   : > { %v2434_v24 = vld [vmem:[#allocation2 + $0x58] sm:$0xf]  ;;  %v2436_v16 = vld [vmem:[#allocation2 + $0x64] sm:$0xf]  ;;  %2325 = vst.msk [vmem:[#allocation6 + $0x58] sm:$0xf] %vm897_vm0, %v2317_v10 }
 0x1e2   : > { %2088 = vrot.lane.b32.xlu1 %v2067_v6, %s5377_s22  ;;  %v2523_v17 = vshrl.u32 %v2434_v24, 16  ;;  %v2526_v46 = vshll.u32 %v2434_v24, 16  ;;  %v1286_v43 = vld [vmem:[#allocation2 + $0x58] sm:$0xf]  ;;  %v2069_v6 = vld [vmem:[#allocation2 + $0x64] sm:$0xf]  ;;  %v1172_v24 = vsel %vm5668_vm9, %v4758_v44, %v1171_v42 }
 0x1e3   : > { %2554 = vrot.lane.b32.xlu0 %v2479_v4, %s5375_s16  ;;  %v2316_v28 = vld [vmem:[#allocation2 + $0x58] sm:$0xf]  ;;  %v1181_v4 = vrot.slane %v1179_v0, 7  ;;  %1294 = vst.msk [vmem:[#allocation6 + $0x168] sm:$0xf] %vm897_vm0, %v1286_v43  ;;  %v5272_v0 = vunpack.i.l.bf16 %v5913_v39  ;;  %v2534_v22 = vrot.slane %v2532_v21, 5  ;;  %v6007_v39 = vmax.f32 %v535_v63, %v5273_v45 }
 0x1e4   : > { %v2525_v30 = vrot.slane %v2523_v17, 4  ;;  %v2528_v33 = vrot.slane %v2526_v46, 5  ;;  %2324 = vst.msk [vmem:[#allocation6 + $0x4c] sm:$0xf] %vm897_vm0, %v2316_v28  ;;  %v1287_v17 = vld [vmem:[#allocation2 + $0x64] sm:$0xf] }
 0x1e5   : > { %2560 = vrot.lane.b32.xlu2 %v2521_v60, %s5375_s16  ;;  %v1184_v60 = vor.u32 %v1182_v9, %v1181_v4  ;;  %1272 = vst.msk [vmem:[#allocation6 + $0xc0] sm:$0xf] %vm897_vm0, %v1172_v24  ;;  %v3607_v46 = vrot.slane %v3605_v1, 4  ;;  %v2537_v48 = vshrl.u32 %v2436_v16, 16  ;;  %v2540_v1 = vshll.u32 %v2436_v16, 16 }
 0x1e6   : > { %v2529_v12 = vor.u32 %v2528_v33, %v2525_v30  ;;  %1295 = vst.msk [vmem:[#allocation6 + $0x174] sm:$0xf] %vm897_vm0, %v1287_v17  ;;  %v1399_v44 = vld [vmem:[#allocation2 + $0x58] sm:$0xf]  ;;  %v6011_v28 = vmax.f32 %v534_v31, %v5272_v0  ;;  %v2437_v63 = vld [vmem:[#allocation2 + $0x68] sm:$0x1] }
 0x1e7   : > { %v1185_v25 = vsel %vm5668_vm9, %v4759_v52, %v1184_v60  ;;  %3552 = vst.msk [vmem:[#allocation6 + $0xc8] sm:$0xf] %vm897_vm0, %v3544_v53  ;;  %v3611_v59 = vor.u32 %v3610_v61, %v3607_v46  ;;  %v2068_v52 = vld [vmem:[#allocation2 + $0x58] sm:$0xf]  ;;  %v2542_v21 = vrot.slane %v2540_v1, 5  ;;  %v2546_v60 = vshll.u32 %v2437_v63, 16 }
 0x1e8   : > { %1273 = vst.msk [vmem:[#allocation6 + $0xcc] sm:$0xf] %vm897_vm0, %v1185_v25  ;;  %v2530_v57 = vrot.slane %v2529_v12, 4  ;;  %v3565_v43 = vld [vmem:[#allocation2 + $0x38] sm:$0x1]  ;;  %v5329_v12 = vpack.i.bf16 %v6007_v39, %v6011_v28 }
 0x1e9   : > { %v5981_v29 = vpop.permute.xlu0 %5280  ;;  %v3612_v35 = vrot.slane %v3611_v59, 4  ;;  %v3614_v20 = vshll.u32 %v3565_v43, 16  ;;  %v1400_v46 = vld [vmem:[#allocation2 + $0x64] sm:$0xf]  ;;  %v1441_v53 = vld [vmem:[#allocation3 + $0x10] sm:$0xf] }
 0x1ea   : > { %2558 = vrot.lane.b32.xlu1 %v2507_v56, %s5375_s16  ;;  %v2539_v56 = vrot.slane %v2537_v48, 4  ;;  %v2548_v45 = vrot.slane %v2546_v60, 5  ;;  %v1910_v0 = vld [vmem:[#allocation3 + $0x10] sm:$0xf]  ;;  %v1148_v59 = vld [vmem:[#allocation3 + $0x24] sm:$0x8] }
 0x1eb   : > { %2086 = vrot.lane.b32.xlu0 %v2066_v5, %s5377_s22  ;;  %v2535_v5 = vsel %vm5524_vm4, %v2530_v57, %v2534_v22  ;;  %v3616_v31 = vrot.slane %v3614_v20, 5  ;;  %v1911_v43 = vld [vmem:[#allocation3 + $0x18] sm:$0x8]  ;;  %v1934_v60 = vshll.u32 %v1910_v0, 16 }
 0x1ec   : > { %v2543_v24 = vor.u32 %v2542_v21, %v2539_v56  ;;  %v1939_v20 = vshrl.u32 %v1911_v43, 16 }
 0x1ed   : > { %2092 = vrot.lane.b32.xlu2 %v2069_v6, %s5377_s22  ;;  %v3617_v17 = vsel %vm5524_vm4, %v3612_v35, %v3616_v31  ;;  %v2374_v35 = vld [vmem:[#allocation3 + $0x10] sm:$0xf] }
 0x1ee   : > { %3698 = vst.msk [vmem:[#allocation6 + $0x140] sm:$0xf] %vm897_vm0, %v3617_v17 }
 0x1f1   : > { %v5286_v30 = vpop.permute.xlu0 %5285  ;;  %v6002_v33 = vpop.permute.xlu2 %5300 }
 0x1f2   : > { %v5288_v32 = vunpack.i.h.bf16 %v5286_v30  ;;  %v5287_v42 = vunpack.i.l.bf16 %v5286_v30  ;;  %2090 = vrot.lane.b32.xlu1 %v2068_v52, %s5377_s22  ;;  %v1909_v30 = vld [vmem:[#allocation3 + $0xc] sm:$0x8]  ;;  %v2991_v52 = vld [vmem:[#allocation3 + $0x18] sm:$0x8] }
 0x1f3   : > { %1421 = vrot.lane.b32.xlu0 %v1399_v44, %s5375_s16 }
 0x1f4   : > { %v843_v4 = vmax.f32 %v5806_v50, %v5288_v32  ;;  %v842_v9 = vmax.f32 %v5810_v54, %v5287_v42  ;;  %v5283_v50 = vunpack.i.h.bf16 %v5981_v29  ;;  %v5282_v54 = vunpack.i.l.bf16 %v5981_v29 }
 0x1f5   : > { %2562 = vrot.lane.b32.xlu2 %v2535_v5, %s5375_s16  ;;  %v2544_v29 = vrot.slane %v2543_v24, 4  ;;  %v1931_v42 = vshrl.u32 %v1910_v0, 16  ;;  %v1187_v5 = vshrl.u32 %v1148_v59, 16 }
 0x1f6   : > { %v875_v6 = vpack.c.bf16 %v843_v4, %v843_v4  ;;  %v874_v18 = vpack.c.bf16 %v842_v9, %v842_v9  ;;  %v6035_v57 = vmax.f32 %v537_v7, %v5283_v50  ;;  %v6039_v22 = vmax.f32 %v536_v49, %v5282_v54  ;;  %v6057_v54 = vld [vmem:[#allocation3 + $0x1c] sm:$0xf] }
 0x1f7   : > { %v2549_v34 = vsel %vm5524_vm4, %v2544_v29, %v2548_v45  ;;  %v1926_v49 = vshrl.u32 %v1909_v30, 16  ;;  %v3008_v4 = vshrl.u32 %v2991_v52, 16  ;;  %v1933_v63 = vrot.slane %v1931_v42, 7  ;;  %v1442_v45 = vld [vmem:[#allocation3 + $0x1c] sm:$0xf] }
 0x1f8   : > { %940 = vst.msk [vmem:[#allocation3 + $0x34] sm:$0xf] %vm897_vm0, %v875_v6  ;;  %v5334_v51 = vpack.i.bf16 %v6035_v57, %v6039_v22  ;;  %v4760_v6 = vrot.slane %v1187_v5, 11  ;;  %v1944_v0 = vshrl.u32 %v6057_v54, 16  ;;  %v1154_v5 = vld [vmem:[#allocation3 + $0x48] sm:$0x8] }
 0x1f9   : > { %939 = vst.msk [vmem:[#allocation3 + $0x28] sm:$0xf] %vm897_vm0, %v874_v18  ;;  %v6025_v10 = vpop.permute.xlu1 %5290  ;;  %v4766_v17 = vrot.slane %v1926_v49, 11 }
 0x1fa   : > { %v5306_v61 = vpop.permute.xlu2 %5305  ;;  %1423 = vrot.lane.b32.xlu1 %v1400_v46, %s5375_s16  ;;  %v6059_v46 = vrot.slane %v3008_v4, 11  ;;  %v1156_v4 = vld [vmem:[#allocation3 + $0x54] sm:$0x8] }
 0x1fb   : > { %5330 = vrot.lane.b32.xlu0 %v5329_v12, %s5377_s22  ;;  %v5308_v16 = vunpack.i.h.bf16 %v5306_v61  ;;  %v5307_v25 = vunpack.i.l.bf16 %v5306_v61 }
 0x1fd   : > { %1457 = vrot.lane.b32.xlu2 %v1441_v53, %s5375_s16  ;;  %v847_v48 = vmax.f32 %v5856_v11, %v5308_v16  ;;  %v846_v1 = vmax.f32 %v5860_v14, %v5307_v25  ;;  %v6050_v14 = vld [vmem:[#allocation3 + $0x1c] sm:$0xf]  ;;  %v1150_v16 = vld [vmem:[#allocation3 + $0x30] sm:$0x8] }
 0x1fe   : > { %v3013_v50 = vshrl.u32 %v6050_v14, 16  ;;  %v1200_v52 = vshrl.u32 %v1150_v16, 16 }
 0x1ff   : > { %v879_v44 = vpack.c.bf16 %v847_v48, %v847_v48  ;;  %v878_v32 = vpack.c.bf16 %v846_v1, %v846_v1  ;;  %v2329_v25 = vld [vmem:[#allocation3 + $0x34] sm:$0xf]  ;;  %v1936_v48 = vor.u32 %v1934_v60, %v1933_v63  ;;  %v6061_v1 = vrot.slane %v1939_v20, 11 }
 0x200   : > { %v1149_v7 = vld [vmem:[#allocation3 + $0x28] sm:$0xf]  ;;  %2337 = vst.msk [vmem:[#allocation6 + $0x88] sm:$0xf] %vm897_vm0, %v2329_v25  ;;  %v1151_v30 = vld [vmem:[#allocation3 + $0x34] sm:$0xf] }
 0x201   : > { %944 = vst.msk [vmem:[#allocation3 + $0x64] sm:$0xf] %vm897_vm0, %v879_v44  ;;  %v1192_v9 = vshrl.u32 %v1149_v7, 16  ;;  %v1195_v31 = vshll.u32 %v1149_v7, 16  ;;  %v6068_v44 = vld [vmem:[#allocation2 + $0x40] sm:$0xf] }
 0x202   : > { %943 = vst.msk [vmem:[#allocation3 + $0x58] sm:$0xf] %vm897_vm0, %v878_v32  ;;  %v5296_v11 = vpop.permute.xlu1 %5295  ;;  %5335 = vrot.lane.b32.xlu1 %v5334_v51, %s5377_s22  ;;  %v1443_v32 = vld [vmem:[#allocation3 + $0x28] sm:$0xf]  ;;  %v3015_v42 = vrot.slane %v3013_v50, 7  ;;  %v1937_v51 = vsel %vm5668_vm9, %v4766_v17, %v1936_v48  ;;  %v1205_v49 = vshrl.u32 %v1151_v30, 16 }
 0x203   : > { %2564 = vrot.lane.b32.xlu0 %v2549_v34, %s5375_s16  ;;  %v5298_v56 = vunpack.i.h.bf16 %v5296_v11  ;;  %v5297_v21 = vunpack.i.l.bf16 %v5296_v11  ;;  %v1194_v18 = vrot.slane %v1192_v9, 7  ;;  %v1914_v43 = vld [vmem:[#allocation3 + $0x28] sm:$0xf]  ;;  %v1158_v9 = vld [vmem:[#allocation3 + $0x60] sm:$0x8]  ;;  %v1208_v63 = vshll.u32 %v1151_v30, 16 }
 0x204   : > { %v2328_v7 = vld [vmem:[#allocation3 + $0x28] sm:$0xf]  ;;  %v3619_v20 = vshrl.u32 %v6068_v44, 16  ;;  %v1946_v50 = vrot.slane %v1944_v0, 7  ;;  %v1152_v17 = vld [vmem:[#allocation3 + $0x3c] sm:$0x8] }
 0x205   : > { %2390 = vrot.lane.b32.xlu2 %v2374_v35, %s5375_s16  ;;  %v845_v12 = vmax.f32 %v5830_v62, %v5298_v56  ;;  %v844_v24 = vmax.f32 %v5834_v36, %v5297_v21  ;;  %v1197_v61 = vor.u32 %v1195_v31, %v1194_v18  ;;  %v3016_v62 = vshll.u32 %v6050_v14, 16  ;;  %v1913_v36 = vld [vmem:[#allocation3 + $0x24] sm:$0x8]  ;;  %2336 = vst.msk [vmem:[#allocation6 + $0x7c] sm:$0xf] %vm897_vm0, %v2328_v7 }
 0x206   : > { %v1952_v34 = vshrl.u32 %v1913_v36, 16  ;;  %v1957_v56 = vshrl.u32 %v1914_v43, 16  ;;  %v4761_v21 = vrot.slane %v1200_v52, 11  ;;  %v1207_v35 = vrot.slane %v1205_v49, 7  ;;  %v2376_v16 = vld [vmem:[#allocation3 + $0x28] sm:$0xf] }
 0x207   : > { %v877_v53 = vpack.c.bf16 %v845_v12, %v845_v12  ;;  %v876_v29 = vpack.c.bf16 %v844_v24, %v844_v24  ;;  %v1198_v59 = vsel %vm5668_vm9, %v4760_v6, %v1197_v61  ;;  %v3622_v6 = vshll.u32 %v6068_v44, 16  ;;  %v2375_v12 = vld [vmem:[#allocation3 + $0x1c] sm:$0xf]  ;;  %v2994_v30 = vld [vmem:[#allocation3 + $0x28] sm:$0xf] }
 0x208   : > { %1274 = vst.msk [vmem:[#allocation6 + $0xd8] sm:$0xf] %vm897_vm0, %v1198_v59  ;;  %v1947_v18 = vshll.u32 %v6057_v54, 16  ;;  %v1226_v31 = vshrl.u32 %v1154_v5, 16  ;;  %v3018_v24 = vor.u32 %v3016_v62, %v3015_v42  ;;  %v4768_v60 = vrot.slane %v1952_v34, 11 }
 0x209   : > { %942 = vst.msk [vmem:[#allocation3 + $0x4c] sm:$0xf] %vm897_vm0, %v877_v53  ;;  %v2332_v14 = vld [vmem:[#allocation3 + $0x58] sm:$0xf]  ;;  %v1210_v61 = vor.u32 %v1208_v63, %v1207_v35  ;;  %v1239_v53 = vshrl.u32 %v1156_v4, 16  ;;  %v1960_v48 = vshll.u32 %v1914_v43, 16  ;;  %v5293_v44 = vunpack.i.h.bf16 %v6025_v10 }
 0x20a   : > { %941 = vst.msk [vmem:[#allocation3 + $0x40] sm:$0xf] %vm897_vm0, %v876_v29  ;;  %1461 = vrot.lane.b32.xlu1 %v1443_v32, %s5375_s16  ;;  %v1252_v29 = vshrl.u32 %v1158_v9, 16  ;;  %v1157_v54 = vld [vmem:[#allocation3 + $0x58] sm:$0xf]  ;;  %v4763_v32 = vrot.slane %v1226_v31, 11  ;;  %v3019_v0 = vsel %vm5668_vm9, %v6059_v46, %v3018_v24 }
 0x20b   : > { %1459 = vrot.lane.b32.xlu0 %v1442_v45, %s5375_s16  ;;  %v6078_v11 = vpop.permute.xlu2 %2080  ;;  %2340 = vst.msk [vmem:[#allocation6 + $0xac] sm:$0xf] %vm897_vm0, %v2332_v14  ;;  %v1959_v45 = vrot.slane %v1957_v56, 7  ;;  %v1211_v59 = vsel %vm5668_vm9, %v4761_v21, %v1210_v61  ;;  %v1213_v42 = vshrl.u32 %v1152_v17, 16  ;;  %v1159_v43 = vld [vmem:[#allocation3 + $0x64] sm:$0xf] }
 0x20c   : > { %1275 = vst.msk [vmem:[#allocation6 + $0xe4] sm:$0xf] %vm897_vm0, %v1211_v59  ;;  %v4764_v49 = vrot.slane %v1239_v53, 11  ;;  %v1244_v7 = vshrl.u32 %v1157_v54, 16  ;;  %v2993_v4 = vld [vmem:[#allocation3 + $0x24] sm:$0x8] }
 0x20d   : > { %2029 = vrot.lane.b32.xlu2 %v1937_v51, %s5377_s22  ;;  %v1949_v51 = vor.u32 %v1947_v18, %v1946_v50  ;;  %v1962_v14 = vor.u32 %v1960_v48, %v1959_v45  ;;  %v3026_v9 = vshrl.u32 %v2994_v30, 16  ;;  %v4762_v63 = vrot.slane %v1213_v42, 11  ;;  %v2333_v61 = vld [vmem:[#allocation3 + $0x64] sm:$0xf]  ;;  %v1444_v42 = vld [vmem:[#allocation3 + $0x34] sm:$0xf] }
 0x20e   : > { %v1246_v31 = vrot.slane %v1244_v7, 7  ;;  %v1257_v24 = vshrl.u32 %v1159_v43, 16  ;;  %v1260_v45 = vshll.u32 %v1159_v43, 16  ;;  %2341 = vst.msk [vmem:[#allocation6 + $0xb8] sm:$0xf] %vm897_vm0, %v2333_v61  ;;  %v3624_v43 = vrot.slane %v3622_v6, 5 }
 0x20f   : > { %v1950_v48 = vsel %vm5668_vm9, %v6061_v1, %v1949_v51  ;;  %v3028_v59 = vrot.slane %v3026_v9, 7  ;;  %v5292_v6 = vunpack.i.l.bf16 %v6025_v10  ;;  %v6135_v61 = vmax.f32 %v539_v13, %v5293_v44 }
 0x210   : > { %v1155_v25 = vld [vmem:[#allocation3 + $0x4c] sm:$0xf]  ;;  %v1259_v53 = vrot.slane %v1257_v24, 7 }
 0x211   : > { %v1231_v36 = vshrl.u32 %v1155_v25, 16  ;;  %v2331_v62 = vld [vmem:[#allocation3 + $0x4c] sm:$0xf]  ;;  %v1234_v5 = vshll.u32 %v1155_v25, 16  ;;  %v1153_v34 = vld [vmem:[#allocation3 + $0x40] sm:$0xf] }
 0x212   : > { %2394 = vrot.lane.b32.xlu1 %v2376_v16, %s5375_s16  ;;  %2339 = vst.msk [vmem:[#allocation6 + $0xa0] sm:$0xf] %vm897_vm0, %v2331_v62  ;;  %v1218_v21 = vshrl.u32 %v1153_v34, 16  ;;  %v2330_v35 = vld [vmem:[#allocation3 + $0x40] sm:$0xf]  ;;  %v1221_v17 = vshll.u32 %v1153_v34, 16 }
 0x213   : > { %2392 = vrot.lane.b32.xlu0 %v2375_v12, %s5375_s16  ;;  %v1233_v52 = vrot.slane %v1231_v36, 7  ;;  %2338 = vst.msk [vmem:[#allocation6 + $0x94] sm:$0xf] %vm897_vm0, %v2330_v35  ;;  %v1247_v12 = vshll.u32 %v1157_v54, 16  ;;  %v4765_v25 = vrot.slane %v1252_v29, 11  ;;  %v3021_v36 = vshrl.u32 %v2993_v4, 16 }
 0x214   : > { %v1220_v50 = vrot.slane %v1218_v21, 7  ;;  %v1262_v29 = vor.u32 %v1260_v45, %v1259_v53  ;;  %v1446_v21 = vld [vmem:[#allocation3 + $0x4c] sm:$0xf]  ;;  %v2377_v35 = vld [vmem:[#allocation3 + $0x34] sm:$0xf] }
 0x215   : > { %3111 = vrot.lane.b32.xlu2 %v3019_v0, %s5376_s21  ;;  %v1236_v56 = vor.u32 %v1234_v5, %v1233_v52  ;;  %v1249_v16 = vor.u32 %v1247_v12, %v1246_v31  ;;  %v3029_v0 = vshll.u32 %v2994_v30, 16  ;;  %v3568_v52 = vld [vmem:[#allocation2 + $0x4c] sm:$0xf]  ;;  %v3621_v5 = vrot.slane %v3619_v20, 4  ;;  %v3547_v24 = vld [vmem:[#allocation3 + $0x40] sm:$0xf] }
 0x216   : > { %v1223_v54 = vor.u32 %v1221_v17, %v1220_v50  ;;  %v4791_v30 = vrot.slane %v3021_v36, 11  ;;  %v3633_v7 = vshrl.u32 %v3568_v52, 16  ;;  %v3636_v4 = vshll.u32 %v3568_v52, 16  ;;  %v3548_v45 = vld [vmem:[#allocation3 + $0x4c] sm:$0xf] }
 0x217   : > { %v2551_v46 = vpop.permute.xlu2 %2550  ;;  %v1237_v18 = vsel %vm5668_vm9, %v4763_v32, %v1236_v56  ;;  %v1963_v32 = vsel %vm5668_vm9, %v4768_v60, %v1962_v14  ;;  %v1250_v62 = vsel %vm5668_vm9, %v4764_v49, %v1249_v16  ;;  %v1263_v60 = vsel %vm5668_vm9, %v4765_v25, %v1262_v29  ;;  %v3567_v49 = vld [vmem:[#allocation2 + $0x44] sm:$0x1]  ;;  %v3545_v14 = vld [vmem:[#allocation3 + $0x28] sm:$0xf]  ;;  %3555 = vst.msk [vmem:[#allocation6 + $0xec] sm:$0xf] %vm897_vm0, %v3547_v24 }
 0x218   : > { %2574 = vst.msk [vmem:[#allocation6 + $0x64] sm:$0xf] %vm1336_vm5, %v2551_v46  ;;  %v1224_v1 = vsel %vm5668_vm9, %v4762_v63, %v1223_v54  ;;  %v3031_v51 = vor.u32 %v3029_v0, %v3028_v59  ;;  %v3625_v9 = vor.u32 %v3624_v43, %v3621_v5  ;;  %v3628_v20 = vshll.u32 %v3567_v49, 16  ;;  %v1916_v46 = vld [vmem:[#allocation3 + $0x34] sm:$0xf] }
 0x219   : > { %1277 = vst.msk [vmem:[#allocation6 + $0xfc] sm:$0xf] %vm897_vm0, %v1237_v18  ;;  %v3546_v63 = vld [vmem:[#allocation3 + $0x34] sm:$0xf]  ;;  %v3635_v18 = vrot.slane %v3633_v7, 4  ;;  %v3638_v50 = vrot.slane %v3636_v4, 5  ;;  %v6139_v16 = vmax.f32 %v538_v19, %v5292_v6  ;;  %v5302_v49 = vunpack.i.l.bf16 %v6002_v33 }
 0x21a   : > { %2033 = vrot.lane.b32.xlu1 %v1963_v32, %s5377_s22  ;;  %1278 = vst.msk [vmem:[#allocation6 + $0x108] sm:$0xf] %vm897_vm0, %v1250_v62  ;;  %v3032_v56 = vsel %vm5668_vm9, %v4791_v30, %v3031_v51  ;;  %v3626_v17 = vrot.slane %v3625_v9, 4  ;;  %v3630_v10 = vrot.slane %v3628_v20, 5  ;;  %v1970_v53 = vshrl.u32 %v1916_v46, 16 }
 0x21b   : > { %2031 = vrot.lane.b32.xlu0 %v1950_v48, %s5377_s22  ;;  %1276 = vst.msk [vmem:[#allocation6 + $0xf0] sm:$0xf] %vm897_vm0, %v1224_v1  ;;  %v3549_v48 = vld [vmem:[#allocation3 + $0x58] sm:$0xf]  ;;  %v3550_v36 = vld [vmem:[#allocation3 + $0x64] sm:$0xf]  ;;  %v3639_v13 = vor.u32 %v3638_v50, %v3635_v18  ;;  %v5339_v32 = vpack.i.bf16 %v6135_v61, %v6139_v16  ;;  %v5303_v30 = vunpack.i.h.bf16 %v6002_v33 }
 0x21c   : > { %1279 = vst.msk [vmem:[#allocation6 + $0x114] sm:$0xf] %vm897_vm0, %v1263_v60  ;;  %v1915_v59 = vld [vmem:[#allocation3 + $0x30] sm:$0x8]  ;;  %v1445_v54 = vld [vmem:[#allocation3 + $0x40] sm:$0xf]  ;;  %v3631_v55 = vsel %vm5524_vm4, %v3626_v17, %v3630_v10 }
 0x21d   : > { %1463 = vrot.lane.b32.xlu2 %v1444_v42, %s5375_s16  ;;  %3553 = vst.msk [vmem:[#allocation6 + $0xd4] sm:$0xf] %vm897_vm0, %v3545_v14  ;;  %v2379_v19 = vld [vmem:[#allocation3 + $0x4c] sm:$0xf]  ;;  %v1965_v62 = vshrl.u32 %v1915_v59, 16  ;;  %v1972_v29 = vrot.slane %v1970_v53, 7 }
 0x21e   : > { %3554 = vst.msk [vmem:[#allocation6 + $0xe0] sm:$0xf] %vm897_vm0, %v3546_v63  ;;  %v1918_v42 = vld [vmem:[#allocation3 + $0x40] sm:$0xf]  ;;  %v3569_v52 = vld [vmem:[#allocation2 + $0x50] sm:$0x1] }
 0x21f   : > { %v1414_v34 = vpop.permute.xlu2 %1413  ;;  %3556 = vst.msk [vmem:[#allocation6 + $0xf8] sm:$0xf] %vm897_vm0, %v3548_v45  ;;  %v3640_v60 = vrot.slane %v3639_v13, 4  ;;  %v1973_v5 = vshll.u32 %v1916_v46, 16  ;;  %v3642_v43 = vshll.u32 %v3569_v52, 16  ;;  %v4769_v7 = vrot.slane %v1965_v62, 11 }
 0x220   : > { %1435 = vst.msk [vmem:[#allocation6 + $0xd8] sm:$0xf] %vm1336_vm5, %v1414_v34  ;;  %v1983_v34 = vshrl.u32 %v1918_v42, 16  ;;  %v1917_v4 = vld [vmem:[#allocation3 + $0x3c] sm:$0x8]  ;;  %v7238_v33 = vmax.f32 %v5844_v3, 0.0 }
 0x221   : > { %3557 = vst.msk [vmem:[#allocation6 + $0x104] sm:$0xf] %vm897_vm0, %v3549_v48  ;;  %v1975_v14 = vor.u32 %v1973_v5, %v1972_v29  ;;  %v3644_v9 = vrot.slane %v3642_v43, 5  ;;  %v2378_v44 = vld [vmem:[#allocation3 + $0x40] sm:$0xf]  ;;  %v1978_v46 = vshrl.u32 %v1917_v4, 16 }
 0x222   : > { %1467 = vrot.lane.b32.xlu1 %v1446_v21, %s5375_s16  ;;  %3558 = vst.msk [vmem:[#allocation6 + $0x110] sm:$0xf] %vm897_vm0, %v3550_v36  ;;  %v1920_v6 = vld [vmem:[#allocation3 + $0x4c] sm:$0xf]  ;;  %v1985_v63 = vrot.slane %v1983_v34, 7  ;;  %v7240_v17 = vmax.f32 %v5879_v58, 0.0 }
 0x223   : > { %3113 = vrot.lane.b32.xlu0 %v3032_v56, %s5376_s21  ;;  %3699 = vst.msk [vmem:[#allocation6 + $0x14c] sm:$0xf] %vm897_vm0, %v3631_v55  ;;  %v3645_v21 = vsel %vm5524_vm4, %v3640_v60, %v3644_v9  ;;  %v1976_v18 = vsel %vm5668_vm9, %v4769_v7, %v1975_v14  ;;  %v1924_v50 = vld [vmem:[#allocation3 + $0x64] sm:$0xf]  ;;  %v7241_v53 = vmax.f32 %v5876_v15, 0.0  ;;  %v1986_v48 = vshll.u32 %v1918_v42, 16 }
 0x224   : > { %v2079_v31 = vpop.permute.xlu1 %2078  ;;  %3700 = vst.msk [vmem:[#allocation6 + $0x158] sm:$0xf] %vm897_vm0, %v3645_v21  ;;  %v1996_v36 = vshrl.u32 %v1920_v6, 16  ;;  %v1919_v13 = vld [vmem:[#allocation3 + $0x48] sm:$0x8]  ;;  %v4770_v55 = vrot.slane %v1978_v46, 11 }
 0x225   : > { %2396 = vrot.lane.b32.xlu2 %v2377_v35, %s5375_s16  ;;  %v1410_v12 = vpop.permute.xlu0 %1409  ;;  %2102 = vst.msk [vmem:[#allocation6 + $0x60] sm:$0xf] %vm2053_vm11, %v2079_v31  ;;  %v2380_v35 = vld [vmem:[#allocation3 + $0x58] sm:$0xf]  ;;  %v6167_v31 = vmax.f32 %v7238_v33, %v5303_v30  ;;  %v2022_v58 = vshrl.u32 %v1924_v50, 16  ;;  %v1991_v52 = vshrl.u32 %v1919_v13, 16 }
 0x226   : > { %1433 = vst.msk [vmem:[#allocation6 + $0xc0] sm:$0xf] %vm1336_vm5, %v1410_v12  ;;  %v7239_v12 = vmax.f32 %v5837_v40, 0.0  ;;  %v1998_v60 = vrot.slane %v1996_v36, 7  ;;  %v1922_v34 = vld [vmem:[#allocation3 + $0x58] sm:$0xf] }
 0x227   : > { %v6142_v25 = vpop.permute.xlu2 %2082  ;;  %v1999_v4 = vshll.u32 %v1920_v6, 16  ;;  %v4771_v9 = vrot.slane %v1991_v52, 11  ;;  %v2009_v46 = vshrl.u32 %v1922_v34, 16 }
 0x228   : > { %v6171_v24 = vmax.f32 %v7239_v12, %v5302_v49 }
 0x229   : > { %v2001_v21 = vor.u32 %v1999_v4, %v1998_v60 }
 0x22a   : > { %2400 = vrot.lane.b32.xlu1 %v2379_v19, %s5375_s16  ;;  %v1988_v19 = vor.u32 %v1986_v48, %v1985_v63  ;;  %v2011_v48 = vrot.slane %v2009_v46, 7 }
 0x22b   : > { %1465 = vrot.lane.b32.xlu0 %v1445_v54, %s5375_s16 }
 0x22c   : > { %v1412_v0 = vpop.permute.xlu1 %1411  ;;  %v1989_v14 = vsel %vm5668_vm9, %v4770_v55, %v1988_v19 }
 0x22d   : > { %5340 = vrot.lane.b32.xlu2 %v5339_v32, %s5377_s22  ;;  %v5311_v1 = vpop.permute.xlu0 %5310  ;;  %1434 = vst.msk [vmem:[#allocation6 + $0xcc] sm:$0xf] %vm1336_vm5, %v1412_v0  ;;  %v1923_v0 = vld [vmem:[#allocation3 + $0x60] sm:$0x8] }
 0x22e   : > { %v5313_v56 = vunpack.i.h.bf16 %v5311_v1  ;;  %v5312_v20 = vunpack.i.l.bf16 %v5311_v1  ;;  %v5344_v1 = vpack.i.bf16 %v6167_v31, %v6171_v24 }
 0x22f   : > { %v1420_v51 = vpop.permute.xlu2 %1419 }
 0x230   : > { %1438 = vst.msk [vmem:[#allocation6 + $0xfc] sm:$0xf] %vm1336_vm5, %v1420_v51  ;;  %v6178_v10 = vmax.f32 %v7240_v17, %v5313_v56  ;;  %v6182_v45 = vmax.f32 %v7241_v53, %v5312_v20  ;;  %v2025_v56 = vshll.u32 %v1924_v50, 16 }
 0x232   : > { %2402 = vrot.lane.b32.xlu1 %v2380_v35, %s5375_s16  ;;  %v5349_v42 = vpack.i.bf16 %v6178_v10, %v6182_v45  ;;  %v1921_v35 = vld [vmem:[#allocation3 + $0x54] sm:$0x8] }
 0x233   : > { %2398 = vrot.lane.b32.xlu0 %v2378_v44, %s5375_s16  ;;  %v2004_v50 = vshrl.u32 %v1921_v35, 16 }
 0x234   : > { %v6185_v3 = vpop.permute.xlu1 %3304 }
 0x235   : > { %2035 = vrot.lane.b32.xlu2 %v1976_v18, %s5377_s22  ;;  %v5316_v40 = vpop.permute.xlu0 %5315 }
 0x236   : > { %v5318_v59 = vunpack.i.h.bf16 %v5316_v40  ;;  %v5317_v23 = vunpack.i.l.bf16 %v5316_v40  ;;  %v2002_v40 = vsel %vm5668_vm9, %v4771_v9, %v2001_v21  ;;  %v6229_v21 = vld [vmem:[#allocation2 + $0x58] sm:$0xf] }
 0x237   : > { %v5326_v54 = vpop.permute.xlu2 %5325 }
 0x238   : > { %v849_v32 = vmax.f32 %v5898_v27, %v5318_v59  ;;  %v848_v15 = vmax.f32 %v5905_v37, %v5317_v23  ;;  %v5328_v62 = vunpack.i.h.bf16 %v5326_v54  ;;  %v5327_v29 = vunpack.i.l.bf16 %v5326_v54  ;;  %v1447_v59 = vld [vmem:[#allocation3 + $0x58] sm:$0xf] }
 0x239   : > { %v2017_v27 = vshrl.u32 %v1923_v0, 16  ;;  %v2024_v37 = vrot.slane %v2022_v58, 7  ;;  %v4772_v54 = vrot.slane %v2004_v50, 11 }
 0x23a   : > { %v881_v5 = vpack.c.bf16 %v849_v32, %v849_v32  ;;  %v880_v43 = vpack.c.bf16 %v848_v15, %v848_v15  ;;  %v853_v30 = vmax.f32 %v5954_v38, %v5328_v62  ;;  %v852_v51 = vmax.f32 %v5958_v26, %v5327_v29  ;;  %5350 = vrot.lane.b32.xlu1 %v5349_v42, %s5377_s22 }
 0x23b   : > { %5345 = vrot.lane.b32.xlu0 %v5344_v1, %s5377_s22  ;;  %v4773_v33 = vrot.slane %v2017_v27, 11  ;;  %v2027_v6 = vor.u32 %v2025_v56, %v2024_v37  ;;  %v3401_v27 = vld [vmem:[#allocation4 + $0x14] sm:$0x1]  ;;  %v3403_v37 = vld [vmem:[#allocation4 + $0x20] sm:$0x1] }
 0x23c   : > { %960 = vst.msk [vmem:[#allocation4 + $0x1c] sm:$0xf] %vm897_vm0, %v881_v5  ;;  %v885_v49 = vpack.c.bf16 %v853_v30, %v853_v30  ;;  %v884_v7 = vpack.c.bf16 %v852_v51, %v852_v51  ;;  %v5321_v38 = vpop.permute.xlu1 %5320 }
 0x23d   : > { %959 = vst.msk [vmem:[#allocation4 + $0x10] sm:$0xf] %vm897_vm0, %v880_v43  ;;  %2037 = vrot.lane.b32.xlu2 %v1989_v14, %s5377_s22  ;;  %v2553_v26 = vpop.permute.xlu0 %2552  ;;  %v5323_v20 = vunpack.i.h.bf16 %v5321_v38  ;;  %v5322_v44 = vunpack.i.l.bf16 %v5321_v38  ;;  %v2028_v36 = vsel %vm5668_vm9, %v4773_v33, %v2027_v6  ;;  %v2381_v43 = vld [vmem:[#allocation3 + $0x64] sm:$0xf] }
 0x23e   : > { %964 = vst.msk [vmem:[#allocation4 + $0x4c] sm:$0xf] %vm897_vm0, %v885_v49 }
 0x23f   : > { %963 = vst.msk [vmem:[#allocation4 + $0x40] sm:$0xf] %vm897_vm0, %v884_v7  ;;  %v2561_v63 = vpop.permute.xlu2 %2560  ;;  %v851_v12 = vmax.f32 %v5919_v8, %v5323_v20  ;;  %v850_v18 = vmax.f32 %v5923_v41, %v5322_v44  ;;  %v2012_v41 = vshll.u32 %v1922_v34, 16 }
 0x240   : > { %2575 = vst.msk [vmem:[#allocation6 + $0x70] sm:$0xf] %vm1336_vm5, %v2553_v26 }
 0x241   : > { %2579 = vst.msk [vmem:[#allocation6 + $0xa0] sm:$0xf] %vm1336_vm5, %v2561_v63  ;;  %v883_v17 = vpack.c.bf16 %v851_v12, %v851_v12  ;;  %v882_v53 = vpack.c.bf16 %v850_v18, %v850_v18  ;;  %v2014_v55 = vor.u32 %v2012_v41, %v2011_v48  ;;  %v3426_v63 = vshll.u32 %v3401_v27, 16  ;;  %v1448_v12 = vld [vmem:[#allocation3 + $0x64] sm:$0xf] }
 0x242   : > { %2043 = vrot.lane.b32.xlu1 %v2028_v36, %s5377_s22  ;;  %v3440_v18 = vshll.u32 %v3403_v37, 16 }
 0x243   : > { %2039 = vrot.lane.b32.xlu0 %v2002_v40, %s5377_s22  ;;  %962 = vst.msk [vmem:[#allocation4 + $0x34] sm:$0xf] %vm897_vm0, %v883_v17  ;;  %v3402_v19 = vld [vmem:[#allocation4 + $0x1c] sm:$0xf]  ;;  %v2015_v0 = vsel %vm5668_vm9, %v4772_v54, %v2014_v55  ;;  %v6232_v17 = vld [vmem:[#allocation4 + $0x2c] sm:$0x1] }
 0x244   : > { %v3400_v8 = vld [vmem:[#allocation4 + $0x10] sm:$0xf]  ;;  %961 = vst.msk [vmem:[#allocation4 + $0x28] sm:$0xf] %vm897_vm0, %v882_v53  ;;  %v1418_v13 = vpop.permute.xlu1 %1417  ;;  %v3431_v62 = vshrl.u32 %v3402_v19, 16  ;;  %v3434_v29 = vshll.u32 %v3402_v19, 16 }
 0x245   : > { %1469 = vrot.lane.b32.xlu2 %v1447_v59, %s5375_s16  ;;  %v1416_v23 = vpop.permute.xlu0 %1415  ;;  %v3417_v58 = vshrl.u32 %v3400_v8, 16  ;;  %v3420_v32 = vshll.u32 %v3400_v8, 16  ;;  %1437 = vst.msk [vmem:[#allocation6 + $0xf0] sm:$0xf] %vm1336_vm5, %v1418_v13  ;;  %v2942_v60 = vld [vmem:[#allocation4 + $0x10] sm:$0xf] }
 0x246   : > { %1436 = vst.msk [vmem:[#allocation6 + $0xe4] sm:$0xf] %vm1336_vm5, %v1416_v23  ;;  %v3408_v30 = vld [vmem:[#allocation4 + $0x40] sm:$0xf]  ;;  %v3433_v34 = vrot.slane %v3431_v62, 4  ;;  %v3436_v49 = vrot.slane %v3434_v29, 5 }
 0x247   : > { %v6218_v15 = vpop.permute.xlu2 %2092  ;;  %v3419_v1 = vrot.slane %v3417_v58, 4  ;;  %v3422_v42 = vrot.slane %v3420_v32, 5  ;;  %v3410_v7 = vld [vmem:[#allocation4 + $0x4c] sm:$0xf]  ;;  %v3473_v35 = vshrl.u32 %v3408_v30, 16  ;;  %v3476_v46 = vshll.u32 %v3408_v30, 16 }
 0x248   : > { %v3487_v33 = vshrl.u32 %v3410_v7, 16  ;;  %v3490_v6 = vshll.u32 %v3410_v7, 16  ;;  %v3437_v48 = vor.u32 %v3436_v49, %v3433_v34  ;;  %v1298_v41 = vld [vmem:[#allocation4 + $0x1c] sm:$0xf]  ;;  %v3428_v19 = vrot.slane %v3426_v63, 5 }
 0x249   : > { %v3423_v44 = vor.u32 %v3422_v42, %v3419_v1  ;;  %v3475_v13 = vrot.slane %v3473_v35, 4  ;;  %v3478_v54 = vrot.slane %v3476_v46, 5  ;;  %v2943_v55 = vld [vmem:[#allocation4 + $0x1c] sm:$0xf]  ;;  %v3647_v58 = vshrl.u32 %v6229_v21, 16 }
 0x24a   : > { %v3406_v52 = vld [vmem:[#allocation4 + $0x34] sm:$0xf]  ;;  %2958 = vrot.lane.b32.xlu1 %v2942_v60, %s5376_s21  ;;  %v3650_v32 = vshll.u32 %v6229_v21, 16  ;;  %v3489_v62 = vrot.slane %v3487_v33, 4  ;;  %v3492_v29 = vrot.slane %v3490_v6, 5  ;;  %v1609_v60 = vshll.u32 %v6232_v17, 16 }
 0x24b   : > { %2041 = vrot.lane.b32.xlu0 %v2015_v0, %s5377_s22  ;;  %v3404_v5 = vld [vmem:[#allocation4 + $0x28] sm:$0xf]  ;;  %v3459_v14 = vshrl.u32 %v3406_v52, 16  ;;  %v3462_v4 = vshll.u32 %v3406_v52, 16  ;;  %v3424_v23 = vrot.slane %v3423_v44, 4  ;;  %v3438_v27 = vrot.slane %v3437_v48, 4 }
 0x24c   : > { %v2557_v38 = vpop.permute.xlu1 %2556  ;;  %v3445_v26 = vshrl.u32 %v3404_v5, 16  ;;  %v3448_v9 = vshll.u32 %v3404_v5, 16  ;;  %v1544_v20 = vld [vmem:[#allocation4 + $0x28] sm:$0xf]  ;;  %v1540_v30 = vld [vmem:[#allocation4 + $0x10] sm:$0xf] }
 0x24d   : > { %2404 = vrot.lane.b32.xlu2 %v2381_v43, %s5375_s16  ;;  %v6226_v51 = vpop.permute.xlu0 %2084  ;;  %2577 = vst.msk [vmem:[#allocation6 + $0x88] sm:$0xf] %vm1336_vm5, %v2557_v38  ;;  %v3461_v50 = vrot.slane %v3459_v14, 4  ;;  %v1600_v53 = vshrl.u32 %v1544_v20, 16  ;;  %v1603_v40 = vshll.u32 %v1544_v20, 16  ;;  %v3464_v36 = vrot.slane %v3462_v4, 5 }
 0x24e   : > { %v3447_v59 = vrot.slane %v3445_v26, 4  ;;  %v3450_v8 = vrot.slane %v3448_v9, 5  ;;  %v3429_v5 = vsel %vm5524_vm4, %v3424_v23, %v3428_v19  ;;  %v3442_v37 = vrot.slane %v3440_v18, 5  ;;  %v3409_v7 = vld [vmem:[#allocation4 + $0x44] sm:$0x1] }
 0x24f   : > { %v2563_v56 = vpop.permute.xlu2 %2562  ;;  %v1602_v42 = vrot.slane %v1600_v53, 4  ;;  %v1605_v52 = vrot.slane %v1603_v40, 5  ;;  %v3465_v49 = vor.u32 %v3464_v36, %v3461_v50  ;;  %v1297_v14 = vld [vmem:[#allocation4 + $0x10] sm:$0xf]  ;;  %v3479_v38 = vor.u32 %v3478_v54, %v3475_v13  ;;  %v3193_v26 = vld [vmem:[#allocation4 + $0x1c] sm:$0xf] }
 0x250   : > { %2580 = vst.msk [vmem:[#allocation6 + $0xac] sm:$0xf] %vm1336_vm5, %v2563_v56  ;;  %v3451_v34 = vor.u32 %v3450_v8, %v3447_v59  ;;  %v3411_v4 = vld [vmem:[#allocation4 + $0x50] sm:$0x1]  ;;  %v3443_v9 = vsel %vm5524_vm4, %v3438_v27, %v3442_v37  ;;  %v3405_v56 = vld [vmem:[#allocation4 + $0x2c] sm:$0x1]  ;;  %v3493_v20 = vor.u32 %v3492_v29, %v3489_v62 }
 0x251   : > { %3536 = vst.msk [vmem:[#allocation6 + $0x68] sm:$0xf] %vm897_vm0, %v3429_v5  ;;  %v1606_v44 = vor.u32 %v1605_v52, %v1602_v42  ;;  %v1572_v35 = vshrl.u32 %v1540_v30, 16  ;;  %v1575_v46 = vshll.u32 %v1540_v30, 16  ;;  %v3407_v63 = vld [vmem:[#allocation4 + $0x38] sm:$0x1] }
 0x252   : > { %1316 = vrot.lane.b32.xlu1 %v1298_v41, %s5375_s16  ;;  %3537 = vst.msk [vmem:[#allocation6 + $0x74] sm:$0xf] %vm897_vm0, %v3443_v9  ;;  %v3452_v33 = vrot.slane %v3451_v34, 4  ;;  %v3454_v6 = vshll.u32 %v3405_v56, 16  ;;  %v3468_v18 = vshll.u32 %v3407_v63, 16  ;;  %v3480_v48 = vrot.slane %v3479_v38, 4 }
 0x253   : > { %1471 = vrot.lane.b32.xlu0 %v1448_v12, %s5375_s16  ;;  %v3466_v12 = vrot.slane %v3465_v49, 4  ;;  %v1129_v50 = vld [vmem:[#allocation4 + $0x10] sm:$0xf]  ;;  %v1299_v17 = vld [vmem:[#allocation4 + $0x28] sm:$0xf]  ;;  %v3482_v36 = vshll.u32 %v3409_v7, 16 }
 0x254   : > { %v6239_v1 = vpop.permute.xlu1 %2088  ;;  %v1541_v53 = vld [vmem:[#allocation4 + $0x14] sm:$0x1]  ;;  %v1542_v40 = vld [vmem:[#allocation4 + $0x1c] sm:$0xf]  ;;  %1137 = vst.msk [vmem:[#allocation6 + $0x6c] sm:$0xf] %vm897_vm0, %v1129_v50 }
 0x255   : > { %2960 = vrot.lane.b32.xlu2 %v2943_v55, %s5376_s21  ;;  %v2555_v0 = vpop.permute.xlu0 %2554  ;;  %v3456_v8 = vrot.slane %v3454_v6, 5  ;;  %v3470_v41 = vrot.slane %v3468_v18, 5  ;;  %v3494_v23 = vrot.slane %v3493_v20, 4  ;;  %v3496_v13 = vshll.u32 %v3411_v4, 16  ;;  %v2343_v54 = vld [vmem:[#allocation4 + $0x1c] sm:$0xf] }
 0x256   : > { %2576 = vst.msk [vmem:[#allocation6 + $0x7c] sm:$0xf] %vm1336_vm5, %v2555_v0  ;;  %v1611_v19 = vrot.slane %v1609_v60, 5  ;;  %v1574_v62 = vrot.slane %v1572_v35, 4  ;;  %v1577_v29 = vrot.slane %v1575_v46, 5  ;;  %v3484_v0 = vrot.slane %v3482_v36, 5 }
 0x257   : > { %v1458_v43 = vpop.permute.xlu2 %1457  ;;  %2351 = vst.msk [vmem:[#allocation6 + $0xd0] sm:$0xf] %vm897_vm0, %v2343_v54  ;;  %v1607_v52 = vrot.slane %v1606_v44, 4  ;;  %v3457_v5 = vsel %vm5524_vm4, %v3452_v33, %v3456_v8  ;;  %v3498_v30 = vrot.slane %v3496_v13, 5  ;;  %v3649_v27 = vrot.slane %v3647_v58, 4 }
 0x258   : > { %1481 = vst.msk [vmem:[#allocation6 + $0x120] sm:$0xf] %vm1336_vm5, %v1458_v43  ;;  %v3471_v43 = vsel %vm5524_vm4, %v3466_v12, %v3470_v41  ;;  %v3485_v60 = vsel %vm5524_vm4, %v3480_v48, %v3484_v0  ;;  %v3571_v37 = vld [vmem:[#allocation2 + $0x5c] sm:$0x1]  ;;  %v3192_v34 = vld [vmem:[#allocation4 + $0x10] sm:$0xf]  ;;  %v1578_v38 = vor.u32 %v1577_v29, %v1574_v62 }
 0x259   : > { %v1581_v49 = vshll.u32 %v1541_v53, 16  ;;  %v1586_v7 = vshrl.u32 %v1542_v40, 16  ;;  %3538 = vst.msk [vmem:[#allocation6 + $0x80] sm:$0xf] %vm897_vm0, %v3457_v5  ;;  %v3652_v4 = vrot.slane %v3650_v32, 5  ;;  %v1612_v9 = vsel %vm5524_vm4, %v1607_v52, %v1611_v19 }
 0x25a   : > { %3210 = vrot.lane.b32.xlu1 %v3193_v26, %s5377_s22  ;;  %v1589_v26 = vshll.u32 %v1542_v40, 16  ;;  %3539 = vst.msk [vmem:[#allocation6 + $0x8c] sm:$0xf] %vm897_vm0, %v3471_v43  ;;  %v1132_v58 = vld [vmem:[#allocation4 + $0x34] sm:$0xf]  ;;  %v3656_v46 = vshll.u32 %v3571_v37, 16 }
 0x25b   : > { %1314 = vrot.lane.b32.xlu0 %v1297_v14, %s5375_s16  ;;  %v3499_v14 = vsel %vm5524_vm4, %v3494_v23, %v3498_v30  ;;  %3540 = vst.msk [vmem:[#allocation6 + $0x98] sm:$0xf] %vm897_vm0, %v3485_v60  ;;  %v3194_v56 = vld [vmem:[#allocation4 + $0x28] sm:$0xf]  ;;  %v1543_v20 = vld [vmem:[#allocation4 + $0x20] sm:$0x1]  ;;  %v3653_v63 = vor.u32 %v3652_v4, %v3649_v27 }
 0x25c   : > { %v2559_v55 = vpop.permute.xlu1 %2558  ;;  %3541 = vst.msk [vmem:[#allocation6 + $0xa4] sm:$0xf] %vm897_vm0, %v3499_v14  ;;  %v1131_v21 = vld [vmem:[#allocation4 + $0x28] sm:$0xf]  ;;  %v1583_v44 = vrot.slane %v1581_v49, 5  ;;  %v1588_v35 = vrot.slane %v1586_v7, 4 }
 0x25d   : > { %1318 = vrot.lane.b32.xlu2 %v1299_v17, %s5375_s16  ;;  %v6254_v59 = vpop.permute.xlu0 %2086  ;;  %2578 = vst.msk [vmem:[#allocation6 + $0x94] sm:$0xf] %vm1336_vm5, %v2559_v55  ;;  %v1579_v6 = vrot.slane %v1578_v38, 4  ;;  %v1591_v12 = vrot.slane %v1589_v26, 5  ;;  %v2342_v18 = vld [vmem:[#allocation4 + $0x10] sm:$0xf] }
 0x25e   : > { %1140 = vst.msk [vmem:[#allocation6 + $0x90] sm:$0xf] %vm897_vm0, %v1132_v58  ;;  %v1130_v17 = vld [vmem:[#allocation4 + $0x1c] sm:$0xf]  ;;  %v1546_v53 = vld [vmem:[#allocation4 + $0x34] sm:$0xf] }
 0x25f   : > { %v2391_v42 = vpop.permute.xlu2 %2390  ;;  %1139 = vst.msk [vmem:[#allocation6 + $0x84] sm:$0xf] %vm897_vm0, %v1131_v21  ;;  %v1134_v40 = vld [vmem:[#allocation4 + $0x4c] sm:$0xf]  ;;  %v1595_v48 = vshll.u32 %v1543_v20, 16  ;;  %v3654_v8 = vrot.slane %v3653_v63, 4  ;;  %v1584_v41 = vsel %vm5524_vm4, %v1579_v6, %v1583_v44  ;;  %v1592_v23 = vor.u32 %v1591_v12, %v1588_v35 }
 0x260   : > { %2414 = vst.msk [vmem:[#allocation6 + $0x4] sm:$0xf] %vm1336_vm5, %v2391_v42  ;;  %v1133_v36 = vld [vmem:[#allocation4 + $0x40] sm:$0xf]  ;;  %v2345_v13 = vld [vmem:[#allocation4 + $0x34] sm:$0xf] }
 0x261   : > { %2350 = vst.msk [vmem:[#allocation6 + $0xc4] sm:$0xf] %vm897_vm0, %v2342_v18  ;;  %v3658_v54 = vrot.slane %v3656_v46, 5  ;;  %v1301_v55 = vld [vmem:[#allocation4 + $0x40] sm:$0xf]  ;;  %v1614_v19 = vshrl.u32 %v1546_v53, 16 }
 0x262   : > { %1675 = vrot.lane.b32.xlu1 %v1612_v9, %s5376_s21  ;;  %1138 = vst.msk [vmem:[#allocation6 + $0x78] sm:$0xf] %vm897_vm0, %v1130_v17  ;;  %v1617_v62 = vshll.u32 %v1546_v53, 16  ;;  %v2944_v29 = vld [vmem:[#allocation4 + $0x28] sm:$0xf]  ;;  %v1597_v42 = vrot.slane %v1595_v48, 5 }
 0x263   : > { %3208 = vrot.lane.b32.xlu0 %v3192_v34, %s5377_s22  ;;  %1142 = vst.msk [vmem:[#allocation6 + $0xa8] sm:$0xf] %vm897_vm0, %v1134_v40  ;;  %v2344_v52 = vld [vmem:[#allocation4 + $0x28] sm:$0xf]  ;;  %v1593_v27 = vrot.slane %v1592_v23, 4  ;;  %v3659_v37 = vsel %vm5524_vm4, %v3654_v8, %v3658_v54  ;;  %v1616_v49 = vrot.slane %v1614_v19, 4 }
 0x264   : > { %v6281_v33 = vpop.permute.xlu1 %2090  ;;  %1141 = vst.msk [vmem:[#allocation6 + $0x9c] sm:$0xf] %vm897_vm0, %v1133_v36  ;;  %v2346_v60 = vld [vmem:[#allocation4 + $0x40] sm:$0xf]  ;;  %v1619_v7 = vrot.slane %v1617_v62, 5  ;;  %v5170_v14 = vld [vmem:[%s7227_s3 + $0x88] sm:$0xff] }
 0x265   : > { %3212 = vrot.lane.b32.xlu2 %v3194_v56, %s5377_s22  ;;  %v1422_v32 = vpop.permute.xlu0 %1421  ;;  %2353 = vst.msk [vmem:[#allocation6 + $0xe8] sm:$0xf] %vm897_vm0, %v2345_v13  ;;  %v1547_v26 = vld [vmem:[#allocation4 + $0x38] sm:$0x1]  ;;  %v1548_v58 = vld [vmem:[#allocation4 + $0x40] sm:$0xf]  ;;  %4389 = vmatpush.bf16.msra.mxu3 %v5170_v14  ;;  %v1598_v21 = vsel %vm5524_vm4, %v1593_v27, %v1597_v42 }
 0x266   : > { %1439 = vst.msk [vmem:[#allocation6 + $0x108] sm:$0xf] %vm1336_vm5, %v1422_v32  ;;  %v5169_v9 = vld [vmem:[%s7227_s3 + $0x80] sm:$0xff]  ;;  %v1623_v32 = vshll.u32 %v1547_v26, 16  ;;  %v1302_v44 = vld [vmem:[#allocation4 + $0x4c] sm:$0xf] }
 0x267   : > { %v2030_v50 = vpop.permute.xlu2 %2029  ;;  %2352 = vst.msk [vmem:[#allocation6 + $0xdc] sm:$0xf] %vm897_vm0, %v2344_v52  ;;  %v1628_v35 = vshrl.u32 %v1548_v58, 16  ;;  %v1631_v46 = vshll.u32 %v1548_v58, 16  ;;  %v1300_v23 = vld [vmem:[#allocation4 + $0x34] sm:$0xf] }
 0x268   : > { %2054 = vst.msk [vmem:[#allocation6] sm:$0xf] %vm2053_vm11, %v2030_v50  ;;  %v1625_v53 = vrot.slane %v1623_v32, 5  ;;  %v3197_v19 = vld [vmem:[#allocation4 + $0x4c] sm:$0xf] }
 0x269   : > { %2354 = vst.msk [vmem:[#allocation6 + $0xf4] sm:$0xf] %vm897_vm0, %v2346_v60  ;;  %4390 = vmatpush.bf16.msra.mxu3 %v5169_v9  ;;  %v1630_v40 = vrot.slane %v1628_v35, 4  ;;  %v1633_v48 = vrot.slane %v1631_v46, 5  ;;  %v1550_v52 = vld [vmem:[#allocation4 + $0x4c] sm:$0xf] }
 0x26a   : > { %1322 = vrot.lane.b32.xlu1 %v1301_v55, %s5375_s16  ;;  %3701 = vst.msk [vmem:[#allocation6 + $0x164] sm:$0xf] %vm897_vm0, %v3659_v37  ;;  %v3195_v60 = vld [vmem:[#allocation4 + $0x34] sm:$0xf]  ;;  %v1642_v37 = vshrl.u32 %v1550_v52, 16 }
 0x26b   : > { %1671 = vrot.lane.b32.xlu0 %v1584_v41, %s5376_s21  ;;  %v1549_v41 = vld [vmem:[#allocation4 + $0x44] sm:$0x1]  ;;  %v1634_v62 = vor.u32 %v1633_v48, %v1630_v40  ;;  %v3413_v14 = vld [vmem:[#allocation4 + $0x5c] sm:$0x1]  ;;  %v1551_v9 = vld [vmem:[#allocation4 + $0x50] sm:$0x1] }
 0x26c   : > { %v1424_v5 = vpop.permute.xlu1 %1423  ;;  %v993_v32 = vld [vmem:[#allocation5 + $0x18] sm:$0x8]  ;;  %v2790_v46 = vld [vmem:[#allocation5 + $0xc] sm:$0x8] }
 0x26d   : > { %2962 = vrot.lane.b32.xlu2 %v2944_v29, %s5376_s21  ;;  %v5331_v0 = vpop.permute.xlu0 %5330  ;;  %1440 = vst.msk [vmem:[#allocation6 + $0x114] sm:$0xf] %vm1336_vm5, %v1424_v5  ;;  %v1637_v29 = vshll.u32 %v1549_v41, 16  ;;  %v1035_v40 = vshrl.u32 %v993_v32, 16  ;;  %v2807_v41 = vshrl.u32 %v2790_v46, 16 }
 0x26e   : > { %v5333_v43 = vunpack.i.h.bf16 %v5331_v0  ;;  %v5332_v30 = vunpack.i.l.bf16 %v5331_v0 }
 0x26f   : > { %v6300_v34 = vpop.permute.xlu2 %3111  ;;  %v1639_v27 = vrot.slane %v1637_v29, 5 }
 0x270   : > { %v855_v4 = vmax.f32 %v6007_v39, %v5333_v43  ;;  %v854_v38 = vmax.f32 %v6011_v28, %v5332_v30  ;;  %v3196_v39 = vld [vmem:[#allocation4 + $0x40] sm:$0xf]  ;;  %v1620_v28 = vor.u32 %v1619_v7, %v1616_v49  ;;  %v1635_v30 = vrot.slane %v1634_v62, 4  ;;  %v2947_v49 = vld [vmem:[#allocation4 + $0x4c] sm:$0xf] }
 0x271   : > { %v1645_v7 = vshll.u32 %v1550_v52, 16  ;;  %v991_v62 = vld [vmem:[#allocation5 + $0xc] sm:$0x8] }
 0x272   : > { %v887_v56 = vpack.c.bf16 %v855_v4, %v855_v4  ;;  %v886_v20 = vpack.c.bf16 %v854_v38, %v854_v38  ;;  %3216 = vrot.lane.b32.xlu1 %v3196_v39, %s5377_s22  ;;  %v1621_v17 = vrot.slane %v1620_v28, 4  ;;  %v1640_v26 = vsel %vm5524_vm4, %v1635_v30, %v1639_v27 }
 0x273   : > { %1673 = vrot.lane.b32.xlu0 %v1598_v21, %s5376_s21  ;;  %v1644_v28 = vrot.slane %v1642_v37, 4 }
 0x274   : > { %966 = vst.msk [vmem:[#allocation4 + $0x64] sm:$0xf] %vm897_vm0, %v887_v56  ;;  %v5336_v6 = vpop.permute.xlu1 %5335  ;;  %v1626_v55 = vsel %vm5524_vm4, %v1621_v17, %v1625_v53  ;;  %v2945_v17 = vld [vmem:[#allocation4 + $0x34] sm:$0xf]  ;;  %v1651_v53 = vshll.u32 %v1551_v9, 16 }
 0x275   : > { %965 = vst.msk [vmem:[#allocation4 + $0x58] sm:$0xf] %vm897_vm0, %v886_v20  ;;  %1324 = vrot.lane.b32.xlu2 %v1302_v44, %s5375_s16  ;;  %v2565_v63 = vpop.permute.xlu0 %2564  ;;  %v5338_v12 = vunpack.i.h.bf16 %v5336_v6  ;;  %v5337_v18 = vunpack.i.l.bf16 %v5336_v6  ;;  %v3510_v44 = vshll.u32 %v3413_v14, 16  ;;  %v1647_v6 = vrot.slane %v1645_v7, 5 }
 0x276   : > { %2581 = vst.msk [vmem:[#allocation6 + $0xb8] sm:$0xf] %vm1336_vm5, %v2565_v63  ;;  %v1653_v37 = vrot.slane %v1651_v53, 5 }
 0x277   : > { %v1464_v50 = vpop.permute.xlu2 %1463  ;;  %v857_v36 = vmax.f32 %v6035_v57, %v5338_v12  ;;  %v856_v8 = vmax.f32 %v6039_v22, %v5337_v18 }
 0x278   : > { %1484 = vst.msk [vmem:[#allocation6 + $0x144] sm:$0xf] %vm1336_vm5, %v1464_v50 }
 0x279   : > { %v889_v13 = vpack.c.bf16 %v857_v36, %v857_v36  ;;  %v888_v54 = vpack.c.bf16 %v856_v8, %v856_v8 }
 0x27a   : > { %1677 = vrot.lane.b32.xlu1 %v1626_v55, %s5376_s21  ;;  %v1648_v55 = vor.u32 %v1647_v6, %v1644_v28  ;;  %v995_v6 = vld [vmem:[#allocation5 + $0x24] sm:$0x8] }
 0x27b   : > { %1320 = vrot.lane.b32.xlu0 %v1300_v23, %s5375_s16  ;;  %982 = vst.msk [vmem:[#allocation5 + $0x1c] sm:$0xf] %vm897_vm0, %v889_v13  ;;  %v3512_v13 = vrot.slane %v3510_v44, 5  ;;  %v2946_v44 = vld [vmem:[#allocation4 + $0x40] sm:$0xf] }
 0x27c   : > { %v3412_v0 = vld [vmem:[#allocation4 + $0x58] sm:$0xf]  ;;  %981 = vst.msk [vmem:[#allocation5 + $0x10] sm:$0xf] %vm897_vm0, %v888_v54  ;;  %v1462_v22 = vpop.permute.xlu1 %1461  ;;  %v1649_v9 = vrot.slane %v1648_v55, 4 }
 0x27d   : > { %3218 = vrot.lane.b32.xlu2 %v3197_v19, %s5377_s22  ;;  %v1460_v57 = vpop.permute.xlu0 %1459  ;;  %1483 = vst.msk [vmem:[#allocation6 + $0x138] sm:$0xf] %vm1336_vm5, %v1462_v22  ;;  %v3501_v5 = vshrl.u32 %v3412_v0, 16  ;;  %v3504_v43 = vshll.u32 %v3412_v0, 16  ;;  %v2948_v8 = vld [vmem:[#allocation4 + $0x58] sm:$0xf] }
 0x27e   : > { %1482 = vst.msk [vmem:[#allocation6 + $0x12c] sm:$0xf] %vm1336_vm5, %v1460_v57  ;;  %v3198_v22 = vld [vmem:[#allocation4 + $0x58] sm:$0xf] }
 0x27f   : > { %v2397_v42 = vpop.permute.xlu2 %2396  ;;  %v3503_v4 = vrot.slane %v3501_v5, 4  ;;  %v3506_v38 = vrot.slane %v3504_v43, 5  ;;  %v4752_v5 = vrot.slane %v1035_v40, 11 }
 0x280   : > { %2417 = vst.msk [vmem:[#allocation6 + $0x28] sm:$0xf] %vm1336_vm5, %v2397_v42 }
 0x281   : > { %v3507_v50 = vor.u32 %v3506_v38, %v3503_v4  ;;  %v4782_v4 = vrot.slane %v2807_v41, 11 }
 0x282   : > { %2968 = vrot.lane.b32.xlu1 %v2947_v49, %s5376_s21  ;;  %v3385_v58 = vld [vmem:[#allocation5 + $0x1c] sm:$0xf]  ;;  %v1022_v49 = vshrl.u32 %v991_v62, 16 }
 0x283   : > { %3214 = vrot.lane.b32.xlu0 %v3195_v60, %s5377_s22  ;;  %v3384_v20 = vld [vmem:[#allocation5 + $0x10] sm:$0xf]  ;;  %3393 = vst.msk [vmem:[#allocation6 + $0x14] sm:$0xf] %vm897_vm0, %v3385_v58  ;;  %v994_v23 = vld [vmem:[#allocation5 + $0x1c] sm:$0xf] }
 0x284   : > { %v2791_v21 = vld [vmem:[#allocation5 + $0x10] sm:$0xf]  ;;  %v2395_v39 = vpop.permute.xlu1 %2394  ;;  %3392 = vst.msk [vmem:[#allocation6 + $0x8] sm:$0xf] %vm897_vm0, %v3384_v20  ;;  %v1040_v19 = vshrl.u32 %v994_v23, 16  ;;  %v1043_v30 = vshll.u32 %v994_v23, 16 }
 0x285   : > { %1679 = vrot.lane.b32.xlu2 %v1640_v26, %s5376_s21  ;;  %v2393_v56 = vpop.permute.xlu0 %2392  ;;  %2416 = vst.msk [vmem:[#allocation6 + $0x1c] sm:$0xf] %vm1336_vm5, %v2395_v39  ;;  %v2812_v63 = vshrl.u32 %v2791_v21, 16  ;;  %v992_v29 = vld [vmem:[#allocation5 + $0x10] sm:$0xf]  ;;  %v2815_v42 = vshll.u32 %v2791_v21, 16 }
 0x286   : > { %2415 = vst.msk [vmem:[#allocation6 + $0x10] sm:$0xf] %vm1336_vm5, %v2393_v56  ;;  %v1042_v43 = vrot.slane %v1040_v19, 7  ;;  %v1027_v27 = vshrl.u32 %v992_v29, 16  ;;  %v1030_v20 = vshll.u32 %v992_v29, 16  ;;  %v1048_v23 = vshrl.u32 %v995_v6, 16 }
 0x287   : > { %v5341_v35 = vpop.permute.xlu2 %5340  ;;  %v2814_v54 = vrot.slane %v2812_v63, 7  ;;  %v3572_v21 = vld [vmem:[#allocation2 + $0x64] sm:$0xf]  ;;  %v3414_v39 = vld [vmem:[#allocation4 + $0x64] sm:$0xf] }
 0x288   : > { %v5343_v12 = vunpack.i.h.bf16 %v5341_v35  ;;  %v5342_v18 = vunpack.i.l.bf16 %v5341_v35  ;;  %v1045_v26 = vor.u32 %v1043_v30, %v1042_v43  ;;  %v1029_v56 = vrot.slane %v1027_v27, 7  ;;  %v997_v19 = vld [vmem:[#allocation5 + $0x30] sm:$0x8] }
 0x289   : > { %v2817_v38 = vor.u32 %v2815_v42, %v2814_v54  ;;  %v4751_v35 = vrot.slane %v1022_v49, 11  ;;  %v3573_v42 = vld [vmem:[#allocation2 + $0x68] sm:$0x1]  ;;  %v1061_v30 = vshrl.u32 %v997_v19, 16  ;;  %v3241_v49 = vld [vmem:[#allocation5 + $0x1c] sm:$0xf] }
 0x28a   : > { %v859_v48 = vmax.f32 %v6135_v61, %v5343_v12  ;;  %v858_v36 = vmax.f32 %v6139_v16, %v5342_v18  ;;  %2970 = vrot.lane.b32.xlu1 %v2948_v8, %s5376_s21  ;;  %v3508_v61 = vrot.slane %v3507_v50, 4  ;;  %v5107_v52 = vld [vmem:[#allocation6 + $0x10] sm:$0xf0]  ;;  %v1046_v28 = vsel %vm5668_vm9, %v4752_v5, %v1045_v26 }
 0x28b   : > { %2964 = vrot.lane.b32.xlu0 %v2945_v17, %s5376_s21  ;;  %v4808_v14 = vld [vmem:[#allocation6 + $0x8] sm:$0xf]  ;;  %1122 = vst.msk [vmem:[#allocation6 + $0x18] sm:$0xf] %vm897_vm0, %v1046_v28  ;;  %v1032_v46 = vor.u32 %v1030_v20, %v1029_v56  ;;  %v2818_v63 = vsel %vm5668_vm9, %v4782_v4, %v2817_v38  ;;  %v3515_v12 = vshrl.u32 %v3414_v39, 16  ;;  %v3518_v18 = vshll.u32 %v3414_v39, 16 }
 0x28c   : > { %v891_v0 = vpack.c.bf16 %v859_v48, %v859_v48  ;;  %v890_v57 = vpack.c.bf16 %v858_v36, %v858_v36  ;;  %v6350_v60 = vpop.permute.xlu1 %2033  ;;  %v4809_v58 = vor.u32 %v5107_v52, %v4808_v14  ;;  %v3513_v32 = vsel %vm5524_vm4, %v3508_v61, %v3512_v13  ;;  %v1552_v48 = vld [vmem:[#allocation4 + $0x58] sm:$0xf]  ;;  %v2949_v4 = vld [vmem:[#allocation4 + $0x64] sm:$0xf] }
 0x28d   : > { %3220 = vrot.lane.b32.xlu2 %v3198_v22, %s5377_s22  ;;  %v6347_v16 = vpop.permute.xlu0 %2031  ;;  %v1654_v50 = vsel %vm5524_vm4, %v1649_v9, %v1653_v37  ;;  %3542 = vst.msk [vmem:[#allocation6 + $0xb0] sm:$0xf] %vm897_vm0, %v3513_v32  ;;  %v3661_v17 = vshrl.u32 %v3572_v21, 16  ;;  %v3664_v36 = vshll.u32 %v3572_v21, 16  ;;  %v1033_v13 = vsel %vm5668_vm9, %v4751_v35, %v1032_v46  ;;  %v1303_v61 = vld [vmem:[#allocation4 + $0x58] sm:$0xf] }
 0x28e   : > { %984 = vst.msk [vmem:[#allocation5 + $0x34] sm:$0xf] %vm897_vm0, %v891_v0  ;;  %5062 = vmatmul.msk.bf16.vlgmr.msra.gmra.mxu3 %vm4156_vm12, %v4809_v58  ;;  %v3517_v62 = vrot.slane %v3515_v12, 4  ;;  %v3520_v29 = vrot.slane %v3518_v18, 5  ;;  %v1659_v22 = vshll.u32 %v1552_v48, 16  ;;  %v4753_v52 = vrot.slane %v1048_v23, 11 }
 0x28f   : > { %983 = vst.msk [vmem:[#allocation5 + $0x28] sm:$0xf] %vm897_vm0, %v890_v57  ;;  %v6353_v7 = vpop.permute.xlu2 %2035  ;;  %v1656_v57 = vshrl.u32 %v1552_v48, 16  ;;  %v3663_v27 = vrot.slane %v3661_v17, 4  ;;  %v3666_v37 = vrot.slane %v3664_v36, 5  ;;  %v3670_v9 = vshll.u32 %v3573_v42, 16 }
 0x290   : > { %1121 = vst.msk [vmem:[#allocation6 + $0xc] sm:$0xf] %vm897_vm0, %v1033_v13  ;;  %v3521_v58 = vor.u32 %v3520_v29, %v3517_v62  ;;  %v1553_v21 = vld [vmem:[#allocation4 + $0x5c] sm:$0x1]  ;;  %v1661_v28 = vrot.slane %v1659_v22, 5  ;;  %v4754_v46 = vrot.slane %v1061_v30, 11 }
 0x291   : > { %v1658_v39 = vrot.slane %v1656_v57, 4  ;;  %v3415_v32 = vld [vmem:[#allocation4 + $0x68] sm:$0x1]  ;;  %v3667_v12 = vor.u32 %v3666_v37, %v3663_v27  ;;  %v1135_v17 = vld [vmem:[#allocation4 + $0x58] sm:$0xf]  ;;  %v3672_v57 = vrot.slane %v3670_v9, 5 }
 0x292   : > { %2910 = vrot.lane.b32.xlu1 %v2818_v63, %s5376_s21  ;;  %v3522_v36 = vrot.slane %v3521_v58, 4  ;;  %v3199_v23 = vld [vmem:[#allocation4 + $0x64] sm:$0xf]  ;;  %1143 = vst.msk [vmem:[#allocation6 + $0xb4] sm:$0xf] %vm897_vm0, %v1135_v17 }
 0x293   : > { %2966 = vrot.lane.b32.xlu0 %v2946_v44, %s5376_s21  ;;  %v1662_v13 = vor.u32 %v1661_v28, %v1658_v39  ;;  %v3668_v29 = vrot.slane %v3667_v12, 4  ;;  %v1346_v22 = vld [vmem:[#allocation5 + $0x10] sm:$0xf] }
 0x294   : > { %v1468_v8 = vpop.permute.xlu1 %1467  ;;  %v1490_v39 = vld [vmem:[#allocation5 + $0x10] sm:$0xf] }
 0x295   : > { %1681 = vrot.lane.b32.xlu2 %v1654_v50, %s5376_s21  ;;  %v6369_v53 = vpop.permute.xlu0 %3113  ;;  %v3387_v40 = vld [vmem:[#allocation5 + $0x34] sm:$0xf]  ;;  %1486 = vst.msk [vmem:[#allocation6 + $0x15c] sm:$0xf] %vm1336_vm5, %v1468_v8  ;;  %v3524_v8 = vshll.u32 %v3415_v32, 16  ;;  %v1663_v30 = vrot.slane %v1662_v13, 4 }
 0x296   : > { %v3386_v41 = vld [vmem:[#allocation5 + $0x28] sm:$0xf]  ;;  %3395 = vst.msk [vmem:[#allocation6 + $0x2c] sm:$0xf] %vm897_vm0, %v3387_v40  ;;  %v998_v14 = vld [vmem:[#allocation5 + $0x34] sm:$0xf] }
 0x297   : > { %v6375_v54 = vpop.permute.xlu2 %2037  ;;  %v996_v55 = vld [vmem:[#allocation5 + $0x28] sm:$0xf]  ;;  %3394 = vst.msk [vmem:[#allocation6 + $0x20] sm:$0xf] %vm897_vm0, %v3386_v41  ;;  %v1066_v26 = vshrl.u32 %v998_v14, 16  ;;  %v1069_v6 = vshll.u32 %v998_v14, 16  ;;  %v3673_v14 = vsel %vm5524_vm4, %v3668_v29, %v3672_v57 }
 0x298   : > { %v1053_v0 = vshrl.u32 %v996_v55, 16  ;;  %v1056_v43 = vshll.u32 %v996_v55, 16  ;;  %v3574_v41 = vld [vmem:[#allocation2 + $0x70] sm:$0xf]  ;;  %v1665_v55 = vshll.u32 %v1553_v21, 16  ;;  %v3526_v62 = vrot.slane %v3524_v8, 5 }
 0x299   : > { %v1068_v63 = vrot.slane %v1066_v26, 7  ;;  %v3678_v58 = vshll.u32 %v3574_v41, 16  ;;  %3702 = vst.msk [vmem:[#allocation6 + $0x170] sm:$0xf] %vm897_vm0, %v3673_v14 }
 0x29a   : > { %v1055_v5 = vrot.slane %v1053_v0, 7  ;;  %3258 = vrot.lane.b32.xlu1 %v3241_v49, %s5377_s22  ;;  %v2583_v0 = vld [vmem:[#allocation5 + $0x1c] sm:$0xf]  ;;  %v3527_v42 = vsel %vm5524_vm4, %v3522_v36, %v3526_v62  ;;  %v1667_v27 = vrot.slane %v1665_v55, 5  ;;  %v3575_v49 = vld [vmem:[#allocation2 + $0x74] sm:$0x1] }
 0x29b   : > { %1326 = vrot.lane.b32.xlu0 %v1303_v61, %s5375_s16  ;;  %v1071_v48 = vor.u32 %v1069_v6, %v1068_v63  ;;  %3543 = vst.msk [vmem:[#allocation6 + $0xbc] sm:$0xf] %vm897_vm0, %v3527_v42  ;;  %v3680_v21 = vrot.slane %v3678_v58, 5 }
 0x29c   : > { %v1058_v38 = vor.u32 %v1056_v43, %v1055_v5  ;;  %v2401_v44 = vpop.permute.xlu1 %2400  ;;  %v3675_v5 = vshrl.u32 %v3574_v41, 16  ;;  %v1668_v9 = vsel %vm5524_vm4, %v1663_v30, %v1667_v27  ;;  %v2582_v30 = vld [vmem:[#allocation5 + $0x10] sm:$0xf]  ;;  %v3242_v27 = vld [vmem:[#allocation5 + $0x28] sm:$0xf] }
 0x29d   : > { %2972 = vrot.lane.b32.xlu2 %v2949_v4, %s5376_s21  ;;  %v1466_v56 = vpop.permute.xlu0 %1465  ;;  %v5110_v20 = vld [vmem:[#allocation6 + $0x28] sm:$0xf0]  ;;  %2419 = vst.msk [vmem:[#allocation6 + $0x40] sm:$0xf] %vm1336_vm5, %v2401_v44  ;;  %v1072_v19 = vsel %vm5668_vm9, %v4754_v46, %v1071_v48 }
 0x29e   : > { %1485 = vst.msk [vmem:[#allocation6 + $0x150] sm:$0xf] %vm1336_vm5, %v1466_v56  ;;  %v1059_v35 = vsel %vm5668_vm9, %v4753_v52, %v1058_v38  ;;  %v4820_v50 = vld [vmem:[#allocation6 + $0x20] sm:$0xf]  ;;  %v2793_v52 = vld [vmem:[#allocation5 + $0x1c] sm:$0xf] }
 0x29f   : > { %v1470_v18 = vpop.permute.xlu2 %1469  ;;  %v4821_v40 = vor.u32 %v5110_v20, %v4820_v50  ;;  %1123 = vst.msk [vmem:[#allocation6 + $0x24] sm:$0xf] %vm897_vm0, %v1059_v35  ;;  %v2825_v4 = vshrl.u32 %v2793_v52, 16  ;;  %v2792_v38 = vld [vmem:[#allocation5 + $0x18] sm:$0x8]  ;;  %v3677_v26 = vrot.slane %v3675_v5, 4 }
 0x2a0   : > { %1487 = vst.msk [vmem:[#allocation6 + $0x168] sm:$0xf] %vm1336_vm5, %v1470_v18  ;;  %v3684_v56 = vshll.u32 %v3575_v49, 16  ;;  %v1348_v20 = vld [vmem:[#allocation5 + $0x28] sm:$0xf]  ;;  %v2820_v28 = vshrl.u32 %v2792_v38, 16 }
 0x2a1   : > { %5063 = vmatmul.msk.bf16.gmra.mxu3 %vm4156_vm12, %v4821_v40  ;;  %1124 = vst.msk [vmem:[#allocation6 + $0x30] sm:$0xf] %vm897_vm0, %v1072_v19  ;;  %v2827_v32 = vrot.slane %v2825_v4, 7  ;;  %v3681_v35 = vor.u32 %v3680_v21, %v3677_v26  ;;  %v2828_v18 = vshll.u32 %v2793_v52, 16  ;;  %v2796_v5 = vld [vmem:[#allocation5 + $0x30] sm:$0x8] }
 0x2a2   : > { %2600 = vrot.lane.b32.xlu1 %v2583_v0, %s5375_s16  ;;  %v3686_v46 = vrot.slane %v3684_v56, 5  ;;  %v4783_v41 = vrot.slane %v2820_v28, 11  ;;  %v3240_v0 = vld [vmem:[#allocation5 + $0x10] sm:$0xf]  ;;  %v2846_v49 = vshrl.u32 %v2796_v5, 16 }
 0x2a3   : > { %3222 = vrot.lane.b32.xlu0 %v3199_v23, %s5377_s22  ;;  %v3682_v48 = vrot.slane %v3681_v35, 4  ;;  %v2830_v23 = vor.u32 %v2828_v18, %v2827_v32  ;;  %v999_v56 = vld [vmem:[#allocation5 + $0x3c] sm:$0x8]  ;;  %v2794_v5 = vld [vmem:[#allocation5 + $0x24] sm:$0x8] }
 0x2a4   : > { %v2403_v43 = vpop.permute.xlu1 %2402  ;;  %v4785_v28 = vrot.slane %v2846_v49, 11  ;;  %v1074_v18 = vshrl.u32 %v999_v56, 16  ;;  %v1491_v49 = vld [vmem:[#allocation5 + $0x1c] sm:$0xf] }
 0x2a5   : > { %1363 = vrot.lane.b32.xlu2 %v1346_v22, %s5375_s16  ;;  %v2399_v61 = vpop.permute.xlu0 %2398  ;;  %2420 = vst.msk [vmem:[#allocation6 + $0x4c] sm:$0xf] %vm1336_vm5, %v2403_v43  ;;  %v3687_v19 = vsel %vm5524_vm4, %v3682_v48, %v3686_v46  ;;  %v2797_v22 = vld [vmem:[#allocation5 + $0x34] sm:$0xf]  ;;  %v1001_v43 = vld [vmem:[#allocation5 + $0x48] sm:$0x8] }
 0x2a6   : > { %2418 = vst.msk [vmem:[#allocation6 + $0x34] sm:$0xf] %vm1336_vm5, %v2399_v61  ;;  %v2851_v61 = vshrl.u32 %v2797_v22, 16  ;;  %v2854_v4 = vshll.u32 %v2797_v22, 16  ;;  %v1087_v58 = vshrl.u32 %v1001_v43, 16 }
 0x2a7   : > { %v2405_v37 = vpop.permute.xlu2 %2404  ;;  %3703 = vst.msk [vmem:[#allocation6 + $0x17c] sm:$0xf] %vm897_vm0, %v3687_v19  ;;  %v1347_v48 = vld [vmem:[#allocation5 + $0x1c] sm:$0xf] }
 0x2a8   : > { %2421 = vst.msk [vmem:[#allocation6 + $0x58] sm:$0xf] %vm1336_vm5, %v2405_v37  ;;  %v1349_v37 = vld [vmem:[#allocation5 + $0x34] sm:$0xf]  ;;  %v2853_v14 = vrot.slane %v2851_v61, 7 }
 0x2a9   : > { %v1003_v61 = vld [vmem:[#allocation5 + $0x54] sm:$0x8] }
 0x2aa   : > { %1367 = vrot.lane.b32.xlu1 %v1348_v20, %s5375_s16  ;;  %v2856_v32 = vor.u32 %v2854_v4, %v2853_v14  ;;  %v2833_v14 = vshrl.u32 %v2794_v5, 16 }
 0x2ab   : > { %1683 = vrot.lane.b32.xlu0 %v1668_v9, %s5376_s21 }
 0x2ac   : > { %v5351_v12 = vpop.permute.xlu1 %5350 }
 0x2ad   : > { %1507 = vrot.lane.b32.xlu2 %v1490_v39, %s5376_s21  ;;  %v5346_v44 = vpop.permute.xlu0 %5345  ;;  %v5353_v50 = vunpack.i.h.bf16 %v5351_v12  ;;  %v5352_v17 = vunpack.i.l.bf16 %v5351_v12 }
 0x2ae   : > { %v5348_v63 = vunpack.i.h.bf16 %v5346_v44  ;;  %v5347_v6 = vunpack.i.l.bf16 %v5346_v44 }
 0x2af   : > { %v2961_v40 = vpop.permute.xlu2 %2960  ;;  %v863_v13 = vmax.f32 %v6178_v10, %v5353_v50  ;;  %v862_v55 = vmax.f32 %v6182_v45, %v5352_v17  ;;  %v2831_v10 = vsel %vm5668_vm9, %v4783_v41, %v2830_v23 }
 0x2b0   : > { %v861_v36 = vmax.f32 %v6167_v31, %v5348_v63  ;;  %v860_v8 = vmax.f32 %v6171_v24, %v5347_v6  ;;  %2983 = vst.msk [vmem:[#allocation6 + $0x70] sm:$0xf] %vm1529_vm10, %v2961_v40  ;;  %v1492_v24 = vld [vmem:[#allocation5 + $0x28] sm:$0xf]  ;;  %v4756_v63 = vrot.slane %v1087_v58, 11 }
 0x2b1   : > { %v895_v57 = vpack.c.bf16 %v863_v13, %v863_v13  ;;  %v894_v31 = vpack.c.bf16 %v862_v55, %v862_v55  ;;  %v4755_v13 = vrot.slane %v1074_v18, 11 }
 0x2b2   : > { %v893_v62 = vpack.c.bf16 %v861_v36, %v861_v36  ;;  %v892_v29 = vpack.c.bf16 %v860_v8, %v860_v8  ;;  %1511 = vrot.lane.b32.xlu1 %v1492_v24, %s5376_s21  ;;  %v2857_v36 = vsel %vm5668_vm9, %v4785_v28, %v2856_v32  ;;  %v2795_v8 = vld [vmem:[#allocation5 + $0x28] sm:$0xf] }
 0x2b3   : > { %3256 = vrot.lane.b32.xlu0 %v3240_v0, %s5377_s22  ;;  %988 = vst.msk [vmem:[#allocation5 + $0x64] sm:$0xf] %vm897_vm0, %v895_v57  ;;  %v2841_v56 = vshll.u32 %v2795_v8, 16 }
 0x2b4   : > { %986 = vst.msk [vmem:[#allocation5 + $0x4c] sm:$0xf] %vm897_vm0, %v893_v62  ;;  %v6428_v42 = vpop.permute.xlu1 %2043  ;;  %v3243_v62 = vld [vmem:[#allocation5 + $0x34] sm:$0xf] }
 0x2b5   : > { %985 = vst.msk [vmem:[#allocation5 + $0x40] sm:$0xf] %vm897_vm0, %v892_v29  ;;  %2912 = vrot.lane.b32.xlu2 %v2831_v10, %s5376_s21  ;;  %v6425_v45 = vpop.permute.xlu0 %2039  ;;  %v2838_v10 = vshrl.u32 %v2795_v8, 16 }
 0x2b6   : > { %987 = vst.msk [vmem:[#allocation5 + $0x58] sm:$0xf] %vm897_vm0, %v894_v31 }
 0x2b7   : > { %v1319_v52 = vpop.permute.xlu2 %1318  ;;  %v2840_v4 = vrot.slane %v2838_v10, 7  ;;  %v5158_v10 = vld [vmem:[%s7227_s3 + $0x28] sm:$0xff] }
 0x2b8   : > { %1340 = vst.msk [vmem:[#allocation6 + $0x24] sm:$0xf] %vm1336_vm5, %v1319_v52 }
 0x2ba   : > { %3260 = vrot.lane.b32.xlu1 %v3242_v27, %s5377_s22  ;;  %v3391_v35 = vld [vmem:[#allocation5 + $0x64] sm:$0xf]  ;;  %v2798_v27 = vld [vmem:[#allocation5 + $0x3c] sm:$0x8] }
 0x2bb   : > { %2598 = vrot.lane.b32.xlu0 %v2582_v30, %s5375_s16  ;;  %v3389_v38 = vld [vmem:[#allocation5 + $0x4c] sm:$0xf]  ;;  %3399 = vst.msk [vmem:[#allocation6 + $0x5c] sm:$0xf] %vm897_vm0, %v3391_v35  ;;  %v2805_v5 = vld [vmem:[#allocation5 + $0x64] sm:$0xf] }
 0x2bc   : > { %v1002_v26 = vld [vmem:[#allocation5 + $0x4c] sm:$0xf]  ;;  %v3388_v9 = vld [vmem:[#allocation5 + $0x40] sm:$0xf]  ;;  %3397 = vst.msk [vmem:[#allocation6 + $0x44] sm:$0xf] %vm897_vm0, %v3389_v38  ;;  %v2959_v39 = vpop.permute.xlu1 %2958 }
 0x2bd   : > { %1369 = vrot.lane.b32.xlu2 %v1349_v37, %s5375_s16  ;;  %v6436_v20 = vpop.permute.xlu0 %2041  ;;  %3396 = vst.msk [vmem:[#allocation6 + $0x38] sm:$0xf] %vm897_vm0, %v3388_v9  ;;  %v1092_v21 = vshrl.u32 %v1002_v26, 16  ;;  %v3390_v44 = vld [vmem:[#allocation5 + $0x58] sm:$0xf]  ;;  %v1095_v12 = vshll.u32 %v1002_v26, 16 }
 0x2be   : > { %2982 = vst.msk [vmem:[#allocation6 + $0x64] sm:$0xf] %vm1529_vm10, %v2959_v39  ;;  %v1000_v50 = vld [vmem:[#allocation5 + $0x40] sm:$0xf]  ;;  %v1100_v37 = vshrl.u32 %v1003_v61, 16 }
 0x2bf   : > { %v6440_v46 = vpop.permute.xlu2 %3212  ;;  %v1094_v6 = vrot.slane %v1092_v21, 7  ;;  %3398 = vst.msk [vmem:[#allocation6 + $0x50] sm:$0xf] %vm897_vm0, %v3390_v44  ;;  %v1079_v40 = vshrl.u32 %v1000_v50, 16  ;;  %v1082_v19 = vshll.u32 %v1000_v50, 16  ;;  %v2859_v21 = vshrl.u32 %v2798_v27, 16 }
 0x2c0   : > { %v2799_v31 = vld [vmem:[#allocation5 + $0x40] sm:$0xf]  ;;  %v1004_v38 = vld [vmem:[#allocation5 + $0x58] sm:$0xf]  ;;  %v4757_v32 = vrot.slane %v1100_v37, 11  ;;  %v2903_v37 = vshrl.u32 %v2805_v5, 16 }
 0x2c1   : > { %v1097_v17 = vor.u32 %v1095_v12, %v1094_v6  ;;  %v1081_v55 = vrot.slane %v1079_v40, 7  ;;  %v2864_v30 = vshrl.u32 %v2799_v31, 16  ;;  %v1494_v26 = vld [vmem:[#allocation5 + $0x40] sm:$0xf]  ;;  %v1105_v58 = vshrl.u32 %v1004_v38, 16 }
 0x2c2   : > { %2916 = vrot.lane.b32.xlu1 %v2857_v36, %s5376_s21  ;;  %v3244_v9 = vld [vmem:[#allocation5 + $0x40] sm:$0xf]  ;;  %v1108_v35 = vshll.u32 %v1004_v38, 16  ;;  %v4784_v6 = vrot.slane %v2833_v14, 11  ;;  %v2843_v12 = vor.u32 %v2841_v56, %v2840_v4  ;;  %v2867_v18 = vshll.u32 %v2799_v31, 16  ;;  %v5159_v31 = vld [vmem:[%s7227_s3 + $0x30] sm:$0xff] }
 0x2c3   : > { %1365 = vrot.lane.b32.xlu0 %v1347_v48, %s5375_s16  ;;  %v5113_v41 = vld [vmem:[#allocation6 + $0x40] sm:$0xf0]  ;;  %v1098_v23 = vsel %vm5668_vm9, %v4756_v63, %v1097_v17  ;;  %v1084_v24 = vor.u32 %v1082_v19, %v1081_v55  ;;  %v2866_v39 = vrot.slane %v2864_v30, 7  ;;  %v1107_v44 = vrot.slane %v1105_v58, 7  ;;  %v5160_v17 = vld [vmem:[%s7227_s3 + $0x38] sm:$0xff]  ;;  %v5167_v58 = vld [vmem:[%s7227_s3 + $0x70] sm:$0xff] }
 0x2c4   : > { %v4832_v29 = vld [vmem:[#allocation6 + $0x38] sm:$0xf]  ;;  %1126 = vst.msk [vmem:[#allocation6 + $0x48] sm:$0xf] %vm897_vm0, %v1098_v23  ;;  %v1317_v22 = vpop.permute.xlu1 %1316  ;;  %v4786_v48 = vrot.slane %v2859_v21, 11  ;;  %4205 = vmatpush.bf16.msra.mxu1 %v5160_v17  ;;  %v2905_v21 = vrot.slane %v2903_v37, 7 }
 0x2c5   : > { %3262 = vrot.lane.b32.xlu2 %v3243_v62, %s5377_s22  ;;  %v1472_v0 = vpop.permute.xlu0 %1471  ;;  %v4833_v57 = vor.u32 %v5113_v41, %v4832_v29  ;;  %1339 = vst.msk [vmem:[#allocation6 + $0x18] sm:$0xf] %vm1336_vm5, %v1317_v22  ;;  %v1085_v43 = vsel %vm5668_vm9, %v4755_v13, %v1084_v24  ;;  %v1110_v40 = vor.u32 %v1108_v35, %v1107_v44  ;;  %v5116_v13 = vld [vmem:[#allocation6 + $0x58] sm:$0xf0]  ;;  %v1351_v55 = vld [vmem:[#allocation5 + $0x4c] sm:$0xf] }
 0x2c6   : > { %1488 = vst.msk [vmem:[#allocation6 + $0x174] sm:$0xf] %vm1336_vm5, %v1472_v0  ;;  %v2869_v36 = vor.u32 %v2867_v18, %v2866_v39  ;;  %v2844_v41 = vsel %vm5668_vm9, %v4784_v6, %v2843_v12  ;;  %v4844_v23 = vld [vmem:[#allocation6 + $0x50] sm:$0xf]  ;;  %v5168_v24 = vld [vmem:[%s7227_s3 + $0x78] sm:$0xff]  ;;  %v2906_v6 = vshll.u32 %v2805_v5, 16 }
 0x2c7   : > { %5064 = vmatmul.msk.bf16.gmra.mxu3 %vm4156_vm12, %v4833_v57  ;;  %v2963_v52 = vpop.permute.xlu2 %2962  ;;  %1125 = vst.msk [vmem:[#allocation6 + $0x3c] sm:$0xf] %vm897_vm0, %v1085_v43  ;;  %v1111_v8 = vsel %vm5668_vm9, %v4757_v32, %v1110_v40  ;;  %v4845_v29 = vor.u32 %v5116_v13, %v4844_v23  ;;  %v1493_v22 = vld [vmem:[#allocation5 + $0x34] sm:$0xf]  ;;  %4294 = vmatpush.bf16.msra.mxu2 %v5168_v24  ;;  %v1495_v61 = vld [vmem:[#allocation5 + $0x4c] sm:$0xf] }
 0x2c8   : > { %2984 = vst.msk [vmem:[#allocation6 + $0x7c] sm:$0xf] %vm1529_vm10, %v2963_v52  ;;  %v2870_v19 = vsel %vm5668_vm9, %v4786_v48, %v2869_v36  ;;  %4206 = vmatpush.bf16.msra.mxu1 %v5159_v31  ;;  %v3289_v52 = vld [vmem:[#allocation2 + $0x28] sm:$0xf]  ;;  %v5119_v4 = vld [vmem:[#allocation6 + $0x70] sm:$0xf0]  ;;  %v2908_v36 = vor.u32 %v2906_v6, %v2905_v21 }
 0x2c9   : > { %1127 = vst.msk [vmem:[#allocation6 + $0x54] sm:$0xf] %vm897_vm0, %v1111_v8  ;;  %v4856_v14 = vld [vmem:[#allocation6 + $0x68] sm:$0xf]  ;;  %v2801_v39 = vld [vmem:[#allocation5 + $0x4c] sm:$0xf] }
 0x2ca   : > { %1515 = vrot.lane.b32.xlu1 %v1494_v26, %s5376_s21  ;;  %v1350_v38 = vld [vmem:[#allocation5 + $0x40] sm:$0xf]  ;;  %v5157_v26 = vld [vmem:[%s7227_s3 + $0x20] sm:$0xff]  ;;  %v5156_v32 = vld [vmem:[%s7227_s3 + $0x18] sm:$0xff]  ;;  %v4857_v35 = vor.u32 %v5119_v4, %v4856_v14  ;;  %v2877_v17 = vshrl.u32 %v2801_v39, 16 }
 0x2cb   : > { %1509 = vrot.lane.b32.xlu0 %v1491_v49, %s5376_s21  ;;  %v2804_v49 = vld [vmem:[#allocation5 + $0x60] sm:$0x8]  ;;  %v2111_v12 = vld [vmem:[#allocation5 + $0x10] sm:$0xf]  ;;  %4295 = vmatpush.bf16.msra.mxu2 %v5167_v58  ;;  %v2800_v8 = vld [vmem:[#allocation5 + $0x48] sm:$0x8] }
 0x2cc   : > { %v6463_v63 = vpop.permute.xlu1 %3210  ;;  %4207 = vmatpush.bf16.msra.mxu1 %v5158_v10  ;;  %v2898_v56 = vshrl.u32 %v2804_v49, 16  ;;  %v5166_v18 = vld [vmem:[%s7227_s3 + $0x68] sm:$0xff]  ;;  %v2110_v23 = vld [vmem:[#allocation5 + $0xc] sm:$0x8]  ;;  %v5165_v31 = vld [vmem:[%s7227_s3 + $0x60] sm:$0xff]  ;;  %v2880_v10 = vshll.u32 %v2801_v39, 16 }
 0x2cd   : > { %3264 = vrot.lane.b32.xlu2 %v3244_v9, %s5377_s22  ;;  %v1315_v28 = vpop.permute.xlu0 %1314  ;;  %v3247_v9 = vld [vmem:[#allocation5 + $0x64] sm:$0xf]  ;;  %v3245_v13 = vld [vmem:[#allocation5 + $0x4c] sm:$0xf]  ;;  %v5164_v37 = vld [vmem:[%s7227_s3 + $0x58] sm:$0xff] }
 0x2ce   : > { %1338 = vst.msk [vmem:[#allocation6 + $0xc] sm:$0xf] %vm1336_vm5, %v1315_v28  ;;  %v1352_v28 = vld [vmem:[#allocation5 + $0x58] sm:$0xf]  ;;  %v4789_v48 = vrot.slane %v2898_v56, 11  ;;  %v5154_v5 = vld [vmem:[%s7227_s3 + $0x8] sm:$0xff] }
 0x2cf   : > { %v1325_v50 = vpop.permute.xlu2 %1324  ;;  %4296 = vmatpush.bf16.msra.mxu2 %v5166_v18  ;;  %v2347_v49 = vld [vmem:[#allocation4 + $0x4c] sm:$0xf]  ;;  %v5153_v21 = vld [vmem:[%s7227_s3] sm:$0xff]  ;;  %v5163_v39 = vld [vmem:[%s7227_s3 + $0x50] sm:$0xff] }
 0x2d0   : > { %1343 = vst.msk [vmem:[#allocation6 + $0x48] sm:$0xf] %vm1336_vm5, %v1325_v50  ;;  %4208 = vmatpush.bf16.msra.mxu1 %v5157_v26  ;;  %v2909_v24 = vsel %vm5668_vm9, %v4789_v48, %v2908_v36  ;;  %v2135_v26 = vshll.u32 %v2111_v12, 16  ;;  %v1702_v6 = vld [vmem:[#allocation3 + $0x1c] sm:$0xf] }
 0x2d1   : > { %2355 = vst.msk [vmem:[#allocation6 + $0x100] sm:$0xf] %vm897_vm0, %v2347_v49 }
 0x2d2   : > { %1373 = vrot.lane.b32.xlu1 %v1351_v55, %s5375_s16  ;;  %v2872_v55 = vshrl.u32 %v2800_v8, 16  ;;  %v5162_v8 = vld [vmem:[%s7227_s3 + $0x48] sm:$0xff] }
 0x2d3   : > { %2914 = vrot.lane.b32.xlu0 %v2844_v41, %s5376_s21  ;;  %v2132_v41 = vshrl.u32 %v2111_v12, 16  ;;  %4297 = vmatpush.bf16.msra.mxu2 %v5165_v31  ;;  %v2803_v12 = vld [vmem:[#allocation5 + $0x58] sm:$0xf] }
 0x2d4   : > { %v6481_v0 = vpop.permute.xlu1 %1675  ;;  %4209 = vmatpush.bf16.msra.mxu1 %v5156_v32  ;;  %v4787_v4 = vrot.slane %v2872_v55, 11  ;;  %v4868_v32 = vld [vmem:[#allocation6 + $0x80] sm:$0xf] }
 0x2d5   : > { %2918 = vrot.lane.b32.xlu2 %v2870_v19, %s5376_s21  ;;  %v6479_v62 = vpop.permute.xlu0 %3208  ;;  %v2879_v19 = vrot.slane %v2877_v17, 7  ;;  %v2998_v17 = vld [vmem:[#allocation3 + $0x40] sm:$0xf]  ;;  %v3246_v31 = vld [vmem:[#allocation5 + $0x58] sm:$0xf] }
 0x2d6   : > { %v3052_v55 = vshrl.u32 %v2998_v17, 16 }
 0x2d7   : > { %v6483_v57 = vpop.permute.xlu2 %3218  ;;  %5065 = vmatmul.msk.bf16.gmra.mxu3 %vm4156_vm12, %v4845_v29  ;;  %v5155_v29 = vld [vmem:[%s7227_s3 + $0x10] sm:$0xff]  ;;  %4298 = vmatpush.bf16.msra.mxu2 %v5164_v37  ;;  %v2893_v37 = vshll.u32 %v2803_v12, 16 }
 0x2d8   : > { %4210 = vmatpush.bf16.msra.mxu1 %v5155_v29  ;;  %v2997_v29 = vld [vmem:[#allocation3 + $0x3c] sm:$0x8] }
 0x2da   : > { %1517 = vrot.lane.b32.xlu1 %v1495_v61, %s5376_s21  ;;  %v2127_v61 = vshrl.u32 %v2110_v23, 16  ;;  %v2890_v23 = vshrl.u32 %v2803_v12, 16  ;;  %v2113_v12 = vld [vmem:[#allocation5 + $0x1c] sm:$0xf] }
 0x2db   : > { %1513 = vrot.lane.b32.xlu0 %v1493_v22, %s5376_s21  ;;  %v1496_v22 = vld [vmem:[#allocation5 + $0x58] sm:$0xf]  ;;  %4299 = vmatpush.bf16.msra.mxu2 %v5163_v39 }
 0x2dc   : > { %v1323_v30 = vpop.permute.xlu1 %1322  ;;  %4211 = vmatpush.bf16.msra.mxu1 %v5154_v5  ;;  %v5161_v5 = vld [vmem:[%s7227_s3 + $0x40] sm:$0xff] }
 0x2dd   : > { %3306 = vrot.lane.b32.xlu2 %v3289_v52, %s5377_s22  ;;  %v6498_v43 = vpop.permute.xlu0 %1671  ;;  %1342 = vst.msk [vmem:[#allocation6 + $0x3c] sm:$0xf] %vm1336_vm5, %v1323_v30  ;;  %v2134_v52 = vrot.slane %v2132_v41, 7 }
 0x2df   : > { %v6501_v27 = vpop.permute.xlu2 %1679  ;;  %v2137_v56 = vor.u32 %v2135_v26, %v2134_v52  ;;  %4300 = vmatpush.bf16.msra.mxu2 %v5162_v8  ;;  %v3054_v52 = vrot.slane %v3052_v55, 7  ;;  %v2145_v8 = vshrl.u32 %v2113_v12, 16  ;;  %v2116_v55 = vld [vmem:[#allocation5 + $0x30] sm:$0x8] }
 0x2e0   : > { %4212 = vmatpush.bf16.msra.mxu1 %v5153_v21 }
 0x2e2   : > { %3270 = vrot.lane.b32.xlu1 %v3247_v9, %s5377_s22  ;;  %v4774_v9 = vrot.slane %v2127_v61, 11  ;;  %v3047_v61 = vshrl.u32 %v2997_v29, 16 }
 0x2e3   : > { %1371 = vrot.lane.b32.xlu0 %v1350_v38, %s5375_s16  ;;  %v2882_v38 = vor.u32 %v2880_v10, %v2879_v19  ;;  %v2802_v19 = vld [vmem:[#allocation5 + $0x54] sm:$0x8]  ;;  %v2584_v10 = vld [vmem:[#allocation5 + $0x28] sm:$0xf]  ;;  %4301 = vmatpush.bf16.msra.mxu2 %v5161_v5  ;;  %v2148_v5 = vshll.u32 %v2113_v12, 16 }
 0x2e4   : > { %v6520_v50 = vpop.permute.xlu1 %3216  ;;  %v2138_v18 = vsel %vm5668_vm9, %v4774_v9, %v2137_v56  ;;  %v4793_v21 = vrot.slane %v3047_v61, 11  ;;  %v2996_v61 = vld [vmem:[#allocation3 + $0x34] sm:$0xf]  ;;  %v4800_v12 = vld [vmem:[#allocation6] sm:$0xf] }
 0x2e5   : > { %1375 = vrot.lane.b32.xlu2 %v1352_v28, %s5375_s16  ;;  %v6515_v44 = vpop.permute.xlu0 %1673  ;;  %v2883_v28 = vsel %vm5668_vm9, %v4787_v4, %v2882_v38  ;;  %v3055_v4 = vshll.u32 %v2998_v17, 16  ;;  %v2117_v17 = vld [vmem:[#allocation5 + $0x34] sm:$0xf] }
 0x2e7   : > { %v6522_v40 = vpop.permute.xlu2 %3220  ;;  %5066 = vmatmul.msk.bf16.gmra.mxu3 %vm4156_vm12, %v4857_v35  ;;  %v5122_v35 = vld [vmem:[#allocation6 + $0x88] sm:$0xf0]  ;;  %v3057_v39 = vor.u32 %v3055_v4, %v3054_v52 }
 0x2e8   : > { %v4869_v36 = vor.u32 %v5122_v35, %v4868_v32  ;;  %v4880_v32 = vld [vmem:[#allocation6 + $0x98] sm:$0xf]  ;;  %v5125_v35 = vld [vmem:[#allocation6 + $0xa0] sm:$0xf0]  ;;  %v1704_v52 = vld [vmem:[#allocation3 + $0x34] sm:$0xf] }
 0x2ea   : > { %2924 = vrot.lane.b32.xlu1 %v2909_v24, %s5376_s21  ;;  %v2885_v24 = vshrl.u32 %v2802_v19, 16  ;;  %v1701_v19 = vld [vmem:[#allocation3 + $0x10] sm:$0xf] }
 0x2eb   : > { %3266 = vrot.lane.b32.xlu0 %v3245_v13, %s5377_s22 }
 0x2ec   : > { %v6543_v14 = vpop.permute.xlu1 %1677  ;;  %v4788_v26 = vrot.slane %v2885_v24, 11  ;;  %v1703_v24 = vld [vmem:[#allocation3 + $0x28] sm:$0xf] }
 0x2ed   : > { %1519 = vrot.lane.b32.xlu2 %v1496_v22, %s5376_s21  ;;  %v1321_v30 = vpop.permute.xlu0 %1320  ;;  %v2892_v22 = vrot.slane %v2890_v23, 7  ;;  %v2171_v23 = vshrl.u32 %v2117_v17, 16 }
 0x2ee   : > { %1341 = vst.msk [vmem:[#allocation6 + $0x30] sm:$0xf] %vm1336_vm5, %v1321_v30  ;;  %v2585_v30 = vld [vmem:[#allocation5 + $0x34] sm:$0xf] }
 0x2ef   : > { %v6545_v58 = vpop.permute.xlu2 %1681  ;;  %v2895_v9 = vor.u32 %v2893_v37, %v2892_v22  ;;  %v2166_v22 = vshrl.u32 %v2116_v55, 16  ;;  %v2174_v37 = vshll.u32 %v2117_v17, 16 }
 0x2f2   : > { %1719 = vrot.lane.b32.xlu1 %v1702_v6, %s5376_s21  ;;  %v3058_v6 = vsel %vm5668_vm9, %v4793_v21, %v3057_v39  ;;  %v4777_v21 = vrot.slane %v2166_v22, 11 }
 0x2f3   : > { %2920 = vrot.lane.b32.xlu0 %v2883_v28, %s5376_s21  ;;  %v2896_v28 = vsel %vm5668_vm9, %v4788_v26, %v2895_v9  ;;  %v2999_v26 = vld [vmem:[#allocation3 + $0x48] sm:$0x8]  ;;  %v3039_v9 = vshrl.u32 %v2996_v61, 16 }
 0x2f4   : > { %v2969_v41 = vpop.permute.xlu1 %2968 }
 0x2f5   : > { %2230 = vrot.lane.b32.xlu2 %v2138_v18, %s5377_s22  ;;  %v6561_v48 = vpop.permute.xlu0 %3214  ;;  %2987 = vst.msk [vmem:[#allocation6 + $0xa0] sm:$0xf] %vm1529_vm10, %v2969_v41  ;;  %v3290_v18 = vld [vmem:[#allocation2 + $0x34] sm:$0xf] }
 0x2f7   : > { %v2973_v13 = vpop.permute.xlu2 %2972  ;;  %5067 = vmatmul.msk.bf16.gmra.mxu3 %vm4156_vm12, %v4869_v36  ;;  %v4881_v36 = vor.u32 %v5125_v35, %v4880_v32  ;;  %v2995_v32 = vld [vmem:[#allocation3 + $0x30] sm:$0x8]  ;;  %v3001_v35 = vld [vmem:[#allocation3 + $0x54] sm:$0x8] }
 0x2f8   : > { %2989 = vst.msk [vmem:[#allocation6 + $0xb8] sm:$0xf] %vm1529_vm10, %v2973_v13  ;;  %v2112_v13 = vld [vmem:[#allocation5 + $0x18] sm:$0x8] }
 0x2f9   : > { %v2140_v29 = vshrl.u32 %v2112_v13, 16  ;;  %v3060_v13 = vshrl.u32 %v2999_v26, 16 }
 0x2fa   : > { %2602 = vrot.lane.b32.xlu1 %v2584_v10, %s5375_s16  ;;  %v2173_v10 = vrot.slane %v2171_v23, 7 }
 0x2fb   : > { %3268 = vrot.lane.b32.xlu0 %v3246_v31, %s5377_s22  ;;  %v2147_v31 = vrot.slane %v2145_v8, 7  ;;  %v4775_v4 = vrot.slane %v2140_v29, 11  ;;  %v3034_v8 = vshrl.u32 %v2995_v32, 16  ;;  %v3042_v29 = vshll.u32 %v2996_v61, 16  ;;  %v2121_v32 = vld [vmem:[#allocation5 + $0x4c] sm:$0xf] }
 0x2fc   : > { %v2971_v38 = vpop.permute.xlu1 %2970  ;;  %v2176_v39 = vor.u32 %v2174_v37, %v2173_v10 }
 0x2fd   : > { %2604 = vrot.lane.b32.xlu2 %v2585_v30, %s5375_s16  ;;  %v2965_v49 = vpop.permute.xlu0 %2964  ;;  %2988 = vst.msk [vmem:[#allocation6 + $0xac] sm:$0xf] %vm1529_vm10, %v2971_v38  ;;  %v2150_v38 = vor.u32 %v2148_v5, %v2147_v31  ;;  %v4792_v5 = vrot.slane %v3034_v8, 11  ;;  %v2120_v8 = vld [vmem:[#allocation5 + $0x48] sm:$0x8] }
 0x2fe   : > { %2985 = vst.msk [vmem:[#allocation6 + $0x88] sm:$0xf] %vm1529_vm10, %v2965_v49  ;;  %v3002_v49 = vld [vmem:[#allocation3 + $0x58] sm:$0xf]  ;;  %v2177_v23 = vsel %vm5668_vm9, %v4777_v21, %v2176_v39 }
 0x2ff   : > { %v1364_v56 = vpop.permute.xlu2 %1363  ;;  %v3081_v37 = vshll.u32 %v3002_v49, 16 }
 0x300   : > { %1386 = vst.msk [vmem:[#allocation6 + $0x6c] sm:$0xf] %vm1336_vm5, %v1364_v56 }
 0x301   : > { %1694 = vst.msk [vmem:[#allocation6 + $0x6c] sm:$0xf] %vm1529_vm10, %v6498_v43 }
 0x302   : > { %2103 = vst.msk [vmem:[#allocation6 + $0x6c] sm:$0xf] %vm2053_vm11, %v6078_v11  ;;  %3117 = vrot.lane.b32.xlu1 %v3058_v6, %s5376_s21  ;;  %v3078_v6 = vshrl.u32 %v3002_v49, 16 }
 0x303   : > { %2922 = vrot.lane.b32.xlu0 %v2896_v28, %s5376_s21 }
 0x304   : > { %v2911_v11 = vpop.permute.xlu1 %2910  ;;  %v3080_v31 = vrot.slane %v3078_v6, 7 }
 0x305   : > { %3308 = vrot.lane.b32.xlu2 %v3290_v18, %s5377_s22  ;;  %v2967_v43 = vpop.permute.xlu0 %2966  ;;  %2934 = vst.msk [vmem:[#allocation6 + $0x4] sm:$0xf] %vm1529_vm10, %v2911_v11  ;;  %v5128_v11 = vld [vmem:[#allocation6 + $0xb8] sm:$0xf0] }
 0x306   : > { %2986 = vst.msk [vmem:[#allocation6 + $0x94] sm:$0xf] %vm1529_vm10, %v2967_v43  ;;  %v2151_v43 = vsel %vm5668_vm9, %v4775_v4, %v2150_v38  ;;  %v4794_v4 = vrot.slane %v3060_v13, 11 }
 0x307   : > { %v1508_v41 = vpop.permute.xlu2 %1507  ;;  %5068 = vmatmul.msk.bf16.gmra.mxu3 %vm4156_vm12, %v4881_v36  ;;  %3232 = vst.msk [vmem:[#allocation6 + $0x4] sm:$0xf] %vm2053_vm11, %v6479_v62  ;;  %v3000_v62 = vld [vmem:[#allocation3 + $0x4c] sm:$0xf]  ;;  %v4892_v36 = vld [vmem:[#allocation6 + $0xb0] sm:$0xf] }
 0x308   : > { %1531 = vst.msk [vmem:[#allocation6 + $0xc] sm:$0xf] %vm1529_vm10, %v1508_v41  ;;  %v3065_v28 = vshrl.u32 %v3000_v62, 16  ;;  %v3041_v41 = vrot.slane %v3039_v9, 7  ;;  %v4893_v22 = vor.u32 %v5128_v11, %v4892_v36  ;;  %v3068_v10 = vshll.u32 %v3000_v62, 16 }
 0x309   : > { %2055 = vst.msk [vmem:[#allocation6 + $0xc] sm:$0xf] %vm2053_vm11, %v6347_v16  ;;  %v3293_v36 = vld [vmem:[#allocation2 + $0x58] sm:$0xf]  ;;  %v3291_v11 = vld [vmem:[#allocation2 + $0x40] sm:$0xf] }
 0x30a   : > { %1721 = vrot.lane.b32.xlu1 %v1703_v24, %s5376_s21  ;;  %v3067_v55 = vrot.slane %v3065_v28, 7  ;;  %v2119_v28 = vld [vmem:[#allocation5 + $0x40] sm:$0xf] }
 0x30b   : > { %1717 = vrot.lane.b32.xlu0 %v1701_v19, %s5376_s21  ;;  %v3073_v19 = vshrl.u32 %v3001_v35, 16 }
 0x30c   : > { %v3259_v16 = vpop.permute.xlu1 %3258  ;;  %v3070_v38 = vor.u32 %v3068_v10, %v3067_v55  ;;  %v1705_v55 = vld [vmem:[#allocation3 + $0x40] sm:$0xf] }
 0x30d   : > { %1723 = vrot.lane.b32.xlu2 %v1704_v52, %s5376_s21  ;;  %v1327_v30 = vpop.permute.xlu0 %1326  ;;  %3281 = vst.msk [vmem:[#allocation6 + $0x70] sm:$0xf] %vm2053_vm11, %v3259_v16  ;;  %v4795_v26 = vrot.slane %v3073_v19, 11  ;;  %v4904_v19 = vld [vmem:[#allocation6 + $0xc8] sm:$0xf] }
 0x30e   : > { %1344 = vst.msk [vmem:[#allocation6 + $0x54] sm:$0xf] %vm1336_vm5, %v1327_v30  ;;  %v3044_v30 = vor.u32 %v3042_v29, %v3041_v41  ;;  %v5105_v61 = vld [vmem:[#allocation6 + $0x4] sm:$0xf]  ;;  %v3071_v21 = vsel %vm5668_vm9, %v4794_v4, %v3070_v38  ;;  %v5131_v41 = vld [vmem:[#allocation6 + $0xd0] sm:$0xf0] }
 0x30f   : > { %v2913_v56 = vpop.permute.xlu2 %2912  ;;  %v2200_v38 = vshll.u32 %v2121_v32, 16 }
 0x310   : > { %2935 = vst.msk [vmem:[#allocation6 + $0x10] sm:$0xf] %vm1529_vm10, %v2913_v56  ;;  %v5106_v18 = vld [vmem:[#allocation6 + $0x8] sm:$0xf0]  ;;  %v3083_v56 = vor.u32 %v3081_v37, %v3080_v31  ;;  %v3045_v49 = vsel %vm5668_vm9, %v4792_v5, %v3044_v30  ;;  %v2192_v31 = vshrl.u32 %v2120_v8, 16  ;;  %v2187_v5 = vshll.u32 %v2119_v28, 16 }
 0x311   : > { %3233 = vst.msk [vmem:[#allocation6 + $0x10] sm:$0xf] %vm2053_vm11, %v6463_v63  ;;  %v4801_v17 = vor.u32 %v5106_v18, %v4800_v12  ;;  %v2586_v63 = vld [vmem:[#allocation5 + $0x40] sm:$0xf]  ;;  %v2184_v12 = vshrl.u32 %v2119_v28, 16 }
 0x312   : > { %2236 = vrot.lane.b32.xlu1 %v2177_v23, %s5377_s22  ;;  %v3084_v39 = vsel %vm5668_vm9, %v4795_v26, %v3083_v56  ;;  %v2114_v18 = vld [vmem:[#allocation5 + $0x24] sm:$0x8]  ;;  %v3004_v30 = vld [vmem:[#allocation3 + $0x64] sm:$0xf]  ;;  %v4779_v56 = vrot.slane %v2192_v31, 11 }
 0x313   : > { %2232 = vrot.lane.b32.xlu0 %v2151_v43, %s5377_s22  ;;  %4213 = vmatmul.bf16.vlgmr.msra.gmra.mxu1 %v4801_v17  ;;  %v2118_v17 = vld [vmem:[#allocation5 + $0x3c] sm:$0x8]  ;;  %v2197_v43 = vshrl.u32 %v2121_v32, 16  ;;  %v2153_v23 = vshrl.u32 %v2114_v18, 16  ;;  %v2186_v29 = vrot.slane %v2184_v12, 7  ;;  %v3094_v12 = vshll.u32 %v3004_v30, 16 }
 0x314   : > { %v2601_v52 = vpop.permute.xlu1 %2600  ;;  %v2589_v8 = vld [vmem:[#allocation5 + $0x64] sm:$0xf] }
 0x315   : > { %2606 = vrot.lane.b32.xlu2 %v2586_v63, %s5375_s16  ;;  %v6612_v24 = vpop.permute.xlu0 %3222  ;;  %2623 = vst.msk [vmem:[#allocation6 + $0xd0] sm:$0xf] %vm1336_vm5, %v2601_v52  ;;  %v2179_v63 = vshrl.u32 %v2118_v17, 16  ;;  %v4905_v52 = vor.u32 %v5131_v41, %v4904_v19  ;;  %v3292_v31 = vld [vmem:[#allocation2 + $0x4c] sm:$0xf] }
 0x316   : > { %3136 = vst.msk [vmem:[#allocation6 + $0xd0] sm:$0xf] %vm1529_vm10, %v6369_v53  ;;  %v2115_v53 = vld [vmem:[#allocation5 + $0x28] sm:$0xf] }
 0x317   : > { %v1370_v16 = vpop.permute.xlu2 %1369  ;;  %5069 = vmatmul.msk.bf16.gmra.mxu3 %vm4156_vm12, %v4893_v22  ;;  %v2199_v22 = vrot.slane %v2197_v43, 7 }
 0x318   : > { %v4802_v9 = vld [vmem:[#allocation6 + $0xc] sm:$0xf0]  ;;  %1389 = vst.msk [vmem:[#allocation6 + $0x90] sm:$0xf] %vm1336_vm5, %v1370_v16  ;;  %v4776_v16 = vrot.slane %v2153_v23, 11 }
 0x319   : > { %v4805_v62 = vor.u32 %v5105_v61, %v4802_v9  ;;  %1697 = vst.msk [vmem:[#allocation6 + $0x90] sm:$0xf] %vm1529_vm10, %v6543_v14  ;;  %v4778_v61 = vrot.slane %v2179_v63, 11  ;;  %v2189_v9 = vor.u32 %v2187_v5, %v2186_v29  ;;  %v2630_v63 = vld [vmem:[#allocation4 + $0x10] sm:$0xf] }
 0x31a   : > { %2106 = vst.msk [vmem:[#allocation6 + $0x90] sm:$0xf] %vm2053_vm11, %v6254_v59  ;;  %3119 = vrot.lane.b32.xlu1 %v3071_v21, %s5376_s21  ;;  %v2158_v59 = vshrl.u32 %v2115_v53, 16  ;;  %v3003_v21 = vld [vmem:[#allocation3 + $0x60] sm:$0x8] }
 0x31b   : > { %4302 = vmatmul.bf16.vlgmr.msra.gmra.mxu2 %v4805_v62  ;;  %3115 = vrot.lane.b32.xlu0 %v3045_v49, %s5376_s21  ;;  %v2202_v62 = vor.u32 %v2200_v38, %v2199_v22  ;;  %v3091_v49 = vshrl.u32 %v3004_v30, 16  ;;  %v2122_v29 = vld [vmem:[#allocation5 + $0x54] sm:$0x8]  ;;  %v3295_v22 = vld [vmem:[#allocation2 + $0x70] sm:$0xf] }
 0x31c   : > { %v1368_v35 = vpop.permute.xlu1 %1367  ;;  %v2160_v13 = vrot.slane %v2158_v59, 7 }
 0x31d   : > { %3121 = vrot.lane.b32.xlu2 %v3084_v39, %s5376_s21  ;;  %v6632_v14 = vpop.permute.xlu0 %1683  ;;  %1388 = vst.msk [vmem:[#allocation6 + $0x84] sm:$0xf] %vm1336_vm5, %v1368_v35  ;;  %v2190_v39 = vsel %vm5668_vm9, %v4778_v61, %v2189_v9  ;;  %v2203_v28 = vsel %vm5668_vm9, %v4779_v56, %v2202_v62  ;;  %v3093_v32 = vrot.slane %v3091_v49, 7  ;;  %v2359_v35 = vld [vmem:[#allocation5 + $0x1c] sm:$0xf] }
 0x31e   : > { %1696 = vst.msk [vmem:[#allocation6 + $0x84] sm:$0xf] %vm1529_vm10, %v6481_v0  ;;  %v2161_v0 = vshll.u32 %v2115_v53, 16  ;;  %v2633_v9 = vld [vmem:[#allocation4 + $0x20] sm:$0x1] }
 0x31f   : > { %v3263_v6 = vpop.permute.xlu2 %3262  ;;  %2105 = vst.msk [vmem:[#allocation6 + $0x84] sm:$0xf] %vm2053_vm11, %v6226_v51  ;;  %v2349_v51 = vld [vmem:[#allocation4 + $0x64] sm:$0xf]  ;;  %v3096_v43 = vor.u32 %v3094_v12, %v3093_v32 }
 0x320   : > { %3283 = vst.msk [vmem:[#allocation6 + $0x88] sm:$0xf] %vm2053_vm11, %v3263_v6  ;;  %v2163_v4 = vor.u32 %v2161_v0, %v2160_v13  ;;  %v2123_v13 = vld [vmem:[#allocation5 + $0x58] sm:$0xf]  ;;  %v2632_v0 = vld [vmem:[#allocation4 + $0x1c] sm:$0xf] }
 0x321   : > { %2357 = vst.msk [vmem:[#allocation6 + $0x118] sm:$0xf] %vm897_vm0, %v2349_v51  ;;  %v2210_v19 = vshrl.u32 %v2123_v13, 16  ;;  %v2647_v51 = vshrl.u32 %v2630_v63, 16  ;;  %v2661_v5 = vshrl.u32 %v2632_v0, 16  ;;  %v2664_v30 = vshll.u32 %v2632_v0, 16 }
 0x322   : > { %3314 = vrot.lane.b32.xlu1 %v3293_v36, %s5377_s22  ;;  %v2164_v53 = vsel %vm5668_vm9, %v4776_v16, %v2163_v4  ;;  %2367 = vst.msk [vmem:[#allocation6 + $0x130] sm:$0xf] %vm897_vm0, %v2359_v35  ;;  %v2587_v36 = vld [vmem:[#allocation5 + $0x4c] sm:$0xf]  ;;  %v2213_v16 = vshll.u32 %v2123_v13, 16  ;;  %v2670_v35 = vshll.u32 %v2633_v9, 16 }
 0x323   : > { %3310 = vrot.lane.b32.xlu0 %v3291_v11, %s5377_s22  ;;  %v5134_v11 = vld [vmem:[#allocation6 + $0xe8] sm:$0xf0]  ;;  %v2631_v4 = vld [vmem:[#allocation4 + $0x14] sm:$0x1]  ;;  %v2663_v49 = vrot.slane %v2661_v5, 4 }
 0x324   : > { %v1512_v37 = vpop.permute.xlu1 %1511  ;;  %v2656_v32 = vshll.u32 %v2631_v4, 16  ;;  %v2672_v13 = vrot.slane %v2670_v35, 5  ;;  %v2358_v4 = vld [vmem:[#allocation5 + $0x10] sm:$0xf] }
 0x325   : > { %1725 = vrot.lane.b32.xlu2 %v1705_v55, %s5376_s21  ;;  %v3257_v10 = vpop.permute.xlu0 %3256  ;;  %1533 = vst.msk [vmem:[#allocation6 + $0x24] sm:$0xf] %vm1529_vm10, %v1512_v37 }
 0x326   : > { %3280 = vst.msk [vmem:[#allocation6 + $0x64] sm:$0xf] %vm2053_vm11, %v3257_v10  ;;  %v2650_v10 = vshll.u32 %v2630_v63, 16 }
 0x327   : > { %v3265_v26 = vpop.permute.xlu2 %3264  ;;  %5070 = vmatmul.msk.bf16.gmra.mxu3 %vm4156_vm12, %v4905_v52  ;;  %2057 = vst.msk [vmem:[#allocation6 + $0x24] sm:$0xf] %vm2053_vm11, %v6353_v7  ;;  %v3086_v7 = vshrl.u32 %v3003_v21, 16  ;;  %v2212_v52 = vrot.slane %v2210_v19, 7  ;;  %v2666_v21 = vrot.slane %v2664_v30, 5 }
 0x328   : > { %3284 = vst.msk [vmem:[#allocation6 + $0x94] sm:$0xf] %vm2053_vm11, %v3265_v26  ;;  %v2649_v26 = vrot.slane %v2647_v51, 4  ;;  %v2652_v61 = vrot.slane %v2650_v10, 5 }
 0x329   : > { %v4796_v17 = vrot.slane %v3086_v7, 11  ;;  %v2215_v62 = vor.u32 %v2213_v16, %v2212_v52  ;;  %2366 = vst.msk [vmem:[#allocation6 + $0x124] sm:$0xf] %vm897_vm0, %v2358_v4 }
 0x32a   : > { %2238 = vrot.lane.b32.xlu1 %v2190_v39, %s5377_s22  ;;  %v1706_v39 = vld [vmem:[#allocation3 + $0x4c] sm:$0xf]  ;;  %v2653_v7 = vor.u32 %v2652_v61, %v2649_v26  ;;  %v1750_v26 = vld [vmem:[#allocation2 + $0x14] sm:$0x1] }
 0x32b   : > { %2234 = vrot.lane.b32.xlu0 %v2164_v53, %s5377_s22  ;;  %v3006_v53 = vld [vmem:[#allocation3 + $0x70] sm:$0xf] }
 0x32c   : > { %v3261_v6 = vpop.permute.xlu1 %3260  ;;  %v3104_v12 = vshrl.u32 %v3006_v53, 16  ;;  %v3107_v63 = vshll.u32 %v3006_v53, 16  ;;  %v3145_v53 = vld [vmem:[#allocation2 + $0x28] sm:$0xf] }
 0x32d   : > { %2240 = vrot.lane.b32.xlu2 %v2203_v28, %s5377_s22  ;;  %v2599_v59 = vpop.permute.xlu0 %2598  ;;  %3282 = vst.msk [vmem:[#allocation6 + $0x7c] sm:$0xf] %vm2053_vm11, %v3261_v6  ;;  %v4928_v28 = vld [vmem:[#allocation6 + $0xf8] sm:$0xf]  ;;  %v2667_v6 = vor.u32 %v2666_v21, %v2663_v49  ;;  %v5140_v49 = vld [vmem:[#allocation6 + $0x118] sm:$0xf0]  ;;  %v6734_v21 = vpop.f32.mrf.mxu3 }
 0x32e   : > { %2622 = vst.msk [vmem:[#allocation6 + $0xc4] sm:$0xf] %vm1336_vm5, %v2599_v59  ;;  %v5137_v59 = vld [vmem:[#allocation6 + $0x100] sm:$0xf0]  ;;  %v3106_v19 = vrot.slane %v3104_v12, 7 }
 0x32f   : > { %3135 = vst.msk [vmem:[#allocation6 + $0xc4] sm:$0xf] %vm1529_vm10, %v6300_v34  ;;  %v2919_v18 = vpop.permute.xlu2 %2918  ;;  %v3097_v34 = vsel %vm5668_vm9, %v4796_v17, %v3096_v43  ;;  %v3005_v17 = vld [vmem:[#allocation3 + $0x6c] sm:$0x8] }
 0x330   : > { %3328 = vst.msk [vmem:[#allocation6 + $0xc4] sm:$0xf] %vm2053_vm11, %v6185_v3  ;;  %v4916_v3 = vld [vmem:[#allocation6 + $0xe0] sm:$0xf]  ;;  %v3109_v51 = vor.u32 %v3107_v63, %v3106_v19  ;;  %v2360_v63 = vld [vmem:[#allocation5 + $0x28] sm:$0xf] }
 0x331   : > { %2938 = vst.msk [vmem:[#allocation6 + $0x34] sm:$0xf] %vm1529_vm10, %v2919_v18  ;;  %v4917_v23 = vor.u32 %v5134_v11, %v4916_v3  ;;  %v4929_v18 = vor.u32 %v5137_v59, %v4928_v28  ;;  %v5109_v11 = vld [vmem:[#allocation6 + $0x20] sm:$0xf0]  ;;  %v1775_v28 = vshll.u32 %v1750_v26, 16 }
 0x332   : > { %3236 = vst.msk [vmem:[#allocation6 + $0x34] sm:$0xf] %vm2053_vm11, %v6520_v50  ;;  %2612 = vrot.lane.b32.xlu1 %v2589_v8, %s5375_s16  ;;  %v1749_v8 = vld [vmem:[#allocation2 + $0x10] sm:$0xf] }
 0x333   : > { %2608 = vrot.lane.b32.xlu0 %v2587_v36, %s5375_s16  ;;  %2368 = vst.msk [vmem:[#allocation6 + $0x13c] sm:$0xf] %vm897_vm0, %v2360_v63  ;;  %v2641_v63 = vld [vmem:[#allocation4 + $0x50] sm:$0x1] }
 0x334   : > { %v2917_v55 = vpop.permute.xlu1 %2916 }
 0x335   : > { %3123 = vrot.lane.b32.xlu2 %v3097_v34, %s5376_s21  ;;  %v1366_v41 = vpop.permute.xlu0 %1365  ;;  %2937 = vst.msk [vmem:[#allocation6 + $0x28] sm:$0xf] %vm1529_vm10, %v2917_v55  ;;  %v2668_v55 = vrot.slane %v2667_v6, 4 }
 0x336   : > { %1387 = vst.msk [vmem:[#allocation6 + $0x78] sm:$0xf] %vm1336_vm5, %v1366_v41  ;;  %v2654_v41 = vrot.slane %v2653_v7, 4 }
 0x337   : > { %1695 = vst.msk [vmem:[#allocation6 + $0x78] sm:$0xf] %vm1529_vm10, %v6515_v44  ;;  %v3307_v50 = vpop.permute.xlu2 %3306  ;;  %5071 = vmatmul.msk.bf16.gmra.mxu3 %vm4156_vm12, %v4917_v23  ;;  %v3294_v44 = vld [vmem:[#allocation2 + $0x64] sm:$0xf]  ;;  %v2658_v23 = vrot.slane %v2656_v32, 5 }
 0x338   : > { %2104 = vst.msk [vmem:[#allocation6 + $0x78] sm:$0xf] %vm2053_vm11, %v6142_v25  ;;  %v2205_v25 = vshrl.u32 %v2122_v29, 16  ;;  %v2348_v29 = vld [vmem:[#allocation4 + $0x58] sm:$0xf] }
 0x339   : > { %3235 = vst.msk [vmem:[#allocation6 + $0x28] sm:$0xf] %vm2053_vm11, %v6561_v48  ;;  %v2659_v0 = vsel %vm5524_vm4, %v2654_v41, %v2658_v23 }
 0x33a   : > { %3329 = vst.msk [vmem:[#allocation6 + $0xd0] sm:$0xf] %vm2053_vm11, %v3307_v50  ;;  %3316 = vrot.lane.b32.xlu1 %v3294_v44, %s5377_s22  ;;  %v4780_v56 = vrot.slane %v2205_v25, 11  ;;  %v3099_v50 = vshrl.u32 %v3005_v17, 16 }
 0x33b   : > { %3312 = vrot.lane.b32.xlu0 %v3292_v31, %s5377_s22  ;;  %v1766_v31 = vshrl.u32 %v1749_v8, 16  ;;  %2356 = vst.msk [vmem:[#allocation6 + $0x10c] sm:$0xf] %vm897_vm0, %v2348_v29  ;;  %v2361_v29 = vld [vmem:[#allocation5 + $0x34] sm:$0xf] }
 0x33c   : > { %v1516_v48 = vpop.permute.xlu1 %1515  ;;  %2369 = vst.msk [vmem:[#allocation6 + $0x148] sm:$0xf] %vm897_vm0, %v2361_v29 }
 0x33d   : > { %3318 = vrot.lane.b32.xlu2 %v3295_v22, %s5377_s22  ;;  %v1510_v37 = vpop.permute.xlu0 %1509  ;;  %1535 = vst.msk [vmem:[#allocation6 + $0x3c] sm:$0xf] %vm1529_vm10, %v1516_v48  ;;  %v1769_v22 = vshll.u32 %v1749_v8, 16  ;;  %v1768_v48 = vrot.slane %v1766_v31, 4 }
 0x33e   : > { %1532 = vst.msk [vmem:[#allocation6 + $0x18] sm:$0xf] %vm1529_vm10, %v1510_v37 }
 0x33f   : > { %2056 = vst.msk [vmem:[#allocation6 + $0x18] sm:$0xf] %vm2053_vm11, %v6350_v60  ;;  %v1376_v38 = vpop.permute.xlu2 %1375  ;;  %v1708_v60 = vld [vmem:[#allocation3 + $0x64] sm:$0xf]  ;;  %v1771_v16 = vrot.slane %v1769_v22, 5 }
 0x340   : > { %2059 = vst.msk [vmem:[#allocation6 + $0x3c] sm:$0xf] %vm2053_vm11, %v6425_v45  ;;  %v2216_v45 = vsel %vm5668_vm9, %v4780_v56, %v2215_v62  ;;  %v4814_v30 = vld [vmem:[#allocation6 + $0x24] sm:$0xf0]  ;;  %v1752_v56 = vld [vmem:[#allocation2 + $0x20] sm:$0x1] }
 0x341   : > { %1392 = vst.msk [vmem:[#allocation6 + $0xb4] sm:$0xf] %vm1336_vm5, %v1376_v38  ;;  %v4940_v62 = vld [vmem:[#allocation6 + $0x110] sm:$0xf]  ;;  %v1789_v32 = vshll.u32 %v1752_v56, 16 }
 0x342   : > { %1700 = vst.msk [vmem:[#allocation6 + $0xb4] sm:$0xf] %vm1529_vm10, %v6632_v14  ;;  %1731 = vrot.lane.b32.xlu1 %v1708_v60, %s5376_s21  ;;  %v3336_v60 = vld [vmem:[#allocation3 + $0x1c] sm:$0xf]  ;;  %v4941_v59 = vor.u32 %v5140_v49, %v4940_v62  ;;  %v1753_v22 = vld [vmem:[#allocation2 + $0x28] sm:$0xf] }
 0x343   : > { %1727 = vrot.lane.b32.xlu0 %v1706_v39, %s5376_s21  ;;  %2109 = vst.msk [vmem:[#allocation6 + $0xb4] sm:$0xf] %vm2053_vm11, %v6218_v15  ;;  %v1751_v15 = vld [vmem:[#allocation2 + $0x1c] sm:$0xf]  ;;  %v1772_v39 = vor.u32 %v1771_v16, %v1768_v48  ;;  %v1791_v8 = vrot.slane %v1789_v32, 5 }
 0x344   : > { %v1374_v43 = vpop.permute.xlu1 %1373  ;;  %v1780_v44 = vshrl.u32 %v1751_v15, 16  ;;  %v1783_v10 = vshll.u32 %v1751_v15, 16  ;;  %v2636_v16 = vld [vmem:[#allocation4 + $0x34] sm:$0xf]  ;;  %v1754_v56 = vld [vmem:[#allocation2 + $0x2c] sm:$0x1] }
 0x345   : > { %2242 = vrot.lane.b32.xlu2 %v2216_v45, %s5377_s22  ;;  %v2915_v14 = vpop.permute.xlu0 %2914  ;;  %1391 = vst.msk [vmem:[#allocation6 + $0xa8] sm:$0xf] %vm1336_vm5, %v1374_v43  ;;  %v1773_v43 = vrot.slane %v1772_v39, 4  ;;  %v2692_v62 = vshll.u32 %v2636_v16, 16  ;;  %v3337_v49 = vld [vmem:[#allocation3 + $0x28] sm:$0xf] }
 0x346   : > { %2936 = vst.msk [vmem:[#allocation6 + $0x1c] sm:$0xf] %vm1529_vm10, %v2915_v14  ;;  %v4812_v36 = vld [vmem:[#allocation6 + $0x18] sm:$0xf]  ;;  %v1782_v61 = vrot.slane %v1780_v44, 4  ;;  %v1785_v9 = vrot.slane %v1783_v10, 5 }
 0x347   : > { %3234 = vst.msk [vmem:[#allocation6 + $0x1c] sm:$0xf] %vm2053_vm11, %v6440_v46  ;;  %5072 = vmatmul.msk.bf16.gmra.mxu3 %vm4156_vm12, %v4929_v18  ;;  %v1520_v34 = vpop.permute.xlu2 %1519  ;;  %v4813_v3 = vor.u32 %v5109_v11, %v4812_v36  ;;  %v2588_v46 = vld [vmem:[#allocation5 + $0x58] sm:$0xf]  ;;  %v5112_v14 = vld [vmem:[#allocation6 + $0x38] sm:$0xf0] }
 0x348   : > { %1699 = vst.msk [vmem:[#allocation6 + $0xa8] sm:$0xf] %vm1529_vm10, %v6545_v58  ;;  %v4797_v58 = vrot.slane %v3099_v50, 11  ;;  %v1786_v7 = vor.u32 %v1785_v9, %v1782_v61  ;;  %v1777_v36 = vrot.slane %v1775_v28, 5  ;;  %v3144_v44 = vld [vmem:[#allocation2 + $0x1c] sm:$0xf] }
 0x349   : > { %4218 = vmatmul.bf16.gmra.mxu1 %v4813_v3  ;;  %2108 = vst.msk [vmem:[#allocation6 + $0xa8] sm:$0xf] %vm2053_vm11, %v6281_v33  ;;  %v2673_v33 = vsel %vm5524_vm4, %v2668_v55, %v2672_v13  ;;  %v2635_v3 = vld [vmem:[#allocation4 + $0x2c] sm:$0x1]  ;;  %v6753_v55 = vpop.f32.mrf.mxu3  ;;  %v5143_v10 = vld [vmem:[#allocation6 + $0x130] sm:$0xf0] }
 0x34a   : > { %1537 = vst.msk [vmem:[#allocation6 + $0x54] sm:$0xf] %vm1529_vm10, %v1520_v34  ;;  %2758 = vrot.lane.b32.xlu1 %v2659_v0, %s5375_s16  ;;  %v3110_v38 = vsel %vm5668_vm9, %v4797_v58, %v3109_v51  ;;  %v1787_v11 = vrot.slane %v1786_v7, 4  ;;  %v1778_v41 = vsel %vm5524_vm4, %v1773_v43, %v1777_v36  ;;  %v2684_v13 = vshll.u32 %v2635_v3, 16  ;;  %v2263_v58 = vld [vmem:[#allocation4 + $0x1c] sm:$0xf] }
 0x34b   : > { %2610 = vrot.lane.b32.xlu0 %v2588_v46, %s5375_s16  ;;  %2061 = vst.msk [vmem:[#allocation6 + $0x54] sm:$0xf] %vm2053_vm11, %v6428_v42  ;;  %v1803_v28 = vshll.u32 %v1754_v56, 16  ;;  %v2694_v32 = vrot.slane %v2692_v62, 5  ;;  %v5146_v36 = vld [vmem:[#allocation6 + $0x148] sm:$0xf0] }
 0x34c   : > { %v1518_v52 = vpop.permute.xlu1 %1517  ;;  %v2686_v31 = vrot.slane %v2684_v13, 5 }
 0x34d   : > { %2760 = vrot.lane.b32.xlu2 %v2673_v33, %s5375_s16  ;;  %v1514_v25 = vpop.permute.xlu0 %1513  ;;  %1536 = vst.msk [vmem:[#allocation6 + $0x48] sm:$0xf] %vm1529_vm10, %v1518_v52  ;;  %v4952_v33 = vld [vmem:[#allocation6 + $0x128] sm:$0xf]  ;;  %v1797_v52 = vshll.u32 %v1753_v22, 16 }
 0x34e   : > { %1534 = vst.msk [vmem:[#allocation6 + $0x30] sm:$0xf] %vm1529_vm10, %v1514_v25  ;;  %v5108_v5 = vld [vmem:[#allocation6 + $0x1c] sm:$0xf] }
 0x34f   : > { %2058 = vst.msk [vmem:[#allocation6 + $0x30] sm:$0xf] %vm2053_vm11, %v6375_v54  ;;  %v6726_v42 = vpop.permute.xlu2 %2230  ;;  %v4817_v37 = vor.u32 %v5108_v5, %v4814_v30  ;;  %v2634_v54 = vld [vmem:[#allocation4 + $0x28] sm:$0xf]  ;;  %v4953_v30 = vor.u32 %v5143_v10, %v4952_v33  ;;  %v1799_v9 = vrot.slane %v1797_v52, 5  ;;  %v2726_v10 = vshll.u32 %v2641_v63, 16 }
 0x350   : > { %2060 = vst.msk [vmem:[#allocation6 + $0x48] sm:$0xf] %vm2053_vm11, %v6436_v20  ;;  %v2675_v20 = vshrl.u32 %v2634_v54, 16  ;;  %v2678_v35 = vshll.u32 %v2634_v54, 16  ;;  %v2689_v54 = vshrl.u32 %v2636_v16, 16 }
 0x351   : > { %4307 = vmatmul.bf16.gmra.mxu2 %v4817_v37  ;;  %v6770_v4 = vpop.f32.mrf.mxu3  ;;  %v1755_v52 = vld [vmem:[#allocation2 + $0x34] sm:$0xf]  ;;  %v1759_v16 = vld [vmem:[#allocation2 + $0x4c] sm:$0xf]  ;;  %v2638_v63 = vld [vmem:[#allocation4 + $0x40] sm:$0xf] }
 0x352   : > { %3162 = vrot.lane.b32.xlu1 %v3145_v53, %s5376_s21  ;;  %v2677_v15 = vrot.slane %v2675_v20, 4  ;;  %v2680_v34 = vrot.slane %v2678_v35, 5  ;;  %v5115_v48 = vld [vmem:[#allocation6 + $0x50] sm:$0xf0]  ;;  %v2691_v7 = vrot.slane %v2689_v54, 4 }
 0x353   : > { %3125 = vrot.lane.b32.xlu0 %v3110_v38, %s5376_s21  ;;  %v3146_v53 = vld [vmem:[#allocation2 + $0x34] sm:$0xf] }
 0x354   : > { %v3271_v6 = vpop.permute.xlu1 %3270  ;;  %v2681_v23 = vor.u32 %v2680_v34, %v2677_v15  ;;  %v5111_v35 = vld [vmem:[#allocation6 + $0x34] sm:$0xf] }
 0x355   : > { %3352 = vrot.lane.b32.xlu2 %v3336_v60, %s5377_s22  ;;  %v1372_v45 = vpop.permute.xlu0 %1371  ;;  %3287 = vst.msk [vmem:[#allocation6 + $0xb8] sm:$0xf] %vm2053_vm11, %v3271_v6 }
 0x356   : > { %1390 = vst.msk [vmem:[#allocation6 + $0x9c] sm:$0xf] %vm1336_vm5, %v1372_v45  ;;  %v4824_v12 = vld [vmem:[#allocation6 + $0x30] sm:$0xf]  ;;  %v2682_v0 = vrot.slane %v2681_v23, 4 }
 0x357   : > { %1698 = vst.msk [vmem:[#allocation6 + $0x9c] sm:$0xf] %vm1529_vm10, %v6501_v27  ;;  %5073 = vmatmul.msk.bf16.gmra.mxu3 %vm4156_vm12, %v4941_v59  ;;  %v2605_v18 = vpop.permute.xlu2 %2604  ;;  %v4825_v17 = vor.u32 %v5112_v14, %v4824_v12  ;;  %v1707_v27 = vld [vmem:[#allocation3 + $0x58] sm:$0xf]  ;;  %v4836_v25 = vld [vmem:[#allocation6 + $0x48] sm:$0xf] }
 0x358   : > { %2107 = vst.msk [vmem:[#allocation6 + $0x9c] sm:$0xf] %vm2053_vm11, %v6239_v1  ;;  %v1792_v1 = vsel %vm5524_vm4, %v1787_v11, %v1791_v8  ;;  %v2687_v51 = vsel %vm5524_vm4, %v2682_v0, %v2686_v31  ;;  %v4837_v26 = vor.u32 %v5115_v48, %v4836_v25  ;;  %v2637_v12 = vld [vmem:[#allocation4 + $0x38] sm:$0x1]  ;;  %v2640_v14 = vld [vmem:[#allocation4 + $0x4c] sm:$0xf]  ;;  %v2695_v8 = vor.u32 %v2694_v32, %v2691_v7 }
 0x359   : > { %4223 = vmatmul.bf16.gmra.mxu1 %v4825_v17  ;;  %2625 = vst.msk [vmem:[#allocation6 + $0xe8] sm:$0xf] %vm1336_vm5, %v2605_v18  ;;  %v1805_v17 = vrot.slane %v1803_v28, 5  ;;  %v6783_v43 = vpop.f32.mrf.mxu3  ;;  %v2262_v11 = vld [vmem:[#allocation4 + $0x10] sm:$0xf]  ;;  %v2698_v15 = vshll.u32 %v2637_v12, 16 }
 0x35a   : > { %1877 = vrot.lane.b32.xlu1 %v1778_v41, %s5376_s21  ;;  %v2717_v34 = vshrl.u32 %v2640_v14, 16  ;;  %v2720_v3 = vshll.u32 %v2640_v14, 16  ;;  %v5118_v23 = vld [vmem:[#allocation6 + $0x68] sm:$0xf0]  ;;  %v2696_v0 = vrot.slane %v2695_v8, 4  ;;  %v1836_v28 = vshrl.u32 %v1759_v16, 16 }
 0x35b   : > { %1729 = vrot.lane.b32.xlu0 %v1707_v27, %s5376_s21  ;;  %v3339_v27 = vld [vmem:[#allocation3 + $0x40] sm:$0xf]  ;;  %v2700_v31 = vrot.slane %v2698_v15, 5  ;;  %v3338_v7 = vld [vmem:[#allocation3 + $0x34] sm:$0xf] }
 0x35c   : > { %v2925_v19 = vpop.permute.xlu1 %2924  ;;  %v5149_v32 = vld [vmem:[#allocation6 + $0x160] sm:$0xf0]  ;;  %v4860_v12 = vld [vmem:[#allocation6 + $0x78] sm:$0xf] }
 0x35d   : > { %1879 = vrot.lane.b32.xlu2 %v1792_v1, %s5376_s21  ;;  %v3267_v50 = vpop.permute.xlu0 %3266  ;;  %2941 = vst.msk [vmem:[#allocation6 + $0x58] sm:$0xf] %vm1529_vm10, %v2925_v19  ;;  %v4964_v1 = vld [vmem:[#allocation6 + $0x140] sm:$0xf]  ;;  %v2701_v25 = vsel %vm5524_vm4, %v2696_v0, %v2700_v31  ;;  %v5121_v15 = vld [vmem:[#allocation6 + $0x80] sm:$0xf0] }
 0x35e   : > { %3285 = vst.msk [vmem:[#allocation6 + $0xa0] sm:$0xf] %vm2053_vm11, %v3267_v50  ;;  %v4965_v50 = vor.u32 %v5146_v36, %v4964_v1  ;;  %v4848_v19 = vld [vmem:[#allocation6 + $0x60] sm:$0xf]  ;;  %v2642_v0 = vld [vmem:[#allocation4 + $0x58] sm:$0xf] }
 0x35f   : > { %v6758_v46 = vpop.permute.xlu2 %3308  ;;  %3239 = vst.msk [vmem:[#allocation6 + $0x58] sm:$0xf] %vm2053_vm11, %v6612_v24  ;;  %v1794_v24 = vshrl.u32 %v1753_v22, 16  ;;  %v2719_v22 = vrot.slane %v2717_v34, 4  ;;  %v2362_v31 = vld [vmem:[#allocation5 + $0x40] sm:$0xf] }
 0x360   : > { %2370 = vst.msk [vmem:[#allocation6 + $0x154] sm:$0xf] %vm897_vm0, %v2362_v31 }
 0x361   : > { %v1796_v61 = vrot.slane %v1794_v24, 4 }
 0x362   : > { %2280 = vrot.lane.b32.xlu1 %v2263_v58, %s5377_s22  ;;  %v4849_v58 = vor.u32 %v5118_v23, %v4848_v19  ;;  %v2363_v23 = vld [vmem:[#allocation5 + $0x4c] sm:$0xf]  ;;  %v4861_v19 = vor.u32 %v5121_v15, %v4860_v12  ;;  %v2266_v15 = vld [vmem:[#allocation4 + $0x40] sm:$0xf] }
 0x363   : > { %3160 = vrot.lane.b32.xlu0 %v3144_v44, %s5376_s21  ;;  %v1800_v39 = vor.u32 %v1799_v9, %v1796_v61  ;;  %v2722_v44 = vrot.slane %v2720_v3, 5  ;;  %v2124_v9 = vld [vmem:[#allocation5 + $0x60] sm:$0x8]  ;;  %v1838_v3 = vrot.slane %v1836_v28, 4  ;;  %2371 = vst.msk [vmem:[#allocation6 + $0x160] sm:$0xf] %vm897_vm0, %v2363_v23 }
 0x364   : > { %v1720_v37 = vpop.permute.xlu1 %1719 }
 0x365   : > { %2762 = vrot.lane.b32.xlu2 %v2687_v51, %s5375_s16  ;;  %v2921_v5 = vpop.permute.xlu0 %2920  ;;  %1742 = vst.msk [vmem:[#allocation6 + $0xcc] sm:$0xf] %vm1529_vm10, %v1720_v37  ;;  %v1801_v18 = vrot.slane %v1800_v39, 4  ;;  %v6797_v51 = vpop.f32.mrf.mxu3  ;;  %v2723_v24 = vor.u32 %v2722_v44, %v2719_v22  ;;  %v2265_v37 = vld [vmem:[#allocation4 + $0x34] sm:$0xf]  ;;  %v2218_v39 = vshrl.u32 %v2124_v9, 16 }
 0x366   : > { %2939 = vst.msk [vmem:[#allocation6 + $0x40] sm:$0xf] %vm1529_vm10, %v2921_v5  ;;  %v2264_v5 = vld [vmem:[#allocation4 + $0x28] sm:$0xf] }
 0x367   : > { %3237 = vst.msk [vmem:[#allocation6 + $0x40] sm:$0xf] %vm2053_vm11, %v6483_v57  ;;  %5074 = vmatmul.msk.bf16.gmra.mxu3 %vm4156_vm12, %v4953_v30  ;;  %v1724_v38 = vpop.permute.xlu2 %1723  ;;  %v3147_v57 = vld [vmem:[#allocation2 + $0x40] sm:$0xf]  ;;  %v1806_v41 = vsel %vm5524_vm4, %v1801_v18, %v1805_v17  ;;  %v2125_v30 = vld [vmem:[#allocation5 + $0x64] sm:$0xf] }
 0x368   : > { %1744 = vst.msk [vmem:[#allocation6 + $0xe4] sm:$0xf] %vm1529_vm10, %v1724_v38  ;;  %v1808_v38 = vshrl.u32 %v1755_v52, 16  ;;  %v2724_v61 = vrot.slane %v2723_v24, 4  ;;  %v2223_v56 = vshrl.u32 %v2125_v30, 16  ;;  %v2226_v14 = vshll.u32 %v2125_v30, 16 }
 0x369   : > { %4228 = vmatmul.bf16.gmra.mxu1 %v4837_v26  ;;  %v1760_v18 = vld [vmem:[#allocation2 + $0x50] sm:$0x1]  ;;  %v1756_v17 = vld [vmem:[#allocation2 + $0x38] sm:$0x1]  ;;  %v4781_v34 = vrot.slane %v2218_v39, 11 }
 0x36a   : > { %3164 = vrot.lane.b32.xlu1 %v3146_v53, %s5376_s21  ;;  %v1845_v44 = vshll.u32 %v1760_v18, 16  ;;  %v3340_v30 = vld [vmem:[#allocation3 + $0x4c] sm:$0xf]  ;;  %v5152_v18 = vld [vmem:[#allocation6 + $0x178] sm:$0xf0] }
 0x36b   : > { %3354 = vrot.lane.b32.xlu0 %v3337_v49, %s5377_s22  ;;  %v4838_v49 = vld [vmem:[#allocation6 + $0x54] sm:$0xf0] }
 0x36c   : > { %v2603_v20 = vpop.permute.xlu1 %2602 }
 0x36d   : > { %3166 = vrot.lane.b32.xlu2 %v3147_v57, %s5376_s21  ;;  %v3269_v60 = vpop.permute.xlu0 %3268  ;;  %2624 = vst.msk [vmem:[#allocation6 + $0xdc] sm:$0xf] %vm1336_vm5, %v2603_v20  ;;  %v1811_v57 = vshll.u32 %v1755_v52, 16  ;;  %v2225_v20 = vrot.slane %v2223_v56, 7  ;;  %v2703_v52 = vshrl.u32 %v2638_v63, 16  ;;  %v1847_v56 = vrot.slane %v1845_v44, 5 }
 0x36e   : > { %3286 = vst.msk [vmem:[#allocation6 + $0xac] sm:$0xf] %vm2053_vm11, %v3269_v60  ;;  %v4826_v45 = vld [vmem:[#allocation6 + $0x3c] sm:$0xf0]  ;;  %v1839_v60 = vshll.u32 %v1759_v16, 16 }
 0x36f   : > { %v2607_v59 = vpop.permute.xlu2 %2606  ;;  %v4829_v6 = vor.u32 %v5111_v35, %v4826_v45  ;;  %v6809_v35 = vpop.f32.mrf.mxu3  ;;  %v1813_v36 = vrot.slane %v1811_v57, 5  ;;  %v2228_v1 = vor.u32 %v2226_v14, %v2225_v20  ;;  %v2705_v57 = vrot.slane %v2703_v52, 4  ;;  %v4988_v14 = vld [vmem:[#allocation6 + $0x170] sm:$0xf]  ;;  %v6856_v52 = vld [vmem:[%s7228_s4] ss:$0 sm:$0xff] }
 0x370   : > { %2626 = vst.msk [vmem:[#allocation6 + $0xf4] sm:$0xf] %vm1336_vm5, %v2607_v59  ;;  %v3148_v59 = vld [vmem:[#allocation2 + $0x4c] sm:$0xf] }
 0x371   : > { %4312 = vmatmul.bf16.gmra.mxu2 %v4829_v6  ;;  %v1810_v6 = vrot.slane %v1808_v38, 4  ;;  %v2229_v24 = vsel %vm5668_vm9, %v4781_v34, %v2228_v1  ;;  %v5124_v34 = vld [vmem:[#allocation6 + $0x98] sm:$0xf0]  ;;  %v4989_v1 = vor.u32 %v5152_v18, %v4988_v14 }
 0x372   : > { %3358 = vrot.lane.b32.xlu1 %v3339_v27, %s5377_s22  ;;  %v1841_v27 = vrot.slane %v1839_v60, 5  ;;  %v4850_v60 = vld [vmem:[#allocation6 + $0x6c] sm:$0xf0] }
 0x373   : > { %2278 = vrot.lane.b32.xlu0 %v2262_v11, %s5377_s22 }
 0x374   : > { %v3118_v29 = vpop.permute.xlu1 %3117  ;;  %v1842_v22 = vor.u32 %v1841_v27, %v1838_v3 }
 0x375   : > { %1881 = vrot.lane.b32.xlu2 %v1806_v41, %s5376_s21  ;;  %v2923_v13 = vpop.permute.xlu0 %2922  ;;  %3138 = vst.msk [vmem:[#allocation6 + $0xe8] sm:$0xf] %vm1529_vm10, %v3118_v29  ;;  %v2364_v29 = vld [vmem:[#allocation5 + $0x58] sm:$0xf] }
 0x376   : > { %2940 = vst.msk [vmem:[#allocation6 + $0x4c] sm:$0xf] %vm1529_vm10, %v2923_v13  ;;  %v2365_v13 = vld [vmem:[#allocation5 + $0x64] sm:$0xf]  ;;  %v1843_v9 = vrot.slane %v1842_v22, 4 }
 0x377   : > { %5075 = vmatmul.msk.bf16.gmra.mxu3 %vm4156_vm12, %v4965_v50  ;;  %v6793_v33 = vpop.permute.xlu2 %3121  ;;  %3238 = vst.msk [vmem:[#allocation6 + $0x4c] sm:$0xf] %vm2053_vm11, %v6522_v40  ;;  %v2728_v40 = vrot.slane %v2726_v10, 5  ;;  %v1817_v10 = vshll.u32 %v1756_v17, 16 }
 0x378   : > { %2373 = vst.msk [vmem:[#allocation6 + $0x178] sm:$0xf] %vm897_vm0, %v2365_v13  ;;  %v4872_v13 = vld [vmem:[#allocation6 + $0x90] sm:$0xf] }
 0x379   : > { %4233 = vmatmul.bf16.gmra.mxu1 %v4849_v58  ;;  %v2729_v45 = vsel %vm5524_vm4, %v2724_v61, %v2728_v40  ;;  %v1814_v58 = vor.u32 %v1813_v36, %v1810_v6  ;;  %2372 = vst.msk [vmem:[#allocation6 + $0x16c] sm:$0xf] %vm897_vm0, %v2364_v29  ;;  %v3341_v40 = vld [vmem:[#allocation3 + $0x58] sm:$0xf]  ;;  %v5117_v61 = vld [vmem:[#allocation6 + $0x64] sm:$0xf]  ;;  %v4873_v31 = vor.u32 %v5124_v34, %v4872_v13 }
 0x37a   : > { %2282 = vrot.lane.b32.xlu1 %v2264_v5, %s5377_s22  ;;  %v2706_v5 = vshll.u32 %v2638_v63, 16  ;;  %v4853_v20 = vor.u32 %v5117_v61, %v4850_v60  ;;  %v2645_v6 = vld [vmem:[#allocation4 + $0x68] sm:$0x1] }
 0x37b   : > { %2764 = vrot.lane.b32.xlu0 %v2701_v25, %s5375_s16  ;;  %v2644_v25 = vld [vmem:[#allocation4 + $0x64] sm:$0xf]  ;;  %v2754_v27 = vshll.u32 %v2645_v6, 16 }
 0x37c   : > { %v1722_v26 = vpop.permute.xlu1 %1721  ;;  %v2745_v16 = vshrl.u32 %v2644_v25, 16  ;;  %v2748_v38 = vshll.u32 %v2644_v25, 16  ;;  %v2708_v39 = vrot.slane %v2706_v5, 5  ;;  %v1763_v5 = vld [vmem:[#allocation2 + $0x64] sm:$0xf] }
 0x37d   : > { %2284 = vrot.lane.b32.xlu2 %v2265_v37, %s5377_s22  ;;  %v1718_v48 = vpop.permute.xlu0 %1717  ;;  %1743 = vst.msk [vmem:[#allocation6 + $0xd8] sm:$0xf] %vm1529_vm10, %v1722_v26  ;;  %v2731_v37 = vshrl.u32 %v2642_v0, 16  ;;  %v6829_v26 = vpop.f32.mrf.mxu3  ;;  %v2756_v25 = vrot.slane %v2754_v27, 5  ;;  %v4884_v27 = vld [vmem:[#allocation6 + $0xa8] sm:$0xf] }
 0x37e   : > { %1741 = vst.msk [vmem:[#allocation6 + $0xc0] sm:$0xf] %vm1529_vm10, %v1718_v48  ;;  %v5114_v62 = vld [vmem:[#allocation6 + $0x4c] sm:$0xf]  ;;  %v2734_v48 = vshll.u32 %v2642_v0, 16  ;;  %v2709_v17 = vor.u32 %v2708_v39, %v2705_v57 }
 0x37f   : > { %v1726_v54 = vpop.permute.xlu2 %1725  ;;  %2254 = vst.msk [vmem:[#allocation6 + $0xc0] sm:$0xf] %vm2053_vm11, %v6726_v42  ;;  %v4841_v53 = vor.u32 %v5114_v62, %v4838_v49  ;;  %v4976_v42 = vld [vmem:[#allocation6 + $0x158] sm:$0xf]  ;;  %v1819_v62 = vrot.slane %v1817_v10, 5 }
 0x380   : > { %1745 = vst.msk [vmem:[#allocation6 + $0xf0] sm:$0xf] %vm1529_vm10, %v1726_v54  ;;  %v4977_v8 = vor.u32 %v5149_v32, %v4976_v42  ;;  %v1815_v54 = vrot.slane %v1814_v58, 4  ;;  %v2736_v32 = vrot.slane %v2734_v48, 5  ;;  %v2750_v42 = vrot.slane %v2748_v38, 5 }
 0x381   : > { %4317 = vmatmul.bf16.gmra.mxu2 %v4841_v53  ;;  %v2639_v53 = vld [vmem:[#allocation4 + $0x44] sm:$0x1]  ;;  %v1757_v58 = vld [vmem:[#allocation2 + $0x40] sm:$0xf]  ;;  %v1758_v39 = vld [vmem:[#allocation2 + $0x44] sm:$0x1] }
 0x382   : > { %2768 = vrot.lane.b32.xlu1 %v2729_v45, %s5375_s16  ;;  %v2643_v45 = vld [vmem:[#allocation4 + $0x5c] sm:$0x1]  ;;  %v1820_v12 = vsel %vm5524_vm4, %v1815_v54, %v1819_v62  ;;  %v2712_v36 = vshll.u32 %v2639_v53, 16  ;;  %v1822_v48 = vshrl.u32 %v1757_v58, 16 }
 0x383   : > { %3356 = vrot.lane.b32.xlu0 %v3338_v7, %s5377_s22  ;;  %v2733_v7 = vrot.slane %v2731_v37, 4 }
 0x384   : > { %v2237_v41 = vpop.permute.xlu1 %2236  ;;  %v2714_v63 = vrot.slane %v2712_v36, 5  ;;  %v1824_v60 = vrot.slane %v1822_v48, 4  ;;  %v1764_v36 = vld [vmem:[#allocation2 + $0x68] sm:$0x1] }
 0x385   : > { %3168 = vrot.lane.b32.xlu2 %v3148_v59, %s5376_s21  ;;  %v2233_v11 = vpop.permute.xlu0 %2232  ;;  %2257 = vst.msk [vmem:[#allocation6 + $0xe4] sm:$0xf] %vm2053_vm11, %v2237_v41  ;;  %v2747_v59 = vrot.slane %v2745_v16, 4  ;;  %v6848_v29 = vpop.f32.mrf.mxu3 }
 0x386   : > { %2255 = vst.msk [vmem:[#allocation6 + $0xcc] sm:$0xf] %vm2053_vm11, %v2233_v11  ;;  %v1848_v11 = vsel %vm5524_vm4, %v1843_v9, %v1847_v56  ;;  %v1864_v9 = vshrl.u32 %v1763_v5, 16  ;;  %v1867_v56 = vshll.u32 %v1763_v5, 16 }
 0x387   : > { %5076 = vmatmul.msk.bf16.gmra.mxu3 %vm4156_vm12, %v4977_v8  ;;  %v6819_v50 = vpop.permute.xlu2 %2240  ;;  %v2737_v8 = vor.u32 %v2736_v32, %v2733_v7  ;;  %v2751_v3 = vor.u32 %v2750_v42, %v2747_v59 }
 0x388   : > { %v1866_v14 = vrot.slane %v1864_v9, 4  ;;  %v1869_v18 = vrot.slane %v1867_v56, 5  ;;  %v2269_v9 = vld [vmem:[#allocation4 + $0x64] sm:$0xf] }
 0x389   : > { %4238 = vmatmul.bf16.gmra.mxu1 %v4861_v19  ;;  %v2710_v19 = vrot.slane %v2709_v17, 4  ;;  %v2738_v22 = vrot.slane %v2737_v8, 4  ;;  %v2752_v10 = vrot.slane %v2751_v3, 4  ;;  %v3151_v17 = vld [vmem:[#allocation2 + $0x70] sm:$0xf] }
 0x38a   : > { %3360 = vrot.lane.b32.xlu1 %v3340_v30, %s5377_s22  ;;  %v3342_v3 = vld [vmem:[#allocation3 + $0x64] sm:$0xf] }
 0x38b   : > { %2244 = vrot.lane.b32.xlu0 %v2229_v24, %s5377_s22  ;;  %v1761_v24 = vld [vmem:[#allocation2 + $0x58] sm:$0xf]  ;;  %v2715_v37 = vsel %vm5524_vm4, %v2710_v19, %v2714_v63  ;;  %v2757_v61 = vsel %vm5524_vm4, %v2752_v10, %v2756_v25  ;;  %v5127_v63 = vld [vmem:[#allocation6 + $0xb0] sm:$0xf0] }
 0x38c   : > { %v3120_v49 = vpop.permute.xlu1 %3119  ;;  %v1850_v38 = vshrl.u32 %v1761_v24, 16 }
 0x38d   : > { %3362 = vrot.lane.b32.xlu2 %v3341_v40, %s5377_s22  ;;  %v3116_v2 = vpop.permute.xlu0 %3115  ;;  %3139 = vst.msk [vmem:[#allocation6 + $0xf4] sm:$0xf] %vm1529_vm10, %v3120_v49  ;;  %v1825_v40 = vshll.u32 %v1757_v58, 16  ;;  %v5120_v49 = vld [vmem:[#allocation6 + $0x7c] sm:$0xf]  ;;  %v4885_v58 = vor.u32 %v5127_v63, %v4884_v27 }
 0x38e   : > { %3137 = vst.msk [vmem:[#allocation6 + $0xdc] sm:$0xf] %vm1529_vm10, %v3116_v2  ;;  %v1853_v2 = vshll.u32 %v1761_v24, 16  ;;  %v1852_v59 = vrot.slane %v1850_v38, 4  ;;  %v5123_v38 = vld [vmem:[#allocation6 + $0x94] sm:$0xf] }
 0x38f   : > { %v6834_v28 = vpop.permute.xlu2 %3123  ;;  %3330 = vst.msk [vmem:[#allocation6 + $0xdc] sm:$0xf] %vm2053_vm11, %v6758_v46  ;;  %v2740_v46 = vshll.u32 %v2643_v45, 16  ;;  %v1827_v7 = vrot.slane %v1825_v40, 5  ;;  %v4862_v45 = vld [vmem:[#allocation6 + $0x84] sm:$0xf0] }
 0x390   : > { %v4214_v30 = vpop.f32.mrf.mxu1  ;;  %v1855_v42 = vrot.slane %v1853_v2, 5  ;;  %v4865_v6 = vor.u32 %v5120_v49, %v4862_v45  ;;  %v5130_v47 = vld [vmem:[#allocation6 + $0xc8] sm:$0xf0] }
 0x391   : > { %4322 = vmatmul.bf16.gmra.mxu2 %v4853_v20  ;;  %v2742_v44 = vrot.slane %v2740_v46, 5  ;;  %v4215_v54 = vadd.f32 %v6856_v52, %v4214_v30  ;;  %v1828_v8 = vor.u32 %v1827_v7, %v1824_v60  ;;  %v1831_v46 = vshll.u32 %v1758_v39, 16  ;;  %v5126_v60 = vld [vmem:[#allocation6 + $0xac] sm:$0xf] }
 0x392   : > { %1887 = vrot.lane.b32.xlu1 %v1848_v11, %s5376_s21  ;;  %v3149_v11 = vld [vmem:[#allocation2 + $0x58] sm:$0xf] }
 0x393   : > { %1883 = vrot.lane.b32.xlu0 %v1820_v12, %s5376_s21  ;;  %v2743_v16 = vsel %vm5524_vm4, %v2738_v22, %v2742_v44  ;;  %v1762_v12 = vld [vmem:[#allocation2 + $0x5c] sm:$0x1]  ;;  %v1833_v22 = vrot.slane %v1831_v46, 5 }
 0x394   : > { %v6845_v23 = vpop.permute.xlu1 %3314  ;;  %v1859_v34 = vshll.u32 %v1762_v12, 16 }
 0x395   : > { %2286 = vrot.lane.b32.xlu2 %v2266_v15, %s5377_s22  ;;  %v3311_v41 = vpop.permute.xlu0 %3310  ;;  %v1856_v15 = vor.u32 %v1855_v42, %v1852_v59  ;;  %v4886_v42 = vld [vmem:[#allocation6 + $0xb4] sm:$0xf0] }
 0x396   : > { %3331 = vst.msk [vmem:[#allocation6 + $0xe8] sm:$0xf] %vm2053_vm11, %v3311_v41  ;;  %v1870_v41 = vor.u32 %v1869_v18, %v1866_v14  ;;  %v1861_v25 = vrot.slane %v1859_v34, 5  ;;  %v4898_v34 = vld [vmem:[#allocation6 + $0xcc] sm:$0xf0] }
 0x397   : > { %5077 = vmatmul.msk.bf16.gmra.mxu3 %vm4156_vm12, %v4989_v1  ;;  %v6851_v0 = vpop.permute.xlu2 %3318  ;;  %v1873_v1 = vshll.u32 %v1764_v36, 16  ;;  %v1857_v10 = vrot.slane %v1856_v15, 4  ;;  %v5133_v36 = vld [vmem:[#allocation6 + $0xe0] sm:$0xf0] }
 0x398   : > { %v1871_v24 = vrot.slane %v1870_v41, 4  ;;  %v6904_v7 = vpop.f32.mrf.mxu1 }
 0x399   : > { %4243 = vmatmul.bf16.gmra.mxu1 %v4873_v31  ;;  %v1829_v31 = vrot.slane %v1828_v8, 4  ;;  %v1875_v5 = vrot.slane %v1873_v1, 5  ;;  %v2268_v8 = vld [vmem:[#allocation4 + $0x58] sm:$0xf]  ;;  %v5129_v1 = vld [vmem:[#allocation6 + $0xc4] sm:$0xf] }
 0x39a   : > { %2770 = vrot.lane.b32.xlu1 %v2743_v16, %s5375_s16 }
 0x39b   : > { %2766 = vrot.lane.b32.xlu0 %v2715_v37, %s5375_s16  ;;  %v1834_v30 = vsel %vm5524_vm4, %v1829_v31, %v1833_v22  ;;  %v1862_v37 = vsel %vm5524_vm4, %v1857_v10, %v1861_v25 }
 0x39c   : > { %v2239_v57 = vpop.permute.xlu1 %2238 }
 0x39d   : > { %2772 = vrot.lane.b32.xlu2 %v2757_v61, %s5375_s16  ;;  %v2235_v62 = vpop.permute.xlu0 %2234  ;;  %2258 = vst.msk [vmem:[#allocation6 + $0xf0] sm:$0xf] %vm2053_vm11, %v2239_v57  ;;  %v2267_v61 = vld [vmem:[#allocation4 + $0x4c] sm:$0xf]  ;;  %v3150_v57 = vld [vmem:[#allocation2 + $0x64] sm:$0xf] }
 0x39e   : > { %v4303_v53 = vpop.f32.mrf.mxu2  ;;  %2256 = vst.msk [vmem:[#allocation6 + $0xd8] sm:$0xf] %vm2053_vm11, %v2235_v62  ;;  %v4896_v62 = vld [vmem:[#allocation6 + $0xc0] sm:$0xf]  ;;  %s4652_s16 = sshll.u32 %s5414_s19, 2 }
 0x39f   : > { %v6869_v32 = vadd.f32 %v4303_v53, %v4215_v54  ;;  %v6872_v20 = vpop.permute.xlu2 %2242  ;;  %v4897_v53 = vor.u32 %v5130_v47, %v4896_v62  ;;  %p221_p4 = scmp.lt.s32.totalorder %s4652_s16, 7 }
 0x3a1   : > { %4327 = vmatmul.bf16.gmra.mxu2 %v4865_v6  ;;  %v3343_v6 = vld [vmem:[#allocation3 + $0x70] sm:$0xf]  ;;  %s7243_s16 = smov (!%p221_p4, %s4652_s16), 7 }
 0x3a2   : > { %3174 = vrot.lane.b32.xlu1 %v3151_v17, %s5376_s21 }
 0x3a3   : > { %3170 = vrot.lane.b32.xlu0 %v3149_v11, %s5376_s21 }
 0x3a4   : > { %v2613_v19 = vpop.permute.xlu1 %2612  ;;  %v4920_v10 = vld [vmem:[#allocation6 + $0xf0] sm:$0xf] }
 0x3a5   : > { %3364 = vrot.lane.b32.xlu2 %v3342_v3, %s5377_s22  ;;  %v2609_v13 = vpop.permute.xlu0 %2608  ;;  %2629 = vst.msk [vmem:[#allocation6 + $0x118] sm:$0xf] %vm1336_vm5, %v2613_v19  ;;  %v4908_v12 = vld [vmem:[#allocation6 + $0xd8] sm:$0xf] }
 0x3a6   : > { %2627 = vst.msk [vmem:[#allocation6 + $0x100] sm:$0xf] %vm1336_vm5, %v2609_v13  ;;  %v6918_v46 = vpop.f32.mrf.mxu2 }
 0x3a7   : > { %v2761_v44 = vpop.permute.xlu2 %2760  ;;  %3140 = vst.msk [vmem:[#allocation6 + $0x100] sm:$0xf] %vm1529_vm10, %v6793_v33  ;;  %v1876_v33 = vsel %vm5524_vm4, %v1871_v24, %v1875_v5  ;;  %v4910_v5 = vld [vmem:[#allocation6 + $0xe4] sm:$0xf0] }
 0x3a8   : > { %3333 = vst.msk [vmem:[#allocation6 + $0x100] sm:$0xf] %vm2053_vm11, %v6845_v23  ;;  %v4874_v23 = vld [vmem:[#allocation6 + $0x9c] sm:$0xf0] }
 0x3a9   : > { %4248 = vmatmul.bf16.gmra.mxu1 %v4885_v58  ;;  %2783 = vst.msk [vmem:[#allocation6 + $0x130] sm:$0xf] %vm1336_vm5, %v2761_v44  ;;  %v4877_v2 = vor.u32 %v5123_v38, %v4874_v23 }
 0x3aa   : > { %1889 = vrot.lane.b32.xlu1 %v1862_v37, %s5376_s21 }
 0x3ab   : > { %1885 = vrot.lane.b32.xlu0 %v1834_v30, %s5376_s21 }
 0x3ac   : > { %v3317_v40 = vpop.permute.xlu1 %3316 }
 0x3ad   : > { %1891 = vrot.lane.b32.xlu2 %v1876_v33, %s5376_s21  ;;  %v3313_v48 = vpop.permute.xlu0 %3312 }
 0x3ae   : > { %3332 = vst.msk [vmem:[#allocation6 + $0xf4] sm:$0xf] %vm2053_vm11, %v3313_v48  ;;  %v5132_v48 = vld [vmem:[#allocation6 + $0xdc] sm:$0xf] }
 0x3af   : > { %v6894_v16 = vpop.permute.xlu2 %3352  ;;  %v4913_v23 = vor.u32 %v5132_v48, %v4910_v5 }
 0x3b1   : > { %4332 = vmatmul.bf16.gmra.mxu2 %v4877_v2 }
 0x3b2   : > { %2292 = vrot.lane.b32.xlu1 %v2269_v9, %s5377_s22 }
 0x3b3   : > { %2288 = vrot.lane.b32.xlu0 %v2267_v61, %s5377_s22  ;;  %v6945_v61 = vpop.f32.mrf.mxu3 }
 0x3b4   : > { %v1732_v54 = vpop.permute.xlu1 %1731 }
 0x3b5   : > { %v1728_v56 = vpop.permute.xlu0 %1727  ;;  %1748 = vst.msk [vmem:[#allocation6 + $0x114] sm:$0xf] %vm1529_vm10, %v1732_v54 }
 0x3b6   : > { %1746 = vst.msk [vmem:[#allocation6 + $0xfc] sm:$0xf] %vm1529_vm10, %v1728_v56  ;;  %v5135_v56 = vld [vmem:[#allocation6 + $0xf4] sm:$0xf] }
 0x3b7   : > { %v1880_v49 = vpop.permute.xlu2 %1879  ;;  %2259 = vst.msk [vmem:[#allocation6 + $0xfc] sm:$0xf] %vm2053_vm11, %v6819_v50  ;;  %v4889_v50 = vor.u32 %v5126_v60, %v4886_v42 }
 0x3b8   : > { %1902 = vst.msk [vmem:[#allocation6 + $0x12c] sm:$0xf] %vm1529_vm10, %v1880_v49 }
 0x3b9   : > { %4253 = vmatmul.bf16.gmra.mxu1 %v4897_v53  ;;  %v4922_v53 = vld [vmem:[#allocation6 + $0xfc] sm:$0xf0] }
 0x3bb   : > { %3172 = vrot.lane.b32.xlu0 %v3150_v57, %s5376_s21  ;;  %v4925_v57 = vor.u32 %v5135_v56, %v4922_v53  ;;  %v6958_v60 = vpop.f32.mrf.mxu3 }
 0x3bc   : > { %v2759_v45 = vpop.permute.xlu1 %2758 }
 0x3bd   : > { %v2611_v39 = vpop.permute.xlu0 %2610  ;;  %2782 = vst.msk [vmem:[#allocation6 + $0x124] sm:$0xf] %vm1336_vm5, %v2759_v45 }
 0x3be   : > { %2628 = vst.msk [vmem:[#allocation6 + $0x10c] sm:$0xf] %vm1336_vm5, %v2611_v39  ;;  %v5136_v63 = vld [vmem:[#allocation6 + $0xf8] sm:$0xf0] }
 0x3bf   : > { %v2763_v59 = vpop.permute.xlu2 %2762  ;;  %3141 = vst.msk [vmem:[#allocation6 + $0x10c] sm:$0xf] %vm1529_vm10, %v6834_v28  ;;  %v4909_v28 = vor.u32 %v5133_v36, %v4908_v12 }
 0x3c0   : > { %3334 = vst.msk [vmem:[#allocation6 + $0x10c] sm:$0xf] %vm2053_vm11, %v3317_v40 }
 0x3c1   : > { %2784 = vst.msk [vmem:[#allocation6 + $0x13c] sm:$0xf] %vm1336_vm5, %v2763_v59  ;;  %4337 = vmatmul.bf16.gmra.mxu2 %v4889_v50 }
 0x3c3   : > { %3366 = vrot.lane.b32.xlu0 %v3343_v6, %s5377_s22  ;;  %v6967_v36 = vpop.f32.mrf.mxu3 }
 0x3c4   : > { %v3163_v18 = vpop.permute.xlu1 %3162 }
 0x3c5   : > { %v3126_v14 = vpop.permute.xlu0 %3125  ;;  %3185 = vst.msk [vmem:[#allocation6 + $0x130] sm:$0xf] %vm1529_vm10, %v3163_v18 }
 0x3c6   : > { %3142 = vst.msk [vmem:[#allocation6 + $0x118] sm:$0xf] %vm1529_vm10, %v3126_v14  ;;  %v4219_v17 = vpop.f32.mrf.mxu1 }
 0x3c7   : > { %v3167_v11 = vpop.permute.xlu2 %3166  ;;  %3335 = vst.msk [vmem:[#allocation6 + $0x118] sm:$0xf] %vm2053_vm11, %v6851_v0  ;;  %v4901_v0 = vor.u32 %v5129_v1, %v4898_v34  ;;  %v4220_v13 = vadd.f32 %v6856_v52, %v4219_v17 }
 0x3c9   : > { %4258 = vmatmul.bf16.gmra.mxu1 %v4909_v28 }
 0x3cb   : > { %2290 = vrot.lane.b32.xlu0 %v2268_v8, %s5377_s22  ;;  %v5138_v8 = vld [vmem:[#allocation6 + $0x10c] sm:$0xf]  ;;  %s4653_s22 = sshll.u32 %s7243_s16, 2 }
 0x3cc   : > { %v1878_v3 = vpop.permute.xlu1 %1877  ;;  %s224_s23 = scalar_lea.vmem %s7229_s5, %s4653_s22 }
 0x3cd   : > { %v1730_v15 = vpop.permute.xlu0 %1729  ;;  %1901 = vst.msk [vmem:[#allocation6 + $0x120] sm:$0xf] %vm1529_vm10, %v1878_v3 }
 0x3ce   : > { %1747 = vst.msk [vmem:[#allocation6 + $0x108] sm:$0xf] %vm1529_vm10, %v1730_v15  ;;  %v6921_v27 = vpop.f32.mrf.mxu1  ;;  %v4934_v17 = vld [vmem:[#allocation6 + $0x114] sm:$0xf0] }
 0x3cf   : > { %v1882_v41 = vpop.permute.xlu2 %1881  ;;  %2260 = vst.msk [vmem:[#allocation6 + $0x108] sm:$0xf] %vm2053_vm11, %v6872_v20  ;;  %v4921_v20 = vor.u32 %v5136_v63, %v4920_v10  ;;  %v4937_v15 = vor.u32 %v5138_v8, %v4934_v17 }
 0x3d0   : > { %1903 = vst.msk [vmem:[#allocation6 + $0x138] sm:$0xf] %vm1529_vm10, %v1882_v41 }
 0x3d1   : > { %4342 = vmatmul.bf16.gmra.mxu2 %v4901_v0 }
 0x3d4   : > { %v4308_v19 = vpop.f32.mrf.mxu2  ;;  %v2281_v44 = vpop.permute.xlu1 %2280 }
 0x3d5   : > { %v6928_v31 = vadd.f32 %v4308_v19, %v4220_v13  ;;  %v3161_v22 = vpop.permute.xlu0 %3160  ;;  %2303 = vst.msk [vmem:[#allocation6 + $0x12c] sm:$0xf] %vm2053_vm11, %v2281_v44 }
 0x3d6   : > { %3184 = vst.msk [vmem:[#allocation6 + $0x124] sm:$0xf] %vm1529_vm10, %v3161_v22  ;;  %v4224_v58 = vpop.f32.mrf.mxu1  ;;  %v4932_v0 = vld [vmem:[#allocation6 + $0x108] sm:$0xf] }
 0x3d7   : > { %v6932_v25 = vpop.permute.xlu2 %2284  ;;  %3376 = vst.msk [vmem:[#allocation6 + $0x124] sm:$0xf] %vm2053_vm11, %v6894_v16  ;;  %v4225_v39 = vadd.f32 %v6856_v52, %v4224_v58  ;;  %v6977_v58 = vpop.f32.mrf.mxu3 }
 0x3d9   : > { %4263 = vmatmul.bf16.gmra.mxu1 %v4921_v20 }
 0x3dc   : > { %v3165_v30 = vpop.permute.xlu1 %3164  ;;  %v6947_v9 = vpop.f32.mrf.mxu2 }
 0x3dd   : > { %v3355_v24 = vpop.permute.xlu0 %3354  ;;  %3186 = vst.msk [vmem:[#allocation6 + $0x13c] sm:$0xf] %vm1529_vm10, %v3165_v30 }
 0x3de   : > { %3377 = vst.msk [vmem:[#allocation6 + $0x130] sm:$0xf] %vm2053_vm11, %v3355_v24  ;;  %v6937_v37 = vpop.f32.mrf.mxu1  ;;  %v5141_v48 = vld [vmem:[#allocation6 + $0x124] sm:$0xf] }
 0x3df   : > { %v6940_v33 = vpop.permute.xlu2 %3168 }
 0x3e1   : > { %4347 = vmatmul.bf16.gmra.mxu2 %v4913_v23 }
 0x3e4   : > { %v3359_v38 = vpop.permute.xlu1 %3358 }
 0x3e5   : > { %v2279_v40 = vpop.permute.xlu0 %2278  ;;  %v4946_v5 = vld [vmem:[#allocation6 + $0x12c] sm:$0xf0] }
 0x3e6   : > { %2302 = vst.msk [vmem:[#allocation6 + $0x120] sm:$0xf] %vm2053_vm11, %v2279_v40  ;;  %v4229_v16 = vpop.f32.mrf.mxu1  ;;  %v4949_v23 = vor.u32 %v5141_v48, %v4946_v5 }
 0x3e7   : > { %v6943_v2 = vpop.permute.xlu2 %3362  ;;  %v4230_v3 = vadd.f32 %v6856_v52, %v4229_v16 }
 0x3ec   : > { %v2283_v54 = vpop.permute.xlu1 %2282 }
 0x3ed   : > { %v2765_v47 = vpop.permute.xlu0 %2764  ;;  %2304 = vst.msk [vmem:[#allocation6 + $0x138] sm:$0xf] %vm2053_vm11, %v2283_v54  ;;  %v4944_v40 = vld [vmem:[#allocation6 + $0x120] sm:$0xf]  ;;  %v5142_v54 = vld [vmem:[#allocation6 + $0x128] sm:$0xf0] }
 0x3ee   : > { %2785 = vst.msk [vmem:[#allocation6 + $0x148] sm:$0xf] %vm1336_vm5, %v2765_v47  ;;  %v6950_v62 = vpop.f32.mrf.mxu1 }
 0x3ef   : > { %v6953_v49 = vpop.permute.xlu2 %2286  ;;  %3187 = vst.msk [vmem:[#allocation6 + $0x148] sm:$0xf] %vm1529_vm10, %v3167_v11 }
 0x3f0   : > { %3379 = vst.msk [vmem:[#allocation6 + $0x148] sm:$0xf] %vm2053_vm11, %v3359_v38  ;;  %v4393_v38 = vadd.f32 %v6734_v21, %v6869_v32 }
 0x3f1   : > { %4352 = vmatmul.bf16.gmra.mxu2 %v4925_v57 }
 0x3f4   : > { %v4313_v45 = vpop.f32.mrf.mxu2  ;;  %v2769_v50 = vpop.permute.xlu1 %2768 }
 0x3f5   : > { %v6960_v59 = vadd.f32 %v4313_v45, %v4225_v39  ;;  %v3357_v42 = vpop.permute.xlu0 %3356  ;;  %2787 = vst.msk [vmem:[#allocation6 + $0x160] sm:$0xf] %vm1336_vm5, %v2769_v50  ;;  %v4472_v45 = vmax.f32 %v4393_v38, 0.0 }
 0x3f6   : > { %3378 = vst.msk [vmem:[#allocation6 + $0x13c] sm:$0xf] %vm2053_vm11, %v3357_v42  ;;  %v4234_v12 = vpop.f32.mrf.mxu1 }
 0x3f7   : > { %v2773_v6 = vpop.permute.xlu2 %2772  ;;  %v4235_v16 = vadd.f32 %v6856_v52, %v4234_v12  ;;  %v7002_v50 = vsel %vm4504_vm13, %v4472_v45, -inf }
 0x3f8   : > { %2789 = vst.msk [vmem:[#allocation6 + $0x178] sm:$0xf] %vm1336_vm5, %v2773_v6 }
 0x3fc   : > { %v6965_v14 = vpop.f32.mrf.mxu2  ;;  %v3361_v11 = vpop.permute.xlu1 %3360 }
 0x3fd   : > { %v2245_v18 = vpop.permute.xlu0 %2244 }
 0x3fe   : > { %2261 = vst.msk [vmem:[#allocation6 + $0x114] sm:$0xf] %vm2053_vm11, %v2245_v18  ;;  %v4236_v34 = vpop.f32.mrf.mxu1 }
 0x3ff   : > { %v6970_v28 = vpop.permute.xlu2 %3364  ;;  %v4237_v6 = vadd.f32 %v6856_v52, %v4236_v34 }
 0x401   : > { %4357 = vmatmul.bf16.gmra.mxu2 %v4937_v15  ;;  %v4958_v15 = vld [vmem:[#allocation6 + $0x144] sm:$0xf0] }
 0x404   : > { %v4318_v41 = vpop.f32.mrf.mxu2  ;;  %v1888_v63 = vpop.permute.xlu1 %1887 }
 0x405   : > { %v1884_v1 = vpop.permute.xlu0 %1883  ;;  %v5139_v13 = vld [vmem:[#allocation6 + $0x110] sm:$0xf0]  ;;  %v6973_v19 = vadd.f32 %v4318_v41, %v4230_v3  ;;  %1906 = vst.msk [vmem:[#allocation6 + $0x15c] sm:$0xf] %vm1529_vm10, %v1888_v63 }
 0x406   : > { %1904 = vst.msk [vmem:[#allocation6 + $0x144] sm:$0xf] %vm1529_vm10, %v1884_v1  ;;  %v4933_v22 = vor.u32 %v5139_v13, %v4932_v0  ;;  %v4239_v10 = vpop.f32.mrf.mxu1  ;;  %v4398_v1 = vadd.f32 %v6770_v4, %v6928_v31 }
 0x407   : > { %v1892_v44 = vpop.permute.xlu2 %1891  ;;  %2305 = vst.msk [vmem:[#allocation6 + $0x144] sm:$0xf] %vm2053_vm11, %v6932_v25  ;;  %v6989_v25 = vpop.f32.mrf.mxu3  ;;  %v4240_v0 = vadd.f32 %v6856_v52, %v4239_v10 }
 0x408   : > { %4268 = vmatmul.bf16.gmra.mxu1 %v4933_v22  ;;  %1908 = vst.msk [vmem:[#allocation6 + $0x174] sm:$0xf] %vm1529_vm10, %v1892_v44  ;;  %v4956_v22 = vld [vmem:[#allocation6 + $0x138] sm:$0xf] }
 0x40c   : > { %v6982_v20 = vpop.f32.mrf.mxu2  ;;  %v2771_v30 = vpop.permute.xlu1 %2770 }
 0x40d   : > { %v2767_v24 = vpop.permute.xlu0 %2766  ;;  %2788 = vst.msk [vmem:[#allocation6 + $0x16c] sm:$0xf] %vm1336_vm5, %v2771_v30 }
 0x40e   : > { %2786 = vst.msk [vmem:[#allocation6 + $0x154] sm:$0xf] %vm1336_vm5, %v2767_v24  ;;  %v4241_v53 = vpop.f32.mrf.mxu1  ;;  %v5145_v41 = vld [vmem:[#allocation6 + $0x140] sm:$0xf0] }
 0x40f   : > { %3188 = vst.msk [vmem:[#allocation6 + $0x154] sm:$0xf] %vm1529_vm10, %v6940_v33  ;;  %v4945_v33 = vor.u32 %v5142_v54, %v4944_v40  ;;  %v6999_v32 = vpop.f32.mrf.mxu3  ;;  %v4957_v30 = vor.u32 %v5145_v41, %v4956_v22  ;;  %v4242_v10 = vadd.f32 %v6856_v52, %v4241_v53 }
 0x410   : > { %3380 = vst.msk [vmem:[#allocation6 + $0x154] sm:$0xf] %vm2053_vm11, %v3361_v11  ;;  %v5144_v11 = vld [vmem:[#allocation6 + $0x13c] sm:$0xf] }
 0x411   : > { %4362 = vmatmul.bf16.gmra.mxu2 %v4949_v23  ;;  %v4961_v34 = vor.u32 %v5144_v11, %v4958_v15 }
 0x414   : > { %v4323_v47 = vpop.f32.mrf.mxu2  ;;  %v3175_v39 = vpop.permute.xlu1 %3174 }
 0x415   : > { %v3171_v56 = vpop.permute.xlu0 %3170  ;;  %v4324_v57 = vadd.f32 %v4323_v47, %v4235_v16  ;;  %3191 = vst.msk [vmem:[#allocation6 + $0x178] sm:$0xf] %vm1529_vm10, %v3175_v39 }
 0x416   : > { %3189 = vst.msk [vmem:[#allocation6 + $0x160] sm:$0xf] %vm1529_vm10, %v3171_v56  ;;  %v4244_v3 = vpop.f32.mrf.mxu1 }
 0x417   : > { %v4413_v42 = vadd.f32 %v6945_v61, %v4324_v57  ;;  %3381 = vst.msk [vmem:[#allocation6 + $0x160] sm:$0xf] %vm2053_vm11, %v6943_v2  ;;  %v7019_v44 = vpop.f32.mrf.mxu3  ;;  %v4245_v45 = vadd.f32 %v6856_v52, %v4244_v3 }
 0x418   : > { %4273 = vmatmul.bf16.gmra.mxu1 %v4945_v33  ;;  %v4403_v33 = vadd.f32 %v6797_v51, %v6960_v59 }
 0x419   : > { %v4480_v21 = vmax.f32 %v4413_v42, 0.0 }
 0x41b   : > { %v7006_v12 = vsel %vm4504_vm13, %v4480_v21, -inf }
 0x41c   : > { %v4507_v18 = vmax.f32 %v7002_v50, %v7006_v12  ;;  %v4325_v61 = vpop.f32.mrf.mxu2  ;;  %v1890_v8 = vpop.permute.xlu1 %1889 }
 0x41d   : > { %v1886_v17 = vpop.permute.xlu0 %1885  ;;  %v7010_v2 = vadd.f32 %v4325_v61, %v4237_v6  ;;  %1907 = vst.msk [vmem:[#allocation6 + $0x168] sm:$0xf] %vm1529_vm10, %v1890_v8  ;;  %v4476_v8 = vmax.f32 %v4403_v33, 0.0 }
 0x41e   : > { %1905 = vst.msk [vmem:[#allocation6 + $0x150] sm:$0xf] %vm1529_vm10, %v1886_v17  ;;  %v4246_v23 = vpop.f32.mrf.mxu1  ;;  %v4970_v56 = vld [vmem:[#allocation6 + $0x15c] sm:$0xf0]  ;;  %v4227_v17 = vadd.f32 %v6856_v52, %v6937_v37 }
 0x41f   : > { %2306 = vst.msk [vmem:[#allocation6 + $0x150] sm:$0xf] %vm2053_vm11, %v6953_v49  ;;  %v4474_v49 = vmax.f32 %v4398_v1, 0.0  ;;  %v7038_v57 = vpop.f32.mrf.mxu3  ;;  %v7049_v3 = vsel %vm4504_vm13, %v4476_v8, -inf  ;;  %v4247_v1 = vadd.f32 %v6856_v52, %v4246_v23 }
 0x420   : > { %v4316_v15 = vadd.f32 %v6965_v14, %v4227_v17 }
 0x421   : > { %4367 = vmatmul.bf16.gmra.mxu2 %v4961_v34  ;;  %v7025_v31 = vsel %vm4504_vm13, %v4474_v49, -inf }
 0x422   : > { %v4405_v41 = vadd.f32 %v6809_v35, %v4316_v15 }
 0x424   : > { %v4328_v13 = vpop.f32.mrf.mxu2  ;;  %v2293_v5 = vpop.permute.xlu1 %2292 }
 0x425   : > { %v2289_v63 = vpop.permute.xlu0 %2288  ;;  %v4329_v24 = vadd.f32 %v4328_v13, %v4240_v0  ;;  %2309 = vst.msk [vmem:[#allocation6 + $0x174] sm:$0xf] %vm2053_vm11, %v2293_v5 }
 0x426   : > { %2307 = vst.msk [vmem:[#allocation6 + $0x15c] sm:$0xf] %vm2053_vm11, %v2289_v63  ;;  %v4249_v42 = vpop.f32.mrf.mxu1  ;;  %v4968_v61 = vld [vmem:[#allocation6 + $0x150] sm:$0xf] }
 0x427   : > { %v4418_v48 = vadd.f32 %v6967_v36, %v4329_v24  ;;  %v5147_v36 = vld [vmem:[#allocation6 + $0x154] sm:$0xf]  ;;  %v4432_v51 = vpop.f32.mrf.mxu3 }
 0x428   : > { %4278 = vmatmul.bf16.gmra.mxu1 %v4957_v30  ;;  %v4973_v53 = vor.u32 %v5147_v36, %v4970_v56  ;;  %v4477_v30 = vmax.f32 %v4405_v41, 0.0  ;;  %v4217_v41 = vadd.f32 %v6856_v52, %v6904_v7 }
 0x429   : > { %v4482_v4 = vmax.f32 %v4418_v48, 0.0 }
 0x42a   : > { %v7061_v23 = vsel %vm4504_vm13, %v4477_v30, -inf }
 0x42b   : > { %v7029_v40 = vsel %vm4504_vm13, %v4482_v4, -inf  ;;  %v4408_v4 = vadd.f32 %v6829_v26, %v6973_v19 }
 0x42c   : > { %v4521_v38 = vmax.f32 %v7025_v31, %v7029_v40  ;;  %v4330_v16 = vpop.f32.mrf.mxu2 }
 0x42d   : > { %v3173_v47 = vpop.permute.xlu0 %3172  ;;  %v7033_v54 = vadd.f32 %v4330_v16, %v4242_v10  ;;  %v5148_v39 = vld [vmem:[#allocation6 + $0x158] sm:$0xf0]  ;;  %v4250_v10 = vadd.f32 %v6856_v52, %v4249_v42 }
 0x42e   : > { %3190 = vst.msk [vmem:[#allocation6 + $0x16c] sm:$0xf] %vm1529_vm10, %v3173_v47  ;;  %v4251_v5 = vpop.f32.mrf.mxu1 }
 0x42f   : > { %3382 = vst.msk [vmem:[#allocation6 + $0x16c] sm:$0xf] %vm2053_vm11, %v6970_v28  ;;  %v4969_v28 = vor.u32 %v5148_v39, %v4968_v61  ;;  %v4434_v48 = vpop.f32.mrf.mxu3  ;;  %v4252_v17 = vadd.f32 %v6856_v52, %v4251_v5 }
 0x431   : > { %4372 = vmatmul.bf16.gmra.mxu2 %v4973_v53  ;;  %v4232_v53 = vadd.f32 %v6856_v52, %v6950_v62 }
 0x434   : > { %v4333_v21 = vpop.f32.mrf.mxu2 }
 0x435   : > { %v3367_v6 = vpop.permute.xlu0 %3366  ;;  %v4334_v11 = vadd.f32 %v4333_v21, %v4245_v45  ;;  %v4478_v45 = vmax.f32 %v4408_v4, 0.0  ;;  %v4321_v21 = vadd.f32 %v6982_v20, %v4232_v53 }
 0x436   : > { %3383 = vst.msk [vmem:[#allocation6 + $0x178] sm:$0xf] %vm2053_vm11, %v3367_v6  ;;  %v5150_v63 = vld [vmem:[#allocation6 + $0x16c] sm:$0xf]  ;;  %v4254_v19 = vpop.f32.mrf.mxu1 }
 0x437   : > { %v4423_v34 = vadd.f32 %v6989_v25, %v4334_v11  ;;  %v7076_v6 = vsel %vm4504_vm13, %v4478_v45, -inf  ;;  %v4410_v61 = vadd.f32 %v6848_v29, %v4321_v21  ;;  %v4437_v20 = vpop.f32.mrf.mxu3 }
 0x438   : > { %4283 = vmatmul.bf16.gmra.mxu1 %v4969_v28 }
 0x439   : > { %v4484_v59 = vmax.f32 %v4423_v34, 0.0 }
 0x43b   : > { %v7054_v37 = vsel %vm4504_vm13, %v4484_v59, -inf }
 0x43c   : > { %v4535_v0 = vmax.f32 %v7049_v3, %v7054_v37  ;;  %v4335_v13 = vpop.f32.mrf.mxu2 }
 0x43d   : > { %v2291_v14 = vpop.permute.xlu0 %2290  ;;  %v4982_v25 = vld [vmem:[#allocation6 + $0x174] sm:$0xf0]  ;;  %v4336_v22 = vadd.f32 %v4335_v13, %v4247_v1  ;;  %v4255_v1 = vadd.f32 %v6856_v52, %v4254_v19 }
 0x43e   : > { %2308 = vst.msk [vmem:[#allocation6 + $0x168] sm:$0xf] %vm2053_vm11, %v2291_v14  ;;  %v4985_v24 = vor.u32 %v5150_v63, %v4982_v25  ;;  %v4256_v59 = vpop.f32.mrf.mxu1  ;;  %v4306_v25 = vadd.f32 %v6918_v46, %v4217_v41 }
 0x43f   : > { %v4425_v35 = vadd.f32 %v6999_v32, %v4336_v22  ;;  %v5151_v32 = vld [vmem:[#allocation6 + $0x170] sm:$0xf0]  ;;  %v4439_v22 = vpop.f32.mrf.mxu3 }
 0x440   : > { %v4395_v5 = vadd.f32 %v6753_v55, %v4306_v25 }
 0x441   : > { %v4485_v49 = vmax.f32 %v4425_v35, 0.0  ;;  %4377 = vmatmul.bf16.gmra.mxu2 %v4985_v24  ;;  %v4415_v24 = vadd.f32 %v6958_v60, %v7010_v2 }
 0x443   : > { %v7067_v16 = vsel %vm4504_vm13, %v4485_v49, -inf  ;;  %v4481_v35 = vmax.f32 %v4415_v24, 0.0  ;;  %v4257_v49 = vadd.f32 %v6856_v52, %v4256_v59 }
 0x444   : > { %v4542_v47 = vmax.f32 %v7061_v23, %v7067_v16  ;;  %v4338_v56 = vpop.f32.mrf.mxu2 }
 0x445   : > { %v4980_v36 = vld [vmem:[#allocation6 + $0x168] sm:$0xf]  ;;  %v4339_v39 = vadd.f32 %v4338_v56, %v4250_v10  ;;  %v4513_v60 = vsel %vm4504_vm13, %v4481_v35, -inf }
 0x446   : > { %v4981_v33 = vor.u32 %v5151_v32, %v4980_v36  ;;  %v4259_v10 = vpop.f32.mrf.mxu1  ;;  %v4473_v36 = vmax.f32 %v4395_v5, 0.0 }
 0x447   : > { %v4428_v26 = vadd.f32 %v7019_v44, %v4339_v39  ;;  %v4479_v44 = vmax.f32 %v4410_v61, 0.0  ;;  %v4260_v45 = vadd.f32 %v6856_v52, %v4259_v10 }
 0x448   : > { %4288 = vmatmul.bf16.gmra.mxu1 %v4981_v33  ;;  %v4512_v55 = vsel %vm4504_vm13, %v4473_v36, -inf  ;;  %v4222_v33 = vadd.f32 %v6856_v52, %v6921_v27 }
 0x449   : > { %v4486_v42 = vmax.f32 %v4428_v26, 0.0  ;;  %v7089_v29 = vsel %vm4504_vm13, %v4479_v44, -inf  ;;  %v4514_v39 = vmax.f32 %v4512_v55, %v4513_v60 }
 0x44a   : > { %v4311_v21 = vadd.f32 %v6947_v9, %v4222_v33 }
 0x44b   : > { %v7081_v11 = vsel %vm4504_vm13, %v4486_v42, -inf }
 0x44c   : > { %v4549_v62 = vmax.f32 %v7076_v6, %v7081_v11  ;;  %v4340_v28 = vpop.f32.mrf.mxu2  ;;  %v4400_v61 = vadd.f32 %v6783_v43, %v4311_v21 }
 0x44d   : > { %v4341_v8 = vadd.f32 %v4340_v28, %v4252_v17 }
 0x44e   : > { %v4261_v19 = vpop.f32.mrf.mxu1 }
 0x44f   : > { %v4430_v15 = vadd.f32 %v7038_v57, %v4341_v8  ;;  %v4262_v8 = vadd.f32 %v6856_v52, %v4261_v19 }
 0x451   : > { %v4487_v34 = vmax.f32 %v4430_v15, 0.0 }
 0x453   : > { %v7093_v13 = vsel %vm4504_vm13, %v4487_v34, -inf  ;;  %v4475_v34 = vmax.f32 %v4400_v61, 0.0 }
 0x454   : > { %v4556_v14 = vmax.f32 %v7089_v29, %v7093_v13  ;;  %v4343_v63 = vpop.f32.mrf.mxu2 }
 0x455   : > { %v4344_v57 = vadd.f32 %v4343_v63, %v4255_v1 }
 0x456   : > { %v4264_v43 = vpop.f32.mrf.mxu1 }
 0x457   : > { %v4433_v7 = vadd.f32 %v4432_v51, %v4344_v57  ;;  %v4442_v51 = vpop.f32.mrf.mxu3  ;;  %v4265_v63 = vadd.f32 %v6856_v52, %v4264_v43 }
 0x459   : > { %v4488_v30 = vmax.f32 %v4433_v7, 0.0 }
 0x45b   : > { %v4508_v4 = vsel %vm4504_vm13, %v4488_v30, -inf }
 0x45c   : > { %v7106_v56 = vmax.f32 %v4507_v18, %v4508_v4  ;;  %v4345_v46 = vpop.f32.mrf.mxu2 }
 0x45d   : > { %v4346_v32 = vadd.f32 %v4345_v46, %v4257_v49 }
 0x45e   : > { %v4266_v30 = vpop.f32.mrf.mxu1 }
 0x45f   : > { %v4435_v2 = vadd.f32 %v4434_v48, %v4346_v32  ;;  %v4420_v48 = vadd.f32 %v6977_v58, %v7033_v54  ;;  %v7120_v28 = vpop.f32.mrf.mxu3 }
 0x461   : > { %v4489_v53 = vmax.f32 %v4435_v2, 0.0  ;;  %v4483_v27 = vmax.f32 %v4420_v48, 0.0 }
 0x463   : > { %v4515_v50 = vsel %vm4504_vm13, %v4489_v53, -inf  ;;  %v4527_v58 = vsel %vm4504_vm13, %v4483_v27, -inf }
 0x464   : > { %v7114_v12 = vmax.f32 %v4514_v39, %v4515_v50  ;;  %v4348_v18 = vpop.f32.mrf.mxu2 }
 0x465   : > { %v4349_v26 = vadd.f32 %v4348_v18, %v4260_v45 }
 0x467   : > { %v4438_v42 = vadd.f32 %v4437_v20, %v4349_v26  ;;  %v4526_v20 = vsel %vm4504_vm13, %v4475_v34, -inf  ;;  %v4447_v40 = vpop.f32.mrf.mxu3 }
 0x468   : > { %v4528_v1 = vmax.f32 %v4526_v20, %v4527_v58 }
 0x469   : > { %v4490_v17 = vmax.f32 %v4438_v42, 0.0 }
 0x46b   : > { %v4522_v44 = vsel %vm4504_vm13, %v4490_v17, -inf }
 0x46c   : > { %v7127_v9 = vmax.f32 %v4521_v38, %v4522_v44  ;;  %v4350_v15 = vpop.f32.mrf.mxu2 }
 0x46d   : > { %v4351_v59 = vadd.f32 %v4350_v15, %v4262_v8 }
 0x46f   : > { %v4440_v54 = vadd.f32 %v4439_v22, %v4351_v59  ;;  %v7141_v49 = vpop.f32.mrf.mxu3 }
 0x471   : > { %v4491_v41 = vmax.f32 %v4440_v54, 0.0 }
 0x473   : > { %v4529_v25 = vsel %vm4504_vm13, %v4491_v41, -inf }
 0x474   : > { %v7133_v57 = vmax.f32 %v4528_v1, %v4529_v25  ;;  %v4353_v31 = vpop.f32.mrf.mxu2 }
 0x475   : > { %v4354_v38 = vadd.f32 %v4353_v31, %v4265_v63 }
 0x477   : > { %v4443_v24 = vadd.f32 %v4442_v51, %v4354_v38  ;;  %v4452_v32 = vpop.f32.mrf.mxu3  ;;  %v4267_v38 = vadd.f32 %v6856_v52, %v4266_v30 }
 0x479   : > { %v4492_v7 = vmax.f32 %v4443_v24, 0.0 }
 0x47b   : > { %v4536_v5 = vsel %vm4504_vm13, %v4492_v7, -inf }
 0x47c   : > { %v7139_v22 = vmax.f32 %v4535_v0, %v4536_v5  ;;  %v4355_v35 = vpop.f32.mrf.mxu2 }
 0x47f   : > { %v4454_v37 = vpop.f32.mrf.mxu3 }
 0x484   : > { %v4358_v4 = vpop.f32.mrf.mxu2 }
 0x485   : > { %v4269_v10 = vpop.f32.mrf.mxu1 }
 0x486   : > { %v4270_v46 = vadd.f32 %v6856_v52, %v4269_v10 }
 0x487   : > { %v4457_v19 = vpop.f32.mrf.mxu3 }
 0x488   : > { %v4359_v36 = vadd.f32 %v4358_v4, %v4270_v46  ;;  %v4356_v4 = vadd.f32 %v4355_v35, %v4267_v38 }
 0x48a   : > { %v4448_v60 = vadd.f32 %v4447_v40, %v4359_v36 }
 0x48c   : > { %v4494_v2 = vmax.f32 %v4448_v60, 0.0  ;;  %v7144_v55 = vpop.f32.mrf.mxu2  ;;  %v4445_v60 = vadd.f32 %v7120_v28, %v4356_v4 }
 0x48d   : > { %v4271_v51 = vpop.f32.mrf.mxu1 }
 0x48e   : > { %v4550_v53 = vsel %vm4504_vm13, %v4494_v2, -inf  ;;  %v4493_v30 = vmax.f32 %v4445_v60, 0.0 }
 0x48f   : > { %v7150_v3 = vmax.f32 %v4549_v62, %v4550_v53  ;;  %v4459_v34 = vpop.f32.mrf.mxu3 }
 0x494   : > { %v4363_v0 = vpop.f32.mrf.mxu2 }
 0x495   : > { %v4274_v39 = vpop.f32.mrf.mxu1 }
 0x496   : > { %v4275_v33 = vadd.f32 %v6856_v52, %v4274_v39 }
 0x497   : > { %v4462_v31 = vpop.f32.mrf.mxu3 }
 0x498   : > { %v4364_v45 = vadd.f32 %v4363_v0, %v4275_v33 }
 0x49a   : > { %v4453_v50 = vadd.f32 %v4452_v32, %v4364_v45  ;;  %v4543_v45 = vsel %vm4504_vm13, %v4493_v30, -inf }
 0x49b   : > { %v4544_v28 = vmax.f32 %v4542_v47, %v4543_v45 }
 0x49c   : > { %v4496_v18 = vmax.f32 %v4453_v50, 0.0  ;;  %v4365_v21 = vpop.f32.mrf.mxu2  ;;  %v4272_v50 = vadd.f32 %v6856_v52, %v4271_v51 }
 0x49d   : > { %v4276_v26 = vpop.f32.mrf.mxu1 }
 0x49e   : > { %v7154_v48 = vsel %vm4504_vm13, %v4496_v18, -inf  ;;  %v4277_v42 = vadd.f32 %v6856_v52, %v4276_v26 }
 0x49f   : > { %v4511_v6 = vmax.f32 %v7106_v56, %v7154_v48  ;;  %v4464_v2 = vpop.f32.mrf.mxu3 }
 0x4a0   : > { %v4366_v11 = vadd.f32 %v4365_v21, %v4277_v42 }
 0x4a2   : > { %v4455_v62 = vadd.f32 %v4454_v37, %v4366_v11  ;;  %v4361_v11 = vadd.f32 %v7144_v55, %v4272_v50 }
 0x4a4   : > { %v4497_v61 = vmax.f32 %v4455_v62, 0.0  ;;  %v4368_v17 = vpop.f32.mrf.mxu2 }
 0x4a5   : > { %v4279_v27 = vpop.f32.mrf.mxu1 }
 0x4a6   : > { %v7160_v8 = vsel %vm4504_vm13, %v4497_v61, -inf  ;;  %v4280_v44 = vadd.f32 %v6856_v52, %v4279_v27 }
 0x4a7   : > { %v4518_v15 = vmax.f32 %v7114_v12, %v7160_v8 }
 0x4a8   : > { %v4369_v59 = vadd.f32 %v4368_v17, %v4280_v44  ;;  %v4467_v17 = vpop.f32.mrf.mxu3 }
 0x4aa   : > { %v4458_v58 = vadd.f32 %v4457_v19, %v4369_v59  ;;  %v4450_v59 = vadd.f32 %v7141_v49, %v4361_v11 }
 0x4ac   : > { %v4498_v54 = vmax.f32 %v4458_v58, 0.0  ;;  %v4370_v43 = vpop.f32.mrf.mxu2  ;;  %v4495_v47 = vmax.f32 %v4450_v59, 0.0 }
 0x4ad   : > { %v4281_v20 = vpop.f32.mrf.mxu1 }
 0x4ae   : > { %v7166_v41 = vsel %vm4504_vm13, %v4498_v54, -inf  ;;  %v4282_v1 = vadd.f32 %v6856_v52, %v4281_v20 }
 0x4af   : > { %v4525_v63 = vmax.f32 %v7127_v9, %v7166_v41 }
 0x4b0   : > { %v4371_v25 = vadd.f32 %v4370_v43, %v4282_v1  ;;  %v4469_v20 = vpop.f32.mrf.mxu3  ;;  %v4557_v1 = vsel %vm4504_vm13, %v4495_v47, -inf }
 0x4b1   : > { %v4558_v49 = vmax.f32 %v4556_v14, %v4557_v1 }
 0x4b2   : > { %v4460_v40 = vadd.f32 %v4459_v34, %v4371_v25 }
 0x4b4   : > { %v4499_v24 = vmax.f32 %v4460_v40, 0.0  ;;  %v4373_v7 = vpop.f32.mrf.mxu2 }
 0x4b5   : > { %v4284_v5 = vpop.f32.mrf.mxu1 }
 0x4b6   : > { %v7173_v10 = vsel %vm4504_vm13, %v4499_v24, -inf  ;;  %v4285_v46 = vadd.f32 %v6856_v52, %v4284_v5 }
 0x4b7   : > { %v4532_v36 = vmax.f32 %v7133_v57, %v7173_v10 }
 0x4b8   : > { %v4374_v32 = vadd.f32 %v4373_v7, %v4285_v46 }
 0x4ba   : > { %v4463_v53 = vadd.f32 %v4462_v31, %v4374_v32 }
 0x4bc   : > { %v4375_v37 = vpop.f32.mrf.mxu2  ;;  %v4500_v33 = vmax.f32 %v4463_v53, 0.0 }
 0x4bd   : > { %v4286_v0 = vpop.f32.mrf.mxu1 }
 0x4be   : > { %v4287_v39 = vadd.f32 %v6856_v52, %v4286_v0  ;;  %v4538_v21 = vsel %vm4504_vm13, %v4500_v33, -inf }
 0x4bf   : > { %v4539_v27 = vmax.f32 %v7139_v22, %v4538_v21 }
 0x4c0   : > { %v4376_v35 = vadd.f32 %v4375_v37, %v4287_v39 }
 0x4c2   : > { %v4465_v18 = vadd.f32 %v4464_v2, %v4376_v35 }
 0x4c4   : > { %v4501_v26 = vmax.f32 %v4465_v18, 0.0  ;;  %v4378_v19 = vpop.f32.mrf.mxu2 }
 0x4c5   : > { %v4289_v42 = vpop.f32.mrf.mxu1 }
 0x4c6   : > { %v4545_v62 = vsel %vm4504_vm13, %v4501_v26, -inf  ;;  %v4290_v61 = vadd.f32 %v6856_v52, %v4289_v42 }
 0x4c7   : > { %v4546_v51 = vmax.f32 %v4544_v28, %v4545_v62 }
 0x4c8   : > { %v4379_v44 = vadd.f32 %v4378_v19, %v4290_v61 }
 0x4c9   : > { %v5354_v34 = vpack.i.bf16 %v4546_v51, %v4539_v27 }
 0x4ca   : > { %v4468_v23 = vadd.f32 %v4467_v17, %v4379_v44 }
 0x4cb   : > { %5355 = vrot.lane.b32.xlu2 %v5354_v34, %s5376_s21 }
 0x4cc   : > { %v4380_v58 = vpop.f32.mrf.mxu2  ;;  %v4502_v54 = vmax.f32 %v4468_v23, 0.0 }
 0x4cd   : > { %v4291_v16 = vpop.f32.mrf.mxu1 }
 0x4ce   : > { %v4292_v55 = vadd.f32 %v6856_v52, %v4291_v16  ;;  %v4552_v25 = vsel %vm4504_vm13, %v4502_v54, -inf }
 0x4cf   : > { %v4553_v38 = vmax.f32 %v7150_v3, %v4552_v25 }
 0x4d0   : > { %v4381_v43 = vadd.f32 %v4380_v58, %v4292_v55 }
 0x4d2   : > { %v4470_v22 = vadd.f32 %v4469_v20, %v4381_v43 }
 0x4d4   : > { %v4503_v31 = vmax.f32 %v4470_v22, 0.0 }
 0x4d6   : > { %v4559_v40 = vsel %vm4504_vm13, %v4503_v31, -inf }
 0x4d7   : > { %v4560_v24 = vmax.f32 %v4558_v49, %v4559_v40 }
 0x4d9   : > { %v5359_v52 = vpack.i.bf16 %v4560_v24, %v4553_v38 }
 0x4db   : > { %5360 = vrot.lane.b32.xlu0 %v5359_v52, %s5376_s21 }
 0x525   : > { %v5356_v7 = vpop.permute.xlu2 %5355 }
 0x526   : > { %v5358_v5 = vunpack.i.h.bf16 %v5356_v7  ;;  %v5357_v4 = vunpack.i.l.bf16 %v5356_v7 }
 0x528   : > { %v4577_v29 = vsel %vm4504_vm13, %v4511_v6, %v5357_v4  ;;  %v4578_v13 = vsel %vm4504_vm13, %v4518_v15, %v5358_v5 }
 0x529   : > { %v5174_v14 = vpack.c.bf16 %v4578_v13, %v4577_v29 }
 0x52b   : > { %5175 = vst [vmem:[%s224_s23] sm:$0xff] %v5174_v14  }
 0x54d   : > { %v5361_v3 = vpop.permute.xlu0 %5360 }
 0x54e   : > { %v5363_v46 = vunpack.i.h.bf16 %v5361_v3  ;;  %v5362_v32 = vunpack.i.l.bf16 %v5361_v3 }
 0x550   : > { %v4579_v60 = vsel %vm4504_vm13, %v4525_v63, %v5362_v32  ;;  %v4580_v56 = vsel %vm4504_vm13, %v4532_v36, %v5363_v46 }
 0x551   : > { %v5179_v48 = vpack.c.bf16 %v4580_v56, %v4579_v60 }
 0x553   : > { %5181 = vst [vmem:[%s224_s23 + $0x8] sm:$0xff] %v5179_v48  }
 0x554 PF: > { %s15_s18 = sadd.s32 1, %s5372_s18  }
 0x555   : > { %p12_p5 = scmp.ge.s32.totalorder %s15_s18, 4  }
 0x557   :  { %14 = sbr.rel (!%p12_p5) target bundleno = 1 (0x1), region = 78 }

</bundles_post_ra>
